<compile_context>
chip_gen: v6e
topology: v6e:2x2x1
jax: 0.10.0
libtpu: 0.0.40
codegen_flags: <defaults>
</compile_context>

<pallas_src>
import functools
import math

import numpy as np
import jax
import jax.numpy as jnp
from jax.experimental import pallas as pl
from jax.experimental.pallas import tpu as pltpu


def _round_up(x, m):
    return ((x + m - 1) // m) * m


# ----------------------------------------------------------------------------
# Pallas kernel 1: tiled matmul + fused epilogue
#   o = act( (x @ w + bias) * scale + shift )
# ----------------------------------------------------------------------------
def _matmul_kernel(x_ref, w_ref, b_ref, s_ref, t_ref, a_ref, o_ref, acc_ref, *,
                   act):
    k = pl.program_id(2)

    @pl.when(k == 0)
    def _():
        acc_ref[...] = jnp.zeros_like(acc_ref)

    acc_ref[...] += jnp.dot(x_ref[...], w_ref[...],
                            preferred_element_type=jnp.float32)

    @pl.when(k == pl.num_programs(2) - 1)
    def _():
        y = acc_ref[...] + b_ref[...]
        y = y * s_ref[...] + t_ref[...]
        if act == "prelu":
            y = jnp.where(y > 0, y, a_ref[...] * y)
        elif act == "tanh":
            y = jnp.tanh(y)
        o_ref[...] = y.astype(o_ref.dtype)


def fused_matmul(x, w, bias, scale, shift, alpha, act,
                 tm=256, tn=256, tk=512):
    """x:(M,K) @ w:(K,N) -> act((x@w + bias)*scale + shift), float32 (M,N)."""
    M, K = x.shape
    K2, N = w.shape
    assert K == K2

    tm = min(tm, _round_up(M, 8))
    tn = min(tn, _round_up(N, 128))
    tk = min(tk, _round_up(K, 128))
    Mp, Np, Kp = _round_up(M, tm), _round_up(N, tn), _round_up(K, tk)

    xp = jnp.zeros((Mp, Kp), jnp.bfloat16).at[:M, :K].set(
        x.astype(jnp.bfloat16))
    wp = jnp.zeros((Kp, Np), jnp.bfloat16).at[:K, :N].set(
        w.astype(jnp.bfloat16))

    def row(v):
        return jnp.zeros((1, Np), jnp.float32).at[0, :N].set(
            v.astype(jnp.float32))

    bp, sp_, tp, ap = row(bias), row(scale), row(shift), row(alpha)

    grid = (Mp // tm, Np // tn, Kp // tk)
    cost = pl.CostEstimate(
        flops=int(2 * Mp * Np * Kp),
        transcendentals=int(Mp * Np) if act == "tanh" else 0,
        bytes_accessed=int(xp.size * 2 + wp.size * 2 + Mp * Np * 4))

    out = pl.pallas_call(
        functools.partial(_matmul_kernel, act=act),
        out_shape=jax.ShapeDtypeStruct((Mp, Np), jnp.float32),
        grid=grid,
        in_specs=[
            pl.BlockSpec((tm, tk), lambda i, j, k: (i, k)),
            pl.BlockSpec((tk, tn), lambda i, j, k: (k, j)),
            pl.BlockSpec((1, tn), lambda i, j, k: (0, j)),
            pl.BlockSpec((1, tn), lambda i, j, k: (0, j)),
            pl.BlockSpec((1, tn), lambda i, j, k: (0, j)),
            pl.BlockSpec((1, tn), lambda i, j, k: (0, j)),
        ],
        out_specs=pl.BlockSpec((tm, tn), lambda i, j, k: (i, j)),
        scratch_shapes=[pltpu.VMEM((tm, tn), jnp.float32)],
        compiler_params=pltpu.CompilerParams(
            dimension_semantics=("parallel", "parallel", "arbitrary"),
            vmem_limit_bytes=48 * 1024 * 1024),
        cost_estimate=cost,
    )(xp, wp, bp, sp_, tp, ap)
    return out[:M, :N]


# ----------------------------------------------------------------------------
# Pallas kernel 2: fused element-wise epilogue for BatchNorm convolutions
#   o = act(z * scale + shift) [+ residual]
# ----------------------------------------------------------------------------
def _affine_act_kernel(*refs, act, has_res):
    if has_res:
        z_ref, s_ref, t_ref, a_ref, r_ref, o_ref = refs
    else:
        z_ref, s_ref, t_ref, a_ref, o_ref = refs
        r_ref = None
    y = z_ref[...] * s_ref[...] + t_ref[...]
    if act == "prelu":
        y = jnp.where(y > 0, y, a_ref[...] * y)
    elif act == "tanh":
        y = jnp.tanh(y)
    if has_res:
        y = y + r_ref[...]
    o_ref[...] = y.astype(o_ref.dtype)


def affine_act(z, scale, shift, alpha, act, residual=None, tm=1024):
    """z:(M,C) -> act(z*scale + shift) (+ residual), all float32."""
    M, C = z.shape
    Cp = _round_up(C, 128)
    tm = min(tm, _round_up(M, 8))
    Mp = _round_up(M, tm)

    zp = jnp.zeros((Mp, Cp), jnp.float32).at[:M, :C].set(z)

    def row(v):
        return jnp.zeros((1, Cp), jnp.float32).at[0, :C].set(
            v.astype(jnp.float32))

    operands = [zp, row(scale), row(shift), row(alpha)]
    in_specs = [
        pl.BlockSpec((tm, Cp), lambda i: (i, 0)),
        pl.BlockSpec((1, Cp), lambda i: (0, 0)),
        pl.BlockSpec((1, Cp), lambda i: (0, 0)),
        pl.BlockSpec((1, Cp), lambda i: (0, 0)),
    ]
    has_res = residual is not None
    if has_res:
        rp = jnp.zeros((Mp, Cp), jnp.float32).at[:M, :C].set(residual)
        operands.append(rp)
        in_specs.append(pl.BlockSpec((tm, Cp), lambda i: (i, 0)))

    out = pl.pallas_call(
        functools.partial(_affine_act_kernel, act=act, has_res=has_res),
        out_shape=jax.ShapeDtypeStruct((Mp, Cp), jnp.float32),
        grid=(Mp // tm,),
        in_specs=in_specs,
        out_specs=pl.BlockSpec((tm, Cp), lambda i: (i, 0)),
        compiler_params=pltpu.CompilerParams(
            dimension_semantics=("parallel",),
            vmem_limit_bytes=48 * 1024 * 1024),
    )(*operands)
    return out[:M, :C]


# ----------------------------------------------------------------------------
# Plain-JAX layout glue
# ----------------------------------------------------------------------------
def im2col(x, k, stride=1):
    """x: (N,H,W,C) NHWC -> (N*Ho*Wo, k*k*C) with (kh, kw, c) column order."""
    N, H, W, C = x.shape
    pad = k // 2
    xp = jnp.pad(x, ((0, 0), (pad, pad), (pad, pad), (0, 0)))
    Ho = (H + 2 * pad - k) // stride + 1
    Wo = (W + 2 * pad - k) // stride + 1
    cols = []
    for kh in range(k):
        for kw in range(k):
            sl = xp[:, kh:kh + (Ho - 1) * stride + 1:stride,
                       kw:kw + (Wo - 1) * stride + 1:stride, :]
            cols.append(sl)
    patches = jnp.stack(cols, axis=3)        # (N, Ho, Wo, k*k, C)
    return patches.reshape(N * Ho * Wo, k * k * C), (N, Ho, Wo)


def pixel_shuffle_nhwc(x, r):
    """PyTorch nn.PixelShuffle semantics, expressed in NHWC layout."""
    N, H, W, Cr2 = x.shape
    C = Cr2 // (r * r)
    x = x.reshape(N, H, W, C, r, r)
    x = jnp.transpose(x, (0, 1, 4, 2, 5, 3))
    return x.reshape(N, H * r, W * r, C)


# ----------------------------------------------------------------------------
# SRResNet forward
# ----------------------------------------------------------------------------
def _conv_init(key, k, cin, cout):
    kw, kb = jax.random.split(key)
    fan_in = cin * k * k
    w = jax.random.normal(kw, (k, k, cin, cout), jnp.float32) / np.sqrt(fan_in)
    b = 0.01 * jax.random.normal(kb, (cout,), jnp.float32)
    # MXU wants bf16 operands; cast weights once at init (not per call).
    return w.astype(jnp.bfloat16), b


class SRResNetPallas:
    def __init__(self, key, large_kernel_size=9, small_kernel_size=3,
                 n_channels=64, n_blocks=16, scaling_factor=4):
        scaling_factor = int(scaling_factor)
        assert scaling_factor in (2, 4, 8)
        self.n_channels = n_channels
        n_sub = int(math.log2(scaling_factor))

        keys = list(jax.random.split(key, 3 + 2 * n_blocks + n_sub))
        it = iter(keys)

        # conv_block1: 9x9 conv (no BN) + PReLU
        self.cb1_w, self.cb1_b = _conv_init(next(it), large_kernel_size, 3,
                                            n_channels)
        self.cb1_a = jnp.float32(0.25)

        # residual blocks: [conv+BN+PReLU] -> [conv+BN] + skip
        ones = jnp.ones((n_channels,), jnp.float32)
        zeros = jnp.zeros((n_channels,), jnp.float32)
        self.res_blocks = []
        for _ in range(n_blocks):
            w1, b1 = _conv_init(next(it), small_kernel_size, n_channels,
                                n_channels)
            w2, b2 = _conv_init(next(it), small_kernel_size, n_channels,
                                n_channels)
            self.res_blocks.append(dict(
                w1=w1, b1=b1, g1=ones, be1=zeros, a1=jnp.float32(0.25),
                w2=w2, b2=b2, g2=ones, be2=zeros))

        # conv_block2: conv + BN (no activation), then long skip add
        self.cb2_w, self.cb2_b = _conv_init(next(it), small_kernel_size,
                                            n_channels, n_channels)
        self.cb2_g, self.cb2_be = ones, zeros

        # sub-pixel convolutional blocks: conv -> pixel shuffle -> PReLU
        self.sub_blocks = []
        for _ in range(n_sub):
            w, b = _conv_init(next(it), small_kernel_size, n_channels,
                              n_channels * 4)
            self.sub_blocks.append(dict(w=w, b=b, a=jnp.float32(0.25)))

        # conv_block3: 9x9 conv (no BN) + Tanh
        self.cb3_w, self.cb3_b = _conv_init(next(it), large_kernel_size,
                                            n_channels, 3)

    # conv (no BN) with activation fused in the matmul epilogue
    def _conv_act(self, x, w, bias, act, alpha=None):
        k = w.shape[0]
        cout = w.shape[-1]
        patches, (N, Ho, Wo) = im2col(x.astype(jnp.bfloat16), k)
        w2d = w.reshape(-1, cout)
        ones = jnp.ones((cout,), jnp.float32)
        zeros = jnp.zeros((cout,), jnp.float32)
        a = (jnp.full((cout,), alpha, jnp.float32)
             if act == "prelu" else zeros)
        y = fused_matmul(patches, w2d, bias, ones, zeros, a, act)
        return y.reshape(N, Ho, Wo, cout)

    # conv + BatchNorm (training-mode batch stats) [+ activation] [+ residual]
    def _conv_bn(self, x, w, bias, gamma, beta, act, alpha=None,
                 residual=None, eps=1e-5):
        k = w.shape[0]
        cout = w.shape[-1]
        patches, (N, Ho, Wo) = im2col(x.astype(jnp.bfloat16), k)
        w2d = w.reshape(-1, cout)
        ones = jnp.ones((cout,), jnp.float32)
        zeros = jnp.zeros((cout,), jnp.float32)

        # Pass 1: tiled matmul (bias only) -> z
        z = fused_matmul(patches, w2d, bias, ones, zeros, zeros, "none")

        # Batch statistics over (N, H, W) == axis 0 of the im2col matmul
        # output, folded into a per-channel affine.
        mean = jnp.mean(z, axis=0)
        var = jnp.mean(jnp.square(z - mean), axis=0)   # biased, as in PyTorch
        scale = gamma * jax.lax.rsqrt(var + eps)
        shift = beta - mean * scale

        a = (jnp.full((cout,), alpha, jnp.float32)
             if act == "prelu" else zeros)
        res2d = residual.reshape(-1, cout) if residual is not None else None

        # Pass 2: fused normalize + activation (+ residual add)
        y = affine_act(z, scale, shift, a, act, residual=res2d)
        return y.reshape(N, Ho, Wo, cout)

    def __call__(self, lr_imgs_nchw):
        x = jnp.transpose(lr_imgs_nchw, (0, 2, 3, 1)).astype(jnp.float32)

        # conv_block1 (PReLU fused in epilogue)
        x = self._conv_act(x, self.cb1_w, self.cb1_b, "prelu", self.cb1_a)
        residual = x

        # residual blocks
        for blk in self.res_blocks:
            y = self._conv_bn(x, blk["w1"], blk["b1"], blk["g1"], blk["be1"],
                              "prelu", alpha=blk["a1"])
            x = self._conv_bn(y, blk["w2"], blk["b2"], blk["g2"], blk["be2"],
                              "none", residual=x)

        # conv_block2 + long skip connection
        x = self._conv_bn(x, self.cb2_w, self.cb2_b, self.cb2_g, self.cb2_be,
                          "none", residual=residual)

        # sub-pixel blocks: PReLU (scalar param) commutes with PixelShuffle,
        # so it is fused into the conv epilogue; the shuffle is pure layout.
        for sp in self.sub_blocks:
            x = self._conv_act(x, sp["w"], sp["b"], "prelu", sp["a"])
            x = pixel_shuffle_nhwc(x, 2)

        # conv_block3 (Tanh fused in epilogue)
        x = self._conv_act(x, self.cb3_w, self.cb3_b, "tanh")

        return jnp.transpose(x, (0, 3, 1, 2))   # back to NCHW


if __name__ == "__main__":
    key = jax.random.PRNGKey(0)
    pkey, xkey = jax.random.split(key)

    # Small, consistent shapes: batch=2, 3-channel 16x16 LR images (NCHW),
    # n_channels=32, 2 residual blocks, x4 upscaling -> (2, 3, 64, 64).
    model = SRResNetPallas(pkey, large_kernel_size=9, small_kernel_size=3,
                           n_channels=32, n_blocks=2, scaling_factor=4)
    lr_imgs = jax.random.normal(xkey, (2, 3, 16, 16), jnp.float32)

    forward = jax.jit(model.__call__)
    sr_imgs = forward(lr_imgs)
    sr_imgs = jax.block_until_ready(sr_imgs)

    assert sr_imgs.shape == (2, 3, 64, 64), sr_imgs.shape
    assert bool(jnp.all(jnp.isfinite(sr_imgs)))
    print("KERNEL_OK")
</pallas_src>

<mosaic_0001>
module attributes {stable_mosaic.version = 11 : i64} {
  func.func @_matmul_kernel(%arg0: i32, %arg1: i32, %arg2: i32, %arg3: memref<256x256xbf16, #tpu.memory_space<vmem>>, %arg4: memref<256x128xbf16, #tpu.memory_space<vmem>>, %arg5: memref<1x128xf32, #tpu.memory_space<vmem>>, %arg6: memref<1x128xf32, #tpu.memory_space<vmem>>, %arg7: memref<1x128xf32, #tpu.memory_space<vmem>>, %arg8: memref<1x128xf32, #tpu.memory_space<vmem>>, %arg9: memref<256x128xf32, #tpu.memory_space<vmem>>, %arg10: memref<256x128xf32, #tpu.memory_space<vmem>>) attributes {dimension_semantics = [#tpu.dimension_semantics<parallel>, #tpu.dimension_semantics<parallel>, #tpu.dimension_semantics<arbitrary>], iteration_bounds = array<i64: 2, 1, 1>, scalar_prefetch = 0 : i64, scratch_operands = 1 : i64, tpu.core_type = #tpu.core_type<tc>, window_params = [{transform_indices = @transform_0, window_bounds = array<i64: 256, 256>}, {transform_indices = @transform_1, window_bounds = array<i64: 256, 128>}, {transform_indices = @transform_2, window_bounds = array<i64: 1, 128>}, {transform_indices = @transform_3, window_bounds = array<i64: 1, 128>}, {transform_indices = @transform_4, window_bounds = array<i64: 1, 128>}, {transform_indices = @transform_5, window_bounds = array<i64: 1, 128>}, {transform_indices = @transform_6, window_bounds = array<i64: 256, 128>}]} {
    %c0_i32 = arith.constant 0 : i32
    %0 = arith.cmpi eq, %arg2, %c0_i32 : i32
    %1 = arith.extui %0 : i1 to i32
    %c0_i32_0 = arith.constant 0 : i32
    %2 = arith.cmpi ne, %1, %c0_i32_0 : i32
    scf.if %2 {
      %cst_10 = arith.constant 0.000000e+00 : f32
      %12 = vector.broadcast %cst_10 : f32 to vector<256x128xf32>
      %c0_11 = arith.constant 0 : index
      %c0_12 = arith.constant 0 : index
      %13 = vector.load %arg10[%c0_11, %c0_12] : memref<256x128xf32, #tpu.memory_space<vmem>>, vector<256x128xf32>
      tpu.vector_store %arg10[%c0_11, %c0_12], %12 {strides = array<i32>} : memref<256x128xf32, #tpu.memory_space<vmem>>, vector<256x128xf32>,
    } else {
    }
    %c0 = arith.constant 0 : index
    %c0_1 = arith.constant 0 : index
    %3 = vector.load %arg10[%c0, %c0_1] : memref<256x128xf32, #tpu.memory_space<vmem>>, vector<256x128xf32>
    %c0_2 = arith.constant 0 : index
    %c0_3 = arith.constant 0 : index
    %4 = vector.load %arg3[%c0_2, %c0_3] : memref<256x256xbf16, #tpu.memory_space<vmem>>, vector<256x256xbf16>
    %c0_4 = arith.constant 0 : index
    %c0_5 = arith.constant 0 : index
    %5 = vector.load %arg4[%c0_4, %c0_5] : memref<256x128xbf16, #tpu.memory_space<vmem>>, vector<256x128xbf16>
    %cst = arith.constant dense<0.000000e+00> : vector<256x128xf32>
    %6 = tpu.matmul %4, %5, %cst {dimension_numbers = #tpu.dot_dimension_numbers<[1], [0], [0], [1], [0, 0, 1, 1], [], []>} : vector<256x256xbf16>, vector<256x128xbf16>, vector<256x128xf32> -> vector<256x128xf32>
    %7 = arith.addf %3, %6 : vector<256x128xf32>
    %c0_6 = arith.constant 0 : index
    %c0_7 = arith.constant 0 : index
    %8 = vector.load %arg10[%c0_6, %c0_7] : memref<256x128xf32, #tpu.memory_space<vmem>>, vector<256x128xf32>
    tpu.vector_store %arg10[%c0_6, %c0_7], %7 {strides = array<i32>} : memref<256x128xf32, #tpu.memory_space<vmem>>, vector<256x128xf32>,
    %c0_i32_8 = arith.constant 0 : i32
    %9 = arith.cmpi eq, %arg2, %c0_i32_8 : i32
    %10 = arith.extui %9 : i1 to i32
    %c0_i32_9 = arith.constant 0 : i32
    %11 = arith.cmpi ne, %10, %c0_i32_9 : i32
    scf.if %11 {
      %c0_10 = arith.constant 0 : index
      %c0_11 = arith.constant 0 : index
      %12 = vector.load %arg10[%c0_10, %c0_11] : memref<256x128xf32, #tpu.memory_space<vmem>>, vector<256x128xf32>
      %c0_12 = arith.constant 0 : index
      %c0_13 = arith.constant 0 : index
      %13 = vector.load %arg5[%c0_12, %c0_13] : memref<1x128xf32, #tpu.memory_space<vmem>>, vector<1x128xf32>
      %14 = vector.broadcast %13 : vector<1x128xf32> to vector<256x128xf32>
      %15 = arith.addf %12, %14 : vector<256x128xf32>
      %c0_14 = arith.constant 0 : index
      %c0_15 = arith.constant 0 : index
      %16 = vector.load %arg6[%c0_14, %c0_15] : memref<1x128xf32, #tpu.memory_space<vmem>>, vector<1x128xf32>
      %17 = vector.broadcast %16 : vector<1x128xf32> to vector<256x128xf32>
      %18 = arith.mulf %15, %17 : vector<256x128xf32>
      %c0_16 = arith.constant 0 : index
      %c0_17 = arith.constant 0 : index
      %19 = vector.load %arg7[%c0_16, %c0_17] : memref<1x128xf32, #tpu.memory_space<vmem>>, vector<1x128xf32>
      %20 = vector.broadcast %19 : vector<1x128xf32> to vector<256x128xf32>
      %21 = arith.addf %18, %20 : vector<256x128xf32>
      %cst_18 = arith.constant 0.000000e+00 : f32
      %22 = vector.broadcast %cst_18 : f32 to vector<256x128xf32>
      %23 = arith.cmpf ogt, %21, %22 : vector<256x128xf32>
      %c0_19 = arith.constant 0 : index
      %c0_20 = arith.constant 0 : index
      %24 = vector.load %arg8[%c0_19, %c0_20] : memref<1x128xf32, #tpu.memory_space<vmem>>, vector<1x128xf32>
      %25 = vector.broadcast %24 : vector<1x128xf32> to vector<256x128xf32>
      %26 = arith.mulf %25, %21 : vector<256x128xf32>
      %27 = arith.select %23, %21, %26 : vector<256x128xi1>, vector<256x128xf32>
      %c0_21 = arith.constant 0 : index
      %c0_22 = arith.constant 0 : index
      %28 = vector.load %arg9[%c0_21, %c0_22] : memref<256x128xf32, #tpu.memory_space<vmem>>, vector<256x128xf32>
      tpu.vector_store %arg9[%c0_21, %c0_22], %27 {strides = array<i32>} : memref<256x128xf32, #tpu.memory_space<vmem>>, vector<256x128xf32>,
    } else {
    }
    return
  }
  func.func @transform_0(%arg0: i32, %arg1: i32, %arg2: i32) -> (i32, i32) {
    %c0_i32 = arith.constant 0 : i32
    return %arg0, %arg2 : i32, i32
  }
  func.func @transform_1(%arg0: i32, %arg1: i32, %arg2: i32) -> (i32, i32) {
    %c0_i32 = arith.constant 0 : i32
    return %arg2, %arg1 : i32, i32
  }
  func.func @transform_2(%arg0: i32, %arg1: i32, %arg2: i32) -> (i32, i32) {
    %c0_i32 = arith.constant 0 : i32
    %c0_i32_0 = arith.constant 0 : i32
    return %c0_i32, %arg1 : i32, i32
  }
  func.func @transform_3(%arg0: i32, %arg1: i32, %arg2: i32) -> (i32, i32) {
    %c0_i32 = arith.constant 0 : i32
    %c0_i32_0 = arith.constant 0 : i32
    return %c0_i32, %arg1 : i32, i32
  }
  func.func @transform_4(%arg0: i32, %arg1: i32, %arg2: i32) -> (i32, i32) {
    %c0_i32 = arith.constant 0 : i32
    %c0_i32_0 = arith.constant 0 : i32
    return %c0_i32, %arg1 : i32, i32
  }
  func.func @transform_5(%arg0: i32, %arg1: i32, %arg2: i32) -> (i32, i32) {
    %c0_i32 = arith.constant 0 : i32
    %c0_i32_0 = arith.constant 0 : i32
    return %c0_i32, %arg1 : i32, i32
  }
  func.func @transform_6(%arg0: i32, %arg1: i32, %arg2: i32) -> (i32, i32) {
    %c0_i32 = arith.constant 0 : i32
    return %arg0, %arg1 : i32, i32
  }
}

module attributes {stable_mosaic.version = 11 : i64} {
  func.func @_matmul_kernel(%arg0: i32, %arg1: i32, %arg2: i32, %arg3: memref<256x384xbf16, #tpu.memory_space<vmem>>, %arg4: memref<384x128xbf16, #tpu.memory_space<vmem>>, %arg5: memref<1x128xf32, #tpu.memory_space<vmem>>, %arg6: memref<1x128xf32, #tpu.memory_space<vmem>>, %arg7: memref<1x128xf32, #tpu.memory_space<vmem>>, %arg8: memref<1x128xf32, #tpu.memory_space<vmem>>, %arg9: memref<256x128xf32, #tpu.memory_space<vmem>>, %arg10: memref<256x128xf32, #tpu.memory_space<vmem>>) attributes {dimension_semantics = [#tpu.dimension_semantics<parallel>, #tpu.dimension_semantics<parallel>, #tpu.dimension_semantics<arbitrary>], iteration_bounds = array<i64: 2, 1, 1>, scalar_prefetch = 0 : i64, scratch_operands = 1 : i64, tpu.core_type = #tpu.core_type<tc>, window_params = [{transform_indices = @transform_0, window_bounds = array<i64: 256, 384>}, {transform_indices = @transform_1, window_bounds = array<i64: 384, 128>}, {transform_indices = @transform_2, window_bounds = array<i64: 1, 128>}, {transform_indices = @transform_3, window_bounds = array<i64: 1, 128>}, {transform_indices = @transform_4, window_bounds = array<i64: 1, 128>}, {transform_indices = @transform_5, window_bounds = array<i64: 1, 128>}, {transform_indices = @transform_6, window_bounds = array<i64: 256, 128>}]} {
    %c0_i32 = arith.constant 0 : i32
    %0 = arith.cmpi eq, %arg2, %c0_i32 : i32
    %1 = arith.extui %0 : i1 to i32
    %c0_i32_0 = arith.constant 0 : i32
    %2 = arith.cmpi ne, %1, %c0_i32_0 : i32
    scf.if %2 {
      %cst_10 = arith.constant 0.000000e+00 : f32
      %12 = vector.broadcast %cst_10 : f32 to vector<256x128xf32>
      %c0_11 = arith.constant 0 : index
      %c0_12 = arith.constant 0 : index
      %13 = vector.load %arg10[%c0_11, %c0_12] : memref<256x128xf32, #tpu.memory_space<vmem>>, vector<256x128xf32>
      tpu.vector_store %arg10[%c0_11, %c0_12], %12 {strides = array<i32>} : memref<256x128xf32, #tpu.memory_space<vmem>>, vector<256x128xf32>,
    } else {
    }
    %c0 = arith.constant 0 : index
    %c0_1 = arith.constant 0 : index
    %3 = vector.load %arg10[%c0, %c0_1] : memref<256x128xf32, #tpu.memory_space<vmem>>, vector<256x128xf32>
    %c0_2 = arith.constant 0 : index
    %c0_3 = arith.constant 0 : index
    %4 = vector.load %arg3[%c0_2, %c0_3] : memref<256x384xbf16, #tpu.memory_space<vmem>>, vector<256x384xbf16>
    %c0_4 = arith.constant 0 : index
    %c0_5 = arith.constant 0 : index
    %5 = vector.load %arg4[%c0_4, %c0_5] : memref<384x128xbf16, #tpu.memory_space<vmem>>, vector<384x128xbf16>
    %cst = arith.constant dense<0.000000e+00> : vector<256x128xf32>
    %6 = tpu.matmul %4, %5, %cst {dimension_numbers = #tpu.dot_dimension_numbers<[1], [0], [0], [1], [0, 0, 1, 1], [], []>} : vector<256x384xbf16>, vector<384x128xbf16>, vector<256x128xf32> -> vector<256x128xf32>
    %7 = arith.addf %3, %6 : vector<256x128xf32>
    %c0_6 = arith.constant 0 : index
    %c0_7 = arith.constant 0 : index
    %8 = vector.load %arg10[%c0_6, %c0_7] : memref<256x128xf32, #tpu.memory_space<vmem>>, vector<256x128xf32>
    tpu.vector_store %arg10[%c0_6, %c0_7], %7 {strides = array<i32>} : memref<256x128xf32, #tpu.memory_space<vmem>>, vector<256x128xf32>,
    %c0_i32_8 = arith.constant 0 : i32
    %9 = arith.cmpi eq, %arg2, %c0_i32_8 : i32
    %10 = arith.extui %9 : i1 to i32
    %c0_i32_9 = arith.constant 0 : i32
    %11 = arith.cmpi ne, %10, %c0_i32_9 : i32
    scf.if %11 {
      %c0_10 = arith.constant 0 : index
      %c0_11 = arith.constant 0 : index
      %12 = vector.load %arg10[%c0_10, %c0_11] : memref<256x128xf32, #tpu.memory_space<vmem>>, vector<256x128xf32>
      %c0_12 = arith.constant 0 : index
      %c0_13 = arith.constant 0 : index
      %13 = vector.load %arg5[%c0_12, %c0_13] : memref<1x128xf32, #tpu.memory_space<vmem>>, vector<1x128xf32>
      %14 = vector.broadcast %13 : vector<1x128xf32> to vector<256x128xf32>
      %15 = arith.addf %12, %14 : vector<256x128xf32>
      %c0_14 = arith.constant 0 : index
      %c0_15 = arith.constant 0 : index
      %16 = vector.load %arg6[%c0_14, %c0_15] : memref<1x128xf32, #tpu.memory_space<vmem>>, vector<1x128xf32>
      %17 = vector.broadcast %16 : vector<1x128xf32> to vector<256x128xf32>
      %18 = arith.mulf %15, %17 : vector<256x128xf32>
      %c0_16 = arith.constant 0 : index
      %c0_17 = arith.constant 0 : index
      %19 = vector.load %arg7[%c0_16, %c0_17] : memref<1x128xf32, #tpu.memory_space<vmem>>, vector<1x128xf32>
      %20 = vector.broadcast %19 : vector<1x128xf32> to vector<256x128xf32>
      %21 = arith.addf %18, %20 : vector<256x128xf32>
      %c0_18 = arith.constant 0 : index
      %c0_19 = arith.constant 0 : index
      %22 = vector.load %arg9[%c0_18, %c0_19] : memref<256x128xf32, #tpu.memory_space<vmem>>, vector<256x128xf32>
      tpu.vector_store %arg9[%c0_18, %c0_19], %21 {strides = array<i32>} : memref<256x128xf32, #tpu.memory_space<vmem>>, vector<256x128xf32>,
    } else {
    }
    return
  }
  func.func @transform_0(%arg0: i32, %arg1: i32, %arg2: i32) -> (i32, i32) {
    %c0_i32 = arith.constant 0 : i32
    return %arg0, %arg2 : i32, i32
  }
  func.func @transform_1(%arg0: i32, %arg1: i32, %arg2: i32) -> (i32, i32) {
    %c0_i32 = arith.constant 0 : i32
    return %arg2, %arg1 : i32, i32
  }
  func.func @transform_2(%arg0: i32, %arg1: i32, %arg2: i32) -> (i32, i32) {
    %c0_i32 = arith.constant 0 : i32
    %c0_i32_0 = arith.constant 0 : i32
    return %c0_i32, %arg1 : i32, i32
  }
  func.func @transform_3(%arg0: i32, %arg1: i32, %arg2: i32) -> (i32, i32) {
    %c0_i32 = arith.constant 0 : i32
    %c0_i32_0 = arith.constant 0 : i32
    return %c0_i32, %arg1 : i32, i32
  }
  func.func @transform_4(%arg0: i32, %arg1: i32, %arg2: i32) -> (i32, i32) {
    %c0_i32 = arith.constant 0 : i32
    %c0_i32_0 = arith.constant 0 : i32
    return %c0_i32, %arg1 : i32, i32
  }
  func.func @transform_5(%arg0: i32, %arg1: i32, %arg2: i32) -> (i32, i32) {
    %c0_i32 = arith.constant 0 : i32
    %c0_i32_0 = arith.constant 0 : i32
    return %c0_i32, %arg1 : i32, i32
  }
  func.func @transform_6(%arg0: i32, %arg1: i32, %arg2: i32) -> (i32, i32) {
    %c0_i32 = arith.constant 0 : i32
    return %arg0, %arg1 : i32, i32
  }
}

module attributes {stable_mosaic.version = 11 : i64} {
  func.func @_affine_act_kernel(%arg0: i32, %arg1: memref<512x128xf32, #tpu.memory_space<vmem>>, %arg2: memref<1x128xf32, #tpu.memory_space<vmem>>, %arg3: memref<1x128xf32, #tpu.memory_space<vmem>>, %arg4: memref<1x128xf32, #tpu.memory_space<vmem>>, %arg5: memref<512x128xf32, #tpu.memory_space<vmem>>) attributes {dimension_semantics = [#tpu.dimension_semantics<parallel>], iteration_bounds = array<i64: 1>, scalar_prefetch = 0 : i64, scratch_operands = 0 : i64, tpu.core_type = #tpu.core_type<tc>, window_params = [{transform_indices = @transform_0, window_bounds = array<i64: 512, 128>}, {pipeline_mode = #tpu.pipeline_mode<synchronous>, transform_indices = @transform_1, window_bounds = array<i64: 1, 128>}, {pipeline_mode = #tpu.pipeline_mode<synchronous>, transform_indices = @transform_2, window_bounds = array<i64: 1, 128>}, {pipeline_mode = #tpu.pipeline_mode<synchronous>, transform_indices = @transform_3, window_bounds = array<i64: 1, 128>}, {transform_indices = @transform_4, window_bounds = array<i64: 512, 128>}]} {
    %c0 = arith.constant 0 : index
    %c0_0 = arith.constant 0 : index
    %0 = vector.load %arg1[%c0, %c0_0] : memref<512x128xf32, #tpu.memory_space<vmem>>, vector<512x128xf32>
    %c0_1 = arith.constant 0 : index
    %c0_2 = arith.constant 0 : index
    %1 = vector.load %arg2[%c0_1, %c0_2] : memref<1x128xf32, #tpu.memory_space<vmem>>, vector<1x128xf32>
    %2 = vector.broadcast %1 : vector<1x128xf32> to vector<512x128xf32>
    %3 = arith.mulf %0, %2 : vector<512x128xf32>
    %c0_3 = arith.constant 0 : index
    %c0_4 = arith.constant 0 : index
    %4 = vector.load %arg3[%c0_3, %c0_4] : memref<1x128xf32, #tpu.memory_space<vmem>>, vector<1x128xf32>
    %5 = vector.broadcast %4 : vector<1x128xf32> to vector<512x128xf32>
    %6 = arith.addf %3, %5 : vector<512x128xf32>
    %cst = arith.constant 0.000000e+00 : f32
    %7 = vector.broadcast %cst : f32 to vector<512x128xf32>
    %8 = arith.cmpf ogt, %6, %7 : vector<512x128xf32>
    %c0_5 = arith.constant 0 : index
    %c0_6 = arith.constant 0 : index
    %9 = vector.load %arg4[%c0_5, %c0_6] : memref<1x128xf32, #tpu.memory_space<vmem>>, vector<1x128xf32>
    %10 = vector.broadcast %9 : vector<1x128xf32> to vector<512x128xf32>
    %11 = arith.mulf %10, %6 : vector<512x128xf32>
    %12 = arith.select %8, %6, %11 : vector<512x128xi1>, vector<512x128xf32>
    %c0_7 = arith.constant 0 : index
    %c0_8 = arith.constant 0 : index
    %13 = vector.load %arg5[%c0_7, %c0_8] : memref<512x128xf32, #tpu.memory_space<vmem>>, vector<512x128xf32>
    tpu.vector_store %arg5[%c0_7, %c0_8], %12 {strides = array<i32>} : memref<512x128xf32, #tpu.memory_space<vmem>>, vector<512x128xf32>,
    return
  }
  func.func @transform_0(%arg0: i32) -> (i32, i32) {
    %c0_i32 = arith.constant 0 : i32
    %c0_i32_0 = arith.constant 0 : i32
    return %arg0, %c0_i32 : i32, i32
  }
  func.func @transform_1(%arg0: i32) -> (i32, i32) {
    %c0_i32 = arith.constant 0 : i32
    %c0_i32_0 = arith.constant 0 : i32
    %c0_i32_1 = arith.constant 0 : i32
    return %c0_i32, %c0_i32_0 : i32, i32
  }
  func.func @transform_2(%arg0: i32) -> (i32, i32) {
    %c0_i32 = arith.constant 0 : i32
    %c0_i32_0 = arith.constant 0 : i32
    %c0_i32_1 = arith.constant 0 : i32
    return %c0_i32, %c0_i32_0 : i32, i32
  }
  func.func @transform_3(%arg0: i32) -> (i32, i32) {
    %c0_i32 = arith.constant 0 : i32
    %c0_i32_0 = arith.constant 0 : i32
    %c0_i32_1 = arith.constant 0 : i32
    return %c0_i32, %c0_i32_0 : i32, i32
  }
  func.func @transform_4(%arg0: i32) -> (i32, i32) {
    %c0_i32 = arith.constant 0 : i32
    %c0_i32_0 = arith.constant 0 : i32
    return %arg0, %c0_i32 : i32, i32
  }
}

module attributes {stable_mosaic.version = 11 : i64} {
  func.func @_affine_act_kernel(%arg0: i32, %arg1: memref<512x128xf32, #tpu.memory_space<vmem>>, %arg2: memref<1x128xf32, #tpu.memory_space<vmem>>, %arg3: memref<1x128xf32, #tpu.memory_space<vmem>>, %arg4: memref<1x128xf32, #tpu.memory_space<vmem>>, %arg5: memref<512x128xf32, #tpu.memory_space<vmem>>, %arg6: memref<512x128xf32, #tpu.memory_space<vmem>>) attributes {dimension_semantics = [#tpu.dimension_semantics<parallel>], iteration_bounds = array<i64: 1>, scalar_prefetch = 0 : i64, scratch_operands = 0 : i64, tpu.core_type = #tpu.core_type<tc>, window_params = [{transform_indices = @transform_0, window_bounds = array<i64: 512, 128>}, {pipeline_mode = #tpu.pipeline_mode<synchronous>, transform_indices = @transform_1, window_bounds = array<i64: 1, 128>}, {pipeline_mode = #tpu.pipeline_mode<synchronous>, transform_indices = @transform_2, window_bounds = array<i64: 1, 128>}, {pipeline_mode = #tpu.pipeline_mode<synchronous>, transform_indices = @transform_3, window_bounds = array<i64: 1, 128>}, {transform_indices = @transform_4, window_bounds = array<i64: 512, 128>}, {transform_indices = @transform_5, window_bounds = array<i64: 512, 128>}]} {
    %c0 = arith.constant 0 : index
    %c0_0 = arith.constant 0 : index
    %0 = vector.load %arg1[%c0, %c0_0] : memref<512x128xf32, #tpu.memory_space<vmem>>, vector<512x128xf32>
    %c0_1 = arith.constant 0 : index
    %c0_2 = arith.constant 0 : index
    %1 = vector.load %arg2[%c0_1, %c0_2] : memref<1x128xf32, #tpu.memory_space<vmem>>, vector<1x128xf32>
    %2 = vector.broadcast %1 : vector<1x128xf32> to vector<512x128xf32>
    %3 = arith.mulf %0, %2 : vector<512x128xf32>
    %c0_3 = arith.constant 0 : index
    %c0_4 = arith.constant 0 : index
    %4 = vector.load %arg3[%c0_3, %c0_4] : memref<1x128xf32, #tpu.memory_space<vmem>>, vector<1x128xf32>
    %5 = vector.broadcast %4 : vector<1x128xf32> to vector<512x128xf32>
    %6 = arith.addf %3, %5 : vector<512x128xf32>
    %c0_5 = arith.constant 0 : index
    %c0_6 = arith.constant 0 : index
    %7 = vector.load %arg5[%c0_5, %c0_6] : memref<512x128xf32, #tpu.memory_space<vmem>>, vector<512x128xf32>
    %8 = arith.addf %6, %7 : vector<512x128xf32>
    %c0_7 = arith.constant 0 : index
    %c0_8 = arith.constant 0 : index
    %9 = vector.load %arg6[%c0_7, %c0_8] : memref<512x128xf32, #tpu.memory_space<vmem>>, vector<512x128xf32>
    tpu.vector_store %arg6[%c0_7, %c0_8], %8 {strides = array<i32>} : memref<512x128xf32, #tpu.memory_space<vmem>>, vector<512x128xf32>,
    return
  }
  func.func @transform_0(%arg0: i32) -> (i32, i32) {
    %c0_i32 = arith.constant 0 : i32
    %c0_i32_0 = arith.constant 0 : i32
    return %arg0, %c0_i32 : i32, i32
  }
  func.func @transform_1(%arg0: i32) -> (i32, i32) {
    %c0_i32 = arith.constant 0 : i32
    %c0_i32_0 = arith.constant 0 : i32
    %c0_i32_1 = arith.constant 0 : i32
    return %c0_i32, %c0_i32_0 : i32, i32
  }
  func.func @transform_2(%arg0: i32) -> (i32, i32) {
    %c0_i32 = arith.constant 0 : i32
    %c0_i32_0 = arith.constant 0 : i32
    %c0_i32_1 = arith.constant 0 : i32
    return %c0_i32, %c0_i32_0 : i32, i32
  }
  func.func @transform_3(%arg0: i32) -> (i32, i32) {
    %c0_i32 = arith.constant 0 : i32
    %c0_i32_0 = arith.constant 0 : i32
    %c0_i32_1 = arith.constant 0 : i32
    return %c0_i32, %c0_i32_0 : i32, i32
  }
  func.func @transform_4(%arg0: i32) -> (i32, i32) {
    %c0_i32 = arith.constant 0 : i32
    %c0_i32_0 = arith.constant 0 : i32
    return %arg0, %c0_i32 : i32, i32
  }
  func.func @transform_5(%arg0: i32) -> (i32, i32) {
    %c0_i32 = arith.constant 0 : i32
    %c0_i32_0 = arith.constant 0 : i32
    return %arg0, %c0_i32 : i32, i32
  }
}

module attributes {stable_mosaic.version = 11 : i64} {
  func.func @_matmul_kernel(%arg0: i32, %arg1: i32, %arg2: i32, %arg3: memref<256x384xbf16, #tpu.memory_space<vmem>>, %arg4: memref<384x128xbf16, #tpu.memory_space<vmem>>, %arg5: memref<1x128xf32, #tpu.memory_space<vmem>>, %arg6: memref<1x128xf32, #tpu.memory_space<vmem>>, %arg7: memref<1x128xf32, #tpu.memory_space<vmem>>, %arg8: memref<1x128xf32, #tpu.memory_space<vmem>>, %arg9: memref<256x128xf32, #tpu.memory_space<vmem>>, %arg10: memref<256x128xf32, #tpu.memory_space<vmem>>) attributes {dimension_semantics = [#tpu.dimension_semantics<parallel>, #tpu.dimension_semantics<parallel>, #tpu.dimension_semantics<arbitrary>], iteration_bounds = array<i64: 2, 1, 1>, scalar_prefetch = 0 : i64, scratch_operands = 1 : i64, tpu.core_type = #tpu.core_type<tc>, window_params = [{transform_indices = @transform_0, window_bounds = array<i64: 256, 384>}, {transform_indices = @transform_1, window_bounds = array<i64: 384, 128>}, {transform_indices = @transform_2, window_bounds = array<i64: 1, 128>}, {transform_indices = @transform_3, window_bounds = array<i64: 1, 128>}, {transform_indices = @transform_4, window_bounds = array<i64: 1, 128>}, {transform_indices = @transform_5, window_bounds = array<i64: 1, 128>}, {transform_indices = @transform_6, window_bounds = array<i64: 256, 128>}]} {
    %c0_i32 = arith.constant 0 : i32
    %0 = arith.cmpi eq, %arg2, %c0_i32 : i32
    %1 = arith.extui %0 : i1 to i32
    %c0_i32_0 = arith.constant 0 : i32
    %2 = arith.cmpi ne, %1, %c0_i32_0 : i32
    scf.if %2 {
      %cst_10 = arith.constant 0.000000e+00 : f32
      %12 = vector.broadcast %cst_10 : f32 to vector<256x128xf32>
      %c0_11 = arith.constant 0 : index
      %c0_12 = arith.constant 0 : index
      %13 = vector.load %arg10[%c0_11, %c0_12] : memref<256x128xf32, #tpu.memory_space<vmem>>, vector<256x128xf32>
      tpu.vector_store %arg10[%c0_11, %c0_12], %12 {strides = array<i32>} : memref<256x128xf32, #tpu.memory_space<vmem>>, vector<256x128xf32>,
    } else {
    }
    %c0 = arith.constant 0 : index
    %c0_1 = arith.constant 0 : index
    %3 = vector.load %arg10[%c0, %c0_1] : memref<256x128xf32, #tpu.memory_space<vmem>>, vector<256x128xf32>
    %c0_2 = arith.constant 0 : index
    %c0_3 = arith.constant 0 : index
    %4 = vector.load %arg3[%c0_2, %c0_3] : memref<256x384xbf16, #tpu.memory_space<vmem>>, vector<256x384xbf16>
    %c0_4 = arith.constant 0 : index
    %c0_5 = arith.constant 0 : index
    %5 = vector.load %arg4[%c0_4, %c0_5] : memref<384x128xbf16, #tpu.memory_space<vmem>>, vector<384x128xbf16>
    %cst = arith.constant dense<0.000000e+00> : vector<256x128xf32>
    %6 = tpu.matmul %4, %5, %cst {dimension_numbers = #tpu.dot_dimension_numbers<[1], [0], [0], [1], [0, 0, 1, 1], [], []>} : vector<256x384xbf16>, vector<384x128xbf16>, vector<256x128xf32> -> vector<256x128xf32>
    %7 = arith.addf %3, %6 : vector<256x128xf32>
    %c0_6 = arith.constant 0 : index
    %c0_7 = arith.constant 0 : index
    %8 = vector.load %arg10[%c0_6, %c0_7] : memref<256x128xf32, #tpu.memory_space<vmem>>, vector<256x128xf32>
    tpu.vector_store %arg10[%c0_6, %c0_7], %7 {strides = array<i32>} : memref<256x128xf32, #tpu.memory_space<vmem>>, vector<256x128xf32>,
    %c0_i32_8 = arith.constant 0 : i32
    %9 = arith.cmpi eq, %arg2, %c0_i32_8 : i32
    %10 = arith.extui %9 : i1 to i32
    %c0_i32_9 = arith.constant 0 : i32
    %11 = arith.cmpi ne, %10, %c0_i32_9 : i32
    scf.if %11 {
      %c0_10 = arith.constant 0 : index
      %c0_11 = arith.constant 0 : index
      %12 = vector.load %arg10[%c0_10, %c0_11] : memref<256x128xf32, #tpu.memory_space<vmem>>, vector<256x128xf32>
      %c0_12 = arith.constant 0 : index
      %c0_13 = arith.constant 0 : index
      %13 = vector.load %arg5[%c0_12, %c0_13] : memref<1x128xf32, #tpu.memory_space<vmem>>, vector<1x128xf32>
      %14 = vector.broadcast %13 : vector<1x128xf32> to vector<256x128xf32>
      %15 = arith.addf %12, %14 : vector<256x128xf32>
      %c0_14 = arith.constant 0 : index
      %c0_15 = arith.constant 0 : index
      %16 = vector.load %arg6[%c0_14, %c0_15] : memref<1x128xf32, #tpu.memory_space<vmem>>, vector<1x128xf32>
      %17 = vector.broadcast %16 : vector<1x128xf32> to vector<256x128xf32>
      %18 = arith.mulf %15, %17 : vector<256x128xf32>
      %c0_16 = arith.constant 0 : index
      %c0_17 = arith.constant 0 : index
      %19 = vector.load %arg7[%c0_16, %c0_17] : memref<1x128xf32, #tpu.memory_space<vmem>>, vector<1x128xf32>
      %20 = vector.broadcast %19 : vector<1x128xf32> to vector<256x128xf32>
      %21 = arith.addf %18, %20 : vector<256x128xf32>
      %cst_18 = arith.constant 0.000000e+00 : f32
      %22 = vector.broadcast %cst_18 : f32 to vector<256x128xf32>
      %23 = arith.cmpf ogt, %21, %22 : vector<256x128xf32>
      %c0_19 = arith.constant 0 : index
      %c0_20 = arith.constant 0 : index
      %24 = vector.load %arg8[%c0_19, %c0_20] : memref<1x128xf32, #tpu.memory_space<vmem>>, vector<1x128xf32>
      %25 = vector.broadcast %24 : vector<1x128xf32> to vector<256x128xf32>
      %26 = arith.mulf %25, %21 : vector<256x128xf32>
      %27 = arith.select %23, %21, %26 : vector<256x128xi1>, vector<256x128xf32>
      %c0_21 = arith.constant 0 : index
      %c0_22 = arith.constant 0 : index
      %28 = vector.load %arg9[%c0_21, %c0_22] : memref<256x128xf32, #tpu.memory_space<vmem>>, vector<256x128xf32>
      tpu.vector_store %arg9[%c0_21, %c0_22], %27 {strides = array<i32>} : memref<256x128xf32, #tpu.memory_space<vmem>>, vector<256x128xf32>,
    } else {
    }
    return
  }
  func.func @transform_0(%arg0: i32, %arg1: i32, %arg2: i32) -> (i32, i32) {
    %c0_i32 = arith.constant 0 : i32
    return %arg0, %arg2 : i32, i32
  }
  func.func @transform_1(%arg0: i32, %arg1: i32, %arg2: i32) -> (i32, i32) {
    %c0_i32 = arith.constant 0 : i32
    return %arg2, %arg1 : i32, i32
  }
  func.func @transform_2(%arg0: i32, %arg1: i32, %arg2: i32) -> (i32, i32) {
    %c0_i32 = arith.constant 0 : i32
    %c0_i32_0 = arith.constant 0 : i32
    return %c0_i32, %arg1 : i32, i32
  }
  func.func @transform_3(%arg0: i32, %arg1: i32, %arg2: i32) -> (i32, i32) {
    %c0_i32 = arith.constant 0 : i32
    %c0_i32_0 = arith.constant 0 : i32
    return %c0_i32, %arg1 : i32, i32
  }
  func.func @transform_4(%arg0: i32, %arg1: i32, %arg2: i32) -> (i32, i32) {
    %c0_i32 = arith.constant 0 : i32
    %c0_i32_0 = arith.constant 0 : i32
    return %c0_i32, %arg1 : i32, i32
  }
  func.func @transform_5(%arg0: i32, %arg1: i32, %arg2: i32) -> (i32, i32) {
    %c0_i32 = arith.constant 0 : i32
    %c0_i32_0 = arith.constant 0 : i32
    return %c0_i32, %arg1 : i32, i32
  }
  func.func @transform_6(%arg0: i32, %arg1: i32, %arg2: i32) -> (i32, i32) {
    %c0_i32 = arith.constant 0 : i32
    return %arg0, %arg1 : i32, i32
  }
}

module attributes {stable_mosaic.version = 11 : i64} {
  func.func @_matmul_kernel(%arg0: i32, %arg1: i32, %arg2: i32, %arg3: memref<256x384xbf16, #tpu.memory_space<vmem>>, %arg4: memref<384x128xbf16, #tpu.memory_space<vmem>>, %arg5: memref<1x128xf32, #tpu.memory_space<vmem>>, %arg6: memref<1x128xf32, #tpu.memory_space<vmem>>, %arg7: memref<1x128xf32, #tpu.memory_space<vmem>>, %arg8: memref<1x128xf32, #tpu.memory_space<vmem>>, %arg9: memref<256x128xf32, #tpu.memory_space<vmem>>, %arg10: memref<256x128xf32, #tpu.memory_space<vmem>>) attributes {dimension_semantics = [#tpu.dimension_semantics<parallel>, #tpu.dimension_semantics<parallel>, #tpu.dimension_semantics<arbitrary>], iteration_bounds = array<i64: 8, 1, 1>, scalar_prefetch = 0 : i64, scratch_operands = 1 : i64, tpu.core_type = #tpu.core_type<tc>, window_params = [{transform_indices = @transform_0, window_bounds = array<i64: 256, 384>}, {transform_indices = @transform_1, window_bounds = array<i64: 384, 128>}, {transform_indices = @transform_2, window_bounds = array<i64: 1, 128>}, {transform_indices = @transform_3, window_bounds = array<i64: 1, 128>}, {transform_indices = @transform_4, window_bounds = array<i64: 1, 128>}, {transform_indices = @transform_5, window_bounds = array<i64: 1, 128>}, {transform_indices = @transform_6, window_bounds = array<i64: 256, 128>}]} {
    %c0_i32 = arith.constant 0 : i32
    %0 = arith.cmpi eq, %arg2, %c0_i32 : i32
    %1 = arith.extui %0 : i1 to i32
    %c0_i32_0 = arith.constant 0 : i32
    %2 = arith.cmpi ne, %1, %c0_i32_0 : i32
    scf.if %2 {
      %cst_10 = arith.constant 0.000000e+00 : f32
      %12 = vector.broadcast %cst_10 : f32 to vector<256x128xf32>
      %c0_11 = arith.constant 0 : index
      %c0_12 = arith.constant 0 : index
      %13 = vector.load %arg10[%c0_11, %c0_12] : memref<256x128xf32, #tpu.memory_space<vmem>>, vector<256x128xf32>
      tpu.vector_store %arg10[%c0_11, %c0_12], %12 {strides = array<i32>} : memref<256x128xf32, #tpu.memory_space<vmem>>, vector<256x128xf32>,
    } else {
    }
    %c0 = arith.constant 0 : index
    %c0_1 = arith.constant 0 : index
    %3 = vector.load %arg10[%c0, %c0_1] : memref<256x128xf32, #tpu.memory_space<vmem>>, vector<256x128xf32>
    %c0_2 = arith.constant 0 : index
    %c0_3 = arith.constant 0 : index
    %4 = vector.load %arg3[%c0_2, %c0_3] : memref<256x384xbf16, #tpu.memory_space<vmem>>, vector<256x384xbf16>
    %c0_4 = arith.constant 0 : index
    %c0_5 = arith.constant 0 : index
    %5 = vector.load %arg4[%c0_4, %c0_5] : memref<384x128xbf16, #tpu.memory_space<vmem>>, vector<384x128xbf16>
    %cst = arith.constant dense<0.000000e+00> : vector<256x128xf32>
    %6 = tpu.matmul %4, %5, %cst {dimension_numbers = #tpu.dot_dimension_numbers<[1], [0], [0], [1], [0, 0, 1, 1], [], []>} : vector<256x384xbf16>, vector<384x128xbf16>, vector<256x128xf32> -> vector<256x128xf32>
    %7 = arith.addf %3, %6 : vector<256x128xf32>
    %c0_6 = arith.constant 0 : index
    %c0_7 = arith.constant 0 : index
    %8 = vector.load %arg10[%c0_6, %c0_7] : memref<256x128xf32, #tpu.memory_space<vmem>>, vector<256x128xf32>
    tpu.vector_store %arg10[%c0_6, %c0_7], %7 {strides = array<i32>} : memref<256x128xf32, #tpu.memory_space<vmem>>, vector<256x128xf32>,
    %c0_i32_8 = arith.constant 0 : i32
    %9 = arith.cmpi eq, %arg2, %c0_i32_8 : i32
    %10 = arith.extui %9 : i1 to i32
    %c0_i32_9 = arith.constant 0 : i32
    %11 = arith.cmpi ne, %10, %c0_i32_9 : i32
    scf.if %11 {
      %c0_10 = arith.constant 0 : index
      %c0_11 = arith.constant 0 : index
      %12 = vector.load %arg10[%c0_10, %c0_11] : memref<256x128xf32, #tpu.memory_space<vmem>>, vector<256x128xf32>
      %c0_12 = arith.constant 0 : index
      %c0_13 = arith.constant 0 : index
      %13 = vector.load %arg5[%c0_12, %c0_13] : memref<1x128xf32, #tpu.memory_space<vmem>>, vector<1x128xf32>
      %14 = vector.broadcast %13 : vector<1x128xf32> to vector<256x128xf32>
      %15 = arith.addf %12, %14 : vector<256x128xf32>
      %c0_14 = arith.constant 0 : index
      %c0_15 = arith.constant 0 : index
      %16 = vector.load %arg6[%c0_14, %c0_15] : memref<1x128xf32, #tpu.memory_space<vmem>>, vector<1x128xf32>
      %17 = vector.broadcast %16 : vector<1x128xf32> to vector<256x128xf32>
      %18 = arith.mulf %15, %17 : vector<256x128xf32>
      %c0_16 = arith.constant 0 : index
      %c0_17 = arith.constant 0 : index
      %19 = vector.load %arg7[%c0_16, %c0_17] : memref<1x128xf32, #tpu.memory_space<vmem>>, vector<1x128xf32>
      %20 = vector.broadcast %19 : vector<1x128xf32> to vector<256x128xf32>
      %21 = arith.addf %18, %20 : vector<256x128xf32>
      %cst_18 = arith.constant 0.000000e+00 : f32
      %22 = vector.broadcast %cst_18 : f32 to vector<256x128xf32>
      %23 = arith.cmpf ogt, %21, %22 : vector<256x128xf32>
      %c0_19 = arith.constant 0 : index
      %c0_20 = arith.constant 0 : index
      %24 = vector.load %arg8[%c0_19, %c0_20] : memref<1x128xf32, #tpu.memory_space<vmem>>, vector<1x128xf32>
      %25 = vector.broadcast %24 : vector<1x128xf32> to vector<256x128xf32>
      %26 = arith.mulf %25, %21 : vector<256x128xf32>
      %27 = arith.select %23, %21, %26 : vector<256x128xi1>, vector<256x128xf32>
      %c0_21 = arith.constant 0 : index
      %c0_22 = arith.constant 0 : index
      %28 = vector.load %arg9[%c0_21, %c0_22] : memref<256x128xf32, #tpu.memory_space<vmem>>, vector<256x128xf32>
      tpu.vector_store %arg9[%c0_21, %c0_22], %27 {strides = array<i32>} : memref<256x128xf32, #tpu.memory_space<vmem>>, vector<256x128xf32>,
    } else {
    }
    return
  }
  func.func @transform_0(%arg0: i32, %arg1: i32, %arg2: i32) -> (i32, i32) {
    %c0_i32 = arith.constant 0 : i32
    return %arg0, %arg2 : i32, i32
  }
  func.func @transform_1(%arg0: i32, %arg1: i32, %arg2: i32) -> (i32, i32) {
    %c0_i32 = arith.constant 0 : i32
    return %arg2, %arg1 : i32, i32
  }
  func.func @transform_2(%arg0: i32, %arg1: i32, %arg2: i32) -> (i32, i32) {
    %c0_i32 = arith.constant 0 : i32
    %c0_i32_0 = arith.constant 0 : i32
    return %c0_i32, %arg1 : i32, i32
  }
  func.func @transform_3(%arg0: i32, %arg1: i32, %arg2: i32) -> (i32, i32) {
    %c0_i32 = arith.constant 0 : i32
    %c0_i32_0 = arith.constant 0 : i32
    return %c0_i32, %arg1 : i32, i32
  }
  func.func @transform_4(%arg0: i32, %arg1: i32, %arg2: i32) -> (i32, i32) {
    %c0_i32 = arith.constant 0 : i32
    %c0_i32_0 = arith.constant 0 : i32
    return %c0_i32, %arg1 : i32, i32
  }
  func.func @transform_5(%arg0: i32, %arg1: i32, %arg2: i32) -> (i32, i32) {
    %c0_i32 = arith.constant 0 : i32
    %c0_i32_0 = arith.constant 0 : i32
    return %c0_i32, %arg1 : i32, i32
  }
  func.func @transform_6(%arg0: i32, %arg1: i32, %arg2: i32) -> (i32, i32) {
    %c0_i32 = arith.constant 0 : i32
    return %arg0, %arg1 : i32, i32
  }
}

module attributes {stable_mosaic.version = 11 : i64} {
  func.func @_matmul_kernel(%arg0: i32, %arg1: i32, %arg2: i32, %arg3: memref<256x512xbf16, #tpu.memory_space<vmem>>, %arg4: memref<512x128xbf16, #tpu.memory_space<vmem>>, %arg5: memref<1x128xf32, #tpu.memory_space<vmem>>, %arg6: memref<1x128xf32, #tpu.memory_space<vmem>>, %arg7: memref<1x128xf32, #tpu.memory_space<vmem>>, %arg8: memref<1x128xf32, #tpu.memory_space<vmem>>, %arg9: memref<256x128xf32, #tpu.memory_space<vmem>>, %arg10: memref<256x128xf32, #tpu.memory_space<vmem>>) attributes {dimension_semantics = [#tpu.dimension_semantics<parallel>, #tpu.dimension_semantics<parallel>, #tpu.dimension_semantics<arbitrary>], iteration_bounds = array<i64: 32, 1, 6>, scalar_prefetch = 0 : i64, scratch_operands = 1 : i64, tpu.core_type = #tpu.core_type<tc>, window_params = [{transform_indices = @transform_0, window_bounds = array<i64: 256, 512>}, {transform_indices = @transform_1, window_bounds = array<i64: 512, 128>}, {transform_indices = @transform_2, window_bounds = array<i64: 1, 128>}, {transform_indices = @transform_3, window_bounds = array<i64: 1, 128>}, {transform_indices = @transform_4, window_bounds = array<i64: 1, 128>}, {transform_indices = @transform_5, window_bounds = array<i64: 1, 128>}, {transform_indices = @transform_6, window_bounds = array<i64: 256, 128>}]} {
    %c0_i32 = arith.constant 0 : i32
    %0 = arith.cmpi eq, %arg2, %c0_i32 : i32
    %1 = arith.extui %0 : i1 to i32
    %c0_i32_0 = arith.constant 0 : i32
    %2 = arith.cmpi ne, %1, %c0_i32_0 : i32
    scf.if %2 {
      %cst_9 = arith.constant 0.000000e+00 : f32
      %12 = vector.broadcast %cst_9 : f32 to vector<256x128xf32>
      %c0_10 = arith.constant 0 : index
      %c0_11 = arith.constant 0 : index
      %13 = vector.load %arg10[%c0_10, %c0_11] : memref<256x128xf32, #tpu.memory_space<vmem>>, vector<256x128xf32>
      tpu.vector_store %arg10[%c0_10, %c0_11], %12 {strides = array<i32>} : memref<256x128xf32, #tpu.memory_space<vmem>>, vector<256x128xf32>,
    } else {
    }
    %c0 = arith.constant 0 : index
    %c0_1 = arith.constant 0 : index
    %3 = vector.load %arg10[%c0, %c0_1] : memref<256x128xf32, #tpu.memory_space<vmem>>, vector<256x128xf32>
    %c0_2 = arith.constant 0 : index
    %c0_3 = arith.constant 0 : index
    %4 = vector.load %arg3[%c0_2, %c0_3] : memref<256x512xbf16, #tpu.memory_space<vmem>>, vector<256x512xbf16>
    %c0_4 = arith.constant 0 : index
    %c0_5 = arith.constant 0 : index
    %5 = vector.load %arg4[%c0_4, %c0_5] : memref<512x128xbf16, #tpu.memory_space<vmem>>, vector<512x128xbf16>
    %cst = arith.constant dense<0.000000e+00> : vector<256x128xf32>
    %6 = tpu.matmul %4, %5, %cst {dimension_numbers = #tpu.dot_dimension_numbers<[1], [0], [0], [1], [0, 0, 1, 1], [], []>} : vector<256x512xbf16>, vector<512x128xbf16>, vector<256x128xf32> -> vector<256x128xf32>
    %7 = arith.addf %3, %6 : vector<256x128xf32>
    %c0_6 = arith.constant 0 : index
    %c0_7 = arith.constant 0 : index
    %8 = vector.load %arg10[%c0_6, %c0_7] : memref<256x128xf32, #tpu.memory_space<vmem>>, vector<256x128xf32>
    tpu.vector_store %arg10[%c0_6, %c0_7], %7 {strides = array<i32>} : memref<256x128xf32, #tpu.memory_space<vmem>>, vector<256x128xf32>,
    %c5_i32 = arith.constant 5 : i32
    %9 = arith.cmpi eq, %arg2, %c5_i32 : i32
    %10 = arith.extui %9 : i1 to i32
    %c0_i32_8 = arith.constant 0 : i32
    %11 = arith.cmpi ne, %10, %c0_i32_8 : i32
    scf.if %11 {
      %c0_9 = arith.constant 0 : index
      %c0_10 = arith.constant 0 : index
      %12 = vector.load %arg10[%c0_9, %c0_10] : memref<256x128xf32, #tpu.memory_space<vmem>>, vector<256x128xf32>
      %c0_11 = arith.constant 0 : index
      %c0_12 = arith.constant 0 : index
      %13 = vector.load %arg5[%c0_11, %c0_12] : memref<1x128xf32, #tpu.memory_space<vmem>>, vector<1x128xf32>
      %14 = vector.broadcast %13 : vector<1x128xf32> to vector<256x128xf32>
      %15 = arith.addf %12, %14 : vector<256x128xf32>
      %c0_13 = arith.constant 0 : index
      %c0_14 = arith.constant 0 : index
      %16 = vector.load %arg6[%c0_13, %c0_14] : memref<1x128xf32, #tpu.memory_space<vmem>>, vector<1x128xf32>
      %17 = vector.broadcast %16 : vector<1x128xf32> to vector<256x128xf32>
      %18 = arith.mulf %15, %17 : vector<256x128xf32>
      %c0_15 = arith.constant 0 : index
      %c0_16 = arith.constant 0 : index
      %19 = vector.load %arg7[%c0_15, %c0_16] : memref<1x128xf32, #tpu.memory_space<vmem>>, vector<1x128xf32>
      %20 = vector.broadcast %19 : vector<1x128xf32> to vector<256x128xf32>
      %21 = arith.addf %18, %20 : vector<256x128xf32>
      %22 = math.tanh %21 : vector<256x128xf32>
      %c0_17 = arith.constant 0 : index
      %c0_18 = arith.constant 0 : index
      %23 = vector.load %arg9[%c0_17, %c0_18] : memref<256x128xf32, #tpu.memory_space<vmem>>, vector<256x128xf32>
      tpu.vector_store %arg9[%c0_17, %c0_18], %22 {strides = array<i32>} : memref<256x128xf32, #tpu.memory_space<vmem>>, vector<256x128xf32>,
    } else {
    }
    return
  }
  func.func @transform_0(%arg0: i32, %arg1: i32, %arg2: i32) -> (i32, i32) {
    %c0_i32 = arith.constant 0 : i32
    return %arg0, %arg2 : i32, i32
  }
  func.func @transform_1(%arg0: i32, %arg1: i32, %arg2: i32) -> (i32, i32) {
    %c0_i32 = arith.constant 0 : i32
    return %arg2, %arg1 : i32, i32
  }
  func.func @transform_2(%arg0: i32, %arg1: i32, %arg2: i32) -> (i32, i32) {
    %c0_i32 = arith.constant 0 : i32
    %c0_i32_0 = arith.constant 0 : i32
    return %c0_i32, %arg1 : i32, i32
  }
  func.func @transform_3(%arg0: i32, %arg1: i32, %arg2: i32) -> (i32, i32) {
    %c0_i32 = arith.constant 0 : i32
    %c0_i32_0 = arith.constant 0 : i32
    return %c0_i32, %arg1 : i32, i32
  }
  func.func @transform_4(%arg0: i32, %arg1: i32, %arg2: i32) -> (i32, i32) {
    %c0_i32 = arith.constant 0 : i32
    %c0_i32_0 = arith.constant 0 : i32
    return %c0_i32, %arg1 : i32, i32
  }
  func.func @transform_5(%arg0: i32, %arg1: i32, %arg2: i32) -> (i32, i32) {
    %c0_i32 = arith.constant 0 : i32
    %c0_i32_0 = arith.constant 0 : i32
    return %c0_i32, %arg1 : i32, i32
  }
  func.func @transform_6(%arg0: i32, %arg1: i32, %arg2: i32) -> (i32, i32) {
    %c0_i32 = arith.constant 0 : i32
    return %arg0, %arg1 : i32, i32
  }
}

</mosaic_0001>

<bundles_post_ra>
// kernel: a_call__.14
= control target key start
LH: loop header
LB: loop body
LE: loop exit
PB: predicated region body
PF: predicated region fallthrough
CT: control target
= control target key end

     0   :  { %s1786_s21 = smov 0   ;;  %s1788_s22 = smov 0   ;;  %s2090_s0 = inlined_call_operand.vmem [shape: bf16[512,256], index: 0, kind: input, shape index: {}]   ;;  %s2091_s1 = inlined_call_operand.vmem [shape: bf16[256,128], index: 1, kind: input, shape index: {}]   ;;  %s2092_s2 = inlined_call_operand.vmem [shape: f32[1,128], index: 2, kind: input, shape index: {}]   ;;  %s2093_s3 = inlined_call_operand.vmem [shape: f32[1,128], index: 3, kind: input, shape index: {}]   ;;  %s2094_s4 = inlined_call_operand.vmem [shape: f32[1,128], index: 4, kind: input, shape index: {}]   ;;  %s2095_s5 = inlined_call_operand.vmem [shape: f32[1,128], index: 5, kind: input, shape index: {}]   ;;  %s2096_s6 = inlined_call_operand.vmem [shape: f32[512,128], index: 6, kind: output, shape index: {}]  }
   0x1   :  { %s1790_s23 = smov 0  }
   0x2 LB: > { %s35_s24 = sadd.s32 1, %s1745_s22  ;;  %p1450_p0 = scmp.ge.s32.totalorder %s1749_s23, 1  ;;  %s1749_s23 = sphi %s1790_s23, %s16_s23   ;;  %s1745_s22 = sphi %s1788_s22, %s2098_s22   ;;  %s1741_s21 = sphi %s1786_s21, %s2097_s21  }
   0x3   : > { %p37_p1 = scmp.ge.s32.totalorder %s35_s24, 2  ;;  %p290_p2 = scmp.lt.s32.totalorder %s1749_s23, 3 }
   0x5   : > { %s2100_s24 = smov (%p37_p1, %s35_s24), 0  ;;  %p291_p3 = pnand %p1450_p0, %p290_p2 }
   0x6   : > { %s1451_s27 = sshll.u32 (!%p291_p3), %s1741_s21, 5 }
   0x7   : > { %294 = sbr.rel (%p291_p3) target bundleno = 313 (0x139), region = 44  ;;  %p350_p4 = scmp.lt.s32.totalorder (!%p291_p3), %s1451_s27, 63 }
   0xc   : > { %v1663_v0 = vld [vmem:[%s2091_s1 + $0x78] sm:$0xff]   ;;  %v1665_v2 = vld [vmem:[%s2091_s1 + $0x70] sm:$0xff]   ;;  %v1667_v4 = vld [vmem:[%s2091_s1 + $0x68] sm:$0xff]   ;;  %s2102_s27 = smov (!%p350_p4, %s1451_s27), 63 }
   0xd   : > { %v1664_v1 = vld [vmem:[%s2091_s1 + $0x38] sm:$0xff]   ;;  %1511 = vmatprep.subr.bf16.mxu0 %v1663_v0  ;;  %1623 = vmatprep.subr.bf16.mxu1 %v1663_v0  ;;  %v1666_v3 = vld [vmem:[%s2091_s1 + $0x30] sm:$0xff]   ;;  %v1668_v5 = vld [vmem:[%s2091_s1 + $0x28] sm:$0xff]   ;;  %s1510_s18 = sshll.u32 %s2102_s27, 3 }
   0xe   : > { %1512 = vmatpush3.bf16.msra.mxu0 %v1664_v1  ;;  %1631 = vmatpush3.bf16.msra.mxu1 %v1664_v1  ;;  %v1669_v6 = vld [vmem:[%s2091_s1 + $0x60] sm:$0xff]   ;;  %v1671_v8 = vld [vmem:[%s2091_s1 + $0x58] sm:$0xff]   ;;  %s1839_s26 = scalar_lea.vmem %s2090_s0, %s1510_s18  ;;  %v1673_v10 = vld [vmem:[%s2091_s1 + $0x50] sm:$0xff]   ;;  %s1927_s9 = scalar_lea.vmem %s2096_s6, %s1510_s18 }
   0xf   : > { %1513 = vmatprep.subr.bf16.mxu0 %v1665_v2  ;;  %1624 = vmatprep.subr.bf16.mxu1 %v1665_v2  ;;  %v1670_v7 = vld [vmem:[%s2091_s1 + $0x20] sm:$0xff]   ;;  %v1672_v9 = vld [vmem:[%s2091_s1 + $0x18] sm:$0xff]   ;;  %v1674_v13 = vld [vmem:[%s2091_s1 + $0x10] sm:$0xff]  }
  0x10   : > { %v1681_v11 = vld [vmem:[%s1839_s26 + $0x4] ss:$8 sps:$4 sm:$0xff]   ;;  %v1679_v18 = vld [vmem:[%s1839_s26] ss:$8 sps:$4 sm:$0xff]   ;;  %v1685_v20 = vld [vmem:[%s1839_s26 + $0x14] ss:$8 sps:$4 sm:$0xff]  }
  0x11   : > { %v1684_v12 = vld [vmem:[%s1839_s26 + $0x84] ss:$8 sps:$4 sm:$0xff]   ;;  %811 = vmatprep.mubr.bf16.mxu0 %v1681_v11  ;;  %v1682_v19 = vld [vmem:[%s1839_s26 + $0x80] ss:$8 sps:$4 sm:$0xff]   ;;  %v1687_v21 = vld [vmem:[%s1839_s26 + $0x94] ss:$8 sps:$4 sm:$0xff]  }
  0x12   : > { %1514 = vmatpush3.bf16.msra.mxu0 %v1666_v3  ;;  %1632 = vmatpush3.bf16.msra.mxu1 %v1666_v3  ;;  %v1675_v14 = vld [vmem:[%s2091_s1 + $0x48] sm:$0xff]   ;;  %v1677_v16 = vld [vmem:[%s2091_s1 + $0x40] sm:$0xff]   ;;  %v1689_v22 = vld [vmem:[%s1839_s26 + $0x10] ss:$8 sps:$4 sm:$0xff]  }
  0x13   : > { %1515 = vmatprep.subr.bf16.mxu0 %v1667_v4  ;;  %1625 = vmatprep.subr.bf16.mxu1 %v1667_v4  ;;  %v1676_v15 = vld [vmem:[%s2091_s1 + $0x8] sm:$0xff]   ;;  %v1678_v17 = vld [vmem:[%s2091_s1] sm:$0xff]   ;;  %v1690_v23 = vld [vmem:[%s1839_s26 + $0x90] ss:$8 sps:$4 sm:$0xff]  }
  0x14   : > { %875 = vmatprep.mubr.bf16.mxu1 %v1684_v12  ;;  %v1691_v24 = vld [vmem:[%s1839_s26 + $0x24] ss:$8 sps:$4 sm:$0xff]   ;;  %v1695_v26 = vld [vmem:[%s1839_s26 + $0x20] ss:$8 sps:$4 sm:$0xff]   ;;  %v1697_v28 = vld [vmem:[%s1839_s26 + $0x34] ss:$8 sps:$4 sm:$0xff]  }
  0x15   : > { %v1693_v25 = vld [vmem:[%s1839_s26 + $0xa4] ss:$8 sps:$4 sm:$0xff]   ;;  %v1696_v27 = vld [vmem:[%s1839_s26 + $0xa0] ss:$8 sps:$4 sm:$0xff]   ;;  %v1699_v29 = vld [vmem:[%s1839_s26 + $0xb4] ss:$8 sps:$4 sm:$0xff]  }
  0x16   : > { %1516 = vmatpush3.bf16.msra.mxu0 %v1668_v5  ;;  %1633 = vmatpush3.bf16.msra.mxu1 %v1668_v5  ;;  %v1701_v30 = vld [vmem:[%s1839_s26 + $0x30] ss:$8 sps:$4 sm:$0xff]   ;;  %v1703_v32 = vld [vmem:[%s1839_s26 + $0x44] ss:$8 sps:$4 sm:$0xff]   ;;  %v1707_v34 = vld [vmem:[%s1839_s26 + $0x40] ss:$8 sps:$4 sm:$0xff]  }
  0x17   : > { %1517 = vmatprep.subr.bf16.mxu0 %v1669_v6  ;;  %1626 = vmatprep.subr.bf16.mxu1 %v1669_v6  ;;  %v1702_v31 = vld [vmem:[%s1839_s26 + $0xb0] ss:$8 sps:$4 sm:$0xff]   ;;  %v1705_v33 = vld [vmem:[%s1839_s26 + $0xc4] ss:$8 sps:$4 sm:$0xff]   ;;  %v1708_v35 = vld [vmem:[%s1839_s26 + $0xc0] ss:$8 sps:$4 sm:$0xff]  }
  0x18   : > { %v1709_v36 = vld [vmem:[%s1839_s26 + $0x54] ss:$8 sps:$4 sm:$0xff]   ;;  %v1713_v38 = vld [vmem:[%s1839_s26 + $0x50] ss:$8 sps:$4 sm:$0xff]   ;;  %v1715_v40 = vld [vmem:[%s1839_s26 + $0x64] ss:$8 sps:$4 sm:$0xff]  }
  0x19   : > { %v1711_v37 = vld [vmem:[%s1839_s26 + $0xd4] ss:$8 sps:$4 sm:$0xff]   ;;  %v1714_v39 = vld [vmem:[%s1839_s26 + $0xd0] ss:$8 sps:$4 sm:$0xff]   ;;  %v1717_v41 = vld [vmem:[%s1839_s26 + $0xe4] ss:$8 sps:$4 sm:$0xff]  }
  0x1a   : > { %1518 = vmatpush3.bf16.msra.mxu0 %v1670_v7  ;;  %1634 = vmatpush3.bf16.msra.mxu1 %v1670_v7  ;;  %v1719_v42 = vld [vmem:[%s1839_s26 + $0x60] ss:$8 sps:$4 sm:$0xff]   ;;  %v1721_v44 = vld [vmem:[%s1839_s26 + $0x74] ss:$8 sps:$4 sm:$0xff]   ;;  %v1725_v46 = vld [vmem:[%s1839_s26 + $0x70] ss:$8 sps:$4 sm:$0xff]  }
  0x1b   : > { %1519 = vmatprep.subr.bf16.mxu0 %v1671_v8  ;;  %1627 = vmatprep.subr.bf16.mxu1 %v1671_v8  ;;  %v1720_v43 = vld [vmem:[%s1839_s26 + $0xe0] ss:$8 sps:$4 sm:$0xff]   ;;  %v1723_v45 = vld [vmem:[%s1839_s26 + $0xf4] ss:$8 sps:$4 sm:$0xff]   ;;  %v1726_v47 = vld [vmem:[%s1839_s26 + $0xf0] ss:$8 sps:$4 sm:$0xff]  }
  0x1c   : > { %v1897_v51 = vld [vmem:[%s2092_s2] ss:$0 sm:$0xff] }
  0x1d   : > { %v1902_v55 = vld [vmem:[%s2093_s3] ss:$0 sm:$0xff] }
  0x1e   : > { %1520 = vmatpush3.bf16.msra.mxu0 %v1672_v9  ;;  %1635 = vmatpush3.bf16.msra.mxu1 %v1672_v9  ;;  %v1909_v60 = vld [vmem:[%s2094_s4] ss:$0 sm:$0xff] }
  0x1f   : > { %1521 = vmatprep.subr.bf16.mxu0 %v1673_v10  ;;  %1628 = vmatprep.subr.bf16.mxu1 %v1673_v10  ;;  %v1916_v3 = vld [vmem:[%s2095_s5] ss:$0 sm:$0xff] }
  0x22   : > { %1522 = vmatpush3.bf16.msra.mxu0 %v1674_v13  ;;  %1636 = vmatpush3.bf16.msra.mxu1 %v1674_v13 }
  0x23   : > { %1523 = vmatprep.subr.bf16.mxu0 %v1675_v14  ;;  %1629 = vmatprep.subr.bf16.mxu1 %v1675_v14 }
  0x26   : > { %1524 = vmatpush3.bf16.msra.mxu0 %v1676_v15  ;;  %1637 = vmatpush3.bf16.msra.mxu1 %v1676_v15 }
  0x27   : > { %1525 = vmatprep.subr.bf16.mxu0 %v1677_v16  ;;  %1630 = vmatprep.subr.bf16.mxu1 %v1677_v16 }
  0x2a   : > { %1526 = vmatpush3.bf16.msra.mxu0 %v1678_v17  ;;  %1638 = vmatpush3.bf16.msra.mxu1 %v1678_v17 }
  0x2d   : > { %812 = vmatmul.mubr.bf16.vlgmr.msra.gmra.mxu0 %v1679_v18  ;;  %876 = vmatmul.mubr.bf16.vlgmr.msra.gmra.mxu1 %v1682_v19 }
  0x2e   : > { %819 = vmatprep.mubr.bf16.mxu0 %v1685_v20  ;;  %883 = vmatprep.mubr.bf16.mxu1 %v1687_v21 }
  0x35   : > { %820 = vmatmul.mubr.bf16.gmra.mxu0 %v1689_v22  ;;  %884 = vmatmul.mubr.bf16.gmra.mxu1 %v1690_v23 }
  0x36   : > { %827 = vmatprep.mubr.bf16.mxu0 %v1691_v24  ;;  %891 = vmatprep.mubr.bf16.mxu1 %v1693_v25 }
  0x3d   : > { %828 = vmatmul.mubr.bf16.gmra.mxu0 %v1695_v26  ;;  %892 = vmatmul.mubr.bf16.gmra.mxu1 %v1696_v27 }
  0x3e   : > { %835 = vmatprep.mubr.bf16.mxu0 %v1697_v28  ;;  %899 = vmatprep.mubr.bf16.mxu1 %v1699_v29 }
  0x45   : > { %836 = vmatmul.mubr.bf16.gmra.mxu0 %v1701_v30  ;;  %900 = vmatmul.mubr.bf16.gmra.mxu1 %v1702_v31 }
  0x46   : > { %843 = vmatprep.mubr.bf16.mxu0 %v1703_v32  ;;  %907 = vmatprep.mubr.bf16.mxu1 %v1705_v33 }
  0x4d   : > { %844 = vmatmul.mubr.bf16.gmra.mxu0 %v1707_v34  ;;  %908 = vmatmul.mubr.bf16.gmra.mxu1 %v1708_v35 }
  0x4e   : > { %851 = vmatprep.mubr.bf16.mxu0 %v1709_v36  ;;  %915 = vmatprep.mubr.bf16.mxu1 %v1711_v37 }
  0x55   : > { %852 = vmatmul.mubr.bf16.gmra.mxu0 %v1713_v38  ;;  %916 = vmatmul.mubr.bf16.gmra.mxu1 %v1714_v39 }
  0x56   : > { %859 = vmatprep.mubr.bf16.mxu0 %v1715_v40  ;;  %923 = vmatprep.mubr.bf16.mxu1 %v1717_v41 }
  0x5d   : > { %860 = vmatmul.mubr.bf16.gmra.mxu0 %v1719_v42  ;;  %924 = vmatmul.mubr.bf16.gmra.mxu1 %v1720_v43 }
  0x5e   : > { %867 = vmatprep.mubr.bf16.mxu0 %v1721_v44  ;;  %931 = vmatprep.mubr.bf16.mxu1 %v1723_v45 }
  0x65   : > { %868 = vmatmul.mubr.bf16.gmra.mxu0 %v1725_v46  ;;  %932 = vmatmul.mubr.bf16.gmra.mxu1 %v1726_v47 }
  0xed   : > { %v1527_v48 = vpop.f32.mrf.mxu0  ;;  %v1575_v49 = vpop.f32.mrf.mxu1 }
  0xef   : > { %v1528_v50 = vpop.f32.mrf.mxu0  ;;  %v1576_v52 = vpop.f32.mrf.mxu1 }
  0xf0   : > { %v1529_v53 = vadd.f32 %v1528_v50, %v1527_v48  ;;  %v1577_v54 = vadd.f32 %v1576_v52, %v1575_v49 }
  0xf1   : > { %v1530_v56 = vpop.f32.mrf.mxu0  ;;  %v1578_v57 = vpop.f32.mrf.mxu1 }
  0xf2   : > { %v1046_v58 = vadd.f32 %v1529_v53, %v1897_v51  ;;  %v1062_v59 = vadd.f32 %v1577_v54, %v1897_v51 }
  0xf3   : > { %v1531_v61 = vpop.f32.mrf.mxu0  ;;  %v1579_v62 = vpop.f32.mrf.mxu1 }
  0xf4   : > { %v1085_v63 = vmul.f32 %v1902_v55, %v1046_v58  ;;  %v1101_v0 = vmul.f32 %v1902_v55, %v1062_v59  ;;  %v1532_v1 = vadd.f32 %v1531_v61, %v1530_v56  ;;  %v1580_v2 = vadd.f32 %v1579_v62, %v1578_v57 }
  0xf5   : > { %v1533_v4 = vpop.f32.mrf.mxu0  ;;  %v1581_v5 = vpop.f32.mrf.mxu1 }
  0xf6   : > { %v1124_v6 = vadd.f32 %v1909_v60, %v1085_v63  ;;  %v1140_v7 = vadd.f32 %v1909_v60, %v1101_v0  ;;  %v1047_v8 = vadd.f32 %v1532_v1, %v1897_v51  ;;  %v1063_v9 = vadd.f32 %v1580_v2, %v1897_v51 }
  0xf7   : > { %v1534_v10 = vpop.f32.mrf.mxu0  ;;  %v1582_v11 = vpop.f32.mrf.mxu1 }
  0xf8   : > { %vm1156_vm0 = vcmp.gt.f32.partialorder %v1124_v6, 0.0  ;;  %v1195_v12 = vmul.f32 %v1916_v3, %v1124_v6  ;;  %vm1172_vm1 = vcmp.gt.f32.partialorder %v1140_v7, 0.0  ;;  %v1211_v13 = vmul.f32 %v1916_v3, %v1140_v7 }
  0xf9   : > { %v1086_v14 = vmul.f32 %v1902_v55, %v1047_v8  ;;  %v1102_v15 = vmul.f32 %v1902_v55, %v1063_v9  ;;  %v1535_v16 = vadd.f32 %v1534_v10, %v1533_v4  ;;  %v1583_v17 = vadd.f32 %v1582_v11, %v1581_v5  ;;  %v1536_v18 = vpop.f32.mrf.mxu0  ;;  %v1584_v19 = vpop.f32.mrf.mxu1 }
  0xfa   : > { %v1227_v20 = vsel %vm1156_vm0, %v1124_v6, %v1195_v12  ;;  %v1243_v21 = vsel %vm1172_vm1, %v1140_v7, %v1211_v13 }
  0xfb   : > { %1259 = vst [vmem:[%s1927_s9] sm:$0xff] %v1227_v20  ;;  %1275 = vst [vmem:[%s1927_s9 + $0x80] sm:$0xff] %v1243_v21  ;;  %v1125_v22 = vadd.f32 %v1909_v60, %v1086_v14  ;;  %v1141_v23 = vadd.f32 %v1909_v60, %v1102_v15  ;;  %v1048_v24 = vadd.f32 %v1535_v16, %v1897_v51  ;;  %v1537_v26 = vpop.f32.mrf.mxu0  ;;  %v1585_v27 = vpop.f32.mrf.mxu1 }
  0xfc   : > { %v1064_v25 = vadd.f32 %v1583_v17, %v1897_v51  ;;  %v1538_v28 = vadd.f32 %v1537_v26, %v1536_v18  ;;  %v1586_v29 = vadd.f32 %v1585_v27, %v1584_v19 }
  0xfd   : > { %vm1157_vm2 = vcmp.gt.f32.partialorder %v1125_v22, 0.0  ;;  %v1196_v30 = vmul.f32 %v1916_v3, %v1125_v22  ;;  %vm1173_vm3 = vcmp.gt.f32.partialorder %v1141_v23, 0.0  ;;  %v1212_v31 = vmul.f32 %v1916_v3, %v1141_v23  ;;  %v1539_v32 = vpop.f32.mrf.mxu0  ;;  %v1587_v33 = vpop.f32.mrf.mxu1 }
  0xfe   : > { %v1087_v34 = vmul.f32 %v1902_v55, %v1048_v24  ;;  %v1103_v35 = vmul.f32 %v1902_v55, %v1064_v25  ;;  %v1049_v36 = vadd.f32 %v1538_v28, %v1897_v51  ;;  %v1065_v37 = vadd.f32 %v1586_v29, %v1897_v51 }
  0xff   : > { %v1228_v38 = vsel %vm1157_vm2, %v1125_v22, %v1196_v30  ;;  %v1244_v39 = vsel %vm1173_vm3, %v1141_v23, %v1212_v31  ;;  %v1540_v40 = vpop.f32.mrf.mxu0  ;;  %v1588_v41 = vpop.f32.mrf.mxu1 }
 0x100   : > { %1260 = vst [vmem:[%s1927_s9 + $0x8] sm:$0xff] %v1228_v38  ;;  %1276 = vst [vmem:[%s1927_s9 + $0x88] sm:$0xff] %v1244_v39  ;;  %v1126_v42 = vadd.f32 %v1909_v60, %v1087_v34  ;;  %v1142_v43 = vadd.f32 %v1909_v60, %v1103_v35  ;;  %v1088_v44 = vmul.f32 %v1902_v55, %v1049_v36 }
 0x101   : > { %v1104_v45 = vmul.f32 %v1902_v55, %v1065_v37  ;;  %v1541_v46 = vadd.f32 %v1540_v40, %v1539_v32  ;;  %v1589_v47 = vadd.f32 %v1588_v41, %v1587_v33  ;;  %v1542_v48 = vpop.f32.mrf.mxu0  ;;  %v1590_v49 = vpop.f32.mrf.mxu1 }
 0x102   : > { %vm1158_vm4 = vcmp.gt.f32.partialorder %v1126_v42, 0.0  ;;  %v1197_v50 = vmul.f32 %v1916_v3, %v1126_v42  ;;  %vm1174_vm5 = vcmp.gt.f32.partialorder %v1142_v43, 0.0  ;;  %v1213_v52 = vmul.f32 %v1916_v3, %v1142_v43 }
 0x103   : > { %v1127_v53 = vadd.f32 %v1909_v60, %v1088_v44  ;;  %v1143_v54 = vadd.f32 %v1909_v60, %v1104_v45  ;;  %v1050_v56 = vadd.f32 %v1541_v46, %v1897_v51  ;;  %v1066_v57 = vadd.f32 %v1589_v47, %v1897_v51  ;;  %v1543_v58 = vpop.f32.mrf.mxu0  ;;  %v1591_v59 = vpop.f32.mrf.mxu1 }
 0x104   : > { %v1229_v61 = vsel %vm1158_vm4, %v1126_v42, %v1197_v50  ;;  %v1245_v62 = vsel %vm1174_vm5, %v1142_v43, %v1213_v52  ;;  %v1544_v63 = vadd.f32 %v1543_v58, %v1542_v48  ;;  %v1592_v0 = vadd.f32 %v1591_v59, %v1590_v49 }
 0x105   : > { %1261 = vst [vmem:[%s1927_s9 + $0x10] sm:$0xff] %v1229_v61  ;;  %1277 = vst [vmem:[%s1927_s9 + $0x90] sm:$0xff] %v1245_v62  ;;  %vm1159_vm6 = vcmp.gt.f32.partialorder %v1127_v53, 0.0  ;;  %v1198_v1 = vmul.f32 %v1916_v3, %v1127_v53  ;;  %vm1175_vm7 = vcmp.gt.f32.partialorder %v1143_v54, 0.0  ;;  %v1214_v2 = vmul.f32 %v1916_v3, %v1143_v54  ;;  %v1545_v4 = vpop.f32.mrf.mxu0  ;;  %v1593_v5 = vpop.f32.mrf.mxu1 }
 0x106   : > { %v1089_v6 = vmul.f32 %v1902_v55, %v1050_v56  ;;  %v1105_v7 = vmul.f32 %v1902_v55, %v1066_v57  ;;  %v1051_v8 = vadd.f32 %v1544_v63, %v1897_v51  ;;  %v1067_v9 = vadd.f32 %v1592_v0, %v1897_v51 }
 0x107   : > { %v1230_v10 = vsel %vm1159_vm6, %v1127_v53, %v1198_v1  ;;  %v1246_v11 = vsel %vm1175_vm7, %v1143_v54, %v1214_v2  ;;  %v1546_v12 = vpop.f32.mrf.mxu0  ;;  %v1594_v13 = vpop.f32.mrf.mxu1 }
 0x108   : > { %1262 = vst [vmem:[%s1927_s9 + $0x18] sm:$0xff] %v1230_v10  ;;  %1278 = vst [vmem:[%s1927_s9 + $0x98] sm:$0xff] %v1246_v11  ;;  %v1128_v14 = vadd.f32 %v1909_v60, %v1089_v6  ;;  %v1144_v15 = vadd.f32 %v1909_v60, %v1105_v7  ;;  %v1090_v16 = vmul.f32 %v1902_v55, %v1051_v8 }
 0x109   : > { %v1106_v17 = vmul.f32 %v1902_v55, %v1067_v9  ;;  %v1547_v18 = vadd.f32 %v1546_v12, %v1545_v4  ;;  %v1595_v19 = vadd.f32 %v1594_v13, %v1593_v5  ;;  %v1548_v20 = vpop.f32.mrf.mxu0  ;;  %v1596_v21 = vpop.f32.mrf.mxu1 }
 0x10a   : > { %vm1160_vm8 = vcmp.gt.f32.partialorder %v1128_v14, 0.0  ;;  %v1199_v22 = vmul.f32 %v1916_v3, %v1128_v14  ;;  %vm1176_vm9 = vcmp.gt.f32.partialorder %v1144_v15, 0.0  ;;  %v1215_v23 = vmul.f32 %v1916_v3, %v1144_v15 }
 0x10b   : > { %v1129_v24 = vadd.f32 %v1909_v60, %v1090_v16  ;;  %v1145_v25 = vadd.f32 %v1909_v60, %v1106_v17  ;;  %v1052_v26 = vadd.f32 %v1547_v18, %v1897_v51  ;;  %v1068_v27 = vadd.f32 %v1595_v19, %v1897_v51  ;;  %v1549_v28 = vpop.f32.mrf.mxu0  ;;  %v1597_v29 = vpop.f32.mrf.mxu1 }
 0x10c   : > { %v1231_v30 = vsel %vm1160_vm8, %v1128_v14, %v1199_v22  ;;  %v1247_v31 = vsel %vm1176_vm9, %v1144_v15, %v1215_v23  ;;  %v1550_v32 = vadd.f32 %v1549_v28, %v1548_v20  ;;  %v1598_v33 = vadd.f32 %v1597_v29, %v1596_v21 }
 0x10d   : > { %1263 = vst [vmem:[%s1927_s9 + $0x20] sm:$0xff] %v1231_v30  ;;  %1279 = vst [vmem:[%s1927_s9 + $0xa0] sm:$0xff] %v1247_v31  ;;  %vm1161_vm10 = vcmp.gt.f32.partialorder %v1129_v24, 0.0  ;;  %v1200_v34 = vmul.f32 %v1916_v3, %v1129_v24  ;;  %vm1177_vm11 = vcmp.gt.f32.partialorder %v1145_v25, 0.0  ;;  %v1216_v35 = vmul.f32 %v1916_v3, %v1145_v25  ;;  %v1551_v36 = vpop.f32.mrf.mxu0  ;;  %v1599_v37 = vpop.f32.mrf.mxu1 }
 0x10e   : > { %v1091_v38 = vmul.f32 %v1902_v55, %v1052_v26  ;;  %v1107_v39 = vmul.f32 %v1902_v55, %v1068_v27  ;;  %v1053_v40 = vadd.f32 %v1550_v32, %v1897_v51  ;;  %v1069_v41 = vadd.f32 %v1598_v33, %v1897_v51 }
 0x10f   : > { %v1232_v42 = vsel %vm1161_vm10, %v1129_v24, %v1200_v34  ;;  %v1248_v43 = vsel %vm1177_vm11, %v1145_v25, %v1216_v35  ;;  %v1552_v44 = vpop.f32.mrf.mxu0  ;;  %v1600_v45 = vpop.f32.mrf.mxu1 }
 0x110   : > { %1264 = vst [vmem:[%s1927_s9 + $0x28] sm:$0xff] %v1232_v42  ;;  %1280 = vst [vmem:[%s1927_s9 + $0xa8] sm:$0xff] %v1248_v43  ;;  %v1130_v46 = vadd.f32 %v1909_v60, %v1091_v38  ;;  %v1146_v47 = vadd.f32 %v1909_v60, %v1107_v39  ;;  %v1092_v48 = vmul.f32 %v1902_v55, %v1053_v40 }
 0x111   : > { %v1108_v49 = vmul.f32 %v1902_v55, %v1069_v41  ;;  %v1553_v50 = vadd.f32 %v1552_v44, %v1551_v36  ;;  %v1601_v52 = vadd.f32 %v1600_v45, %v1599_v37  ;;  %v1554_v53 = vpop.f32.mrf.mxu0  ;;  %v1602_v54 = vpop.f32.mrf.mxu1 }
 0x112   : > { %vm1162_vm12 = vcmp.gt.f32.partialorder %v1130_v46, 0.0  ;;  %v1201_v56 = vmul.f32 %v1916_v3, %v1130_v46  ;;  %vm1178_vm13 = vcmp.gt.f32.partialorder %v1146_v47, 0.0  ;;  %v1217_v57 = vmul.f32 %v1916_v3, %v1146_v47 }
 0x113   : > { %v1131_v58 = vadd.f32 %v1909_v60, %v1092_v48  ;;  %v1147_v59 = vadd.f32 %v1909_v60, %v1108_v49  ;;  %v1054_v61 = vadd.f32 %v1553_v50, %v1897_v51  ;;  %v1070_v62 = vadd.f32 %v1601_v52, %v1897_v51  ;;  %v1555_v63 = vpop.f32.mrf.mxu0  ;;  %v1603_v0 = vpop.f32.mrf.mxu1 }
 0x114   : > { %v1233_v1 = vsel %vm1162_vm12, %v1130_v46, %v1201_v56  ;;  %v1249_v2 = vsel %vm1178_vm13, %v1146_v47, %v1217_v57  ;;  %v1556_v4 = vadd.f32 %v1555_v63, %v1554_v53  ;;  %v1604_v5 = vadd.f32 %v1603_v0, %v1602_v54 }
 0x115   : > { %1265 = vst [vmem:[%s1927_s9 + $0x30] sm:$0xff] %v1233_v1  ;;  %1281 = vst [vmem:[%s1927_s9 + $0xb0] sm:$0xff] %v1249_v2  ;;  %vm1163_vm14 = vcmp.gt.f32.partialorder %v1131_v58, 0.0  ;;  %v1202_v6 = vmul.f32 %v1916_v3, %v1131_v58  ;;  %vm1179_vm15 = vcmp.gt.f32.partialorder %v1147_v59, 0.0  ;;  %v1218_v7 = vmul.f32 %v1916_v3, %v1147_v59  ;;  %v1557_v8 = vpop.f32.mrf.mxu0  ;;  %v1605_v9 = vpop.f32.mrf.mxu1 }
 0x116   : > { %v1093_v10 = vmul.f32 %v1902_v55, %v1054_v61  ;;  %v1109_v11 = vmul.f32 %v1902_v55, %v1070_v62  ;;  %v1055_v12 = vadd.f32 %v1556_v4, %v1897_v51  ;;  %v1071_v13 = vadd.f32 %v1604_v5, %v1897_v51 }
 0x117   : > { %v1234_v14 = vsel %vm1163_vm14, %v1131_v58, %v1202_v6  ;;  %v1250_v15 = vsel %vm1179_vm15, %v1147_v59, %v1218_v7  ;;  %v1558_v16 = vpop.f32.mrf.mxu0  ;;  %v1606_v17 = vpop.f32.mrf.mxu1 }
 0x118   : > { %1266 = vst [vmem:[%s1927_s9 + $0x38] sm:$0xff] %v1234_v14  ;;  %1282 = vst [vmem:[%s1927_s9 + $0xb8] sm:$0xff] %v1250_v15  ;;  %v1132_v18 = vadd.f32 %v1909_v60, %v1093_v10  ;;  %v1148_v19 = vadd.f32 %v1909_v60, %v1109_v11  ;;  %v1094_v20 = vmul.f32 %v1902_v55, %v1055_v12 }
 0x119   : > { %v1110_v21 = vmul.f32 %v1902_v55, %v1071_v13  ;;  %v1559_v22 = vadd.f32 %v1558_v16, %v1557_v8  ;;  %v1607_v23 = vadd.f32 %v1606_v17, %v1605_v9  ;;  %v1560_v24 = vpop.f32.mrf.mxu0  ;;  %v1608_v25 = vpop.f32.mrf.mxu1 }
 0x11a   : > { %vm1164_vm0 = vcmp.gt.f32.partialorder %v1132_v18, 0.0  ;;  %v1203_v26 = vmul.f32 %v1916_v3, %v1132_v18  ;;  %vm1180_vm1 = vcmp.gt.f32.partialorder %v1148_v19, 0.0  ;;  %v1219_v27 = vmul.f32 %v1916_v3, %v1148_v19 }
 0x11b   : > { %v1133_v28 = vadd.f32 %v1909_v60, %v1094_v20  ;;  %v1149_v29 = vadd.f32 %v1909_v60, %v1110_v21  ;;  %v1056_v30 = vadd.f32 %v1559_v22, %v1897_v51  ;;  %v1072_v31 = vadd.f32 %v1607_v23, %v1897_v51  ;;  %v1561_v32 = vpop.f32.mrf.mxu0  ;;  %v1609_v33 = vpop.f32.mrf.mxu1 }
 0x11c   : > { %v1235_v34 = vsel %vm1164_vm0, %v1132_v18, %v1203_v26  ;;  %v1251_v35 = vsel %vm1180_vm1, %v1148_v19, %v1219_v27  ;;  %v1562_v36 = vadd.f32 %v1561_v32, %v1560_v24  ;;  %v1610_v37 = vadd.f32 %v1609_v33, %v1608_v25 }
 0x11d   : > { %1267 = vst [vmem:[%s1927_s9 + $0x40] sm:$0xff] %v1235_v34  ;;  %1283 = vst [vmem:[%s1927_s9 + $0xc0] sm:$0xff] %v1251_v35  ;;  %vm1165_vm2 = vcmp.gt.f32.partialorder %v1133_v28, 0.0  ;;  %v1204_v38 = vmul.f32 %v1916_v3, %v1133_v28  ;;  %vm1181_vm3 = vcmp.gt.f32.partialorder %v1149_v29, 0.0  ;;  %v1220_v39 = vmul.f32 %v1916_v3, %v1149_v29  ;;  %v1563_v40 = vpop.f32.mrf.mxu0  ;;  %v1611_v41 = vpop.f32.mrf.mxu1 }
 0x11e   : > { %v1095_v42 = vmul.f32 %v1902_v55, %v1056_v30  ;;  %v1111_v43 = vmul.f32 %v1902_v55, %v1072_v31  ;;  %v1057_v44 = vadd.f32 %v1562_v36, %v1897_v51  ;;  %v1073_v45 = vadd.f32 %v1610_v37, %v1897_v51 }
 0x11f   : > { %v1236_v46 = vsel %vm1165_vm2, %v1133_v28, %v1204_v38  ;;  %v1252_v47 = vsel %vm1181_vm3, %v1149_v29, %v1220_v39  ;;  %v1564_v48 = vpop.f32.mrf.mxu0  ;;  %v1612_v49 = vpop.f32.mrf.mxu1 }
 0x120   : > { %1268 = vst [vmem:[%s1927_s9 + $0x48] sm:$0xff] %v1236_v46  ;;  %1284 = vst [vmem:[%s1927_s9 + $0xc8] sm:$0xff] %v1252_v47  ;;  %v1134_v50 = vadd.f32 %v1909_v60, %v1095_v42  ;;  %v1150_v52 = vadd.f32 %v1909_v60, %v1111_v43  ;;  %v1096_v53 = vmul.f32 %v1902_v55, %v1057_v44 }
 0x121   : > { %v1112_v54 = vmul.f32 %v1902_v55, %v1073_v45  ;;  %v1565_v56 = vadd.f32 %v1564_v48, %v1563_v40  ;;  %v1613_v57 = vadd.f32 %v1612_v49, %v1611_v41  ;;  %v1566_v58 = vpop.f32.mrf.mxu0  ;;  %v1614_v59 = vpop.f32.mrf.mxu1 }
 0x122   : > { %vm1166_vm4 = vcmp.gt.f32.partialorder %v1134_v50, 0.0  ;;  %v1205_v61 = vmul.f32 %v1916_v3, %v1134_v50  ;;  %vm1182_vm5 = vcmp.gt.f32.partialorder %v1150_v52, 0.0  ;;  %v1221_v62 = vmul.f32 %v1916_v3, %v1150_v52 }
 0x123   : > { %v1135_v63 = vadd.f32 %v1909_v60, %v1096_v53  ;;  %v1151_v0 = vadd.f32 %v1909_v60, %v1112_v54  ;;  %v1058_v1 = vadd.f32 %v1565_v56, %v1897_v51  ;;  %v1074_v2 = vadd.f32 %v1613_v57, %v1897_v51  ;;  %v1567_v4 = vpop.f32.mrf.mxu0  ;;  %v1615_v5 = vpop.f32.mrf.mxu1 }
 0x124   : > { %v1237_v6 = vsel %vm1166_vm4, %v1134_v50, %v1205_v61  ;;  %v1253_v7 = vsel %vm1182_vm5, %v1150_v52, %v1221_v62  ;;  %v1568_v8 = vadd.f32 %v1567_v4, %v1566_v58  ;;  %v1616_v9 = vadd.f32 %v1615_v5, %v1614_v59 }
 0x125   : > { %1269 = vst [vmem:[%s1927_s9 + $0x50] sm:$0xff] %v1237_v6  ;;  %1285 = vst [vmem:[%s1927_s9 + $0xd0] sm:$0xff] %v1253_v7  ;;  %vm1167_vm6 = vcmp.gt.f32.partialorder %v1135_v63, 0.0  ;;  %v1206_v10 = vmul.f32 %v1916_v3, %v1135_v63  ;;  %vm1183_vm7 = vcmp.gt.f32.partialorder %v1151_v0, 0.0  ;;  %v1222_v11 = vmul.f32 %v1916_v3, %v1151_v0  ;;  %v1569_v12 = vpop.f32.mrf.mxu0  ;;  %v1617_v13 = vpop.f32.mrf.mxu1 }
 0x126   : > { %v1097_v14 = vmul.f32 %v1902_v55, %v1058_v1  ;;  %v1113_v15 = vmul.f32 %v1902_v55, %v1074_v2  ;;  %v1059_v16 = vadd.f32 %v1568_v8, %v1897_v51  ;;  %v1075_v17 = vadd.f32 %v1616_v9, %v1897_v51 }
 0x127   : > { %v1238_v18 = vsel %vm1167_vm6, %v1135_v63, %v1206_v10  ;;  %v1254_v19 = vsel %vm1183_vm7, %v1151_v0, %v1222_v11  ;;  %v1570_v20 = vpop.f32.mrf.mxu0  ;;  %v1618_v21 = vpop.f32.mrf.mxu1 }
 0x128   : > { %1270 = vst [vmem:[%s1927_s9 + $0x58] sm:$0xff] %v1238_v18  ;;  %1286 = vst [vmem:[%s1927_s9 + $0xd8] sm:$0xff] %v1254_v19  ;;  %v1136_v22 = vadd.f32 %v1909_v60, %v1097_v14  ;;  %v1152_v23 = vadd.f32 %v1909_v60, %v1113_v15  ;;  %v1098_v24 = vmul.f32 %v1902_v55, %v1059_v16 }
 0x129   : > { %v1114_v25 = vmul.f32 %v1902_v55, %v1075_v17  ;;  %v1571_v26 = vadd.f32 %v1570_v20, %v1569_v12  ;;  %v1619_v27 = vadd.f32 %v1618_v21, %v1617_v13  ;;  %v1572_v28 = vpop.f32.mrf.mxu0  ;;  %v1620_v29 = vpop.f32.mrf.mxu1 }
 0x12a   : > { %vm1168_vm8 = vcmp.gt.f32.partialorder %v1136_v22, 0.0  ;;  %v1207_v30 = vmul.f32 %v1916_v3, %v1136_v22  ;;  %vm1184_vm9 = vcmp.gt.f32.partialorder %v1152_v23, 0.0  ;;  %v1223_v31 = vmul.f32 %v1916_v3, %v1152_v23 }
 0x12b   : > { %v1137_v32 = vadd.f32 %v1909_v60, %v1098_v24  ;;  %v1153_v33 = vadd.f32 %v1909_v60, %v1114_v25  ;;  %v1060_v34 = vadd.f32 %v1571_v26, %v1897_v51  ;;  %v1076_v35 = vadd.f32 %v1619_v27, %v1897_v51  ;;  %v1573_v36 = vpop.f32.mrf.mxu0  ;;  %v1621_v37 = vpop.f32.mrf.mxu1 }
 0x12c   : > { %v1239_v38 = vsel %vm1168_vm8, %v1136_v22, %v1207_v30  ;;  %v1255_v39 = vsel %vm1184_vm9, %v1152_v23, %v1223_v31  ;;  %v1574_v40 = vadd.f32 %v1573_v36, %v1572_v28  ;;  %v1622_v41 = vadd.f32 %v1621_v37, %v1620_v29 }
 0x12d   : > { %1271 = vst [vmem:[%s1927_s9 + $0x60] sm:$0xff] %v1239_v38  ;;  %1287 = vst [vmem:[%s1927_s9 + $0xe0] sm:$0xff] %v1255_v39  ;;  %vm1169_vm10 = vcmp.gt.f32.partialorder %v1137_v32, 0.0  ;;  %v1208_v42 = vmul.f32 %v1916_v3, %v1137_v32  ;;  %vm1185_vm11 = vcmp.gt.f32.partialorder %v1153_v33, 0.0  ;;  %v1224_v43 = vmul.f32 %v1916_v3, %v1153_v33 }
 0x12e   : > { %v1099_v44 = vmul.f32 %v1902_v55, %v1060_v34  ;;  %v1115_v45 = vmul.f32 %v1902_v55, %v1076_v35  ;;  %v1061_v46 = vadd.f32 %v1574_v40, %v1897_v51  ;;  %v1077_v47 = vadd.f32 %v1622_v41, %v1897_v51 }
 0x12f   : > { %v1240_v48 = vsel %vm1169_vm10, %v1137_v32, %v1208_v42  ;;  %v1256_v49 = vsel %vm1185_vm11, %v1153_v33, %v1224_v43 }
 0x130   : > { %1272 = vst [vmem:[%s1927_s9 + $0x68] sm:$0xff] %v1240_v48  ;;  %1288 = vst [vmem:[%s1927_s9 + $0xe8] sm:$0xff] %v1256_v49  ;;  %v1138_v50 = vadd.f32 %v1909_v60, %v1099_v44  ;;  %v1154_v52 = vadd.f32 %v1909_v60, %v1115_v45  ;;  %v1100_v53 = vmul.f32 %v1902_v55, %v1061_v46 }
 0x131   : > { %v1116_v54 = vmul.f32 %v1902_v55, %v1077_v47 }
 0x132   : > { %vm1170_vm12 = vcmp.gt.f32.partialorder %v1138_v50, 0.0  ;;  %v1209_v56 = vmul.f32 %v1916_v3, %v1138_v50  ;;  %vm1186_vm13 = vcmp.gt.f32.partialorder %v1154_v52, 0.0  ;;  %v1225_v51 = vmul.f32 %v1916_v3, %v1154_v52 }
 0x133   : > { %v1139_v57 = vadd.f32 %v1909_v60, %v1100_v53  ;;  %v1155_v58 = vadd.f32 %v1909_v60, %v1116_v54 }
 0x134   : > { %v1241_v59 = vsel %vm1170_vm12, %v1138_v50, %v1209_v56  ;;  %v1257_v61 = vsel %vm1186_vm13, %v1154_v52, %v1225_v51 }
 0x135   : > { %1273 = vst [vmem:[%s1927_s9 + $0x70] sm:$0xff] %v1241_v59  ;;  %1289 = vst [vmem:[%s1927_s9 + $0xf0] sm:$0xff] %v1257_v61  ;;  %vm1171_vm14 = vcmp.gt.f32.partialorder %v1139_v57, 0.0  ;;  %v1210_v62 = vmul.f32 %v1916_v3, %v1139_v57  ;;  %vm1187_vm15 = vcmp.gt.f32.partialorder %v1155_v58, 0.0  ;;  %v1226_v55 = vmul.f32 %v1916_v3, %v1155_v58 }
 0x137   : > { %v1242_v63 = vsel %vm1171_vm14, %v1139_v57, %v1210_v62  ;;  %v1258_v0 = vsel %vm1187_vm15, %v1155_v58, %v1226_v55 }
 0x138   : > { %1274 = vst [vmem:[%s1927_s9 + $0x78] sm:$0xff] %v1242_v63  ;;  %1290 = vst [vmem:[%s1927_s9 + $0xf8] sm:$0xff] %v1258_v0 }
 0x139 PF: > { %s16_s23 = sadd.s32 1, %s1749_s23   ;;  %s2097_s21 = smov %s1745_s22 }
 0x13a   : > { %p13_p5 = scmp.ge.s32.totalorder %s16_s23, 4   ;;  %s2098_s22 = smov %s2100_s24 }
 0x13c   :  { %15 = sbr.rel (!%p13_p5) target bundleno = 2 (0x2), region = 97 }

// kernel: a_call__.15
= control target key start
LH: loop header
LB: loop body
LE: loop exit
PB: predicated region body
PF: predicated region fallthrough
CT: control target
= control target key end

     0   :  { %s2154_s21 = smov 0   ;;  %s2156_s22 = smov 0   ;;  %s2500_s0 = inlined_call_operand.vmem [shape: bf16[512,384], index: 0, kind: input, shape index: {}]   ;;  %s2501_s1 = inlined_call_operand.vmem [shape: bf16[384,128], index: 1, kind: input, shape index: {}]   ;;  %s2502_s2 = inlined_call_operand.vmem [shape: f32[1,128], index: 2, kind: input, shape index: {}]   ;;  %s2503_s3 = inlined_call_operand.vmem [shape: f32[1,128], index: 3, kind: input, shape index: {}]   ;;  %s2504_s4 = inlined_call_operand.vmem [shape: f32[1,128], index: 4, kind: input, shape index: {}, may-alias: {4,5}]   ;;  %s2505_s5 = inlined_call_operand.vmem [shape: f32[1,128], index: 5, kind: input, shape index: {}, may-alias: {4,5}]   ;;  %s2506_s6 = inlined_call_operand.vmem [shape: f32[512,128], index: 6, kind: output, shape index: {}]  }
   0x1   :  { %s2158_s23 = smov 0  }
   0x2 LB: > { %s35_s5 = sadd.s32 1, %s2113_s22  ;;  %p1700_p0 = scmp.ge.s32.totalorder %s2117_s23, 1  ;;  %s2117_s23 = sphi %s2158_s23, %s16_s23   ;;  %s2113_s22 = sphi %s2156_s22, %s2508_s22   ;;  %s2109_s21 = sphi %s2154_s21, %s2507_s21  }
   0x3   : > { %p37_p1 = scmp.ge.s32.totalorder %s35_s5, 2  ;;  %p290_p2 = scmp.lt.s32.totalorder %s2117_s23, 3 }
   0x5   : > { %s2510_s5 = smov (%p37_p1, %s35_s5), 0  ;;  %p291_p3 = pnand %p1700_p0, %p290_p2 }
   0x6   : > { %s1701_s26 = sshll.u32 (!%p291_p3), %s2109_s21, 5 }
   0x7   : > { %294 = sbr.rel (%p291_p3) target bundleno = 343 (0x157), region = 44  ;;  %p350_p4 = scmp.lt.s32.totalorder (!%p291_p3), %s1701_s26, 63 }
   0xc   : > { %v2007_v0 = vld [vmem:[%s2501_s1 + $0x78] sm:$0xff]   ;;  %v2009_v2 = vld [vmem:[%s2501_s1 + $0x70] sm:$0xff]   ;;  %v2011_v4 = vld [vmem:[%s2501_s1 + $0x68] sm:$0xff]   ;;  %s2512_s26 = smov (!%p350_p4, %s1701_s26), 63 }
   0xd   : > { %v2008_v1 = vld [vmem:[%s2501_s1 + $0x38] sm:$0xff]   ;;  %1782 = vmatprep.subr.bf16.mxu0 %v2007_v0  ;;  %1966 = vmatprep.subr.bf16.mxu1 %v2007_v0  ;;  %v2010_v3 = vld [vmem:[%s2501_s1 + $0x30] sm:$0xff]   ;;  %v2012_v5 = vld [vmem:[%s2501_s1 + $0x28] sm:$0xff]   ;;  %s1982_s15 = smul.u32 12, %s2512_s26 }
   0xe   : > { %1783 = vmatpush3.bf16.msra.mxu0 %v2008_v1  ;;  %1974 = vmatpush3.bf16.msra.mxu1 %v2008_v1  ;;  %v2013_v6 = vld [vmem:[%s2501_s1 + $0x60] sm:$0xff]   ;;  %v2015_v8 = vld [vmem:[%s2501_s1 + $0x58] sm:$0xff]   ;;  %v2017_v10 = vld [vmem:[%s2501_s1 + $0x50] sm:$0xff]  }
   0xf   : > { %1784 = vmatprep.subr.bf16.mxu0 %v2009_v2  ;;  %1967 = vmatprep.subr.bf16.mxu1 %v2009_v2  ;;  %v2014_v7 = vld [vmem:[%s2501_s1 + $0x20] sm:$0xff]   ;;  %s2205_s24 = scalar_lea.vmem %s2500_s0, %s1982_s15  ;;  %v2016_v9 = vld [vmem:[%s2501_s1 + $0x18] sm:$0xff]   ;;  %v2018_v13 = vld [vmem:[%s2501_s1 + $0x10] sm:$0xff]   ;;  %s1704_s15 = sshll.u32 %s2512_s26, 3 }
  0x10   : > { %v2025_v11 = vld [vmem:[%s2205_s24 + $0x4] ss:$12 sps:$4 sm:$0xff]   ;;  %v2019_v14 = vld [vmem:[%s2501_s1 + $0x48] sm:$0xff]   ;;  %v2029_v18 = vld [vmem:[%s2501_s1 + $0xb8] sm:$0xff]   ;;  %s2346_s26 = scalar_lea.vmem %s2506_s6, %s1704_s15 }
  0x11   : > { %v2028_v12 = vld [vmem:[%s2205_s24 + $0x124] ss:$12 sps:$4 sm:$0xff]   ;;  %1003 = vmatprep.mubr.bf16.mxu0 %v2025_v11  ;;  %v2020_v15 = vld [vmem:[%s2501_s1 + $0x8] sm:$0xff]   ;;  %v2039_v28 = vld [vmem:[%s2205_s24 + $0x34] ss:$12 sps:$4 sm:$0xff]  }
  0x12   : > { %1785 = vmatpush3.bf16.msra.mxu0 %v2010_v3  ;;  %1975 = vmatpush3.bf16.msra.mxu1 %v2010_v3  ;;  %v2021_v16 = vld [vmem:[%s2501_s1 + $0x40] sm:$0xff]   ;;  %v2031_v21 = vld [vmem:[%s2205_s24 + $0x1c] ss:$12 sps:$4 sm:$0xff]   ;;  %v2030_v22 = vld [vmem:[%s2501_s1 + $0xb0] sm:$0xff]  }
  0x13   : > { %1786 = vmatprep.subr.bf16.mxu0 %v2011_v4  ;;  %1968 = vmatprep.subr.bf16.mxu1 %v2011_v4  ;;  %v2022_v17 = vld [vmem:[%s2501_s1] sm:$0xff]   ;;  %v2033_v23 = vld [vmem:[%s2205_s24 + $0x13c] ss:$12 sps:$4 sm:$0xff]   ;;  %v2046_v33 = vld [vmem:[%s2501_s1 + $0x90] sm:$0xff]  }
  0x14   : > { %1099 = vmatprep.mubr.bf16.mxu1 %v2028_v12  ;;  %v2023_v19 = vld [vmem:[%s2205_s24] ss:$12 sps:$4 sm:$0xff]   ;;  %v2035_v24 = vld [vmem:[%s2205_s24 + $0x18] ss:$12 sps:$4 sm:$0xff]   ;;  %v2043_v31 = vld [vmem:[%s2205_s24 + $0x30] ss:$12 sps:$4 sm:$0xff]  }
  0x15   : > { %v2026_v20 = vld [vmem:[%s2205_s24 + $0x120] ss:$12 sps:$4 sm:$0xff]   ;;  %v2036_v26 = vld [vmem:[%s2205_s24 + $0x138] ss:$12 sps:$4 sm:$0xff]   ;;  %v2044_v32 = vld [vmem:[%s2205_s24 + $0x150] ss:$12 sps:$4 sm:$0xff]  }
  0x16   : > { %1787 = vmatpush3.bf16.msra.mxu0 %v2012_v5  ;;  %1976 = vmatpush3.bf16.msra.mxu1 %v2012_v5  ;;  %v2037_v25 = vld [vmem:[%s2501_s1 + $0xa8] sm:$0xff]   ;;  %v2038_v27 = vld [vmem:[%s2501_s1 + $0xa0] sm:$0xff]   ;;  %v2045_v30 = vld [vmem:[%s2501_s1 + $0x98] sm:$0xff]  }
  0x17   : > { %1788 = vmatprep.subr.bf16.mxu0 %v2013_v6  ;;  %1969 = vmatprep.subr.bf16.mxu1 %v2013_v6  ;;  %v2041_v29 = vld [vmem:[%s2205_s24 + $0x154] ss:$12 sps:$4 sm:$0xff]   ;;  %v2047_v34 = vld [vmem:[%s2205_s24 + $0x4c] ss:$12 sps:$4 sm:$0xff]   ;;  %v2055_v39 = vld [vmem:[%s2205_s24 + $0x64] ss:$12 sps:$4 sm:$0xff]  }
  0x18   : > { %v2049_v35 = vld [vmem:[%s2205_s24 + $0x16c] ss:$12 sps:$4 sm:$0xff]   ;;  %v2051_v37 = vld [vmem:[%s2205_s24 + $0x48] ss:$12 sps:$4 sm:$0xff]   ;;  %v2054_v40 = vld [vmem:[%s2501_s1 + $0x80] sm:$0xff]  }
  0x19   : > { %v2053_v36 = vld [vmem:[%s2501_s1 + $0x88] sm:$0xff]   ;;  %v2062_v45 = vld [vmem:[%s2205_s24 + $0x38] ss:$12 sps:$4 sm:$0xff]   ;;  %v2064_v47 = vld [vmem:[%s2205_s24 + $0x50] ss:$12 sps:$4 sm:$0xff]  }
  0x1a   : > { %1789 = vmatpush3.bf16.msra.mxu0 %v2014_v7  ;;  %1977 = vmatpush3.bf16.msra.mxu1 %v2014_v7  ;;  %v2052_v38 = vld [vmem:[%s2205_s24 + $0x168] ss:$12 sps:$4 sm:$0xff]   ;;  %v2058_v42 = vld [vmem:[%s2205_s24 + $0x60] ss:$12 sps:$4 sm:$0xff]   ;;  %v2063_v46 = vld [vmem:[%s2205_s24 + $0x78] ss:$12 sps:$4 sm:$0xff]  }
  0x1b   : > { %1790 = vmatprep.subr.bf16.mxu0 %v2015_v8  ;;  %1970 = vmatprep.subr.bf16.mxu1 %v2015_v8  ;;  %v2057_v41 = vld [vmem:[%s2205_s24 + $0x8] ss:$12 sps:$4 sm:$0xff]   ;;  %v2059_v43 = vld [vmem:[%s2205_s24 + $0x20] ss:$12 sps:$4 sm:$0xff]   ;;  %v2068_v50 = vld [vmem:[%s2205_s24 + $0x90] ss:$12 sps:$4 sm:$0xff]  }
  0x1c   : > { %v2060_v44 = vld [vmem:[%s2205_s24 + $0x7c] ss:$12 sps:$4 sm:$0xff]   ;;  %v2065_v48 = vld [vmem:[%s2205_s24 + $0x94] ss:$12 sps:$4 sm:$0xff]   ;;  %v2070_v52 = vld [vmem:[%s2205_s24 + $0xac] ss:$12 sps:$4 sm:$0xff]  }
  0x1d   : > { %v2067_v49 = vld [vmem:[%s2205_s24 + $0x68] ss:$12 sps:$4 sm:$0xff]   ;;  %v2069_v51 = vld [vmem:[%s2205_s24 + $0x80] ss:$12 sps:$4 sm:$0xff]   ;;  %v2072_v53 = vld [vmem:[%s2205_s24 + $0x98] ss:$12 sps:$4 sm:$0xff]  }
  0x1e   : > { %1791 = vmatpush3.bf16.msra.mxu0 %v2016_v9  ;;  %1978 = vmatpush3.bf16.msra.mxu1 %v2016_v9  ;;  %v2073_v54 = vld [vmem:[%s2205_s24 + $0xa8] ss:$12 sps:$4 sm:$0xff]   ;;  %v2074_v55 = vld [vmem:[%s2205_s24 + $0xb0] ss:$12 sps:$4 sm:$0xff]   ;;  %v2078_v58 = vld [vmem:[%s2205_s24 + $0xc0] ss:$12 sps:$4 sm:$0xff]  }
  0x1f   : > { %1792 = vmatprep.subr.bf16.mxu0 %v2017_v10  ;;  %1971 = vmatprep.subr.bf16.mxu1 %v2017_v10  ;;  %v2075_v56 = vld [vmem:[%s2205_s24 + $0xc4] ss:$12 sps:$4 sm:$0xff]   ;;  %v2077_v57 = vld [vmem:[%s2205_s24 + $0xc8] ss:$12 sps:$4 sm:$0xff]   ;;  %v2079_v59 = vld [vmem:[%s2205_s24 + $0xe0] ss:$12 sps:$4 sm:$0xff]  }
  0x20   : > { %v2080_v60 = vld [vmem:[%s2205_s24 + $0xdc] ss:$12 sps:$4 sm:$0xff]   ;;  %v2082_v61 = vld [vmem:[%s2205_s24 + $0xf8] ss:$12 sps:$4 sm:$0xff]   ;;  %v2085_v0 = vld [vmem:[%s2205_s24 + $0xf4] ss:$12 sps:$4 sm:$0xff]  }
  0x21   : > { %v2083_v62 = vld [vmem:[%s2205_s24 + $0xd8] ss:$12 sps:$4 sm:$0xff]   ;;  %v2084_v63 = vld [vmem:[%s2205_s24 + $0x110] ss:$12 sps:$4 sm:$0xff]   ;;  %v2087_v1 = vld [vmem:[%s2205_s24 + $0x128] ss:$12 sps:$4 sm:$0xff]  }
  0x22   : > { %1793 = vmatpush3.bf16.msra.mxu0 %v2018_v13  ;;  %1979 = vmatpush3.bf16.msra.mxu1 %v2018_v13  ;;  %v2088_v2 = vld [vmem:[%s2205_s24 + $0xf0] ss:$12 sps:$4 sm:$0xff]   ;;  %v2089_v3 = vld [vmem:[%s2205_s24 + $0x140] ss:$12 sps:$4 sm:$0xff]   ;;  %v2092_v5 = vld [vmem:[%s2205_s24 + $0x158] ss:$12 sps:$4 sm:$0xff]  }
  0x23   : > { %1794 = vmatprep.subr.bf16.mxu0 %v2019_v14  ;;  %1972 = vmatprep.subr.bf16.mxu1 %v2019_v14  ;;  %v2090_v4 = vld [vmem:[%s2205_s24 + $0x10c] ss:$12 sps:$4 sm:$0xff]   ;;  %v2093_v6 = vld [vmem:[%s2205_s24 + $0x108] ss:$12 sps:$4 sm:$0xff]   ;;  %v2094_v7 = vld [vmem:[%s2205_s24 + $0x170] ss:$12 sps:$4 sm:$0xff]  }
  0x26   : > { %1795 = vmatpush3.bf16.msra.mxu0 %v2020_v15  ;;  %1980 = vmatpush3.bf16.msra.mxu1 %v2020_v15 }
  0x27   : > { %1796 = vmatprep.subr.bf16.mxu0 %v2021_v16  ;;  %1973 = vmatprep.subr.bf16.mxu1 %v2021_v16 }
  0x2a   : > { %1797 = vmatpush3.bf16.msra.mxu0 %v2022_v17  ;;  %1981 = vmatpush3.bf16.msra.mxu1 %v2022_v17 }
  0x2b   : > { %1918 = vmatprep.subr.bf16.mxu1 %v2029_v18 }
  0x2d   : > { %1004 = vmatmul.mubr.bf16.vlgmr.msra.gmra.mxu0 %v2023_v19  ;;  %1100 = vmatmul.mubr.bf16.vlgmr.msra.gmra.mxu1 %v2026_v20 }
  0x2e   : > { %1919 = vmatpush3.bf16.msra.mxu1 %v2029_v18  ;;  %1011 = vmatprep.mubr.bf16.mxu0 %v2031_v21 }
  0x2f   : > { %1920 = vmatprep.subr.bf16.mxu1 %v2030_v22  ;;  %1107 = vmatprep.mubr.bf16.mxu1 %v2033_v23 }
  0x32   : > { %1921 = vmatpush3.bf16.msra.mxu1 %v2030_v22 }
  0x33   : > { %1922 = vmatprep.subr.bf16.mxu1 %v2037_v25 }
  0x35   : > { %1012 = vmatmul.mubr.bf16.gmra.mxu0 %v2035_v24  ;;  %1108 = vmatmul.mubr.bf16.gmra.mxu1 %v2036_v26 }
  0x36   : > { %1923 = vmatpush3.bf16.msra.mxu1 %v2037_v25  ;;  %1019 = vmatprep.mubr.bf16.mxu0 %v2039_v28 }
  0x37   : > { %1924 = vmatprep.subr.bf16.mxu1 %v2038_v27  ;;  %1115 = vmatprep.mubr.bf16.mxu1 %v2041_v29 }
  0x3a   : > { %1925 = vmatpush3.bf16.msra.mxu1 %v2038_v27 }
  0x3b   : > { %1926 = vmatprep.subr.bf16.mxu1 %v2045_v30 }
  0x3d   : > { %1020 = vmatmul.mubr.bf16.gmra.mxu0 %v2043_v31  ;;  %1116 = vmatmul.mubr.bf16.gmra.mxu1 %v2044_v32 }
  0x3e   : > { %1927 = vmatpush3.bf16.msra.mxu1 %v2045_v30  ;;  %1027 = vmatprep.mubr.bf16.mxu0 %v2047_v34 }
  0x3f   : > { %1928 = vmatprep.subr.bf16.mxu1 %v2046_v33  ;;  %1123 = vmatprep.mubr.bf16.mxu1 %v2049_v35 }
  0x42   : > { %1929 = vmatpush3.bf16.msra.mxu1 %v2046_v33 }
  0x43   : > { %1930 = vmatprep.subr.bf16.mxu1 %v2053_v36 }
  0x45   : > { %1028 = vmatmul.mubr.bf16.gmra.mxu0 %v2051_v37  ;;  %1124 = vmatmul.mubr.bf16.gmra.mxu1 %v2052_v38 }
  0x46   : > { %1931 = vmatpush3.bf16.msra.mxu1 %v2053_v36  ;;  %1035 = vmatprep.mubr.bf16.mxu0 %v2055_v39 }
  0x47   : > { %1932 = vmatprep.subr.bf16.mxu1 %v2054_v40  ;;  %1934 = vmatprep.mubr.bf16.mxu1 %v2057_v41 }
  0x4a   : > { %1933 = vmatpush3.bf16.msra.mxu1 %v2054_v40 }
  0x4d   : > { %1036 = vmatmul.mubr.bf16.gmra.mxu0 %v2058_v42  ;;  %1935 = vmatmul.mubr.bf16.vlgmr.msra.gmra.mxu1 %v2059_v43 }
  0x4e   : > { %1043 = vmatprep.mubr.bf16.mxu0 %v2060_v44  ;;  %1938 = vmatprep.mubr.bf16.mxu1 %v2062_v45 }
  0x55   : > { %1044 = vmatmul.mubr.bf16.gmra.mxu0 %v2063_v46  ;;  %1939 = vmatmul.mubr.bf16.gmra.mxu1 %v2064_v47 }
  0x56   : > { %1051 = vmatprep.mubr.bf16.mxu0 %v2065_v48  ;;  %1942 = vmatprep.mubr.bf16.mxu1 %v2067_v49  ;;  %v2325_v49 = vld [vmem:[%s2502_s2] ss:$0 sm:$0xff] }
  0x5d   : > { %1052 = vmatmul.mubr.bf16.gmra.mxu0 %v2068_v50  ;;  %1943 = vmatmul.mubr.bf16.gmra.mxu1 %v2069_v51 }
  0x5e   : > { %1059 = vmatprep.mubr.bf16.mxu0 %v2070_v52  ;;  %1946 = vmatprep.mubr.bf16.mxu1 %v2072_v53  ;;  %v2330_v52 = vld [vmem:[%s2503_s3] ss:$0 sm:$0xff] }
  0x65   : > { %1060 = vmatmul.mubr.bf16.gmra.mxu0 %v2073_v54  ;;  %1947 = vmatmul.mubr.bf16.gmra.mxu1 %v2074_v55 }
  0x66   : > { %1067 = vmatprep.mubr.bf16.mxu0 %v2075_v56  ;;  %1950 = vmatprep.mubr.bf16.mxu1 %v2077_v57 }
  0x6d   : > { %1068 = vmatmul.mubr.bf16.gmra.mxu0 %v2078_v58  ;;  %1951 = vmatmul.mubr.bf16.gmra.mxu1 %v2079_v59  ;;  %v2337_v58 = vld [vmem:[%s2504_s4] ss:$0 sm:$0xff] }
  0x6e   : > { %1075 = vmatprep.mubr.bf16.mxu0 %v2080_v60  ;;  %1954 = vmatprep.mubr.bf16.mxu1 %v2082_v61 }
  0x75   : > { %1076 = vmatmul.mubr.bf16.gmra.mxu0 %v2083_v62  ;;  %1955 = vmatmul.mubr.bf16.gmra.mxu1 %v2084_v63 }
  0x76   : > { %1083 = vmatprep.mubr.bf16.mxu0 %v2085_v0  ;;  %1958 = vmatprep.mubr.bf16.mxu1 %v2087_v1 }
  0x7d   : > { %1084 = vmatmul.mubr.bf16.gmra.mxu0 %v2088_v2  ;;  %1959 = vmatmul.mubr.bf16.gmra.mxu1 %v2089_v3 }
  0x7e   : > { %1091 = vmatprep.mubr.bf16.mxu0 %v2090_v4  ;;  %1962 = vmatprep.mubr.bf16.mxu1 %v2092_v5 }
  0x85   : > { %1092 = vmatmul.mubr.bf16.gmra.mxu0 %v2093_v6  ;;  %1963 = vmatmul.mubr.bf16.gmra.mxu1 %v2094_v7 }
  0xed   : > { %v1798_v8 = vpop.f32.mrf.mxu0  ;;  %v1870_v9 = vpop.f32.mrf.mxu1 }
  0xef   : > { %v1799_v10 = vpop.f32.mrf.mxu0  ;;  %v1871_v11 = vpop.f32.mrf.mxu1 }
  0xf0   : > { %v2300_v12 = vadd.f32 %v1871_v11, %v1870_v9  ;;  %v1800_v50 = vadd.f32 %v1799_v10, %v1798_v8 }
  0xf1   : > { %v1801_v13 = vpop.f32.mrf.mxu0  ;;  %v1873_v14 = vpop.f32.mrf.mxu1 }
  0xf3   : > { %v1802_v15 = vpop.f32.mrf.mxu0  ;;  %v1874_v16 = vpop.f32.mrf.mxu1 }
  0xf4   : > { %v2302_v17 = vadd.f32 %v1874_v16, %v1873_v14  ;;  %v1803_v0 = vadd.f32 %v1802_v15, %v1801_v13 }
  0xf5   : > { %v1804_v18 = vpop.f32.mrf.mxu0  ;;  %v1876_v19 = vpop.f32.mrf.mxu1 }
  0xf7   : > { %v1805_v20 = vpop.f32.mrf.mxu0  ;;  %v1877_v21 = vpop.f32.mrf.mxu1 }
  0xf8   : > { %v2304_v22 = vadd.f32 %v1877_v21, %v1876_v19  ;;  %v1806_v46 = vadd.f32 %v1805_v20, %v1804_v18 }
  0xf9   : > { %v1807_v23 = vpop.f32.mrf.mxu0  ;;  %v1879_v24 = vpop.f32.mrf.mxu1 }
  0xfb   : > { %v1808_v25 = vpop.f32.mrf.mxu0  ;;  %v1880_v26 = vpop.f32.mrf.mxu1 }
  0xfc   : > { %v2306_v27 = vadd.f32 %v1880_v26, %v1879_v24  ;;  %v1809_v55 = vadd.f32 %v1808_v25, %v1807_v23 }
  0xfd   : > { %v1810_v28 = vpop.f32.mrf.mxu0  ;;  %v1882_v29 = vpop.f32.mrf.mxu1 }
  0xff   : > { %v1811_v30 = vpop.f32.mrf.mxu0  ;;  %v1883_v31 = vpop.f32.mrf.mxu1 }
 0x100   : > { %v2308_v32 = vadd.f32 %v1883_v31, %v1882_v29  ;;  %v1812_v10 = vadd.f32 %v1811_v30, %v1810_v28 }
 0x101   : > { %v2310_v33 = vpop.f32.mrf.mxu0  ;;  %v1885_v34 = vpop.f32.mrf.mxu1 }
 0x103   : > { %v1814_v35 = vpop.f32.mrf.mxu0  ;;  %v1886_v36 = vpop.f32.mrf.mxu1 }
 0x104   : > { %v2312_v37 = vadd.f32 %v1886_v36, %v1885_v34  ;;  %v1815_v31 = vadd.f32 %v1814_v35, %v2310_v33 }
 0x105   : > { %v1816_v38 = vpop.f32.mrf.mxu0  ;;  %v2314_v39 = vpop.f32.mrf.mxu1 }
 0x107   : > { %v1817_v40 = vpop.f32.mrf.mxu0  ;;  %v2316_v41 = vpop.f32.mrf.mxu1 }
 0x108   : > { %v1818_v3 = vadd.f32 %v1817_v40, %v1816_v38 }
 0x109   : > { %v1819_v42 = vpop.f32.mrf.mxu0  ;;  %v2318_v43 = vpop.f32.mrf.mxu1 }
 0x10b   : > { %v1820_v44 = vpop.f32.mrf.mxu0  ;;  %v2320_v45 = vpop.f32.mrf.mxu1 }
 0x10c   : > { %v1821_v19 = vadd.f32 %v1820_v44, %v1819_v42 }
 0x10d   : > { %v1822_v47 = vpop.f32.mrf.mxu0  ;;  %v1936_v48 = vpop.f32.mrf.mxu1 }
 0x10e   : > { %v1175_v51 = vadd.f32 %v1936_v48, %v1806_v46 }
 0x10f   : > { %v1823_v53 = vpop.f32.mrf.mxu0  ;;  %v1166_v54 = vpop.f32.mrf.mxu1 }
 0x110   : > { %v1401_v56 = vadd.f32 %v2325_v49, %v1175_v51  ;;  %v1167_v57 = vadd.f32 %v1800_v50, %v1166_v54  ;;  %v1824_v54 = vadd.f32 %v1823_v53, %v1822_v47 }
 0x111   : > { %v2339_v59 = vpop.f32.mrf.mxu0  ;;  %v1937_v60 = vpop.f32.mrf.mxu1 }
 0x112   : > { %v1440_v61 = vmul.f32 %v2330_v52, %v1401_v56  ;;  %v1399_v62 = vadd.f32 %v2325_v49, %v1167_v57  ;;  %v1178_v63 = vadd.f32 %v1937_v60, %v1809_v55 }
 0x113   : > { %v1826_v1 = vpop.f32.mrf.mxu0  ;;  %v1169_v2 = vpop.f32.mrf.mxu1 }
 0x114   : > { %v1479_v4 = vadd.f32 %v2337_v58, %v1440_v61  ;;  %v1438_v5 = vmul.f32 %v2330_v52, %v1399_v62  ;;  %v1402_v6 = vadd.f32 %v2325_v49, %v1178_v63  ;;  %v1170_v7 = vadd.f32 %v1803_v0, %v1169_v2 }
 0x115   : > { %v1828_v8 = vpop.f32.mrf.mxu0  ;;  %v1940_v9 = vpop.f32.mrf.mxu1 }
 0x116   : > { %1511 = vst [vmem:[%s2346_s26 + $0x10] sm:$0xff] %v1479_v4  ;;  %v1477_v11 = vadd.f32 %v2337_v58, %v1438_v5  ;;  %v1441_v13 = vmul.f32 %v2330_v52, %v1402_v6  ;;  %v1191_v14 = vadd.f32 %v1940_v9, %v1818_v3  ;;  %v1400_v15 = vadd.f32 %v2325_v49, %v1170_v7 }
 0x117   : > { %v1829_v16 = vpop.f32.mrf.mxu0  ;;  %v1182_v18 = vpop.f32.mrf.mxu1  ;;  %v1827_v6 = vadd.f32 %v1826_v1, %v2339_v59 }
 0x118   : > { %1509 = vst [vmem:[%s2346_s26] sm:$0xff] %v1477_v11  ;;  %v1480_v20 = vadd.f32 %v2337_v58, %v1441_v13  ;;  %v1405_v21 = vadd.f32 %v2325_v49, %v1191_v14  ;;  %v1183_v23 = vadd.f32 %v1812_v10, %v1182_v18  ;;  %v1439_v24 = vmul.f32 %v2330_v52, %v1400_v15 }
 0x119   : > { %v1831_v25 = vpop.f32.mrf.mxu0  ;;  %v1941_v26 = vpop.f32.mrf.mxu1  ;;  %v1830_v42 = vadd.f32 %v1829_v16, %v1828_v8 }
 0x11a   : > { %1512 = vst [vmem:[%s2346_s26 + $0x18] sm:$0xff] %v1480_v20  ;;  %v1444_v28 = vmul.f32 %v2330_v52, %v1405_v21  ;;  %v1403_v29 = vadd.f32 %v2325_v49, %v1183_v23  ;;  %v1194_v30 = vadd.f32 %v1941_v26, %v1821_v19  ;;  %v1478_v34 = vadd.f32 %v2337_v58, %v1439_v24 }
 0x11b   : > { %v1832_v36 = vpop.f32.mrf.mxu0  ;;  %v1185_v38 = vpop.f32.mrf.mxu1 }
 0x11c   : > { %v1483_v40 = vadd.f32 %v2337_v58, %v1444_v28  ;;  %v1442_v44 = vmul.f32 %v2330_v52, %v1403_v29  ;;  %v1406_v46 = vadd.f32 %v2325_v49, %v1194_v30  ;;  %1510 = vst [vmem:[%s2346_s26 + $0x8] sm:$0xff] %v1478_v34  ;;  %v1186_v48 = vadd.f32 %v1815_v31, %v1185_v38 }
 0x11d   : > { %v1834_v50 = vpop.f32.mrf.mxu0  ;;  %v1944_v51 = vpop.f32.mrf.mxu1  ;;  %v1833_v62 = vadd.f32 %v1832_v36, %v1831_v25 }
 0x11e   : > { %1515 = vst [vmem:[%s2346_s26 + $0x30] sm:$0xff] %v1483_v40  ;;  %v1481_v33 = vadd.f32 %v2337_v58, %v1442_v44  ;;  %v1445_v35 = vmul.f32 %v2330_v52, %v1406_v46  ;;  %v1207_v55 = vadd.f32 %v1944_v51, %v1830_v42  ;;  %v1404_v56 = vadd.f32 %v2325_v49, %v1186_v48 }
 0x11f   : > { %v1835_v57 = vpop.f32.mrf.mxu0  ;;  %v1198_v60 = vpop.f32.mrf.mxu1 }
 0x120   : > { %1513 = vst [vmem:[%s2346_s26 + $0x20] sm:$0xff] %v1481_v33  ;;  %v1484_v61 = vadd.f32 %v2337_v58, %v1445_v35  ;;  %v1409_v63 = vadd.f32 %v2325_v49, %v1207_v55  ;;  %v1199_v0 = vadd.f32 %v1824_v54, %v1198_v60  ;;  %v1443_v47 = vmul.f32 %v2330_v52, %v1404_v56 }
 0x121   : > { %v1837_v53 = vpop.f32.mrf.mxu0  ;;  %v1945_v2 = vpop.f32.mrf.mxu1  ;;  %v1836_v18 = vadd.f32 %v1835_v57, %v1834_v50 }
 0x122   : > { %1516 = vst [vmem:[%s2346_s26 + $0x38] sm:$0xff] %v1484_v61  ;;  %v1448_v3 = vmul.f32 %v2330_v52, %v1409_v63  ;;  %v1407_v4 = vadd.f32 %v2325_v49, %v1199_v0  ;;  %v1210_v5 = vadd.f32 %v1945_v2, %v1833_v62  ;;  %v1482_v7 = vadd.f32 %v2337_v58, %v1443_v47 }
 0x123   : > { %v1838_v8 = vpop.f32.mrf.mxu0  ;;  %v1201_v9 = vpop.f32.mrf.mxu1 }
 0x124   : > { %v1487_v10 = vadd.f32 %v2337_v58, %v1448_v3  ;;  %v1446_v11 = vmul.f32 %v2330_v52, %v1407_v4  ;;  %v1410_v13 = vadd.f32 %v2325_v49, %v1210_v5  ;;  %1514 = vst [vmem:[%s2346_s26 + $0x28] sm:$0xff] %v1482_v7  ;;  %v1202_v14 = vadd.f32 %v1827_v6, %v1201_v9 }
 0x125   : > { %v1840_v15 = vpop.f32.mrf.mxu0  ;;  %v1948_v16 = vpop.f32.mrf.mxu1  ;;  %v1839_v30 = vadd.f32 %v1838_v8, %v1837_v53 }
 0x126   : > { %1519 = vst [vmem:[%s2346_s26 + $0x50] sm:$0xff] %v1487_v10  ;;  %v1485_v59 = vadd.f32 %v2337_v58, %v1446_v11  ;;  %v1449_v1 = vmul.f32 %v2330_v52, %v1410_v13  ;;  %v1408_v19 = vadd.f32 %v2325_v49, %v1202_v14 }
 0x127   : > { %v1841_v20 = vpop.f32.mrf.mxu0  ;;  %v1214_v21 = vpop.f32.mrf.mxu1 }
 0x128   : > { %1517 = vst [vmem:[%s2346_s26 + $0x40] sm:$0xff] %v1485_v59  ;;  %v1488_v23 = vadd.f32 %v2337_v58, %v1449_v1  ;;  %v1842_v24 = vadd.f32 %v1841_v20, %v1840_v15  ;;  %v1215_v25 = vadd.f32 %v1836_v18, %v1214_v21  ;;  %v1447_v26 = vmul.f32 %v2330_v52, %v1408_v19 }
 0x129   : > { %v1843_v28 = vpop.f32.mrf.mxu0  ;;  %v1949_v29 = vpop.f32.mrf.mxu1 }
 0x12a   : > { %1520 = vst [vmem:[%s2346_s26 + $0x58] sm:$0xff] %v1488_v23  ;;  %v1223_v31 = vadd.f32 %v1948_v16, %v1842_v24  ;;  %v1411_v34 = vadd.f32 %v2325_v49, %v1215_v25  ;;  %v1486_v36 = vadd.f32 %v2337_v58, %v1447_v26 }
 0x12b   : > { %v1844_v38 = vpop.f32.mrf.mxu0  ;;  %v1217_v40 = vpop.f32.mrf.mxu1 }
 0x12c   : > { %v1413_v42 = vadd.f32 %v2325_v49, %v1223_v31  ;;  %v1450_v44 = vmul.f32 %v2330_v52, %v1411_v34  ;;  %v1845_v46 = vadd.f32 %v1844_v38, %v1843_v28  ;;  %v1218_v48 = vadd.f32 %v1839_v30, %v1217_v40  ;;  %1518 = vst [vmem:[%s2346_s26 + $0x48] sm:$0xff] %v1486_v36 }
 0x12d   : > { %v1846_v50 = vpop.f32.mrf.mxu0  ;;  %v1952_v51 = vpop.f32.mrf.mxu1 }
 0x12e   : > { %v1452_v54 = vmul.f32 %v2330_v52, %v1413_v42  ;;  %v1489_v33 = vadd.f32 %v2337_v58, %v1450_v44  ;;  %v1226_v35 = vadd.f32 %v1949_v29, %v1845_v46  ;;  %v1412_v55 = vadd.f32 %v2325_v49, %v1218_v48 }
 0x12f   : > { %v1847_v56 = vpop.f32.mrf.mxu0  ;;  %v1230_v57 = vpop.f32.mrf.mxu1 }
 0x130   : > { %v1491_v60 = vadd.f32 %v2337_v58, %v1452_v54  ;;  %1521 = vst [vmem:[%s2346_s26 + $0x60] sm:$0xff] %v1489_v33  ;;  %v1414_v61 = vadd.f32 %v2325_v49, %v1226_v35  ;;  %v1451_v62 = vmul.f32 %v2330_v52, %v1412_v55  ;;  %v1848_v63 = vadd.f32 %v1847_v56, %v1846_v50 }
 0x131   : > { %v1849_v0 = vpop.f32.mrf.mxu0  ;;  %v1953_v47 = vpop.f32.mrf.mxu1  ;;  %v1890_v56 = vadd.f32 %v2316_v41, %v2314_v39 }
 0x132   : > { %1523 = vst [vmem:[%s2346_s26 + $0x70] sm:$0xff] %v1491_v60  ;;  %v1453_v53 = vmul.f32 %v2330_v52, %v1414_v61  ;;  %v1490_v2 = vadd.f32 %v2337_v58, %v1451_v62  ;;  %v1231_v3 = vadd.f32 %v1848_v63, %v1230_v57 }
 0x133   : > { %v1850_v4 = vpop.f32.mrf.mxu0  ;;  %v1233_v5 = vpop.f32.mrf.mxu1 }
 0x134   : > { %v1492_v6 = vadd.f32 %v2337_v58, %v1453_v53  ;;  %1522 = vst [vmem:[%s2346_s26 + $0x68] sm:$0xff] %v1490_v2  ;;  %v1415_v7 = vadd.f32 %v2325_v49, %v1231_v3  ;;  %v1851_v8 = vadd.f32 %v1850_v4, %v1849_v0 }
 0x135   : > { %v1852_v9 = vpop.f32.mrf.mxu0  ;;  %v2411_v10 = vpop.f32.mrf.mxu1 }
 0x136   : > { %1524 = vst [vmem:[%s2346_s26 + $0x78] sm:$0xff] %v1492_v6  ;;  %v1454_v11 = vmul.f32 %v2330_v52, %v1415_v7  ;;  %v1234_v13 = vadd.f32 %v1851_v8, %v1233_v5  ;;  %v1893_v5 = vadd.f32 %v2320_v45, %v2318_v43 }
 0x137   : > { %v1853_v14 = vpop.f32.mrf.mxu0  ;;  %v1246_v15 = vpop.f32.mrf.mxu1 }
 0x138   : > { %v1493_v16 = vadd.f32 %v2337_v58, %v1454_v11  ;;  %v1416_v18 = vadd.f32 %v2325_v49, %v1234_v13  ;;  %v1854_v59 = vadd.f32 %v1853_v14, %v1852_v9 }
 0x139   : > { %v1855_v1 = vpop.f32.mrf.mxu0  ;;  %v2417_v19 = vpop.f32.mrf.mxu1 }
 0x13a   : > { %1525 = vst [vmem:[%s2346_s26 + $0x80] sm:$0xff] %v1493_v16  ;;  %v1455_v20 = vmul.f32 %v2330_v52, %v1416_v18  ;;  %v1239_v21 = vadd.f32 %v1952_v51, %v1854_v59 }
 0x13b   : > { %v1856_v23 = vpop.f32.mrf.mxu0  ;;  %v1249_v24 = vpop.f32.mrf.mxu1 }
 0x13c   : > { %v1494_v25 = vadd.f32 %v2337_v58, %v1455_v20  ;;  %v1417_v26 = vadd.f32 %v2325_v49, %v1239_v21  ;;  %v1857_v28 = vadd.f32 %v1856_v23, %v1855_v1 }
 0x13d   : > { %v1858_v29 = vpop.f32.mrf.mxu0  ;;  %v1960_v30 = vpop.f32.mrf.mxu1 }
 0x13e   : > { %1526 = vst [vmem:[%s2346_s26 + $0x88] sm:$0xff] %v1494_v25  ;;  %v1456_v31 = vmul.f32 %v2330_v52, %v1417_v26  ;;  %v1242_v34 = vadd.f32 %v1953_v47, %v1857_v28  ;;  %v1271_v36 = vadd.f32 %v1960_v30, %v2304_v22 }
 0x13f   : > { %v1859_v38 = vpop.f32.mrf.mxu0  ;;  %v1262_v40 = vpop.f32.mrf.mxu1 }
 0x140   : > { %v1495_v42 = vadd.f32 %v2337_v58, %v1456_v31  ;;  %v1418_v44 = vadd.f32 %v2325_v49, %v1242_v34  ;;  %v1425_v46 = vadd.f32 %v2325_v49, %v1271_v36  ;;  %v1860_v48 = vadd.f32 %v1859_v38, %v1858_v29 }
 0x141   : > { %v1263_v50 = vadd.f32 %v2300_v12, %v1262_v40  ;;  %v1861_v51 = vpop.f32.mrf.mxu0  ;;  %v1961_v54 = vpop.f32.mrf.mxu1 }
 0x142   : > { %1527 = vst [vmem:[%s2346_s26 + $0x90] sm:$0xff] %v1495_v42  ;;  %v1457_v33 = vmul.f32 %v2330_v52, %v1418_v44  ;;  %v1464_v35 = vmul.f32 %v2330_v52, %v1425_v46  ;;  %v1247_v22 = vadd.f32 %v1860_v48, %v1246_v15  ;;  %v1274_v55 = vadd.f32 %v1961_v54, %v2306_v27 }
 0x143   : > { %v1423_v57 = vadd.f32 %v2325_v49, %v1263_v50  ;;  %v1862_v60 = vpop.f32.mrf.mxu0  ;;  %v1265_v61 = vpop.f32.mrf.mxu1 }
 0x144   : > { %v1496_v12 = vadd.f32 %v2337_v58, %v1457_v33  ;;  %v1503_v62 = vadd.f32 %v2337_v58, %v1464_v35  ;;  %v1419_v63 = vadd.f32 %v2325_v49, %v1247_v22  ;;  %v1426_v0 = vadd.f32 %v2325_v49, %v1274_v55 }
 0x145   : > { %v1462_v47 = vmul.f32 %v2330_v52, %v1423_v57  ;;  %v1863_v53 = vadd.f32 %v1862_v60, %v1861_v51  ;;  %v1266_v27 = vadd.f32 %v2302_v17, %v1265_v61  ;;  %v1864_v2 = vpop.f32.mrf.mxu0  ;;  %v1964_v3 = vpop.f32.mrf.mxu1 }
 0x146   : > { %1528 = vst [vmem:[%s2346_s26 + $0x98] sm:$0xff] %v1496_v12  ;;  %1535 = vst [vmem:[%s2346_s26 + $0xd0] sm:$0xff] %v1503_v62  ;;  %v1458_v39 = vmul.f32 %v2330_v52, %v1419_v63  ;;  %v1465_v41 = vmul.f32 %v2330_v52, %v1426_v0  ;;  %v1287_v4 = vadd.f32 %v1964_v3, %v1890_v56 }
 0x147   : > { %v1501_v6 = vadd.f32 %v2337_v58, %v1462_v47  ;;  %v1250_v7 = vadd.f32 %v1863_v53, %v1249_v24  ;;  %v1424_v17 = vadd.f32 %v2325_v49, %v1266_v27  ;;  %v1865_v8 = vpop.f32.mrf.mxu0  ;;  %v1278_v9 = vpop.f32.mrf.mxu1 }
 0x148   : > { %v1497_v11 = vadd.f32 %v2337_v58, %v1458_v39  ;;  %v1504_v13 = vadd.f32 %v2337_v58, %v1465_v41  ;;  %v1429_v14 = vadd.f32 %v2325_v49, %v1287_v4  ;;  %v1866_v15 = vadd.f32 %v1865_v8, %v1864_v2 }
 0x149   : > { %1533 = vst [vmem:[%s2346_s26 + $0xc0] sm:$0xff] %v1501_v6  ;;  %v1420_v16 = vadd.f32 %v2325_v49, %v1250_v7  ;;  %v1463_v43 = vmul.f32 %v2330_v52, %v1424_v17  ;;  %v1279_v45 = vadd.f32 %v2308_v32, %v1278_v9  ;;  %v1867_v18 = vpop.f32.mrf.mxu0  ;;  %v1965_v59 = vpop.f32.mrf.mxu1 }
 0x14a   : > { %1529 = vst [vmem:[%s2346_s26 + $0xa0] sm:$0xff] %v1497_v11  ;;  %1536 = vst [vmem:[%s2346_s26 + $0xd8] sm:$0xff] %v1504_v13  ;;  %v1468_v1 = vmul.f32 %v2330_v52, %v1429_v14  ;;  %v1255_v20 = vadd.f32 %v2411_v10, %v1866_v15  ;;  %v1290_v21 = vadd.f32 %v1965_v59, %v1893_v5 }
 0x14b   : > { %v1459_v23 = vmul.f32 %v2330_v52, %v1420_v16  ;;  %v1502_v24 = vadd.f32 %v2337_v58, %v1463_v43  ;;  %v1427_v25 = vadd.f32 %v2325_v49, %v1279_v45  ;;  %v1868_v26 = vpop.f32.mrf.mxu0  ;;  %v1281_v32 = vpop.f32.mrf.mxu1 }
 0x14c   : > { %v1507_v28 = vadd.f32 %v2337_v58, %v1468_v1  ;;  %v1421_v29 = vadd.f32 %v2325_v49, %v1255_v20  ;;  %v1430_v30 = vadd.f32 %v2325_v49, %v1290_v21  ;;  %v1869_v31 = vadd.f32 %v1868_v26, %v1867_v18 }
 0x14d   : > { %v1498_v10 = vadd.f32 %v2337_v58, %v1459_v23  ;;  %1534 = vst [vmem:[%s2346_s26 + $0xc8] sm:$0xff] %v1502_v24  ;;  %v1466_v34 = vmul.f32 %v2330_v52, %v1427_v25  ;;  %v1282_v36 = vadd.f32 %v2312_v37, %v1281_v32 }
 0x14e   : > { %1539 = vst [vmem:[%s2346_s26 + $0xf0] sm:$0xff] %v1507_v28  ;;  %v1460_v38 = vmul.f32 %v2330_v52, %v1421_v29  ;;  %v1469_v40 = vmul.f32 %v2330_v52, %v1430_v30  ;;  %v1258_v42 = vadd.f32 %v2417_v19, %v1869_v31 }
 0x14f   : > { %1530 = vst [vmem:[%s2346_s26 + $0xa8] sm:$0xff] %v1498_v10  ;;  %v1505_v44 = vadd.f32 %v2337_v58, %v1466_v34  ;;  %v1428_v46 = vadd.f32 %v2325_v49, %v1282_v36 }
 0x150   : > { %v1499_v48 = vadd.f32 %v2337_v58, %v1460_v38  ;;  %v1508_v50 = vadd.f32 %v2337_v58, %v1469_v40  ;;  %v1422_v37 = vadd.f32 %v2325_v49, %v1258_v42 }
 0x151   : > { %1537 = vst [vmem:[%s2346_s26 + $0xe0] sm:$0xff] %v1505_v44  ;;  %v1467_v51 = vmul.f32 %v2330_v52, %v1428_v46 }
 0x152   : > { %1531 = vst [vmem:[%s2346_s26 + $0xb0] sm:$0xff] %v1499_v48  ;;  %1540 = vst [vmem:[%s2346_s26 + $0xf8] sm:$0xff] %v1508_v50  ;;  %v1461_v54 = vmul.f32 %v2330_v52, %v1422_v37 }
 0x153   : > { %v1506_v19 = vadd.f32 %v2337_v58, %v1467_v51 }
 0x154   : > { %v1500_v33 = vadd.f32 %v2337_v58, %v1461_v54 }
 0x155   : > { %1538 = vst [vmem:[%s2346_s26 + $0xe8] sm:$0xff] %v1506_v19 }
 0x156   : > { %1532 = vst [vmem:[%s2346_s26 + $0xb8] sm:$0xff] %v1500_v33 }
 0x157 PF: > { %s16_s23 = sadd.s32 1, %s2117_s23   ;;  %s2507_s21 = smov %s2113_s22 }
 0x158   : > { %p13_p5 = scmp.ge.s32.totalorder %s16_s23, 4   ;;  %s2508_s22 = smov %s2510_s5 }
 0x15a   :  { %15 = sbr.rel (!%p13_p5) target bundleno = 2 (0x2), region = 97 }

// kernel: a_call__.16
= control target key start
LH: loop header
LB: loop body
LE: loop exit
PB: predicated region body
PF: predicated region fallthrough
CT: control target
= control target key end

     0   :  { %s1112_s0 = inlined_call_operand.vmem [shape: f32[512,128], index: 0, kind: input, shape index: {}]   ;;  %s1113_s1 = inlined_call_operand.vmem [shape: f32[1,128], index: 1, kind: input, shape index: {}]   ;;  %s1114_s2 = inlined_call_operand.vmem [shape: f32[1,128], index: 2, kind: input, shape index: {}]   ;;  %s1115_s3 = inlined_call_operand.vmem [shape: f32[1,128], index: 3, kind: input, shape index: {}]   ;;  %s1116_s4 = inlined_call_operand.vmem [shape: f32[512,128], index: 4, kind: output, shape index: {}]  }
   0x1   :  { %v17_v0 = vld [vmem:[%s1112_s0] sm:$0xff]  ;;  %v18_v5 = vld [vmem:[%s1112_s0 + $0x8] sm:$0xff]  ;;  %v19_v6 = vld [vmem:[%s1112_s0 + $0x10] sm:$0xff] }
   0x2   :  { %v524_v1 = vld [vmem:[%s1113_s1] ss:$0 sm:$0xff]  ;;  %v20_v9 = vld [vmem:[%s1112_s0 + $0x18] sm:$0xff]  ;;  %v22_v11 = vld [vmem:[%s1112_s0 + $0x28] sm:$0xff] }
   0x3   :  { %v529_v2 = vld [vmem:[%s1114_s2] ss:$0 sm:$0xff]  ;;  %v88_v3 = vmul.f32 %v524_v1, %v17_v0  ;;  %v89_v7 = vmul.f32 %v524_v1, %v18_v5  ;;  %v90_v8 = vmul.f32 %v524_v1, %v19_v6  ;;  %v91_v13 = vmul.f32 %v524_v1, %v20_v9  ;;  %v23_v16 = vld [vmem:[%s1112_s0 + $0x30] sm:$0xff]  ;;  %v24_v17 = vld [vmem:[%s1112_s0 + $0x38] sm:$0xff] }
   0x4   :  { %v535_v4 = vld [vmem:[%s1115_s3] ss:$0 sm:$0xff]  ;;  %v93_v15 = vmul.f32 %v524_v1, %v22_v11  ;;  %v94_v20 = vmul.f32 %v524_v1, %v23_v16  ;;  %v95_v21 = vmul.f32 %v524_v1, %v24_v17  ;;  %v26_v30 = vld [vmem:[%s1112_s0 + $0x48] sm:$0xff]  ;;  %v27_v39 = vld [vmem:[%s1112_s0 + $0x50] sm:$0xff] }
   0x5   :  { %v21_v10 = vld [vmem:[%s1112_s0 + $0x20] sm:$0xff]  ;;  %v159_v12 = vadd.f32 %v529_v2, %v88_v3  ;;  %v160_v18 = vadd.f32 %v529_v2, %v89_v7  ;;  %v161_v19 = vadd.f32 %v529_v2, %v90_v8  ;;  %v162_v23 = vadd.f32 %v529_v2, %v91_v13  ;;  %v28_v43 = vld [vmem:[%s1112_s0 + $0x58] sm:$0xff]  ;;  %v30_v51 = vld [vmem:[%s1112_s0 + $0x68] sm:$0xff] }
   0x6   :  { %v92_v14 = vmul.f32 %v524_v1, %v21_v10  ;;  %v25_v27 = vld [vmem:[%s1112_s0 + $0x40] sm:$0xff]  ;;  %v164_v34 = vadd.f32 %v529_v2, %v93_v15  ;;  %v165_v36 = vadd.f32 %v529_v2, %v94_v20  ;;  %v166_v37 = vadd.f32 %v529_v2, %v95_v21  ;;  %v31_v56 = vld [vmem:[%s1112_s0 + $0x70] sm:$0xff]  ;;  %v32_v57 = vld [vmem:[%s1112_s0 + $0x78] sm:$0xff] }
   0x7   :  { %vm223_vm0 = vcmp.gt.f32.partialorder %v159_v12, 0.0  ;;  %v294_v22 = vmul.f32 %v535_v4, %v159_v12  ;;  %vm224_vm1 = vcmp.gt.f32.partialorder %v160_v18, 0.0  ;;  %v295_v25 = vmul.f32 %v535_v4, %v160_v18  ;;  %v29_v44 = vld [vmem:[%s1112_s0 + $0x60] sm:$0xff]  ;;  %v34_v17 = vld [vmem:[%s1112_s0 + $0x88] sm:$0xff] }
   0x8   :  { %v163_v24 = vadd.f32 %v529_v2, %v92_v14  ;;  %vm225_vm2 = vcmp.gt.f32.partialorder %v161_v19, 0.0  ;;  %v296_v26 = vmul.f32 %v535_v4, %v161_v19  ;;  %vm226_vm3 = vcmp.gt.f32.partialorder %v162_v23, 0.0  ;;  %v33_v7 = vld [vmem:[%s1112_s0 + $0x80] sm:$0xff] }
   0x9   :  { %v358_v28 = vsel %vm223_vm0, %v159_v12, %v294_v22  ;;  %v297_v29 = vmul.f32 %v535_v4, %v162_v23  ;;  %v359_v31 = vsel %vm224_vm1, %v160_v18, %v295_v25  ;;  %v96_v38 = vmul.f32 %v524_v1, %v25_v27  ;;  %v35_v18 = vld [vmem:[%s1112_s0 + $0x90] sm:$0xff]  ;;  %v37_v25 = vld [vmem:[%s1112_s0 + $0xa0] sm:$0xff] }
   0xa   :  { %vm227_vm4 = vcmp.gt.f32.partialorder %v163_v24, 0.0  ;;  %422 = vst [vmem:[%s1116_s4] sm:$0xff] %v358_v28  ;;  %v360_v32 = vsel %vm225_vm2, %v161_v19, %v296_v26  ;;  %v298_v33 = vmul.f32 %v535_v4, %v163_v24  ;;  %423 = vst [vmem:[%s1116_s4 + $0x8] sm:$0xff] %v359_v31  ;;  %vm228_vm5 = vcmp.gt.f32.partialorder %v164_v34, 0.0  ;;  %v36_v19 = vld [vmem:[%s1112_s0 + $0x98] sm:$0xff]  ;;  %v39_v31 = vld [vmem:[%s1112_s0 + $0xb0] sm:$0xff] }
   0xb   :  { %424 = vst [vmem:[%s1116_s4 + $0x10] sm:$0xff] %v360_v32  ;;  %v361_v35 = vsel %vm226_vm3, %v162_v23, %v297_v29  ;;  %v299_v41 = vmul.f32 %v535_v4, %v164_v34  ;;  %v97_v42 = vmul.f32 %v524_v1, %v26_v30  ;;  %vm229_vm6 = vcmp.gt.f32.partialorder %v165_v36, 0.0  ;;  %v38_v30 = vld [vmem:[%s1112_s0 + $0xa8] sm:$0xff]  ;;  %v40_v32 = vld [vmem:[%s1112_s0 + $0xb8] sm:$0xff] }
   0xc   :  { %425 = vst [vmem:[%s1116_s4 + $0x18] sm:$0xff] %v361_v35  ;;  %v362_v40 = vsel %vm227_vm4, %v163_v24, %v298_v33  ;;  %v300_v45 = vmul.f32 %v535_v4, %v165_v36  ;;  %vm230_vm7 = vcmp.gt.f32.partialorder %v166_v37, 0.0  ;;  %v301_v46 = vmul.f32 %v535_v4, %v166_v37 }
   0xd   :  { %426 = vst [vmem:[%s1116_s4 + $0x20] sm:$0xff] %v362_v40  ;;  %v363_v47 = vsel %vm228_vm5, %v164_v34, %v299_v41  ;;  %v167_v48 = vadd.f32 %v529_v2, %v96_v38  ;;  %v168_v49 = vadd.f32 %v529_v2, %v97_v42  ;;  %v98_v50 = vmul.f32 %v524_v1, %v27_v39 }
   0xe   :  { %427 = vst [vmem:[%s1116_s4 + $0x28] sm:$0xff] %v363_v47  ;;  %v364_v52 = vsel %vm229_vm6, %v165_v36, %v300_v45  ;;  %v365_v53 = vsel %vm230_vm7, %v166_v37, %v301_v46  ;;  %v99_v54 = vmul.f32 %v524_v1, %v28_v43  ;;  %v100_v55 = vmul.f32 %v524_v1, %v29_v44 }
   0xf   :  { %428 = vst [vmem:[%s1116_s4 + $0x30] sm:$0xff] %v364_v52  ;;  %429 = vst [vmem:[%s1116_s4 + $0x38] sm:$0xff] %v365_v53  ;;  %vm231_vm8 = vcmp.gt.f32.partialorder %v167_v48, 0.0  ;;  %v302_v58 = vmul.f32 %v535_v4, %v167_v48  ;;  %vm232_vm9 = vcmp.gt.f32.partialorder %v168_v49, 0.0  ;;  %v303_v59 = vmul.f32 %v535_v4, %v168_v49  ;;  %v41_v53 = vld [vmem:[%s1112_s0 + $0xc0] sm:$0xff] }
  0x10   :  { %v169_v60 = vadd.f32 %v529_v2, %v98_v50  ;;  %v170_v61 = vadd.f32 %v529_v2, %v99_v54  ;;  %v171_v62 = vadd.f32 %v529_v2, %v100_v55  ;;  %v101_v63 = vmul.f32 %v524_v1, %v30_v51  ;;  %v42_v54 = vld [vmem:[%s1112_s0 + $0xc8] sm:$0xff] }
  0x11   :  { %v366_v0 = vsel %vm231_vm8, %v167_v48, %v302_v58  ;;  %v367_v3 = vsel %vm232_vm9, %v168_v49, %v303_v59  ;;  %v102_v5 = vmul.f32 %v524_v1, %v31_v56  ;;  %v103_v6 = vmul.f32 %v524_v1, %v32_v57  ;;  %v43_v57 = vld [vmem:[%s1112_s0 + $0xd0] sm:$0xff]  ;;  %v44_v58 = vld [vmem:[%s1112_s0 + $0xd8] sm:$0xff] }
  0x12   :  { %430 = vst [vmem:[%s1116_s4 + $0x40] sm:$0xff] %v366_v0  ;;  %431 = vst [vmem:[%s1116_s4 + $0x48] sm:$0xff] %v367_v3  ;;  %vm233_vm10 = vcmp.gt.f32.partialorder %v169_v60, 0.0  ;;  %v304_v8 = vmul.f32 %v535_v4, %v169_v60  ;;  %vm234_vm11 = vcmp.gt.f32.partialorder %v170_v61, 0.0  ;;  %v305_v9 = vmul.f32 %v535_v4, %v170_v61 }
  0x13   :  { %vm235_vm12 = vcmp.gt.f32.partialorder %v171_v62, 0.0  ;;  %v306_v10 = vmul.f32 %v535_v4, %v171_v62  ;;  %v172_v11 = vadd.f32 %v529_v2, %v101_v63  ;;  %v173_v12 = vadd.f32 %v529_v2, %v102_v5  ;;  %v46_v5 = vld [vmem:[%s1112_s0 + $0xe8] sm:$0xff] }
  0x14   :  { %v368_v13 = vsel %vm233_vm10, %v169_v60, %v304_v8  ;;  %v369_v14 = vsel %vm234_vm11, %v170_v61, %v305_v9  ;;  %v174_v15 = vadd.f32 %v529_v2, %v103_v6  ;;  %v104_v16 = vmul.f32 %v524_v1, %v33_v7  ;;  %v45_v61 = vld [vmem:[%s1112_s0 + $0xe0] sm:$0xff]  ;;  %v47_v6 = vld [vmem:[%s1112_s0 + $0xf0] sm:$0xff] }
  0x15   :  { %432 = vst [vmem:[%s1116_s4 + $0x50] sm:$0xff] %v368_v13  ;;  %433 = vst [vmem:[%s1116_s4 + $0x58] sm:$0xff] %v369_v14  ;;  %v370_v20 = vsel %vm235_vm12, %v171_v62, %v306_v10  ;;  %vm236_vm13 = vcmp.gt.f32.partialorder %v172_v11, 0.0  ;;  %v307_v21 = vmul.f32 %v535_v4, %v172_v11  ;;  %vm237_vm14 = vcmp.gt.f32.partialorder %v173_v12, 0.0 }
  0x16   :  { %434 = vst [vmem:[%s1116_s4 + $0x60] sm:$0xff] %v370_v20  ;;  %v308_v22 = vmul.f32 %v535_v4, %v173_v12  ;;  %vm238_vm15 = vcmp.gt.f32.partialorder %v174_v15, 0.0  ;;  %v309_v23 = vmul.f32 %v535_v4, %v174_v15  ;;  %v175_v24 = vadd.f32 %v529_v2, %v104_v16 }
  0x17   :  { %v371_v26 = vsel %vm236_vm13, %v172_v11, %v307_v21  ;;  %v105_v27 = vmul.f32 %v524_v1, %v34_v17  ;;  %v106_v28 = vmul.f32 %v524_v1, %v35_v18  ;;  %v107_v29 = vmul.f32 %v524_v1, %v36_v19  ;;  %v48_v21 = vld [vmem:[%s1112_s0 + $0xf8] sm:$0xff] }
  0x18   :  { %435 = vst [vmem:[%s1116_s4 + $0x68] sm:$0xff] %v371_v26  ;;  %v372_v33 = vsel %vm237_vm14, %v173_v12, %v308_v22  ;;  %v373_v34 = vsel %vm238_vm15, %v174_v15, %v309_v23  ;;  %vm239_vm0 = vcmp.gt.f32.partialorder %v175_v24, 0.0  ;;  %v310_v35 = vmul.f32 %v535_v4, %v175_v24 }
  0x19   :  { %436 = vst [vmem:[%s1116_s4 + $0x70] sm:$0xff] %v372_v33  ;;  %437 = vst [vmem:[%s1116_s4 + $0x78] sm:$0xff] %v373_v34  ;;  %v176_v36 = vadd.f32 %v529_v2, %v105_v27  ;;  %v177_v37 = vadd.f32 %v529_v2, %v106_v28  ;;  %v178_v38 = vadd.f32 %v529_v2, %v107_v29  ;;  %v49_v28 = vld [vmem:[%s1112_s0 + $0x100] sm:$0xff]  ;;  %v50_v33 = vld [vmem:[%s1112_s0 + $0x108] sm:$0xff] }
  0x1a   :  { %v108_v39 = vmul.f32 %v524_v1, %v37_v25  ;;  %v374_v40 = vsel %vm239_vm0, %v175_v24, %v310_v35  ;;  %v109_v41 = vmul.f32 %v524_v1, %v38_v30  ;;  %v110_v42 = vmul.f32 %v524_v1, %v39_v31  ;;  %v51_v34 = vld [vmem:[%s1112_s0 + $0x110] sm:$0xff] }
  0x1b   :  { %v111_v43 = vmul.f32 %v524_v1, %v40_v32  ;;  %438 = vst [vmem:[%s1116_s4 + $0x80] sm:$0xff] %v374_v40  ;;  %vm240_vm1 = vcmp.gt.f32.partialorder %v176_v36, 0.0  ;;  %v311_v44 = vmul.f32 %v535_v4, %v176_v36  ;;  %vm241_vm2 = vcmp.gt.f32.partialorder %v177_v37, 0.0  ;;  %v52_v40 = vld [vmem:[%s1112_s0 + $0x118] sm:$0xff] }
  0x1c   :  { %v312_v45 = vmul.f32 %v535_v4, %v177_v37  ;;  %vm242_vm3 = vcmp.gt.f32.partialorder %v178_v38, 0.0  ;;  %v313_v46 = vmul.f32 %v535_v4, %v178_v38  ;;  %v179_v47 = vadd.f32 %v529_v2, %v108_v39 }
  0x1d   :  { %v180_v48 = vadd.f32 %v529_v2, %v109_v41  ;;  %v375_v49 = vsel %vm240_vm1, %v176_v36, %v311_v44  ;;  %v181_v51 = vadd.f32 %v529_v2, %v110_v42  ;;  %v182_v52 = vadd.f32 %v529_v2, %v111_v43  ;;  %v53_v41 = vld [vmem:[%s1112_s0 + $0x120] sm:$0xff] }
  0x1e   :  { %v376_v50 = vsel %vm241_vm2, %v177_v37, %v312_v45  ;;  %439 = vst [vmem:[%s1116_s4 + $0x88] sm:$0xff] %v375_v49  ;;  %v377_v55 = vsel %vm242_vm3, %v178_v38, %v313_v46  ;;  %vm243_vm4 = vcmp.gt.f32.partialorder %v179_v47, 0.0  ;;  %v314_v56 = vmul.f32 %v535_v4, %v179_v47  ;;  %v54_v46 = vld [vmem:[%s1112_s0 + $0x128] sm:$0xff] }
  0x1f   :  { %440 = vst [vmem:[%s1116_s4 + $0x90] sm:$0xff] %v376_v50  ;;  %vm244_vm5 = vcmp.gt.f32.partialorder %v180_v48, 0.0  ;;  %441 = vst [vmem:[%s1116_s4 + $0x98] sm:$0xff] %v377_v55  ;;  %v315_v59 = vmul.f32 %v535_v4, %v180_v48  ;;  %vm245_vm6 = vcmp.gt.f32.partialorder %v181_v51, 0.0  ;;  %v316_v60 = vmul.f32 %v535_v4, %v181_v51 }
  0x20   :  { %vm246_vm7 = vcmp.gt.f32.partialorder %v182_v52, 0.0  ;;  %v378_v62 = vsel %vm243_vm4, %v179_v47, %v314_v56  ;;  %v317_v63 = vmul.f32 %v535_v4, %v182_v52  ;;  %v112_v0 = vmul.f32 %v524_v1, %v41_v53 }
  0x21   :  { %v113_v3 = vmul.f32 %v524_v1, %v42_v54  ;;  %442 = vst [vmem:[%s1116_s4 + $0xa0] sm:$0xff] %v378_v62  ;;  %v379_v7 = vsel %vm244_vm5, %v180_v48, %v315_v59  ;;  %v380_v8 = vsel %vm245_vm6, %v181_v51, %v316_v60  ;;  %v114_v9 = vmul.f32 %v524_v1, %v43_v57  ;;  %v55_v57 = vld [vmem:[%s1112_s0 + $0x130] sm:$0xff] }
  0x22   :  { %v115_v10 = vmul.f32 %v524_v1, %v44_v58  ;;  %443 = vst [vmem:[%s1116_s4 + $0xa8] sm:$0xff] %v379_v7  ;;  %444 = vst [vmem:[%s1116_s4 + $0xb0] sm:$0xff] %v380_v8  ;;  %v381_v11 = vsel %vm246_vm7, %v182_v52, %v317_v63  ;;  %v183_v12 = vadd.f32 %v529_v2, %v112_v0  ;;  %v56_v58 = vld [vmem:[%s1112_s0 + $0x138] sm:$0xff]  ;;  %v57_v8 = vld [vmem:[%s1112_s0 + $0x140] sm:$0xff] }
  0x23   :  { %v184_v13 = vadd.f32 %v529_v2, %v113_v3  ;;  %v116_v14 = vmul.f32 %v524_v1, %v45_v61  ;;  %445 = vst [vmem:[%s1116_s4 + $0xb8] sm:$0xff] %v381_v11  ;;  %v185_v15 = vadd.f32 %v529_v2, %v114_v9  ;;  %v117_v17 = vmul.f32 %v524_v1, %v46_v5  ;;  %v58_v9 = vld [vmem:[%s1112_s0 + $0x148] sm:$0xff] }
  0x24   :  { %v186_v16 = vadd.f32 %v529_v2, %v115_v10  ;;  %v118_v18 = vmul.f32 %v524_v1, %v47_v6  ;;  %vm247_vm8 = vcmp.gt.f32.partialorder %v183_v12, 0.0  ;;  %v318_v19 = vmul.f32 %v535_v4, %v183_v12 }
  0x25   :  { %vm248_vm9 = vcmp.gt.f32.partialorder %v184_v13, 0.0  ;;  %v319_v20 = vmul.f32 %v535_v4, %v184_v13  ;;  %vm249_vm10 = vcmp.gt.f32.partialorder %v185_v15, 0.0  ;;  %v320_v22 = vmul.f32 %v535_v4, %v185_v15 }
  0x26   :  { %vm250_vm11 = vcmp.gt.f32.partialorder %v186_v16, 0.0  ;;  %v321_v23 = vmul.f32 %v535_v4, %v186_v16  ;;  %v382_v24 = vsel %vm247_vm8, %v183_v12, %v318_v19  ;;  %v187_v26 = vadd.f32 %v529_v2, %v116_v14 }
  0x27   :  { %v383_v25 = vsel %vm248_vm9, %v184_v13, %v319_v20  ;;  %v188_v27 = vadd.f32 %v529_v2, %v117_v17  ;;  %446 = vst [vmem:[%s1116_s4 + $0xc0] sm:$0xff] %v382_v24  ;;  %v384_v29 = vsel %vm249_vm10, %v185_v15, %v320_v22  ;;  %v189_v31 = vadd.f32 %v529_v2, %v118_v18  ;;  %v59_v15 = vld [vmem:[%s1112_s0 + $0x150] sm:$0xff]  ;;  %v60_v20 = vld [vmem:[%s1112_s0 + $0x158] sm:$0xff]  ;;  %v62_v22 = vld [vmem:[%s1112_s0 + $0x168] sm:$0xff] }
  0x28   :  { %447 = vst [vmem:[%s1116_s4 + $0xc8] sm:$0xff] %v383_v25  ;;  %v385_v30 = vsel %vm250_vm11, %v186_v16, %v321_v23  ;;  %v119_v32 = vmul.f32 %v524_v1, %v48_v21  ;;  %448 = vst [vmem:[%s1116_s4 + $0xd0] sm:$0xff] %v384_v29  ;;  %vm251_vm12 = vcmp.gt.f32.partialorder %v187_v26, 0.0  ;;  %v322_v35 = vmul.f32 %v535_v4, %v187_v26  ;;  %v61_v21 = vld [vmem:[%s1112_s0 + $0x160] sm:$0xff] }
  0x29   :  { %449 = vst [vmem:[%s1116_s4 + $0xd8] sm:$0xff] %v385_v30  ;;  %vm252_vm13 = vcmp.gt.f32.partialorder %v188_v27, 0.0  ;;  %v323_v36 = vmul.f32 %v535_v4, %v188_v27  ;;  %vm253_vm14 = vcmp.gt.f32.partialorder %v189_v31, 0.0  ;;  %v324_v37 = vmul.f32 %v535_v4, %v189_v31 }
  0x2a   :  { %v190_v38 = vadd.f32 %v529_v2, %v119_v32  ;;  %v120_v39 = vmul.f32 %v524_v1, %v49_v28  ;;  %v386_v42 = vsel %vm251_vm12, %v187_v26, %v322_v35  ;;  %v121_v44 = vmul.f32 %v524_v1, %v50_v33  ;;  %v63_v33 = vld [vmem:[%s1112_s0 + $0x170] sm:$0xff] }
  0x2b   :  { %v387_v43 = vsel %vm252_vm13, %v188_v27, %v323_v36  ;;  %v122_v45 = vmul.f32 %v524_v1, %v51_v34  ;;  %450 = vst [vmem:[%s1116_s4 + $0xe0] sm:$0xff] %v386_v42  ;;  %v388_v47 = vsel %vm253_vm14, %v189_v31, %v324_v37  ;;  %v123_v52 = vmul.f32 %v524_v1, %v52_v40  ;;  %v64_v34 = vld [vmem:[%s1112_s0 + $0x178] sm:$0xff] }
  0x2c   :  { %451 = vst [vmem:[%s1116_s4 + $0xe8] sm:$0xff] %v387_v43  ;;  %vm254_vm15 = vcmp.gt.f32.partialorder %v190_v38, 0.0  ;;  %v325_v48 = vmul.f32 %v535_v4, %v190_v38  ;;  %v191_v49 = vadd.f32 %v529_v2, %v120_v39  ;;  %452 = vst [vmem:[%s1116_s4 + $0xf0] sm:$0xff] %v388_v47  ;;  %v192_v50 = vadd.f32 %v529_v2, %v121_v44  ;;  %v65_v47 = vld [vmem:[%s1112_s0 + $0x180] sm:$0xff] }
  0x2d   :  { %v193_v51 = vadd.f32 %v529_v2, %v122_v45  ;;  %v124_v53 = vmul.f32 %v524_v1, %v53_v41  ;;  %v125_v56 = vmul.f32 %v524_v1, %v54_v46  ;;  %v194_v62 = vadd.f32 %v529_v2, %v123_v52 }
  0x2e   :  { %v389_v54 = vsel %vm254_vm15, %v190_v38, %v325_v48  ;;  %vm255_vm0 = vcmp.gt.f32.partialorder %v191_v49, 0.0  ;;  %v326_v55 = vmul.f32 %v535_v4, %v191_v49  ;;  %vm256_vm1 = vcmp.gt.f32.partialorder %v192_v50, 0.0  ;;  %v66_v48 = vld [vmem:[%s1112_s0 + $0x188] sm:$0xff] }
  0x2f   :  { %453 = vst [vmem:[%s1116_s4 + $0xf8] sm:$0xff] %v389_v54  ;;  %v327_v59 = vmul.f32 %v535_v4, %v192_v50  ;;  %vm257_vm2 = vcmp.gt.f32.partialorder %v193_v51, 0.0  ;;  %v328_v60 = vmul.f32 %v535_v4, %v193_v51  ;;  %v195_v63 = vadd.f32 %v529_v2, %v124_v53 }
  0x30   :  { %v390_v61 = vsel %vm255_vm0, %v191_v49, %v326_v55  ;;  %v196_v0 = vadd.f32 %v529_v2, %v125_v56  ;;  %v126_v6 = vmul.f32 %v524_v1, %v55_v57  ;;  %v127_v7 = vmul.f32 %v524_v1, %v56_v58  ;;  %v67_v55 = vld [vmem:[%s1112_s0 + $0x190] sm:$0xff] }
  0x31   :  { %454 = vst [vmem:[%s1116_s4 + $0x100] sm:$0xff] %v390_v61  ;;  %v391_v3 = vsel %vm256_vm1, %v192_v50, %v327_v59  ;;  %v392_v5 = vsel %vm257_vm2, %v193_v51, %v328_v60  ;;  %vm258_vm3 = vcmp.gt.f32.partialorder %v194_v62, 0.0  ;;  %v329_v10 = vmul.f32 %v535_v4, %v194_v62  ;;  %v68_v60 = vld [vmem:[%s1112_s0 + $0x198] sm:$0xff]  ;;  %v69_v61 = vld [vmem:[%s1112_s0 + $0x1a0] sm:$0xff] }
  0x32   :  { %455 = vst [vmem:[%s1116_s4 + $0x108] sm:$0xff] %v391_v3  ;;  %456 = vst [vmem:[%s1116_s4 + $0x110] sm:$0xff] %v392_v5  ;;  %vm259_vm4 = vcmp.gt.f32.partialorder %v195_v63, 0.0  ;;  %v330_v11 = vmul.f32 %v535_v4, %v195_v63  ;;  %vm260_vm5 = vcmp.gt.f32.partialorder %v196_v0, 0.0  ;;  %v331_v12 = vmul.f32 %v535_v4, %v196_v0 }
  0x33   :  { %v197_v13 = vadd.f32 %v529_v2, %v126_v6  ;;  %v198_v14 = vadd.f32 %v529_v2, %v127_v7  ;;  %v393_v16 = vsel %vm258_vm3, %v194_v62, %v329_v10  ;;  %v128_v18 = vmul.f32 %v524_v1, %v57_v8  ;;  %v70_v62 = vld [vmem:[%s1112_s0 + $0x1a8] sm:$0xff] }
  0x34   :  { %v394_v17 = vsel %vm259_vm4, %v195_v63, %v330_v11  ;;  %v129_v19 = vmul.f32 %v524_v1, %v58_v9  ;;  %457 = vst [vmem:[%s1116_s4 + $0x118] sm:$0xff] %v393_v16  ;;  %v395_v23 = vsel %vm260_vm5, %v196_v0, %v331_v12  ;;  %v130_v28 = vmul.f32 %v524_v1, %v59_v15  ;;  %v71_v12 = vld [vmem:[%s1112_s0 + $0x1b0] sm:$0xff] }
  0x35   :  { %458 = vst [vmem:[%s1116_s4 + $0x120] sm:$0xff] %v394_v17  ;;  %vm261_vm6 = vcmp.gt.f32.partialorder %v197_v13, 0.0  ;;  %v332_v24 = vmul.f32 %v535_v4, %v197_v13  ;;  %vm262_vm7 = vcmp.gt.f32.partialorder %v198_v14, 0.0  ;;  %459 = vst [vmem:[%s1116_s4 + $0x128] sm:$0xff] %v395_v23  ;;  %v333_v25 = vmul.f32 %v535_v4, %v198_v14 }
  0x36   :  { %v199_v26 = vadd.f32 %v529_v2, %v128_v18  ;;  %v200_v27 = vadd.f32 %v529_v2, %v129_v19  ;;  %v131_v30 = vmul.f32 %v524_v1, %v60_v20  ;;  %v132_v31 = vmul.f32 %v524_v1, %v61_v21 }
  0x37   :  { %v396_v29 = vsel %vm261_vm6, %v197_v13, %v332_v24  ;;  %v133_v32 = vmul.f32 %v524_v1, %v62_v22  ;;  %v397_v35 = vsel %vm262_vm7, %v198_v14, %v333_v25  ;;  %v201_v38 = vadd.f32 %v529_v2, %v130_v28  ;;  %v72_v13 = vld [vmem:[%s1112_s0 + $0x1b8] sm:$0xff] }
  0x38   :  { %460 = vst [vmem:[%s1116_s4 + $0x130] sm:$0xff] %v396_v29  ;;  %vm263_vm8 = vcmp.gt.f32.partialorder %v199_v26, 0.0  ;;  %v334_v36 = vmul.f32 %v535_v4, %v199_v26  ;;  %vm264_vm9 = vcmp.gt.f32.partialorder %v200_v27, 0.0  ;;  %461 = vst [vmem:[%s1116_s4 + $0x138] sm:$0xff] %v397_v35  ;;  %v335_v37 = vmul.f32 %v535_v4, %v200_v27 }
  0x39   :  { %v202_v39 = vadd.f32 %v529_v2, %v131_v30  ;;  %v203_v40 = vadd.f32 %v529_v2, %v132_v31  ;;  %v204_v42 = vadd.f32 %v529_v2, %v133_v32  ;;  %v134_v43 = vmul.f32 %v524_v1, %v63_v33 }
  0x3a   :  { %v398_v41 = vsel %vm263_vm8, %v199_v26, %v334_v36  ;;  %v135_v44 = vmul.f32 %v524_v1, %v64_v34  ;;  %v399_v45 = vsel %vm264_vm9, %v200_v27, %v335_v37  ;;  %vm265_vm10 = vcmp.gt.f32.partialorder %v201_v38, 0.0  ;;  %v73_v26 = vld [vmem:[%s1112_s0 + $0x1c0] sm:$0xff]  ;;  %v74_v27 = vld [vmem:[%s1112_s0 + $0x1c8] sm:$0xff]  ;;  %v75_v34 = vld [vmem:[%s1112_s0 + $0x1d0] sm:$0xff] }
  0x3b   :  { %462 = vst [vmem:[%s1116_s4 + $0x140] sm:$0xff] %v398_v41  ;;  %v336_v46 = vmul.f32 %v535_v4, %v201_v38  ;;  %vm266_vm11 = vcmp.gt.f32.partialorder %v202_v39, 0.0  ;;  %463 = vst [vmem:[%s1116_s4 + $0x148] sm:$0xff] %v399_v45  ;;  %v337_v49 = vmul.f32 %v535_v4, %v202_v39  ;;  %vm267_vm12 = vcmp.gt.f32.partialorder %v203_v40, 0.0  ;;  %v78_v41 = vld [vmem:[%s1112_s0 + $0x1e8] sm:$0xff] }
  0x3c   :  { %v338_v50 = vmul.f32 %v535_v4, %v203_v40  ;;  %vm268_vm13 = vcmp.gt.f32.partialorder %v204_v42, 0.0  ;;  %v339_v52 = vmul.f32 %v535_v4, %v204_v42  ;;  %v205_v53 = vadd.f32 %v529_v2, %v134_v43 }
  0x3d   :  { %v400_v51 = vsel %vm265_vm10, %v201_v38, %v336_v46  ;;  %v206_v54 = vadd.f32 %v529_v2, %v135_v44  ;;  %v401_v56 = vsel %vm266_vm11, %v202_v39, %v337_v49  ;;  %v136_v58 = vmul.f32 %v524_v1, %v65_v47  ;;  %v76_v39 = vld [vmem:[%s1112_s0 + $0x1d8] sm:$0xff] }
  0x3e   :  { %464 = vst [vmem:[%s1116_s4 + $0x150] sm:$0xff] %v400_v51  ;;  %v402_v57 = vsel %vm267_vm12, %v203_v40, %v338_v50  ;;  %v137_v59 = vmul.f32 %v524_v1, %v66_v48  ;;  %465 = vst [vmem:[%s1116_s4 + $0x158] sm:$0xff] %v401_v56  ;;  %v403_v63 = vsel %vm268_vm13, %v204_v42, %v339_v52  ;;  %vm269_vm14 = vcmp.gt.f32.partialorder %v205_v53, 0.0  ;;  %v77_v40 = vld [vmem:[%s1112_s0 + $0x1e0] sm:$0xff]  ;;  %v79_v52 = vld [vmem:[%s1112_s0 + $0x1f0] sm:$0xff] }
  0x3f   :  { %466 = vst [vmem:[%s1116_s4 + $0x160] sm:$0xff] %v402_v57  ;;  %v340_v0 = vmul.f32 %v535_v4, %v205_v53  ;;  %vm270_vm15 = vcmp.gt.f32.partialorder %v206_v54, 0.0  ;;  %467 = vst [vmem:[%s1116_s4 + $0x168] sm:$0xff] %v403_v63  ;;  %v341_v3 = vmul.f32 %v535_v4, %v206_v54  ;;  %v207_v5 = vadd.f32 %v529_v2, %v136_v58 }
  0x40   :  { %v208_v6 = vadd.f32 %v529_v2, %v137_v59  ;;  %v138_v7 = vmul.f32 %v524_v1, %v67_v55  ;;  %v139_v9 = vmul.f32 %v524_v1, %v68_v60  ;;  %v140_v10 = vmul.f32 %v524_v1, %v69_v61 }
  0x41   :  { %v404_v8 = vsel %vm269_vm14, %v205_v53, %v340_v0  ;;  %v141_v11 = vmul.f32 %v524_v1, %v70_v62  ;;  %v405_v14 = vsel %vm270_vm15, %v206_v54, %v341_v3  ;;  %vm271_vm0 = vcmp.gt.f32.partialorder %v207_v5, 0.0  ;;  %v80_v53 = vld [vmem:[%s1112_s0 + $0x1f8] sm:$0xff] }
  0x42   :  { %468 = vst [vmem:[%s1116_s4 + $0x170] sm:$0xff] %v404_v8  ;;  %v342_v15 = vmul.f32 %v535_v4, %v207_v5  ;;  %vm272_vm1 = vcmp.gt.f32.partialorder %v208_v6, 0.0  ;;  %469 = vst [vmem:[%s1116_s4 + $0x178] sm:$0xff] %v405_v14  ;;  %v343_v16 = vmul.f32 %v535_v4, %v208_v6  ;;  %v209_v17 = vadd.f32 %v529_v2, %v138_v7 }
  0x43   :  { %v210_v18 = vadd.f32 %v529_v2, %v139_v9  ;;  %v211_v19 = vadd.f32 %v529_v2, %v140_v10  ;;  %v212_v21 = vadd.f32 %v529_v2, %v141_v11  ;;  %v142_v22 = vmul.f32 %v524_v1, %v71_v12 }
  0x44   :  { %v406_v20 = vsel %vm271_vm0, %v207_v5, %v342_v15  ;;  %v143_v23 = vmul.f32 %v524_v1, %v72_v13  ;;  %v407_v24 = vsel %vm272_vm1, %v208_v6, %v343_v16  ;;  %vm273_vm2 = vcmp.gt.f32.partialorder %v209_v17, 0.0 }
  0x45   :  { %470 = vst [vmem:[%s1116_s4 + $0x180] sm:$0xff] %v406_v20  ;;  %v344_v25 = vmul.f32 %v535_v4, %v209_v17  ;;  %vm274_vm3 = vcmp.gt.f32.partialorder %v210_v18, 0.0  ;;  %471 = vst [vmem:[%s1116_s4 + $0x188] sm:$0xff] %v407_v24  ;;  %v345_v28 = vmul.f32 %v535_v4, %v210_v18  ;;  %vm275_vm4 = vcmp.gt.f32.partialorder %v211_v19, 0.0 }
  0x46   :  { %v346_v29 = vmul.f32 %v535_v4, %v211_v19  ;;  %vm276_vm5 = vcmp.gt.f32.partialorder %v212_v21, 0.0  ;;  %v347_v31 = vmul.f32 %v535_v4, %v212_v21  ;;  %v213_v32 = vadd.f32 %v529_v2, %v142_v22 }
  0x47   :  { %v408_v30 = vsel %vm273_vm2, %v209_v17, %v344_v25  ;;  %v214_v33 = vadd.f32 %v529_v2, %v143_v23  ;;  %v409_v35 = vsel %vm274_vm3, %v210_v18, %v345_v28  ;;  %v144_v37 = vmul.f32 %v524_v1, %v73_v26 }
  0x48   :  { %472 = vst [vmem:[%s1116_s4 + $0x190] sm:$0xff] %v408_v30  ;;  %v410_v36 = vsel %vm275_vm4, %v211_v19, %v346_v29  ;;  %v145_v38 = vmul.f32 %v524_v1, %v74_v27  ;;  %473 = vst [vmem:[%s1116_s4 + $0x198] sm:$0xff] %v409_v35  ;;  %v411_v42 = vsel %vm276_vm5, %v212_v21, %v347_v31  ;;  %vm277_vm6 = vcmp.gt.f32.partialorder %v213_v32, 0.0 }
  0x49   :  { %474 = vst [vmem:[%s1116_s4 + $0x1a0] sm:$0xff] %v410_v36  ;;  %v348_v43 = vmul.f32 %v535_v4, %v213_v32  ;;  %vm278_vm7 = vcmp.gt.f32.partialorder %v214_v33, 0.0  ;;  %475 = vst [vmem:[%s1116_s4 + $0x1a8] sm:$0xff] %v411_v42  ;;  %v349_v44 = vmul.f32 %v535_v4, %v214_v33  ;;  %v215_v45 = vadd.f32 %v529_v2, %v144_v37 }
  0x4a   :  { %v216_v46 = vadd.f32 %v529_v2, %v145_v38  ;;  %v146_v47 = vmul.f32 %v524_v1, %v75_v34  ;;  %v147_v49 = vmul.f32 %v524_v1, %v76_v39  ;;  %v148_v50 = vmul.f32 %v524_v1, %v77_v40 }
  0x4b   :  { %v412_v48 = vsel %vm277_vm6, %v213_v32, %v348_v43  ;;  %v149_v51 = vmul.f32 %v524_v1, %v78_v41  ;;  %v413_v54 = vsel %vm278_vm7, %v214_v33, %v349_v44  ;;  %vm279_vm8 = vcmp.gt.f32.partialorder %v215_v45, 0.0 }
  0x4c   :  { %476 = vst [vmem:[%s1116_s4 + $0x1b0] sm:$0xff] %v412_v48  ;;  %v350_v55 = vmul.f32 %v535_v4, %v215_v45  ;;  %vm280_vm9 = vcmp.gt.f32.partialorder %v216_v46, 0.0  ;;  %477 = vst [vmem:[%s1116_s4 + $0x1b8] sm:$0xff] %v413_v54  ;;  %v351_v56 = vmul.f32 %v535_v4, %v216_v46  ;;  %v217_v57 = vadd.f32 %v529_v2, %v146_v47 }
  0x4d   :  { %v218_v58 = vadd.f32 %v529_v2, %v147_v49  ;;  %v219_v59 = vadd.f32 %v529_v2, %v148_v50  ;;  %v220_v61 = vadd.f32 %v529_v2, %v149_v51  ;;  %v150_v62 = vmul.f32 %v524_v1, %v79_v52 }
  0x4e   :  { %v414_v60 = vsel %vm279_vm8, %v215_v45, %v350_v55  ;;  %v151_v63 = vmul.f32 %v524_v1, %v80_v53  ;;  %v415_v0 = vsel %vm280_vm9, %v216_v46, %v351_v56  ;;  %vm281_vm10 = vcmp.gt.f32.partialorder %v217_v57, 0.0 }
  0x4f   :  { %478 = vst [vmem:[%s1116_s4 + $0x1c0] sm:$0xff] %v414_v60  ;;  %v352_v3 = vmul.f32 %v535_v4, %v217_v57  ;;  %vm282_vm11 = vcmp.gt.f32.partialorder %v218_v58, 0.0  ;;  %479 = vst [vmem:[%s1116_s4 + $0x1c8] sm:$0xff] %v415_v0  ;;  %v353_v5 = vmul.f32 %v535_v4, %v218_v58  ;;  %vm283_vm12 = vcmp.gt.f32.partialorder %v219_v59, 0.0 }
  0x50   :  { %v354_v6 = vmul.f32 %v535_v4, %v219_v59  ;;  %vm284_vm13 = vcmp.gt.f32.partialorder %v220_v61, 0.0  ;;  %v355_v7 = vmul.f32 %v535_v4, %v220_v61  ;;  %v221_v8 = vadd.f32 %v529_v2, %v150_v62 }
  0x51   :  { %v416_v1 = vsel %vm281_vm10, %v217_v57, %v352_v3  ;;  %v222_v9 = vadd.f32 %v529_v2, %v151_v63  ;;  %v417_v10 = vsel %vm282_vm11, %v218_v58, %v353_v5 }
  0x52   :  { %480 = vst [vmem:[%s1116_s4 + $0x1d0] sm:$0xff] %v416_v1  ;;  %v418_v11 = vsel %vm283_vm12, %v219_v59, %v354_v6  ;;  %481 = vst [vmem:[%s1116_s4 + $0x1d8] sm:$0xff] %v417_v10  ;;  %v419_v12 = vsel %vm284_vm13, %v220_v61, %v355_v7  ;;  %vm285_vm14 = vcmp.gt.f32.partialorder %v221_v8, 0.0  ;;  %v356_v13 = vmul.f32 %v535_v4, %v221_v8 }
  0x53   :  { %482 = vst [vmem:[%s1116_s4 + $0x1e0] sm:$0xff] %v418_v11  ;;  %vm286_vm15 = vcmp.gt.f32.partialorder %v222_v9, 0.0  ;;  %483 = vst [vmem:[%s1116_s4 + $0x1e8] sm:$0xff] %v419_v12  ;;  %v357_v2 = vmul.f32 %v535_v4, %v222_v9 }
  0x54   :  { %v420_v14 = vsel %vm285_vm14, %v221_v8, %v356_v13 }
  0x55   :  { %484 = vst [vmem:[%s1116_s4 + $0x1f0] sm:$0xff] %v420_v14  ;;  %v421_v15 = vsel %vm286_vm15, %v222_v9, %v357_v2 }
  0x56   :  { %485 = vst [vmem:[%s1116_s4 + $0x1f8] sm:$0xff] %v421_v15 }

// kernel: a_call__.18
= control target key start
LH: loop header
LB: loop body
LE: loop exit
PB: predicated region body
PF: predicated region fallthrough
CT: control target
= control target key end

     0   :  { %s1168_s0 = inlined_call_operand.vmem [shape: f32[512,128], index: 0, kind: input, shape index: {}]   ;;  %s1169_s1 = inlined_call_operand.vmem [shape: f32[1,128], index: 1, kind: input, shape index: {}]   ;;  %s1170_s2 = inlined_call_operand.vmem [shape: f32[1,128], index: 2, kind: input, shape index: {}]   ;;  %s1171_s3 = inlined_call_operand.vmem [shape: f32[1,128], index: 3, kind: input, shape index: {}]   ;;  %s1172_s4 = inlined_call_operand.vmem [shape: f32[512,128], index: 4, kind: input, shape index: {}]   ;;  %s1173_s5 = inlined_call_operand.vmem [shape: f32[512,128], index: 5, kind: output, shape index: {}]  }
   0x1   :  { %v20_v0 = vld [vmem:[%s1168_s0] sm:$0xff]  ;;  %v21_v4 = vld [vmem:[%s1168_s0 + $0x8] sm:$0xff]  ;;  %v22_v7 = vld [vmem:[%s1168_s0 + $0x10] sm:$0xff] }
   0x2   :  { %v460_v1 = vld [vmem:[%s1169_s1] ss:$0 sm:$0xff]  ;;  %v23_v8 = vld [vmem:[%s1168_s0 + $0x18] sm:$0xff]  ;;  %v227_v10 = vld [vmem:[%s1172_s4 + $0x8] sm:$0xff] }
   0x3   :  { %v465_v2 = vld [vmem:[%s1170_s2] ss:$0 sm:$0xff]  ;;  %v91_v3 = vmul.f32 %v460_v1, %v20_v0  ;;  %v92_v6 = vmul.f32 %v460_v1, %v21_v4  ;;  %v93_v11 = vmul.f32 %v460_v1, %v22_v7  ;;  %v228_v12 = vld [vmem:[%s1172_s4 + $0x10] sm:$0xff]  ;;  %v94_v13 = vmul.f32 %v460_v1, %v23_v8  ;;  %v229_v16 = vld [vmem:[%s1172_s4 + $0x18] sm:$0xff] }
   0x4   :  { %v226_v5 = vld [vmem:[%s1172_s4] sm:$0xff]  ;;  %v25_v18 = vld [vmem:[%s1168_s0 + $0x28] sm:$0xff]  ;;  %v26_v19 = vld [vmem:[%s1168_s0 + $0x30] sm:$0xff] }
   0x5   :  { %v162_v9 = vadd.f32 %v465_v2, %v91_v3  ;;  %v24_v14 = vld [vmem:[%s1168_s0 + $0x20] sm:$0xff]  ;;  %v163_v15 = vadd.f32 %v465_v2, %v92_v6  ;;  %v164_v21 = vadd.f32 %v465_v2, %v93_v11  ;;  %v165_v22 = vadd.f32 %v465_v2, %v94_v13  ;;  %v27_v25 = vld [vmem:[%s1168_s0 + $0x38] sm:$0xff]  ;;  %v231_v28 = vld [vmem:[%s1172_s4 + $0x28] sm:$0xff] }
   0x6   :  { %v95_v17 = vmul.f32 %v460_v1, %v24_v14  ;;  %v230_v23 = vld [vmem:[%s1172_s4 + $0x20] sm:$0xff]  ;;  %v96_v24 = vmul.f32 %v460_v1, %v25_v18  ;;  %v97_v29 = vmul.f32 %v460_v1, %v26_v19  ;;  %v98_v30 = vmul.f32 %v460_v1, %v27_v25  ;;  %v29_v32 = vld [vmem:[%s1168_s0 + $0x48] sm:$0xff]  ;;  %v232_v36 = vld [vmem:[%s1172_s4 + $0x30] sm:$0xff] }
   0x7   :  { %v290_v20 = vadd.f32 %v226_v5, %v162_v9  ;;  %v291_v26 = vadd.f32 %v227_v10, %v163_v15  ;;  %v28_v31 = vld [vmem:[%s1168_s0 + $0x40] sm:$0xff]  ;;  %v292_v33 = vadd.f32 %v228_v12, %v164_v21  ;;  %v293_v34 = vadd.f32 %v229_v16, %v165_v22  ;;  %v233_v37 = vld [vmem:[%s1172_s4 + $0x38] sm:$0xff]  ;;  %v30_v39 = vld [vmem:[%s1168_s0 + $0x50] sm:$0xff] }
   0x8   :  { %v166_v27 = vadd.f32 %v465_v2, %v95_v17  ;;  %v167_v35 = vadd.f32 %v465_v2, %v96_v24  ;;  %v99_v38 = vmul.f32 %v460_v1, %v28_v31  ;;  %v168_v41 = vadd.f32 %v465_v2, %v97_v29  ;;  %v234_v43 = vld [vmem:[%s1172_s4 + $0x40] sm:$0xff]  ;;  %v31_v45 = vld [vmem:[%s1168_s0 + $0x58] sm:$0xff]  ;;  %v235_v49 = vld [vmem:[%s1172_s4 + $0x48] sm:$0xff] }
   0x9   :  { %354 = vst [vmem:[%s1173_s5] sm:$0xff] %v290_v20  ;;  %355 = vst [vmem:[%s1173_s5 + $0x8] sm:$0xff] %v291_v26  ;;  %v169_v42 = vadd.f32 %v465_v2, %v98_v30  ;;  %v100_v44 = vmul.f32 %v460_v1, %v29_v32  ;;  %v32_v46 = vld [vmem:[%s1168_s0 + $0x60] sm:$0xff]  ;;  %v101_v50 = vmul.f32 %v460_v1, %v30_v39  ;;  %v236_v51 = vld [vmem:[%s1172_s4 + $0x50] sm:$0xff] }
   0xa   :  { %v294_v40 = vadd.f32 %v230_v23, %v166_v27  ;;  %356 = vst [vmem:[%s1173_s5 + $0x10] sm:$0xff] %v292_v33  ;;  %357 = vst [vmem:[%s1173_s5 + $0x18] sm:$0xff] %v293_v34  ;;  %v295_v47 = vadd.f32 %v231_v28, %v167_v35  ;;  %v170_v48 = vadd.f32 %v465_v2, %v99_v38  ;;  %v33_v53 = vld [vmem:[%s1168_s0 + $0x68] sm:$0xff]  ;;  %v237_v57 = vld [vmem:[%s1172_s4 + $0x58] sm:$0xff] }
   0xb   :  { %v102_v52 = vmul.f32 %v460_v1, %v31_v45  ;;  %v296_v54 = vadd.f32 %v232_v36, %v168_v41  ;;  %v297_v55 = vadd.f32 %v233_v37, %v169_v42  ;;  %v171_v56 = vadd.f32 %v465_v2, %v100_v44  ;;  %v34_v59 = vld [vmem:[%s1168_s0 + $0x70] sm:$0xff]  ;;  %v35_v60 = vld [vmem:[%s1168_s0 + $0x78] sm:$0xff]  ;;  %v238_v0 = vld [vmem:[%s1172_s4 + $0x60] sm:$0xff] }
   0xc   :  { %358 = vst [vmem:[%s1173_s5 + $0x20] sm:$0xff] %v294_v40  ;;  %v103_v58 = vmul.f32 %v460_v1, %v32_v46  ;;  %359 = vst [vmem:[%s1173_s5 + $0x28] sm:$0xff] %v295_v47  ;;  %v298_v61 = vadd.f32 %v234_v43, %v170_v48  ;;  %v172_v62 = vadd.f32 %v465_v2, %v101_v50  ;;  %v36_v4 = vld [vmem:[%s1168_s0 + $0x80] sm:$0xff]  ;;  %v239_v7 = vld [vmem:[%s1172_s4 + $0x68] sm:$0xff] }
   0xd   :  { %v173_v63 = vadd.f32 %v465_v2, %v102_v52  ;;  %v104_v3 = vmul.f32 %v460_v1, %v33_v53  ;;  %360 = vst [vmem:[%s1173_s5 + $0x30] sm:$0xff] %v296_v54  ;;  %361 = vst [vmem:[%s1173_s5 + $0x38] sm:$0xff] %v297_v55  ;;  %v299_v5 = vadd.f32 %v235_v49, %v171_v56  ;;  %v37_v10 = vld [vmem:[%s1168_s0 + $0x88] sm:$0xff]  ;;  %v38_v11 = vld [vmem:[%s1168_s0 + $0x90] sm:$0xff] }
   0xe   :  { %v174_v6 = vadd.f32 %v465_v2, %v103_v58  ;;  %v105_v8 = vmul.f32 %v460_v1, %v34_v59  ;;  %v106_v9 = vmul.f32 %v460_v1, %v35_v60  ;;  %362 = vst [vmem:[%s1173_s5 + $0x40] sm:$0xff] %v298_v61  ;;  %v300_v12 = vadd.f32 %v236_v51, %v172_v62  ;;  %v240_v15 = vld [vmem:[%s1172_s4 + $0x70] sm:$0xff]  ;;  %v241_v16 = vld [vmem:[%s1172_s4 + $0x78] sm:$0xff]  ;;  %v242_v22 = vld [vmem:[%s1172_s4 + $0x80] sm:$0xff] }
   0xf   :  { %v301_v13 = vadd.f32 %v237_v57, %v173_v63  ;;  %v175_v14 = vadd.f32 %v465_v2, %v104_v3  ;;  %v107_v17 = vmul.f32 %v460_v1, %v36_v4  ;;  %v39_v18 = vld [vmem:[%s1168_s0 + $0x98] sm:$0xff]  ;;  %363 = vst [vmem:[%s1173_s5 + $0x48] sm:$0xff] %v299_v5  ;;  %v108_v23 = vmul.f32 %v460_v1, %v37_v10  ;;  %v40_v24 = vld [vmem:[%s1168_s0 + $0xa0] sm:$0xff]  ;;  %v41_v25 = vld [vmem:[%s1168_s0 + $0xa8] sm:$0xff] }
  0x10   :  { %v302_v19 = vadd.f32 %v238_v0, %v174_v6  ;;  %v176_v20 = vadd.f32 %v465_v2, %v105_v8  ;;  %v177_v21 = vadd.f32 %v465_v2, %v106_v9  ;;  %364 = vst [vmem:[%s1173_s5 + $0x50] sm:$0xff] %v300_v12  ;;  %v243_v28 = vld [vmem:[%s1172_s4 + $0x88] sm:$0xff]  ;;  %v109_v29 = vmul.f32 %v460_v1, %v38_v11  ;;  %v244_v30 = vld [vmem:[%s1172_s4 + $0x90] sm:$0xff]  ;;  %v245_v36 = vld [vmem:[%s1172_s4 + $0x98] sm:$0xff] }
  0x11   :  { %365 = vst [vmem:[%s1173_s5 + $0x58] sm:$0xff] %v301_v13  ;;  %v303_v26 = vadd.f32 %v239_v7, %v175_v14  ;;  %v178_v27 = vadd.f32 %v465_v2, %v107_v17  ;;  %v110_v31 = vmul.f32 %v460_v1, %v39_v18  ;;  %v42_v32 = vld [vmem:[%s1168_s0 + $0xb0] sm:$0xff]  ;;  %v179_v35 = vadd.f32 %v465_v2, %v108_v23  ;;  %v43_v38 = vld [vmem:[%s1168_s0 + $0xb8] sm:$0xff]  ;;  %v44_v39 = vld [vmem:[%s1168_s0 + $0xc0] sm:$0xff] }
  0x12   :  { %366 = vst [vmem:[%s1173_s5 + $0x60] sm:$0xff] %v302_v19  ;;  %v304_v33 = vadd.f32 %v240_v15, %v176_v20  ;;  %v305_v34 = vadd.f32 %v241_v16, %v177_v21  ;;  %v111_v37 = vmul.f32 %v460_v1, %v40_v24  ;;  %v180_v41 = vadd.f32 %v465_v2, %v109_v29  ;;  %v246_v43 = vld [vmem:[%s1172_s4 + $0xa0] sm:$0xff]  ;;  %v45_v45 = vld [vmem:[%s1168_s0 + $0xc8] sm:$0xff]  ;;  %v46_v51 = vld [vmem:[%s1168_s0 + $0xd0] sm:$0xff] }
  0x13   :  { %367 = vst [vmem:[%s1173_s5 + $0x68] sm:$0xff] %v303_v26  ;;  %v306_v40 = vadd.f32 %v242_v22, %v178_v27  ;;  %v181_v42 = vadd.f32 %v465_v2, %v110_v31  ;;  %v112_v44 = vmul.f32 %v460_v1, %v41_v25  ;;  %v307_v46 = vadd.f32 %v243_v28, %v179_v35  ;;  %v247_v48 = vld [vmem:[%s1172_s4 + $0xa8] sm:$0xff]  ;;  %v47_v52 = vld [vmem:[%s1168_s0 + $0xd8] sm:$0xff]  ;;  %v248_v56 = vld [vmem:[%s1172_s4 + $0xb0] sm:$0xff] }
  0x14   :  { %368 = vst [vmem:[%s1173_s5 + $0x70] sm:$0xff] %v304_v33  ;;  %369 = vst [vmem:[%s1173_s5 + $0x78] sm:$0xff] %v305_v34  ;;  %v182_v47 = vadd.f32 %v465_v2, %v111_v37  ;;  %v113_v49 = vmul.f32 %v460_v1, %v42_v32  ;;  %v114_v50 = vmul.f32 %v460_v1, %v43_v38  ;;  %v249_v57 = vld [vmem:[%s1172_s4 + $0xb8] sm:$0xff]  ;;  %v48_v59 = vld [vmem:[%s1168_s0 + $0xe0] sm:$0xff] }
  0x15   :  { %370 = vst [vmem:[%s1173_s5 + $0x80] sm:$0xff] %v306_v40  ;;  %v308_v53 = vadd.f32 %v244_v30, %v180_v41  ;;  %v309_v54 = vadd.f32 %v245_v36, %v181_v42  ;;  %v183_v55 = vadd.f32 %v465_v2, %v112_v44  ;;  %v115_v58 = vmul.f32 %v460_v1, %v44_v39  ;;  %v250_v63 = vld [vmem:[%s1172_s4 + $0xc0] sm:$0xff]  ;;  %v49_v3 = vld [vmem:[%s1168_s0 + $0xe8] sm:$0xff]  ;;  %v50_v9 = vld [vmem:[%s1168_s0 + $0xf0] sm:$0xff] }
  0x16   :  { %371 = vst [vmem:[%s1173_s5 + $0x88] sm:$0xff] %v307_v46  ;;  %v310_v60 = vadd.f32 %v246_v43, %v182_v47  ;;  %v184_v61 = vadd.f32 %v465_v2, %v113_v49  ;;  %v185_v62 = vadd.f32 %v465_v2, %v114_v50  ;;  %v116_v0 = vmul.f32 %v460_v1, %v45_v45  ;;  %v251_v6 = vld [vmem:[%s1172_s4 + $0xc8] sm:$0xff]  ;;  %v51_v10 = vld [vmem:[%s1168_s0 + $0xf8] sm:$0xff]  ;;  %v252_v14 = vld [vmem:[%s1172_s4 + $0xd0] sm:$0xff] }
  0x17   :  { %372 = vst [vmem:[%s1173_s5 + $0x90] sm:$0xff] %v308_v53  ;;  %373 = vst [vmem:[%s1173_s5 + $0x98] sm:$0xff] %v309_v54  ;;  %v311_v4 = vadd.f32 %v247_v48, %v183_v55  ;;  %v186_v5 = vadd.f32 %v465_v2, %v115_v58  ;;  %v117_v7 = vmul.f32 %v460_v1, %v46_v51  ;;  %v253_v15 = vld [vmem:[%s1172_s4 + $0xd8] sm:$0xff]  ;;  %v52_v17 = vld [vmem:[%s1168_s0 + $0x100] sm:$0xff] }
  0x18   :  { %v118_v8 = vmul.f32 %v460_v1, %v47_v52  ;;  %374 = vst [vmem:[%s1173_s5 + $0xa0] sm:$0xff] %v310_v60  ;;  %v312_v11 = vadd.f32 %v248_v56, %v184_v61  ;;  %v313_v12 = vadd.f32 %v249_v57, %v185_v62  ;;  %v187_v13 = vadd.f32 %v465_v2, %v116_v0  ;;  %v254_v21 = vld [vmem:[%s1172_s4 + $0xe0] sm:$0xff]  ;;  %v53_v23 = vld [vmem:[%s1168_s0 + $0x108] sm:$0xff]  ;;  %v54_v29 = vld [vmem:[%s1168_s0 + $0x110] sm:$0xff] }
  0x19   :  { %v119_v16 = vmul.f32 %v460_v1, %v48_v59  ;;  %375 = vst [vmem:[%s1173_s5 + $0xa8] sm:$0xff] %v311_v4  ;;  %v314_v18 = vadd.f32 %v250_v63, %v186_v5  ;;  %v188_v19 = vadd.f32 %v465_v2, %v117_v7  ;;  %v120_v22 = vmul.f32 %v460_v1, %v49_v3  ;;  %v255_v26 = vld [vmem:[%s1172_s4 + $0xe8] sm:$0xff]  ;;  %v55_v30 = vld [vmem:[%s1168_s0 + $0x118] sm:$0xff]  ;;  %v256_v34 = vld [vmem:[%s1172_s4 + $0xf0] sm:$0xff] }
  0x1a   :  { %v189_v20 = vadd.f32 %v465_v2, %v118_v8  ;;  %376 = vst [vmem:[%s1173_s5 + $0xb0] sm:$0xff] %v312_v11  ;;  %377 = vst [vmem:[%s1173_s5 + $0xb8] sm:$0xff] %v313_v12  ;;  %v315_v24 = vadd.f32 %v251_v6, %v187_v13  ;;  %v121_v27 = vmul.f32 %v460_v1, %v50_v9  ;;  %v257_v35 = vld [vmem:[%s1172_s4 + $0xf8] sm:$0xff]  ;;  %v56_v37 = vld [vmem:[%s1168_s0 + $0x120] sm:$0xff] }
  0x1b   :  { %v190_v25 = vadd.f32 %v465_v2, %v119_v16  ;;  %v122_v28 = vmul.f32 %v460_v1, %v51_v10  ;;  %378 = vst [vmem:[%s1173_s5 + $0xc0] sm:$0xff] %v314_v18  ;;  %v316_v31 = vadd.f32 %v252_v14, %v188_v19  ;;  %v191_v33 = vadd.f32 %v465_v2, %v120_v22  ;;  %v258_v41 = vld [vmem:[%s1172_s4 + $0x100] sm:$0xff]  ;;  %v57_v43 = vld [vmem:[%s1168_s0 + $0x128] sm:$0xff]  ;;  %v58_v49 = vld [vmem:[%s1168_s0 + $0x130] sm:$0xff] }
  0x1c   :  { %v317_v32 = vadd.f32 %v253_v15, %v189_v20  ;;  %v123_v36 = vmul.f32 %v460_v1, %v52_v17  ;;  %379 = vst [vmem:[%s1173_s5 + $0xc8] sm:$0xff] %v315_v24  ;;  %v192_v39 = vadd.f32 %v465_v2, %v121_v27  ;;  %v124_v42 = vmul.f32 %v460_v1, %v53_v23  ;;  %v259_v46 = vld [vmem:[%s1172_s4 + $0x108] sm:$0xff]  ;;  %v59_v50 = vld [vmem:[%s1168_s0 + $0x138] sm:$0xff]  ;;  %v260_v54 = vld [vmem:[%s1172_s4 + $0x110] sm:$0xff] }
  0x1d   :  { %v318_v38 = vadd.f32 %v254_v21, %v190_v25  ;;  %v193_v40 = vadd.f32 %v465_v2, %v122_v28  ;;  %380 = vst [vmem:[%s1173_s5 + $0xd0] sm:$0xff] %v316_v31  ;;  %v319_v44 = vadd.f32 %v255_v26, %v191_v33  ;;  %v125_v47 = vmul.f32 %v460_v1, %v54_v29  ;;  %v261_v55 = vld [vmem:[%s1172_s4 + $0x118] sm:$0xff]  ;;  %v60_v57 = vld [vmem:[%s1168_s0 + $0x140] sm:$0xff]  ;;  %v61_v63 = vld [vmem:[%s1168_s0 + $0x148] sm:$0xff] }
  0x1e   :  { %381 = vst [vmem:[%s1173_s5 + $0xd8] sm:$0xff] %v317_v32  ;;  %v194_v45 = vadd.f32 %v465_v2, %v123_v36  ;;  %v126_v48 = vmul.f32 %v460_v1, %v55_v30  ;;  %v320_v51 = vadd.f32 %v256_v34, %v192_v39  ;;  %v195_v53 = vadd.f32 %v465_v2, %v124_v42  ;;  %v262_v61 = vld [vmem:[%s1172_s4 + $0x120] sm:$0xff]  ;;  %v263_v4 = vld [vmem:[%s1172_s4 + $0x128] sm:$0xff]  ;;  %v62_v7 = vld [vmem:[%s1168_s0 + $0x150] sm:$0xff] }
  0x1f   :  { %382 = vst [vmem:[%s1173_s5 + $0xe0] sm:$0xff] %v318_v38  ;;  %v321_v52 = vadd.f32 %v257_v35, %v193_v40  ;;  %v127_v56 = vmul.f32 %v460_v1, %v56_v37  ;;  %383 = vst [vmem:[%s1173_s5 + $0xe8] sm:$0xff] %v319_v44  ;;  %v196_v59 = vadd.f32 %v465_v2, %v125_v47  ;;  %v63_v8 = vld [vmem:[%s1168_s0 + $0x158] sm:$0xff]  ;;  %v264_v12 = vld [vmem:[%s1172_s4 + $0x130] sm:$0xff] }
  0x20   :  { %v322_v58 = vadd.f32 %v258_v41, %v194_v45  ;;  %v197_v60 = vadd.f32 %v465_v2, %v126_v48  ;;  %v128_v62 = vmul.f32 %v460_v1, %v57_v43  ;;  %384 = vst [vmem:[%s1173_s5 + $0xf0] sm:$0xff] %v320_v51  ;;  %v323_v0 = vadd.f32 %v259_v46, %v195_v53  ;;  %v265_v13 = vld [vmem:[%s1172_s4 + $0x138] sm:$0xff]  ;;  %v64_v15 = vld [vmem:[%s1168_s0 + $0x160] sm:$0xff]  ;;  %v65_v21 = vld [vmem:[%s1168_s0 + $0x168] sm:$0xff] }
  0x21   :  { %385 = vst [vmem:[%s1173_s5 + $0xf8] sm:$0xff] %v321_v52  ;;  %v198_v3 = vadd.f32 %v465_v2, %v127_v56  ;;  %v129_v5 = vmul.f32 %v460_v1, %v58_v49  ;;  %v130_v6 = vmul.f32 %v460_v1, %v59_v50  ;;  %v324_v9 = vadd.f32 %v260_v54, %v196_v59  ;;  %v266_v19 = vld [vmem:[%s1172_s4 + $0x140] sm:$0xff]  ;;  %v267_v24 = vld [vmem:[%s1172_s4 + $0x148] sm:$0xff]  ;;  %v66_v27 = vld [vmem:[%s1168_s0 + $0x170] sm:$0xff] }
  0x22   :  { %386 = vst [vmem:[%s1173_s5 + $0x100] sm:$0xff] %v322_v58  ;;  %v325_v10 = vadd.f32 %v261_v55, %v197_v60  ;;  %v199_v11 = vadd.f32 %v465_v2, %v128_v62  ;;  %v131_v14 = vmul.f32 %v460_v1, %v60_v57  ;;  %387 = vst [vmem:[%s1173_s5 + $0x108] sm:$0xff] %v323_v0  ;;  %v67_v28 = vld [vmem:[%s1168_s0 + $0x178] sm:$0xff]  ;;  %v268_v32 = vld [vmem:[%s1172_s4 + $0x150] sm:$0xff] }
  0x23   :  { %v326_v16 = vadd.f32 %v262_v61, %v198_v3  ;;  %v200_v17 = vadd.f32 %v465_v2, %v129_v5  ;;  %v201_v18 = vadd.f32 %v465_v2, %v130_v6  ;;  %v132_v20 = vmul.f32 %v460_v1, %v61_v63  ;;  %388 = vst [vmem:[%s1173_s5 + $0x110] sm:$0xff] %v324_v9  ;;  %v269_v33 = vld [vmem:[%s1172_s4 + $0x158] sm:$0xff]  ;;  %v68_v35 = vld [vmem:[%s1168_s0 + $0x180] sm:$0xff]  ;;  %v69_v41 = vld [vmem:[%s1168_s0 + $0x188] sm:$0xff] }
  0x24   :  { %389 = vst [vmem:[%s1173_s5 + $0x118] sm:$0xff] %v325_v10  ;;  %v327_v22 = vadd.f32 %v263_v4, %v199_v11  ;;  %v202_v23 = vadd.f32 %v465_v2, %v131_v14  ;;  %v133_v25 = vmul.f32 %v460_v1, %v62_v7  ;;  %v134_v26 = vmul.f32 %v460_v1, %v63_v8  ;;  %v270_v39 = vld [vmem:[%s1172_s4 + $0x160] sm:$0xff]  ;;  %v271_v44 = vld [vmem:[%s1172_s4 + $0x168] sm:$0xff]  ;;  %v70_v47 = vld [vmem:[%s1168_s0 + $0x190] sm:$0xff] }
  0x25   :  { %390 = vst [vmem:[%s1173_s5 + $0x120] sm:$0xff] %v326_v16  ;;  %v328_v29 = vadd.f32 %v264_v12, %v200_v17  ;;  %v329_v30 = vadd.f32 %v265_v13, %v201_v18  ;;  %v203_v31 = vadd.f32 %v465_v2, %v132_v20  ;;  %v135_v34 = vmul.f32 %v460_v1, %v64_v15  ;;  %v71_v48 = vld [vmem:[%s1168_s0 + $0x198] sm:$0xff]  ;;  %v272_v52 = vld [vmem:[%s1172_s4 + $0x170] sm:$0xff]  ;;  %v72_v55 = vld [vmem:[%s1168_s0 + $0x1a0] sm:$0xff] }
  0x26   :  { %391 = vst [vmem:[%s1173_s5 + $0x128] sm:$0xff] %v327_v22  ;;  %v330_v36 = vadd.f32 %v266_v19, %v202_v23  ;;  %v204_v37 = vadd.f32 %v465_v2, %v133_v25  ;;  %v205_v38 = vadd.f32 %v465_v2, %v134_v26  ;;  %v136_v40 = vmul.f32 %v460_v1, %v65_v21  ;;  %v273_v53 = vld [vmem:[%s1172_s4 + $0x178] sm:$0xff]  ;;  %v274_v59 = vld [vmem:[%s1172_s4 + $0x180] sm:$0xff]  ;;  %v73_v61 = vld [vmem:[%s1168_s0 + $0x1a8] sm:$0xff] }
  0x27   :  { %392 = vst [vmem:[%s1173_s5 + $0x130] sm:$0xff] %v328_v29  ;;  %393 = vst [vmem:[%s1173_s5 + $0x138] sm:$0xff] %v329_v30  ;;  %v331_v42 = vadd.f32 %v267_v24, %v203_v31  ;;  %v206_v43 = vadd.f32 %v465_v2, %v135_v34  ;;  %v137_v45 = vmul.f32 %v460_v1, %v66_v27  ;;  %v275_v0 = vld [vmem:[%s1172_s4 + $0x188] sm:$0xff]  ;;  %v74_v5 = vld [vmem:[%s1168_s0 + $0x1b0] sm:$0xff] }
  0x28   :  { %v138_v46 = vmul.f32 %v460_v1, %v67_v28  ;;  %394 = vst [vmem:[%s1173_s5 + $0x140] sm:$0xff] %v330_v36  ;;  %v332_v49 = vadd.f32 %v268_v32, %v204_v37  ;;  %v333_v50 = vadd.f32 %v269_v33, %v205_v38  ;;  %v207_v51 = vadd.f32 %v465_v2, %v136_v40  ;;  %v75_v6 = vld [vmem:[%s1168_s0 + $0x1b8] sm:$0xff]  ;;  %v276_v10 = vld [vmem:[%s1172_s4 + $0x190] sm:$0xff]  ;;  %v76_v13 = vld [vmem:[%s1168_s0 + $0x1c0] sm:$0xff] }
  0x29   :  { %v139_v54 = vmul.f32 %v460_v1, %v68_v35  ;;  %395 = vst [vmem:[%s1173_s5 + $0x148] sm:$0xff] %v331_v42  ;;  %v334_v56 = vadd.f32 %v270_v39, %v206_v43  ;;  %v208_v57 = vadd.f32 %v465_v2, %v137_v45  ;;  %v140_v60 = vmul.f32 %v460_v1, %v69_v41  ;;  %v277_v11 = vld [vmem:[%s1172_s4 + $0x198] sm:$0xff]  ;;  %v278_v17 = vld [vmem:[%s1172_s4 + $0x1a0] sm:$0xff]  ;;  %v77_v19 = vld [vmem:[%s1168_s0 + $0x1c8] sm:$0xff] }
  0x2a   :  { %v209_v58 = vadd.f32 %v465_v2, %v138_v46  ;;  %396 = vst [vmem:[%s1173_s5 + $0x150] sm:$0xff] %v332_v49  ;;  %397 = vst [vmem:[%s1173_s5 + $0x158] sm:$0xff] %v333_v50  ;;  %v335_v62 = vadd.f32 %v271_v44, %v207_v51  ;;  %v141_v3 = vmul.f32 %v460_v1, %v70_v47  ;;  %v279_v22 = vld [vmem:[%s1172_s4 + $0x1a8] sm:$0xff]  ;;  %v78_v25 = vld [vmem:[%s1168_s0 + $0x1d0] sm:$0xff] }
  0x2b   :  { %v210_v63 = vadd.f32 %v465_v2, %v139_v54  ;;  %v142_v4 = vmul.f32 %v460_v1, %v71_v48  ;;  %398 = vst [vmem:[%s1173_s5 + $0x160] sm:$0xff] %v334_v56  ;;  %v336_v7 = vadd.f32 %v272_v52, %v208_v57  ;;  %v211_v9 = vadd.f32 %v465_v2, %v140_v60  ;;  %v79_v26 = vld [vmem:[%s1168_s0 + $0x1d8] sm:$0xff]  ;;  %v280_v30 = vld [vmem:[%s1172_s4 + $0x1b0] sm:$0xff]  ;;  %v80_v33 = vld [vmem:[%s1168_s0 + $0x1e0] sm:$0xff] }
  0x2c   :  { %v337_v8 = vadd.f32 %v273_v53, %v209_v58  ;;  %v143_v12 = vmul.f32 %v460_v1, %v72_v55  ;;  %399 = vst [vmem:[%s1173_s5 + $0x168] sm:$0xff] %v335_v62  ;;  %v212_v15 = vadd.f32 %v465_v2, %v141_v3  ;;  %v144_v18 = vmul.f32 %v460_v1, %v73_v61  ;;  %v281_v31 = vld [vmem:[%s1172_s4 + $0x1b8] sm:$0xff]  ;;  %v282_v37 = vld [vmem:[%s1172_s4 + $0x1c0] sm:$0xff]  ;;  %v81_v39 = vld [vmem:[%s1168_s0 + $0x1e8] sm:$0xff] }
  0x2d   :  { %v338_v14 = vadd.f32 %v274_v59, %v210_v63  ;;  %v213_v16 = vadd.f32 %v465_v2, %v142_v4  ;;  %400 = vst [vmem:[%s1173_s5 + $0x170] sm:$0xff] %v336_v7  ;;  %v339_v20 = vadd.f32 %v275_v0, %v211_v9  ;;  %v145_v23 = vmul.f32 %v460_v1, %v74_v5  ;;  %v283_v42 = vld [vmem:[%s1172_s4 + $0x1c8] sm:$0xff]  ;;  %v82_v45 = vld [vmem:[%s1168_s0 + $0x1f0] sm:$0xff]  ;;  %v83_v46 = vld [vmem:[%s1168_s0 + $0x1f8] sm:$0xff] }
  0x2e   :  { %401 = vst [vmem:[%s1173_s5 + $0x178] sm:$0xff] %v337_v8  ;;  %v214_v21 = vadd.f32 %v465_v2, %v143_v12  ;;  %v146_v24 = vmul.f32 %v460_v1, %v75_v6  ;;  %v340_v27 = vadd.f32 %v276_v10, %v212_v15  ;;  %v215_v29 = vadd.f32 %v465_v2, %v144_v18  ;;  %v284_v50 = vld [vmem:[%s1172_s4 + $0x1d0] sm:$0xff]  ;;  %v285_v51 = vld [vmem:[%s1172_s4 + $0x1d8] sm:$0xff]  ;;  %v286_v56 = vld [vmem:[%s1172_s4 + $0x1e0] sm:$0xff] }
  0x2f   :  { %402 = vst [vmem:[%s1173_s5 + $0x180] sm:$0xff] %v338_v14  ;;  %v341_v28 = vadd.f32 %v277_v11, %v213_v16  ;;  %v147_v32 = vmul.f32 %v460_v1, %v76_v13  ;;  %403 = vst [vmem:[%s1173_s5 + $0x188] sm:$0xff] %v339_v20  ;;  %v216_v35 = vadd.f32 %v465_v2, %v145_v23  ;;  %v287_v60 = vld [vmem:[%s1172_s4 + $0x1e8] sm:$0xff]  ;;  %v288_v4 = vld [vmem:[%s1172_s4 + $0x1f0] sm:$0xff] }
  0x30   :  { %v342_v34 = vadd.f32 %v278_v17, %v214_v21  ;;  %v217_v36 = vadd.f32 %v465_v2, %v146_v24  ;;  %v148_v38 = vmul.f32 %v460_v1, %v77_v19  ;;  %404 = vst [vmem:[%s1173_s5 + $0x190] sm:$0xff] %v340_v27  ;;  %v343_v40 = vadd.f32 %v279_v22, %v215_v29  ;;  %v289_v5 = vld [vmem:[%s1172_s4 + $0x1f8] sm:$0xff] }
  0x31   :  { %405 = vst [vmem:[%s1173_s5 + $0x198] sm:$0xff] %v341_v28  ;;  %v218_v41 = vadd.f32 %v465_v2, %v147_v32  ;;  %v149_v43 = vmul.f32 %v460_v1, %v78_v25  ;;  %v150_v44 = vmul.f32 %v460_v1, %v79_v26  ;;  %v344_v47 = vadd.f32 %v280_v30, %v216_v35 }
  0x32   :  { %406 = vst [vmem:[%s1173_s5 + $0x1a0] sm:$0xff] %v342_v34  ;;  %v345_v48 = vadd.f32 %v281_v31, %v217_v36  ;;  %v219_v49 = vadd.f32 %v465_v2, %v148_v38  ;;  %v151_v52 = vmul.f32 %v460_v1, %v80_v33  ;;  %407 = vst [vmem:[%s1173_s5 + $0x1a8] sm:$0xff] %v343_v40 }
  0x33   :  { %v346_v53 = vadd.f32 %v282_v37, %v218_v41  ;;  %v220_v54 = vadd.f32 %v465_v2, %v149_v43  ;;  %v221_v55 = vadd.f32 %v465_v2, %v150_v44  ;;  %v152_v57 = vmul.f32 %v460_v1, %v81_v39  ;;  %408 = vst [vmem:[%s1173_s5 + $0x1b0] sm:$0xff] %v344_v47 }
  0x34   :  { %409 = vst [vmem:[%s1173_s5 + $0x1b8] sm:$0xff] %v345_v48  ;;  %v347_v58 = vadd.f32 %v283_v42, %v219_v49  ;;  %v222_v59 = vadd.f32 %v465_v2, %v151_v52  ;;  %v153_v61 = vmul.f32 %v460_v1, %v82_v45  ;;  %v154_v62 = vmul.f32 %v460_v1, %v83_v46 }
  0x35   :  { %410 = vst [vmem:[%s1173_s5 + $0x1c0] sm:$0xff] %v346_v53  ;;  %v348_v63 = vadd.f32 %v284_v50, %v220_v54  ;;  %v349_v0 = vadd.f32 %v285_v51, %v221_v55  ;;  %v223_v3 = vadd.f32 %v465_v2, %v152_v57 }
  0x36   :  { %411 = vst [vmem:[%s1173_s5 + $0x1c8] sm:$0xff] %v347_v58  ;;  %v350_v1 = vadd.f32 %v286_v56, %v222_v59  ;;  %v224_v6 = vadd.f32 %v465_v2, %v153_v61  ;;  %v225_v7 = vadd.f32 %v465_v2, %v154_v62 }
  0x37   :  { %412 = vst [vmem:[%s1173_s5 + $0x1d0] sm:$0xff] %v348_v63  ;;  %413 = vst [vmem:[%s1173_s5 + $0x1d8] sm:$0xff] %v349_v0  ;;  %v351_v8 = vadd.f32 %v287_v60, %v223_v3 }
  0x38   :  { %414 = vst [vmem:[%s1173_s5 + $0x1e0] sm:$0xff] %v350_v1  ;;  %v352_v9 = vadd.f32 %v288_v4, %v224_v6  ;;  %v353_v10 = vadd.f32 %v289_v5, %v225_v7 }
  0x39   :  { %415 = vst [vmem:[%s1173_s5 + $0x1e8] sm:$0xff] %v351_v8 }
  0x3a   :  { %416 = vst [vmem:[%s1173_s5 + $0x1f0] sm:$0xff] %v352_v9  ;;  %417 = vst [vmem:[%s1173_s5 + $0x1f8] sm:$0xff] %v353_v10 }

// kernel: a_call__.25
= control target key start
LH: loop header
LB: loop body
LE: loop exit
PB: predicated region body
PF: predicated region fallthrough
CT: control target
= control target key end

     0   :  { %s2258_s21 = smov 0   ;;  %s2260_s22 = smov 0   ;;  %s2641_s0 = inlined_call_operand.vmem [shape: bf16[512,384], index: 0, kind: input, shape index: {}]   ;;  %s2642_s1 = inlined_call_operand.vmem [shape: bf16[384,128], index: 1, kind: input, shape index: {}]   ;;  %s2643_s2 = inlined_call_operand.vmem [shape: f32[1,128], index: 2, kind: input, shape index: {}]   ;;  %s2644_s3 = inlined_call_operand.vmem [shape: f32[1,128], index: 3, kind: input, shape index: {}]   ;;  %s2645_s4 = inlined_call_operand.vmem [shape: f32[1,128], index: 4, kind: input, shape index: {}]   ;;  %s2646_s5 = inlined_call_operand.vmem [shape: f32[1,128], index: 5, kind: input, shape index: {}]   ;;  %s2647_s6 = inlined_call_operand.vmem [shape: f32[512,128], index: 6, kind: output, shape index: {}]  }
   0x1   :  { %s2262_s23 = smov 0  }
   0x2 LB: > { %s35_s24 = sadd.s32 1, %s2217_s22  ;;  %p1803_p0 = scmp.ge.s32.totalorder %s2221_s23, 1  ;;  %s2221_s23 = sphi %s2262_s23, %s16_s23   ;;  %s2217_s22 = sphi %s2260_s22, %s2649_s22   ;;  %s2213_s21 = sphi %s2258_s21, %s2648_s21  }
   0x3   : > { %p37_p1 = scmp.ge.s32.totalorder %s35_s24, 2  ;;  %p290_p2 = scmp.lt.s32.totalorder %s2221_s23, 3 }
   0x5   : > { %s2651_s24 = smov (%p37_p1, %s35_s24), 0  ;;  %p291_p3 = pnand %p1803_p0, %p290_p2 }
   0x6   : > { %s1804_s27 = sshll.u32 (!%p291_p3), %s2213_s21, 5 }
   0x7   : > { %294 = sbr.rel (%p291_p3) target bundleno = 350 (0x15e), region = 44  ;;  %p350_p4 = scmp.lt.s32.totalorder (!%p291_p3), %s1804_s27, 63 }
   0xc   : > { %v2111_v0 = vld [vmem:[%s2642_s1 + $0x78] sm:$0xff]   ;;  %v2113_v2 = vld [vmem:[%s2642_s1 + $0x70] sm:$0xff]   ;;  %v2115_v4 = vld [vmem:[%s2642_s1 + $0x68] sm:$0xff]   ;;  %s2653_s27 = smov (!%p350_p4, %s1804_s27), 63 }
   0xd   : > { %v2112_v1 = vld [vmem:[%s2642_s1 + $0x38] sm:$0xff]   ;;  %1886 = vmatprep.subr.bf16.mxu0 %v2111_v0  ;;  %2070 = vmatprep.subr.bf16.mxu1 %v2111_v0  ;;  %v2114_v3 = vld [vmem:[%s2642_s1 + $0x30] sm:$0xff]   ;;  %v2116_v5 = vld [vmem:[%s2642_s1 + $0x28] sm:$0xff]   ;;  %s2086_s16 = smul.u32 12, %s2653_s27  ;;  %s1807_s20 = sshll.u32 %s2653_s27, 3 }
   0xe   : > { %1887 = vmatpush3.bf16.msra.mxu0 %v2112_v1  ;;  %2078 = vmatpush3.bf16.msra.mxu1 %v2112_v1  ;;  %v2117_v6 = vld [vmem:[%s2642_s1 + $0x60] sm:$0xff]   ;;  %v2119_v8 = vld [vmem:[%s2642_s1 + $0x58] sm:$0xff]   ;;  %v2121_v10 = vld [vmem:[%s2642_s1 + $0x50] sm:$0xff]   ;;  %s2458_s29 = scalar_lea.vmem %s2647_s6, %s1807_s20 }
   0xf   : > { %1888 = vmatprep.subr.bf16.mxu0 %v2113_v2  ;;  %2071 = vmatprep.subr.bf16.mxu1 %v2113_v2  ;;  %v2118_v7 = vld [vmem:[%s2642_s1 + $0x20] sm:$0xff]   ;;  %s2309_s26 = scalar_lea.vmem %s2641_s0, %s2086_s16  ;;  %v2120_v9 = vld [vmem:[%s2642_s1 + $0x18] sm:$0xff]   ;;  %v2122_v13 = vld [vmem:[%s2642_s1 + $0x10] sm:$0xff]  }
  0x10   : > { %v2129_v11 = vld [vmem:[%s2309_s26 + $0x4] ss:$12 sps:$4 sm:$0xff]   ;;  %v2123_v14 = vld [vmem:[%s2642_s1 + $0x48] sm:$0xff]   ;;  %v2133_v18 = vld [vmem:[%s2642_s1 + $0xb8] sm:$0xff]  }
  0x11   : > { %v2132_v12 = vld [vmem:[%s2309_s26 + $0x124] ss:$12 sps:$4 sm:$0xff]   ;;  %1003 = vmatprep.mubr.bf16.mxu0 %v2129_v11  ;;  %v2124_v15 = vld [vmem:[%s2642_s1 + $0x8] sm:$0xff]   ;;  %v2143_v28 = vld [vmem:[%s2309_s26 + $0x34] ss:$12 sps:$4 sm:$0xff]  }
  0x12   : > { %1889 = vmatpush3.bf16.msra.mxu0 %v2114_v3  ;;  %2079 = vmatpush3.bf16.msra.mxu1 %v2114_v3  ;;  %v2125_v16 = vld [vmem:[%s2642_s1 + $0x40] sm:$0xff]   ;;  %v2135_v21 = vld [vmem:[%s2309_s26 + $0x1c] ss:$12 sps:$4 sm:$0xff]   ;;  %v2134_v22 = vld [vmem:[%s2642_s1 + $0xb0] sm:$0xff]  }
  0x13   : > { %1890 = vmatprep.subr.bf16.mxu0 %v2115_v4  ;;  %2072 = vmatprep.subr.bf16.mxu1 %v2115_v4  ;;  %v2126_v17 = vld [vmem:[%s2642_s1] sm:$0xff]   ;;  %v2137_v23 = vld [vmem:[%s2309_s26 + $0x13c] ss:$12 sps:$4 sm:$0xff]   ;;  %v2150_v33 = vld [vmem:[%s2642_s1 + $0x90] sm:$0xff]  }
  0x14   : > { %1099 = vmatprep.mubr.bf16.mxu1 %v2132_v12  ;;  %v2127_v19 = vld [vmem:[%s2309_s26] ss:$12 sps:$4 sm:$0xff]   ;;  %v2139_v24 = vld [vmem:[%s2309_s26 + $0x18] ss:$12 sps:$4 sm:$0xff]   ;;  %v2147_v31 = vld [vmem:[%s2309_s26 + $0x30] ss:$12 sps:$4 sm:$0xff]  }
  0x15   : > { %v2130_v20 = vld [vmem:[%s2309_s26 + $0x120] ss:$12 sps:$4 sm:$0xff]   ;;  %v2140_v26 = vld [vmem:[%s2309_s26 + $0x138] ss:$12 sps:$4 sm:$0xff]   ;;  %v2148_v32 = vld [vmem:[%s2309_s26 + $0x150] ss:$12 sps:$4 sm:$0xff]  }
  0x16   : > { %1891 = vmatpush3.bf16.msra.mxu0 %v2116_v5  ;;  %2080 = vmatpush3.bf16.msra.mxu1 %v2116_v5  ;;  %v2141_v25 = vld [vmem:[%s2642_s1 + $0xa8] sm:$0xff]   ;;  %v2142_v27 = vld [vmem:[%s2642_s1 + $0xa0] sm:$0xff]   ;;  %v2149_v30 = vld [vmem:[%s2642_s1 + $0x98] sm:$0xff]  }
  0x17   : > { %1892 = vmatprep.subr.bf16.mxu0 %v2117_v6  ;;  %2073 = vmatprep.subr.bf16.mxu1 %v2117_v6  ;;  %v2145_v29 = vld [vmem:[%s2309_s26 + $0x154] ss:$12 sps:$4 sm:$0xff]   ;;  %v2151_v34 = vld [vmem:[%s2309_s26 + $0x4c] ss:$12 sps:$4 sm:$0xff]   ;;  %v2159_v39 = vld [vmem:[%s2309_s26 + $0x64] ss:$12 sps:$4 sm:$0xff]  }
  0x18   : > { %v2153_v35 = vld [vmem:[%s2309_s26 + $0x16c] ss:$12 sps:$4 sm:$0xff]   ;;  %v2155_v37 = vld [vmem:[%s2309_s26 + $0x48] ss:$12 sps:$4 sm:$0xff]   ;;  %v2158_v40 = vld [vmem:[%s2642_s1 + $0x80] sm:$0xff]  }
  0x19   : > { %v2157_v36 = vld [vmem:[%s2642_s1 + $0x88] sm:$0xff]   ;;  %v2166_v45 = vld [vmem:[%s2309_s26 + $0x38] ss:$12 sps:$4 sm:$0xff]   ;;  %v2168_v47 = vld [vmem:[%s2309_s26 + $0x50] ss:$12 sps:$4 sm:$0xff]  }
  0x1a   : > { %1893 = vmatpush3.bf16.msra.mxu0 %v2118_v7  ;;  %2081 = vmatpush3.bf16.msra.mxu1 %v2118_v7  ;;  %v2156_v38 = vld [vmem:[%s2309_s26 + $0x168] ss:$12 sps:$4 sm:$0xff]   ;;  %v2162_v42 = vld [vmem:[%s2309_s26 + $0x60] ss:$12 sps:$4 sm:$0xff]   ;;  %v2167_v46 = vld [vmem:[%s2309_s26 + $0x78] ss:$12 sps:$4 sm:$0xff]  }
  0x1b   : > { %1894 = vmatprep.subr.bf16.mxu0 %v2119_v8  ;;  %2074 = vmatprep.subr.bf16.mxu1 %v2119_v8  ;;  %v2161_v41 = vld [vmem:[%s2309_s26 + $0x8] ss:$12 sps:$4 sm:$0xff]   ;;  %v2163_v43 = vld [vmem:[%s2309_s26 + $0x20] ss:$12 sps:$4 sm:$0xff]   ;;  %v2172_v50 = vld [vmem:[%s2309_s26 + $0x90] ss:$12 sps:$4 sm:$0xff]  }
  0x1c   : > { %v2164_v44 = vld [vmem:[%s2309_s26 + $0x7c] ss:$12 sps:$4 sm:$0xff]   ;;  %v2169_v48 = vld [vmem:[%s2309_s26 + $0x94] ss:$12 sps:$4 sm:$0xff]   ;;  %v2174_v52 = vld [vmem:[%s2309_s26 + $0xac] ss:$12 sps:$4 sm:$0xff]  }
  0x1d   : > { %v2171_v49 = vld [vmem:[%s2309_s26 + $0x68] ss:$12 sps:$4 sm:$0xff]   ;;  %v2173_v51 = vld [vmem:[%s2309_s26 + $0x80] ss:$12 sps:$4 sm:$0xff]   ;;  %v2176_v53 = vld [vmem:[%s2309_s26 + $0x98] ss:$12 sps:$4 sm:$0xff]  }
  0x1e   : > { %1895 = vmatpush3.bf16.msra.mxu0 %v2120_v9  ;;  %2082 = vmatpush3.bf16.msra.mxu1 %v2120_v9  ;;  %v2177_v54 = vld [vmem:[%s2309_s26 + $0xa8] ss:$12 sps:$4 sm:$0xff]   ;;  %v2178_v55 = vld [vmem:[%s2309_s26 + $0xb0] ss:$12 sps:$4 sm:$0xff]   ;;  %v2182_v58 = vld [vmem:[%s2309_s26 + $0xc0] ss:$12 sps:$4 sm:$0xff]  }
  0x1f   : > { %1896 = vmatprep.subr.bf16.mxu0 %v2121_v10  ;;  %2075 = vmatprep.subr.bf16.mxu1 %v2121_v10  ;;  %v2179_v56 = vld [vmem:[%s2309_s26 + $0xc4] ss:$12 sps:$4 sm:$0xff]   ;;  %v2181_v57 = vld [vmem:[%s2309_s26 + $0xc8] ss:$12 sps:$4 sm:$0xff]   ;;  %v2183_v59 = vld [vmem:[%s2309_s26 + $0xe0] ss:$12 sps:$4 sm:$0xff]  }
  0x20   : > { %v2184_v60 = vld [vmem:[%s2309_s26 + $0xdc] ss:$12 sps:$4 sm:$0xff]   ;;  %v2186_v61 = vld [vmem:[%s2309_s26 + $0xf8] ss:$12 sps:$4 sm:$0xff]   ;;  %v2189_v0 = vld [vmem:[%s2309_s26 + $0xf4] ss:$12 sps:$4 sm:$0xff]  }
  0x21   : > { %v2187_v62 = vld [vmem:[%s2309_s26 + $0xd8] ss:$12 sps:$4 sm:$0xff]   ;;  %v2188_v63 = vld [vmem:[%s2309_s26 + $0x110] ss:$12 sps:$4 sm:$0xff]   ;;  %v2191_v1 = vld [vmem:[%s2309_s26 + $0x128] ss:$12 sps:$4 sm:$0xff]  }
  0x22   : > { %1897 = vmatpush3.bf16.msra.mxu0 %v2122_v13  ;;  %2083 = vmatpush3.bf16.msra.mxu1 %v2122_v13  ;;  %v2192_v2 = vld [vmem:[%s2309_s26 + $0xf0] ss:$12 sps:$4 sm:$0xff]   ;;  %v2193_v3 = vld [vmem:[%s2309_s26 + $0x140] ss:$12 sps:$4 sm:$0xff]   ;;  %v2196_v5 = vld [vmem:[%s2309_s26 + $0x158] ss:$12 sps:$4 sm:$0xff]  }
  0x23   : > { %1898 = vmatprep.subr.bf16.mxu0 %v2123_v14  ;;  %2076 = vmatprep.subr.bf16.mxu1 %v2123_v14  ;;  %v2194_v4 = vld [vmem:[%s2309_s26 + $0x10c] ss:$12 sps:$4 sm:$0xff]   ;;  %v2197_v6 = vld [vmem:[%s2309_s26 + $0x108] ss:$12 sps:$4 sm:$0xff]   ;;  %v2198_v7 = vld [vmem:[%s2309_s26 + $0x170] ss:$12 sps:$4 sm:$0xff]  }
  0x26   : > { %1899 = vmatpush3.bf16.msra.mxu0 %v2124_v15  ;;  %2084 = vmatpush3.bf16.msra.mxu1 %v2124_v15 }
  0x27   : > { %1900 = vmatprep.subr.bf16.mxu0 %v2125_v16  ;;  %2077 = vmatprep.subr.bf16.mxu1 %v2125_v16 }
  0x2a   : > { %1901 = vmatpush3.bf16.msra.mxu0 %v2126_v17  ;;  %2085 = vmatpush3.bf16.msra.mxu1 %v2126_v17 }
  0x2b   : > { %2022 = vmatprep.subr.bf16.mxu1 %v2133_v18 }
  0x2d   : > { %1004 = vmatmul.mubr.bf16.vlgmr.msra.gmra.mxu0 %v2127_v19  ;;  %1100 = vmatmul.mubr.bf16.vlgmr.msra.gmra.mxu1 %v2130_v20 }
  0x2e   : > { %2023 = vmatpush3.bf16.msra.mxu1 %v2133_v18  ;;  %1011 = vmatprep.mubr.bf16.mxu0 %v2135_v21 }
  0x2f   : > { %2024 = vmatprep.subr.bf16.mxu1 %v2134_v22  ;;  %1107 = vmatprep.mubr.bf16.mxu1 %v2137_v23 }
  0x32   : > { %2025 = vmatpush3.bf16.msra.mxu1 %v2134_v22 }
  0x33   : > { %2026 = vmatprep.subr.bf16.mxu1 %v2141_v25 }
  0x35   : > { %1012 = vmatmul.mubr.bf16.gmra.mxu0 %v2139_v24  ;;  %1108 = vmatmul.mubr.bf16.gmra.mxu1 %v2140_v26 }
  0x36   : > { %2027 = vmatpush3.bf16.msra.mxu1 %v2141_v25  ;;  %1019 = vmatprep.mubr.bf16.mxu0 %v2143_v28 }
  0x37   : > { %2028 = vmatprep.subr.bf16.mxu1 %v2142_v27  ;;  %1115 = vmatprep.mubr.bf16.mxu1 %v2145_v29 }
  0x3a   : > { %2029 = vmatpush3.bf16.msra.mxu1 %v2142_v27 }
  0x3b   : > { %2030 = vmatprep.subr.bf16.mxu1 %v2149_v30 }
  0x3d   : > { %1020 = vmatmul.mubr.bf16.gmra.mxu0 %v2147_v31  ;;  %1116 = vmatmul.mubr.bf16.gmra.mxu1 %v2148_v32 }
  0x3e   : > { %2031 = vmatpush3.bf16.msra.mxu1 %v2149_v30  ;;  %1027 = vmatprep.mubr.bf16.mxu0 %v2151_v34 }
  0x3f   : > { %2032 = vmatprep.subr.bf16.mxu1 %v2150_v33  ;;  %1123 = vmatprep.mubr.bf16.mxu1 %v2153_v35 }
  0x42   : > { %2033 = vmatpush3.bf16.msra.mxu1 %v2150_v33 }
  0x43   : > { %2034 = vmatprep.subr.bf16.mxu1 %v2157_v36 }
  0x45   : > { %1028 = vmatmul.mubr.bf16.gmra.mxu0 %v2155_v37  ;;  %1124 = vmatmul.mubr.bf16.gmra.mxu1 %v2156_v38 }
  0x46   : > { %2035 = vmatpush3.bf16.msra.mxu1 %v2157_v36  ;;  %1035 = vmatprep.mubr.bf16.mxu0 %v2159_v39 }
  0x47   : > { %2036 = vmatprep.subr.bf16.mxu1 %v2158_v40  ;;  %2038 = vmatprep.mubr.bf16.mxu1 %v2161_v41 }
  0x4a   : > { %2037 = vmatpush3.bf16.msra.mxu1 %v2158_v40 }
  0x4d   : > { %1036 = vmatmul.mubr.bf16.gmra.mxu0 %v2162_v42  ;;  %2039 = vmatmul.mubr.bf16.vlgmr.msra.gmra.mxu1 %v2163_v43 }
  0x4e   : > { %1043 = vmatprep.mubr.bf16.mxu0 %v2164_v44  ;;  %2042 = vmatprep.mubr.bf16.mxu1 %v2166_v45 }
  0x55   : > { %1044 = vmatmul.mubr.bf16.gmra.mxu0 %v2167_v46  ;;  %2043 = vmatmul.mubr.bf16.gmra.mxu1 %v2168_v47 }
  0x56   : > { %1051 = vmatprep.mubr.bf16.mxu0 %v2169_v48  ;;  %2046 = vmatprep.mubr.bf16.mxu1 %v2171_v49 }
  0x5d   : > { %1052 = vmatmul.mubr.bf16.gmra.mxu0 %v2172_v50  ;;  %2047 = vmatmul.mubr.bf16.gmra.mxu1 %v2173_v51  ;;  %v2425_v51 = vld [vmem:[%s2643_s2] ss:$0 sm:$0xff] }
  0x5e   : > { %1059 = vmatprep.mubr.bf16.mxu0 %v2174_v52  ;;  %2050 = vmatprep.mubr.bf16.mxu1 %v2176_v53 }
  0x65   : > { %1060 = vmatmul.mubr.bf16.gmra.mxu0 %v2177_v54  ;;  %2051 = vmatmul.mubr.bf16.gmra.mxu1 %v2178_v55  ;;  %v2430_v54 = vld [vmem:[%s2644_s3] ss:$0 sm:$0xff] }
  0x66   : > { %1067 = vmatprep.mubr.bf16.mxu0 %v2179_v56  ;;  %2054 = vmatprep.mubr.bf16.mxu1 %v2181_v57 }
  0x6d   : > { %1068 = vmatmul.mubr.bf16.gmra.mxu0 %v2182_v58  ;;  %2055 = vmatmul.mubr.bf16.gmra.mxu1 %v2183_v59 }
  0x6e   : > { %1075 = vmatprep.mubr.bf16.mxu0 %v2184_v60  ;;  %2058 = vmatprep.mubr.bf16.mxu1 %v2186_v61  ;;  %v2438_v60 = vld [vmem:[%s2645_s4] ss:$0 sm:$0xff] }
  0x75   : > { %1076 = vmatmul.mubr.bf16.gmra.mxu0 %v2187_v62  ;;  %2059 = vmatmul.mubr.bf16.gmra.mxu1 %v2188_v63 }
  0x76   : > { %1083 = vmatprep.mubr.bf16.mxu0 %v2189_v0  ;;  %2062 = vmatprep.mubr.bf16.mxu1 %v2191_v1 }
  0x7d   : > { %1084 = vmatmul.mubr.bf16.gmra.mxu0 %v2192_v2  ;;  %2063 = vmatmul.mubr.bf16.gmra.mxu1 %v2193_v3  ;;  %v2448_v3 = vld [vmem:[%s2646_s5] ss:$0 sm:$0xff] }
  0x7e   : > { %1091 = vmatprep.mubr.bf16.mxu0 %v2194_v4  ;;  %2066 = vmatprep.mubr.bf16.mxu1 %v2196_v5 }
  0x85   : > { %1092 = vmatmul.mubr.bf16.gmra.mxu0 %v2197_v6  ;;  %2067 = vmatmul.mubr.bf16.gmra.mxu1 %v2198_v7 }
  0xed   : > { %v1902_v8 = vpop.f32.mrf.mxu0  ;;  %v1974_v9 = vpop.f32.mrf.mxu1 }
  0xef   : > { %v1903_v10 = vpop.f32.mrf.mxu0  ;;  %v1975_v11 = vpop.f32.mrf.mxu1 }
  0xf0   : > { %v2404_v12 = vadd.f32 %v1975_v11, %v1974_v9  ;;  %v1904_v52 = vadd.f32 %v1903_v10, %v1902_v8 }
  0xf1   : > { %v1905_v13 = vpop.f32.mrf.mxu0  ;;  %v1977_v14 = vpop.f32.mrf.mxu1 }
  0xf3   : > { %v1906_v15 = vpop.f32.mrf.mxu0  ;;  %v1978_v16 = vpop.f32.mrf.mxu1 }
  0xf4   : > { %v2406_v17 = vadd.f32 %v1978_v16, %v1977_v14  ;;  %v1907_v2 = vadd.f32 %v1906_v15, %v1905_v13 }
  0xf5   : > { %v1908_v18 = vpop.f32.mrf.mxu0  ;;  %v1980_v19 = vpop.f32.mrf.mxu1 }
  0xf7   : > { %v1909_v20 = vpop.f32.mrf.mxu0  ;;  %v1981_v21 = vpop.f32.mrf.mxu1 }
  0xf8   : > { %v2408_v22 = vadd.f32 %v1981_v21, %v1980_v19  ;;  %v1910_v47 = vadd.f32 %v1909_v20, %v1908_v18 }
  0xf9   : > { %v1911_v23 = vpop.f32.mrf.mxu0  ;;  %v1983_v24 = vpop.f32.mrf.mxu1 }
  0xfb   : > { %v1912_v25 = vpop.f32.mrf.mxu0  ;;  %v1984_v26 = vpop.f32.mrf.mxu1 }
  0xfc   : > { %v2410_v27 = vadd.f32 %v1984_v26, %v1983_v24  ;;  %v1913_v57 = vadd.f32 %v1912_v25, %v1911_v23 }
  0xfd   : > { %v1914_v28 = vpop.f32.mrf.mxu0  ;;  %v1986_v29 = vpop.f32.mrf.mxu1 }
  0xff   : > { %v1915_v30 = vpop.f32.mrf.mxu0  ;;  %v1987_v31 = vpop.f32.mrf.mxu1 }
 0x100   : > { %v2412_v32 = vadd.f32 %v1987_v31, %v1986_v29  ;;  %v1916_v18 = vadd.f32 %v1915_v30, %v1914_v28 }
 0x101   : > { %v1917_v33 = vpop.f32.mrf.mxu0  ;;  %v1989_v34 = vpop.f32.mrf.mxu1 }
 0x103   : > { %v1918_v35 = vpop.f32.mrf.mxu0  ;;  %v1990_v36 = vpop.f32.mrf.mxu1 }
 0x104   : > { %v2414_v37 = vadd.f32 %v1990_v36, %v1989_v34  ;;  %v1919_v31 = vadd.f32 %v1918_v35, %v1917_v33 }
 0x105   : > { %v1920_v38 = vpop.f32.mrf.mxu0  ;;  %v1992_v39 = vpop.f32.mrf.mxu1 }
 0x107   : > { %v1921_v40 = vpop.f32.mrf.mxu0  ;;  %v1993_v41 = vpop.f32.mrf.mxu1 }
 0x108   : > { %v2416_v42 = vadd.f32 %v1993_v41, %v1992_v39  ;;  %v1922_v9 = vadd.f32 %v1921_v40, %v1920_v38 }
 0x109   : > { %v1923_v43 = vpop.f32.mrf.mxu0  ;;  %v1995_v44 = vpop.f32.mrf.mxu1 }
 0x10b   : > { %v1924_v45 = vpop.f32.mrf.mxu0  ;;  %v1996_v46 = vpop.f32.mrf.mxu1 }
 0x10c   : > { %v2418_v48 = vadd.f32 %v1996_v46, %v1995_v44  ;;  %v1925_v19 = vadd.f32 %v1924_v45, %v1923_v43 }
 0x10d   : > { %v2420_v49 = vpop.f32.mrf.mxu0  ;;  %v2040_v50 = vpop.f32.mrf.mxu1 }
 0x10e   : > { %v1175_v53 = vadd.f32 %v2040_v50, %v1910_v47 }
 0x10f   : > { %v2432_v55 = vpop.f32.mrf.mxu0  ;;  %v1166_v56 = vpop.f32.mrf.mxu1 }
 0x110   : > { %v1401_v58 = vadd.f32 %v2425_v51, %v1175_v53  ;;  %v1167_v59 = vadd.f32 %v1904_v52, %v1166_v56 }
 0x111   : > { %v2440_v61 = vpop.f32.mrf.mxu0  ;;  %v2041_v62 = vpop.f32.mrf.mxu1 }
 0x112   : > { %v1440_v63 = vmul.f32 %v2430_v54, %v1401_v58  ;;  %v1399_v0 = vadd.f32 %v2425_v51, %v1167_v59  ;;  %v1178_v1 = vadd.f32 %v2041_v62, %v1913_v57  ;;  %v1928_v62 = vadd.f32 %v2432_v55, %v2420_v49 }
 0x113   : > { %v2450_v4 = vpop.f32.mrf.mxu0  ;;  %v1169_v5 = vpop.f32.mrf.mxu1 }
 0x114   : > { %v1479_v6 = vadd.f32 %v2438_v60, %v1440_v63  ;;  %v1438_v7 = vmul.f32 %v2430_v54, %v1399_v0  ;;  %v1402_v8 = vadd.f32 %v2425_v51, %v1178_v1  ;;  %v1170_v10 = vadd.f32 %v1907_v2, %v1169_v5 }
 0x115   : > { %v1932_v11 = vpop.f32.mrf.mxu0  ;;  %v2044_v14 = vpop.f32.mrf.mxu1 }
 0x116   : > { %vm1511_vm0 = vcmp.gt.f32.partialorder %v1479_v6, 0.0  ;;  %v1550_v13 = vmul.f32 %v2448_v3, %v1479_v6  ;;  %v1477_v15 = vadd.f32 %v2438_v60, %v1438_v7  ;;  %v1441_v16 = vmul.f32 %v2430_v54, %v1402_v8 }
 0x117   : > { %v1400_v20 = vadd.f32 %v2425_v51, %v1170_v10  ;;  %v1191_v21 = vadd.f32 %v2044_v14, %v1922_v9  ;;  %v1933_v23 = vpop.f32.mrf.mxu0  ;;  %v1182_v24 = vpop.f32.mrf.mxu1 }
 0x118   : > { %v1582_v25 = vsel %vm1511_vm0, %v1479_v6, %v1550_v13  ;;  %vm1509_vm1 = vcmp.gt.f32.partialorder %v1477_v15, 0.0  ;;  %v1548_v26 = vmul.f32 %v2448_v3, %v1477_v15  ;;  %v1480_v29 = vadd.f32 %v2438_v60, %v1441_v16 }
 0x119   : > { %1614 = vst [vmem:[%s2458_s29 + $0x10] sm:$0xff] %v1582_v25  ;;  %v1439_v34 = vmul.f32 %v2430_v54, %v1400_v20  ;;  %v1405_v36 = vadd.f32 %v2425_v51, %v1191_v21  ;;  %v1183_v28 = vadd.f32 %v1916_v18, %v1182_v24  ;;  %v1935_v30 = vpop.f32.mrf.mxu0  ;;  %v2045_v38 = vpop.f32.mrf.mxu1  ;;  %v1934_v47 = vadd.f32 %v1933_v23, %v1932_v11 }
 0x11a   : > { %v1580_v39 = vsel %vm1509_vm1, %v1477_v15, %v1548_v26  ;;  %vm1512_vm2 = vcmp.gt.f32.partialorder %v1480_v29, 0.0  ;;  %v1551_v40 = vmul.f32 %v2448_v3, %v1480_v29  ;;  %v1194_v41 = vadd.f32 %v2045_v38, %v1925_v19 }
 0x11b   : > { %1612 = vst [vmem:[%s2458_s29] sm:$0xff] %v1580_v39  ;;  %v1478_v43 = vadd.f32 %v2438_v60, %v1439_v34  ;;  %v1444_v44 = vmul.f32 %v2430_v54, %v1405_v36  ;;  %v1403_v33 = vadd.f32 %v2425_v51, %v1183_v28  ;;  %v1936_v35 = vpop.f32.mrf.mxu0  ;;  %v1185_v45 = vpop.f32.mrf.mxu1  ;;  %v1931_v21 = vadd.f32 %v2450_v4, %v2440_v61 }
 0x11c   : > { %v1583_v46 = vsel %vm1512_vm2, %v1480_v29, %v1551_v40  ;;  %v1406_v50 = vadd.f32 %v2425_v51, %v1194_v41  ;;  %v1186_v52 = vadd.f32 %v1919_v31, %v1185_v45  ;;  %v1937_v10 = vadd.f32 %v1936_v35, %v1935_v30 }
 0x11d   : > { %1615 = vst [vmem:[%s2458_s29 + $0x18] sm:$0xff] %v1583_v46  ;;  %vm1510_vm3 = vcmp.gt.f32.partialorder %v1478_v43, 0.0  ;;  %v1549_v53 = vmul.f32 %v2448_v3, %v1478_v43  ;;  %v1483_v56 = vadd.f32 %v2438_v60, %v1444_v44  ;;  %v1442_v57 = vmul.f32 %v2430_v54, %v1403_v33  ;;  %v1938_v58 = vpop.f32.mrf.mxu0  ;;  %v2048_v59 = vpop.f32.mrf.mxu1 }
 0x11e   : > { %v1445_v63 = vmul.f32 %v2430_v54, %v1406_v50  ;;  %v1404_v0 = vadd.f32 %v2425_v51, %v1186_v52  ;;  %v1207_v1 = vadd.f32 %v2048_v59, %v1934_v47 }
 0x11f   : > { %v1581_v2 = vsel %vm1510_vm3, %v1478_v43, %v1549_v53  ;;  %vm1515_vm4 = vcmp.gt.f32.partialorder %v1483_v56, 0.0  ;;  %v1554_v5 = vmul.f32 %v2448_v3, %v1483_v56  ;;  %v1481_v6 = vadd.f32 %v2438_v60, %v1442_v57  ;;  %v1939_v7 = vpop.f32.mrf.mxu0  ;;  %v1198_v8 = vpop.f32.mrf.mxu1 }
 0x120   : > { %1613 = vst [vmem:[%s2458_s29 + $0x8] sm:$0xff] %v1581_v2  ;;  %v1484_v9 = vadd.f32 %v2438_v60, %v1445_v63  ;;  %v1443_v49 = vmul.f32 %v2430_v54, %v1404_v0  ;;  %v1409_v55 = vadd.f32 %v2425_v51, %v1207_v1  ;;  %v1199_v13 = vadd.f32 %v1928_v62, %v1198_v8 }
 0x121   : > { %v1586_v11 = vsel %vm1515_vm4, %v1483_v56, %v1554_v5  ;;  %vm1513_vm5 = vcmp.gt.f32.partialorder %v1481_v6, 0.0  ;;  %v1552_v14 = vmul.f32 %v2448_v3, %v1481_v6  ;;  %v1941_v15 = vpop.f32.mrf.mxu0  ;;  %v2049_v16 = vpop.f32.mrf.mxu1  ;;  %v1940_v41 = vadd.f32 %v1939_v7, %v1938_v58 }
 0x122   : > { %1618 = vst [vmem:[%s2458_s29 + $0x30] sm:$0xff] %v1586_v11  ;;  %vm1516_vm6 = vcmp.gt.f32.partialorder %v1484_v9, 0.0  ;;  %v1555_v18 = vmul.f32 %v2448_v3, %v1484_v9  ;;  %v1482_v19 = vadd.f32 %v2438_v60, %v1443_v49  ;;  %v1448_v20 = vmul.f32 %v2430_v54, %v1409_v55 }
 0x123   : > { %v1584_v23 = vsel %vm1513_vm5, %v1481_v6, %v1552_v14  ;;  %v1407_v24 = vadd.f32 %v2425_v51, %v1199_v13  ;;  %v1210_v25 = vadd.f32 %v2049_v16, %v1937_v10  ;;  %v1942_v26 = vpop.f32.mrf.mxu0  ;;  %v1201_v29 = vpop.f32.mrf.mxu1 }
 0x124   : > { %1616 = vst [vmem:[%s2458_s29 + $0x20] sm:$0xff] %v1584_v23  ;;  %v1587_v31 = vsel %vm1516_vm6, %v1484_v9, %v1555_v18  ;;  %vm1514_vm7 = vcmp.gt.f32.partialorder %v1482_v19, 0.0  ;;  %v1553_v34 = vmul.f32 %v2448_v3, %v1482_v19  ;;  %v1487_v36 = vadd.f32 %v2438_v60, %v1448_v20 }
 0x125   : > { %1619 = vst [vmem:[%s2458_s29 + $0x38] sm:$0xff] %v1587_v31  ;;  %v1446_v28 = vmul.f32 %v2430_v54, %v1407_v24  ;;  %v1410_v30 = vadd.f32 %v2425_v51, %v1210_v25  ;;  %v1202_v61 = vadd.f32 %v1931_v21, %v1201_v29  ;;  %v1944_v4 = vpop.f32.mrf.mxu0  ;;  %v2052_v38 = vpop.f32.mrf.mxu1  ;;  %v1943_v59 = vadd.f32 %v1942_v26, %v1941_v15 }
 0x126   : > { %v1585_v39 = vsel %vm1514_vm7, %v1482_v19, %v1553_v34  ;;  %vm1519_vm8 = vcmp.gt.f32.partialorder %v1487_v36, 0.0  ;;  %v1558_v40 = vmul.f32 %v2448_v3, %v1487_v36 }
 0x127   : > { %1617 = vst [vmem:[%s2458_s29 + $0x28] sm:$0xff] %v1585_v39  ;;  %v1485_v43 = vadd.f32 %v2438_v60, %v1446_v28  ;;  %v1449_v44 = vmul.f32 %v2430_v54, %v1410_v30  ;;  %v1408_v33 = vadd.f32 %v2425_v51, %v1202_v61  ;;  %v1945_v35 = vpop.f32.mrf.mxu0  ;;  %v1214_v45 = vpop.f32.mrf.mxu1 }
 0x128   : > { %v1590_v46 = vsel %vm1519_vm8, %v1487_v36, %v1558_v40  ;;  %v1946_v47 = vadd.f32 %v1945_v35, %v1944_v4  ;;  %v1215_v50 = vadd.f32 %v1940_v41, %v1214_v45 }
 0x129   : > { %1622 = vst [vmem:[%s2458_s29 + $0x50] sm:$0xff] %v1590_v46  ;;  %vm1517_vm9 = vcmp.gt.f32.partialorder %v1485_v43, 0.0  ;;  %v1556_v52 = vmul.f32 %v2448_v3, %v1485_v43  ;;  %v1488_v53 = vadd.f32 %v2438_v60, %v1449_v44  ;;  %v1447_v56 = vmul.f32 %v2430_v54, %v1408_v33  ;;  %v1947_v57 = vpop.f32.mrf.mxu0  ;;  %v2053_v58 = vpop.f32.mrf.mxu1 }
 0x12a   : > { %v1223_v62 = vadd.f32 %v2052_v38, %v1946_v47  ;;  %v1411_v63 = vadd.f32 %v2425_v51, %v1215_v50 }
 0x12b   : > { %v1588_v0 = vsel %vm1517_vm9, %v1485_v43, %v1556_v52  ;;  %vm1520_vm10 = vcmp.gt.f32.partialorder %v1488_v53, 0.0  ;;  %v1559_v1 = vmul.f32 %v2448_v3, %v1488_v53  ;;  %v1486_v2 = vadd.f32 %v2438_v60, %v1447_v56  ;;  %v1948_v5 = vpop.f32.mrf.mxu0  ;;  %v1217_v6 = vpop.f32.mrf.mxu1 }
 0x12c   : > { %1620 = vst [vmem:[%s2458_s29 + $0x40] sm:$0xff] %v1588_v0  ;;  %v1413_v7 = vadd.f32 %v2425_v51, %v1223_v62  ;;  %v1450_v8 = vmul.f32 %v2430_v54, %v1411_v63  ;;  %v1949_v9 = vadd.f32 %v1948_v5, %v1947_v57  ;;  %v1218_v10 = vadd.f32 %v1943_v59, %v1217_v6 }
 0x12d   : > { %v1591_v49 = vsel %vm1520_vm10, %v1488_v53, %v1559_v1  ;;  %vm1518_vm11 = vcmp.gt.f32.partialorder %v1486_v2, 0.0  ;;  %v1557_v55 = vmul.f32 %v2448_v3, %v1486_v2  ;;  %v1950_v11 = vpop.f32.mrf.mxu0  ;;  %v2056_v14 = vpop.f32.mrf.mxu1 }
 0x12e   : > { %1623 = vst [vmem:[%s2458_s29 + $0x58] sm:$0xff] %v1591_v49  ;;  %v1452_v13 = vmul.f32 %v2430_v54, %v1413_v7  ;;  %v1489_v15 = vadd.f32 %v2438_v60, %v1450_v8  ;;  %v1226_v16 = vadd.f32 %v2053_v58, %v1949_v9  ;;  %v1412_v18 = vadd.f32 %v2425_v51, %v1218_v10 }
 0x12f   : > { %v1589_v19 = vsel %vm1518_vm11, %v1486_v2, %v1557_v55  ;;  %v1951_v20 = vpop.f32.mrf.mxu0  ;;  %v1230_v21 = vpop.f32.mrf.mxu1 }
 0x130   : > { %1621 = vst [vmem:[%s2458_s29 + $0x48] sm:$0xff] %v1589_v19  ;;  %v1491_v23 = vadd.f32 %v2438_v60, %v1452_v13  ;;  %vm1521_vm12 = vcmp.gt.f32.partialorder %v1489_v15, 0.0  ;;  %v1560_v24 = vmul.f32 %v2448_v3, %v1489_v15  ;;  %v1414_v25 = vadd.f32 %v2425_v51, %v1226_v16 }
 0x131   : > { %v1451_v26 = vmul.f32 %v2430_v54, %v1412_v18  ;;  %v1952_v29 = vadd.f32 %v1951_v20, %v1950_v11  ;;  %v1953_v31 = vpop.f32.mrf.mxu0  ;;  %v2057_v34 = vpop.f32.mrf.mxu1 }
 0x132   : > { %vm1523_vm13 = vcmp.gt.f32.partialorder %v1491_v23, 0.0  ;;  %v1562_v36 = vmul.f32 %v2448_v3, %v1491_v23  ;;  %v1592_v28 = vsel %vm1521_vm12, %v1489_v15, %v1560_v24  ;;  %v1453_v30 = vmul.f32 %v2430_v54, %v1414_v25 }
 0x133   : > { %1624 = vst [vmem:[%s2458_s29 + $0x60] sm:$0xff] %v1592_v28  ;;  %v1490_v61 = vadd.f32 %v2438_v60, %v1451_v26  ;;  %v1231_v4 = vadd.f32 %v1952_v29, %v1230_v21  ;;  %v1954_v38 = vpop.f32.mrf.mxu0  ;;  %v1233_v39 = vpop.f32.mrf.mxu1 }
 0x134   : > { %v1594_v40 = vsel %vm1523_vm13, %v1491_v23, %v1562_v36  ;;  %v1492_v41 = vadd.f32 %v2438_v60, %v1453_v30  ;;  %v1955_v43 = vadd.f32 %v1954_v38, %v1953_v31 }
 0x135   : > { %1626 = vst [vmem:[%s2458_s29 + $0x70] sm:$0xff] %v1594_v40  ;;  %vm1522_vm14 = vcmp.gt.f32.partialorder %v1490_v61, 0.0  ;;  %v1561_v44 = vmul.f32 %v2448_v3, %v1490_v61  ;;  %v1415_v33 = vadd.f32 %v2425_v51, %v1231_v4  ;;  %v1956_v35 = vpop.f32.mrf.mxu0  ;;  %v2536_v45 = vpop.f32.mrf.mxu1 }
 0x136   : > { %vm1524_vm15 = vcmp.gt.f32.partialorder %v1492_v41, 0.0  ;;  %v1563_v46 = vmul.f32 %v2448_v3, %v1492_v41  ;;  %v1234_v47 = vadd.f32 %v1955_v43, %v1233_v39 }
 0x137   : > { %v1593_v50 = vsel %vm1522_vm14, %v1490_v61, %v1561_v44  ;;  %v1454_v52 = vmul.f32 %v2430_v54, %v1415_v33  ;;  %v1957_v53 = vpop.f32.mrf.mxu0  ;;  %v1246_v56 = vpop.f32.mrf.mxu1 }
 0x138   : > { %v1595_v57 = vsel %vm1524_vm15, %v1492_v41, %v1563_v46  ;;  %1625 = vst [vmem:[%s2458_s29 + $0x68] sm:$0xff] %v1593_v50  ;;  %v1416_v58 = vadd.f32 %v2425_v51, %v1234_v47  ;;  %v1958_v59 = vadd.f32 %v1957_v53, %v1956_v35 }
 0x139   : > { %1627 = vst [vmem:[%s2458_s29 + $0x78] sm:$0xff] %v1595_v57  ;;  %v1493_v62 = vadd.f32 %v2438_v60, %v1454_v52  ;;  %v1959_v63 = vpop.f32.mrf.mxu0  ;;  %v2544_v0 = vpop.f32.mrf.mxu1 }
 0x13a   : > { %v1455_v1 = vmul.f32 %v2430_v54, %v1416_v58  ;;  %v1239_v2 = vadd.f32 %v2056_v14, %v1958_v59 }
 0x13b   : > { %vm1525_vm0 = vcmp.gt.f32.partialorder %v1493_v62, 0.0  ;;  %v1564_v5 = vmul.f32 %v2448_v3, %v1493_v62  ;;  %v1960_v6 = vpop.f32.mrf.mxu0  ;;  %v1249_v7 = vpop.f32.mrf.mxu1 }
 0x13c   : > { %v1494_v8 = vadd.f32 %v2438_v60, %v1455_v1  ;;  %v1417_v9 = vadd.f32 %v2425_v51, %v1239_v2  ;;  %v1961_v10 = vadd.f32 %v1960_v6, %v1959_v63 }
 0x13d   : > { %v1596_v49 = vsel %vm1525_vm0, %v1493_v62, %v1564_v5  ;;  %v1962_v55 = vpop.f32.mrf.mxu0  ;;  %v2064_v11 = vpop.f32.mrf.mxu1 }
 0x13e   : > { %1628 = vst [vmem:[%s2458_s29 + $0x80] sm:$0xff] %v1596_v49  ;;  %vm1526_vm1 = vcmp.gt.f32.partialorder %v1494_v8, 0.0  ;;  %v1565_v13 = vmul.f32 %v2448_v3, %v1494_v8  ;;  %v1456_v14 = vmul.f32 %v2430_v54, %v1417_v9  ;;  %v1242_v15 = vadd.f32 %v2057_v34, %v1961_v10 }
 0x13f   : > { %v1271_v16 = vadd.f32 %v2064_v11, %v2408_v22  ;;  %v1963_v18 = vpop.f32.mrf.mxu0  ;;  %v1262_v19 = vpop.f32.mrf.mxu1 }
 0x140   : > { %v1597_v20 = vsel %vm1526_vm1, %v1494_v8, %v1565_v13  ;;  %v1495_v21 = vadd.f32 %v2438_v60, %v1456_v14  ;;  %v1418_v23 = vadd.f32 %v2425_v51, %v1242_v15  ;;  %v1964_v24 = vadd.f32 %v1963_v18, %v1962_v55 }
 0x141   : > { %1629 = vst [vmem:[%s2458_s29 + $0x88] sm:$0xff] %v1597_v20  ;;  %v1425_v25 = vadd.f32 %v2425_v51, %v1271_v16  ;;  %v1263_v26 = vadd.f32 %v2404_v12, %v1262_v19  ;;  %v1965_v29 = vpop.f32.mrf.mxu0  ;;  %v2065_v31 = vpop.f32.mrf.mxu1 }
 0x142   : > { %vm1527_vm2 = vcmp.gt.f32.partialorder %v1495_v21, 0.0  ;;  %v1566_v34 = vmul.f32 %v2448_v3, %v1495_v21  ;;  %v1457_v22 = vmul.f32 %v2430_v54, %v1418_v23  ;;  %v1247_v36 = vadd.f32 %v1964_v24, %v1246_v56 }
 0x143   : > { %v1464_v28 = vmul.f32 %v2430_v54, %v1425_v25  ;;  %v1423_v30 = vadd.f32 %v2425_v51, %v1263_v26  ;;  %v1274_v61 = vadd.f32 %v2065_v31, %v2410_v27  ;;  %v1966_v4 = vpop.f32.mrf.mxu0  ;;  %v1265_v38 = vpop.f32.mrf.mxu1 }
 0x144   : > { %v1598_v39 = vsel %vm1527_vm2, %v1495_v21, %v1566_v34  ;;  %v1496_v12 = vadd.f32 %v2438_v60, %v1457_v22  ;;  %v1419_v40 = vadd.f32 %v2425_v51, %v1247_v36  ;;  %v1967_v41 = vadd.f32 %v1966_v4, %v1965_v29 }
 0x145   : > { %1630 = vst [vmem:[%s2458_s29 + $0x90] sm:$0xff] %v1598_v39  ;;  %v1503_v43 = vadd.f32 %v2438_v60, %v1464_v28  ;;  %v1462_v44 = vmul.f32 %v2430_v54, %v1423_v30  ;;  %v1426_v33 = vadd.f32 %v2425_v51, %v1274_v61  ;;  %v1266_v35 = vadd.f32 %v2406_v17, %v1265_v38  ;;  %v1968_v46 = vpop.f32.mrf.mxu0  ;;  %v2068_v27 = vpop.f32.mrf.mxu1 }
 0x146   : > { %vm1528_vm3 = vcmp.gt.f32.partialorder %v1496_v12, 0.0  ;;  %v1567_v47 = vmul.f32 %v2448_v3, %v1496_v12  ;;  %v1458_v50 = vmul.f32 %v2430_v54, %v1419_v40  ;;  %v1250_v52 = vadd.f32 %v1967_v41, %v1249_v7 }
 0x147   : > { %vm1535_vm4 = vcmp.gt.f32.partialorder %v1503_v43, 0.0  ;;  %v1574_v53 = vmul.f32 %v2448_v3, %v1503_v43  ;;  %v1501_v56 = vadd.f32 %v2438_v60, %v1462_v44  ;;  %v1465_v57 = vmul.f32 %v2430_v54, %v1426_v33  ;;  %v1969_v58 = vpop.f32.mrf.mxu0  ;;  %v1278_v59 = vpop.f32.mrf.mxu1 }
 0x148   : > { %v1599_v17 = vsel %vm1528_vm3, %v1496_v12, %v1567_v47  ;;  %v1497_v62 = vadd.f32 %v2438_v60, %v1458_v50  ;;  %v1420_v63 = vadd.f32 %v2425_v51, %v1250_v52  ;;  %v1424_v1 = vadd.f32 %v2425_v51, %v1266_v35 }
 0x149   : > { %1631 = vst [vmem:[%s2458_s29 + $0x98] sm:$0xff] %v1599_v17  ;;  %v1606_v2 = vsel %vm1535_vm4, %v1503_v43, %v1574_v53  ;;  %vm1533_vm5 = vcmp.gt.f32.partialorder %v1501_v56, 0.0  ;;  %v1572_v5 = vmul.f32 %v2448_v3, %v1501_v56  ;;  %v1504_v6 = vadd.f32 %v2438_v60, %v1465_v57  ;;  %v1971_v7 = vpop.f32.mrf.mxu0  ;;  %v2069_v8 = vpop.f32.mrf.mxu1 }
 0x14a   : > { %1638 = vst [vmem:[%s2458_s29 + $0xd0] sm:$0xff] %v1606_v2  ;;  %vm1529_vm6 = vcmp.gt.f32.partialorder %v1497_v62, 0.0  ;;  %v1568_v9 = vmul.f32 %v2448_v3, %v1497_v62  ;;  %v1459_v10 = vmul.f32 %v2430_v54, %v1420_v63  ;;  %v1463_v49 = vmul.f32 %v2430_v54, %v1424_v1 }
 0x14b   : > { %v1604_v55 = vsel %vm1533_vm5, %v1501_v56, %v1572_v5  ;;  %vm1536_vm7 = vcmp.gt.f32.partialorder %v1504_v6, 0.0  ;;  %v1575_v11 = vmul.f32 %v2448_v3, %v1504_v6  ;;  %v1287_v13 = vadd.f32 %v2068_v27, %v2416_v42  ;;  %v1972_v24 = vpop.f32.mrf.mxu0  ;;  %v1281_v25 = vpop.f32.mrf.mxu1 }
 0x14c   : > { %v1600_v14 = vsel %vm1529_vm6, %v1497_v62, %v1568_v9  ;;  %1636 = vst [vmem:[%s2458_s29 + $0xc0] sm:$0xff] %v1604_v55  ;;  %v1498_v15 = vadd.f32 %v2438_v60, %v1459_v10  ;;  %v1502_v16 = vadd.f32 %v2438_v60, %v1463_v49  ;;  %v1970_v18 = vadd.f32 %v1969_v58, %v1968_v46 }
 0x14d   : > { %1632 = vst [vmem:[%s2458_s29 + $0xa0] sm:$0xff] %v1600_v14  ;;  %v1607_v19 = vsel %vm1536_vm7, %v1504_v6, %v1575_v11  ;;  %v1429_v20 = vadd.f32 %v2425_v51, %v1287_v13  ;;  %v1279_v21 = vadd.f32 %v2412_v32, %v1278_v59  ;;  %v1290_v23 = vadd.f32 %v2069_v8, %v2418_v48 }
 0x14e   : > { %1639 = vst [vmem:[%s2458_s29 + $0xd8] sm:$0xff] %v1607_v19  ;;  %vm1530_vm8 = vcmp.gt.f32.partialorder %v1498_v15, 0.0  ;;  %v1569_v42 = vmul.f32 %v2448_v3, %v1498_v15  ;;  %vm1534_vm9 = vcmp.gt.f32.partialorder %v1502_v16, 0.0  ;;  %v1573_v26 = vmul.f32 %v2448_v3, %v1502_v16 }
 0x14f   : > { %v1468_v29 = vmul.f32 %v2430_v54, %v1429_v20  ;;  %v1255_v31 = vadd.f32 %v2536_v45, %v1970_v18  ;;  %v1427_v34 = vadd.f32 %v2425_v51, %v1279_v21  ;;  %v1430_v32 = vadd.f32 %v2425_v51, %v1290_v23 }
 0x150   : > { %v1601_v48 = vsel %vm1530_vm8, %v1498_v15, %v1569_v42  ;;  %v1605_v22 = vsel %vm1534_vm9, %v1502_v16, %v1573_v26  ;;  %v1973_v36 = vadd.f32 %v1972_v24, %v1971_v7  ;;  %v1282_v28 = vadd.f32 %v2414_v37, %v1281_v25 }
 0x151   : > { %1633 = vst [vmem:[%s2458_s29 + $0xa8] sm:$0xff] %v1601_v48  ;;  %1637 = vst [vmem:[%s2458_s29 + $0xc8] sm:$0xff] %v1605_v22  ;;  %v1507_v30 = vadd.f32 %v2438_v60, %v1468_v29  ;;  %v1421_v61 = vadd.f32 %v2425_v51, %v1255_v31  ;;  %v1466_v4 = vmul.f32 %v2430_v54, %v1427_v34 }
 0x152   : > { %v1469_v45 = vmul.f32 %v2430_v54, %v1430_v32  ;;  %v1258_v38 = vadd.f32 %v2544_v0, %v1973_v36  ;;  %v1428_v39 = vadd.f32 %v2425_v51, %v1282_v28 }
 0x153   : > { %vm1539_vm10 = vcmp.gt.f32.partialorder %v1507_v30, 0.0  ;;  %v1578_v12 = vmul.f32 %v2448_v3, %v1507_v30  ;;  %v1460_v37 = vmul.f32 %v2430_v54, %v1421_v61  ;;  %v1505_v40 = vadd.f32 %v2438_v60, %v1466_v4 }
 0x154   : > { %v1508_v41 = vadd.f32 %v2438_v60, %v1469_v45  ;;  %v1422_v43 = vadd.f32 %v2425_v51, %v1258_v38  ;;  %v1467_v44 = vmul.f32 %v2430_v54, %v1428_v39 }
 0x155   : > { %v1610_v33 = vsel %vm1539_vm10, %v1507_v30, %v1578_v12  ;;  %v1499_v35 = vadd.f32 %v2438_v60, %v1460_v37  ;;  %vm1537_vm11 = vcmp.gt.f32.partialorder %v1505_v40, 0.0  ;;  %v1576_v0 = vmul.f32 %v2448_v3, %v1505_v40 }
 0x156   : > { %1642 = vst [vmem:[%s2458_s29 + $0xf0] sm:$0xff] %v1610_v33  ;;  %vm1540_vm12 = vcmp.gt.f32.partialorder %v1508_v41, 0.0  ;;  %v1579_v46 = vmul.f32 %v2448_v3, %v1508_v41  ;;  %v1461_v27 = vmul.f32 %v2430_v54, %v1422_v43  ;;  %v1506_v47 = vadd.f32 %v2438_v60, %v1467_v44 }
 0x157   : > { %vm1531_vm13 = vcmp.gt.f32.partialorder %v1499_v35, 0.0  ;;  %v1570_v51 = vmul.f32 %v2448_v3, %v1499_v35  ;;  %v1608_v50 = vsel %vm1537_vm11, %v1505_v40, %v1576_v0 }
 0x158   : > { %1640 = vst [vmem:[%s2458_s29 + $0xe0] sm:$0xff] %v1608_v50  ;;  %v1611_v52 = vsel %vm1540_vm12, %v1508_v41, %v1579_v46  ;;  %v1500_v53 = vadd.f32 %v2438_v60, %v1461_v27  ;;  %vm1538_vm14 = vcmp.gt.f32.partialorder %v1506_v47, 0.0  ;;  %v1577_v56 = vmul.f32 %v2448_v3, %v1506_v47 }
 0x159   : > { %v1602_v57 = vsel %vm1531_vm13, %v1499_v35, %v1570_v51  ;;  %1643 = vst [vmem:[%s2458_s29 + $0xf8] sm:$0xff] %v1611_v52 }
 0x15a   : > { %1634 = vst [vmem:[%s2458_s29 + $0xb0] sm:$0xff] %v1602_v57  ;;  %vm1532_vm15 = vcmp.gt.f32.partialorder %v1500_v53, 0.0  ;;  %v1571_v54 = vmul.f32 %v2448_v3, %v1500_v53  ;;  %v1609_v58 = vsel %vm1538_vm14, %v1506_v47, %v1577_v56 }
 0x15b   : > { %1641 = vst [vmem:[%s2458_s29 + $0xe8] sm:$0xff] %v1609_v58 }
 0x15c   : > { %v1603_v59 = vsel %vm1532_vm15, %v1500_v53, %v1571_v54 }
 0x15d   : > { %1635 = vst [vmem:[%s2458_s29 + $0xb8] sm:$0xff] %v1603_v59 }
 0x15e PF: > { %s16_s23 = sadd.s32 1, %s2221_s23   ;;  %s2648_s21 = smov %s2217_s22 }
 0x15f   : > { %p13_p5 = scmp.ge.s32.totalorder %s16_s23, 4   ;;  %s2649_s22 = smov %s2651_s24 }
 0x161   :  { %15 = sbr.rel (!%p13_p5) target bundleno = 2 (0x2), region = 97 }

// kernel: a_call__.26
= control target key start
LH: loop header
LB: loop body
LE: loop exit
PB: predicated region body
PF: predicated region fallthrough
CT: control target
= control target key end

     0   :  { %s2258_s21 = smov 0   ;;  %s2260_s22 = smov 0   ;;  %s2641_s0 = inlined_call_operand.vmem [shape: bf16[2048,384], index: 0, kind: input, shape index: {}]   ;;  %s2642_s1 = inlined_call_operand.vmem [shape: bf16[384,128], index: 1, kind: input, shape index: {}]   ;;  %s2643_s2 = inlined_call_operand.vmem [shape: f32[1,128], index: 2, kind: input, shape index: {}]   ;;  %s2644_s3 = inlined_call_operand.vmem [shape: f32[1,128], index: 3, kind: input, shape index: {}]   ;;  %s2645_s4 = inlined_call_operand.vmem [shape: f32[1,128], index: 4, kind: input, shape index: {}]   ;;  %s2646_s5 = inlined_call_operand.vmem [shape: f32[1,128], index: 5, kind: input, shape index: {}]   ;;  %s2647_s6 = inlined_call_operand.vmem [shape: f32[2048,128], index: 6, kind: output, shape index: {}]  }
   0x1   :  { %s2262_s23 = smov 0  }
   0x2 LB: > { %s35_s24 = sadd.s32 1, %s2217_s22  ;;  %p1803_p0 = scmp.ge.s32.totalorder %s2221_s23, 1  ;;  %s2221_s23 = sphi %s2262_s23, %s16_s23   ;;  %s2217_s22 = sphi %s2260_s22, %s2649_s22   ;;  %s2213_s21 = sphi %s2258_s21, %s2648_s21  }
   0x3   : > { %p37_p1 = scmp.ge.s32.totalorder %s35_s24, 8  ;;  %p290_p2 = scmp.lt.s32.totalorder %s2221_s23, 9 }
   0x5   : > { %s2651_s24 = smov (%p37_p1, %s35_s24), 0  ;;  %p291_p3 = pnand %p1803_p0, %p290_p2 }
   0x6   : > { %s1804_s27 = sshll.u32 (!%p291_p3), %s2213_s21, 5 }
   0x7   : > { %294 = sbr.rel (%p291_p3) target bundleno = 350 (0x15e), region = 44  ;;  %p350_p4 = scmp.lt.s32.totalorder (!%p291_p3), %s1804_s27, 255 }
   0xc   : > { %v2111_v0 = vld [vmem:[%s2642_s1 + $0x78] sm:$0xff]   ;;  %v2113_v2 = vld [vmem:[%s2642_s1 + $0x70] sm:$0xff]   ;;  %v2115_v4 = vld [vmem:[%s2642_s1 + $0x68] sm:$0xff]   ;;  %s2653_s27 = smov (!%p350_p4, %s1804_s27), 255 }
   0xd   : > { %v2112_v1 = vld [vmem:[%s2642_s1 + $0x38] sm:$0xff]   ;;  %1886 = vmatprep.subr.bf16.mxu0 %v2111_v0  ;;  %2070 = vmatprep.subr.bf16.mxu1 %v2111_v0  ;;  %v2114_v3 = vld [vmem:[%s2642_s1 + $0x30] sm:$0xff]   ;;  %v2116_v5 = vld [vmem:[%s2642_s1 + $0x28] sm:$0xff]   ;;  %s2086_s16 = smul.u32 12, %s2653_s27  ;;  %s1807_s20 = sshll.u32 %s2653_s27, 3 }
   0xe   : > { %1887 = vmatpush3.bf16.msra.mxu0 %v2112_v1  ;;  %2078 = vmatpush3.bf16.msra.mxu1 %v2112_v1  ;;  %v2117_v6 = vld [vmem:[%s2642_s1 + $0x60] sm:$0xff]   ;;  %v2119_v8 = vld [vmem:[%s2642_s1 + $0x58] sm:$0xff]   ;;  %v2121_v10 = vld [vmem:[%s2642_s1 + $0x50] sm:$0xff]   ;;  %s2458_s29 = scalar_lea.vmem %s2647_s6, %s1807_s20 }
   0xf   : > { %1888 = vmatprep.subr.bf16.mxu0 %v2113_v2  ;;  %2071 = vmatprep.subr.bf16.mxu1 %v2113_v2  ;;  %v2118_v7 = vld [vmem:[%s2642_s1 + $0x20] sm:$0xff]   ;;  %s2309_s26 = scalar_lea.vmem %s2641_s0, %s2086_s16  ;;  %v2120_v9 = vld [vmem:[%s2642_s1 + $0x18] sm:$0xff]   ;;  %v2122_v13 = vld [vmem:[%s2642_s1 + $0x10] sm:$0xff]  }
  0x10   : > { %v2129_v11 = vld [vmem:[%s2309_s26 + $0x4] ss:$12 sps:$4 sm:$0xff]   ;;  %v2123_v14 = vld [vmem:[%s2642_s1 + $0x48] sm:$0xff]   ;;  %v2133_v18 = vld [vmem:[%s2642_s1 + $0xb8] sm:$0xff]  }
  0x11   : > { %v2132_v12 = vld [vmem:[%s2309_s26 + $0x124] ss:$12 sps:$4 sm:$0xff]   ;;  %1003 = vmatprep.mubr.bf16.mxu0 %v2129_v11  ;;  %v2124_v15 = vld [vmem:[%s2642_s1 + $0x8] sm:$0xff]   ;;  %v2143_v28 = vld [vmem:[%s2309_s26 + $0x34] ss:$12 sps:$4 sm:$0xff]  }
  0x12   : > { %1889 = vmatpush3.bf16.msra.mxu0 %v2114_v3  ;;  %2079 = vmatpush3.bf16.msra.mxu1 %v2114_v3  ;;  %v2125_v16 = vld [vmem:[%s2642_s1 + $0x40] sm:$0xff]   ;;  %v2135_v21 = vld [vmem:[%s2309_s26 + $0x1c] ss:$12 sps:$4 sm:$0xff]   ;;  %v2134_v22 = vld [vmem:[%s2642_s1 + $0xb0] sm:$0xff]  }
  0x13   : > { %1890 = vmatprep.subr.bf16.mxu0 %v2115_v4  ;;  %2072 = vmatprep.subr.bf16.mxu1 %v2115_v4  ;;  %v2126_v17 = vld [vmem:[%s2642_s1] sm:$0xff]   ;;  %v2137_v23 = vld [vmem:[%s2309_s26 + $0x13c] ss:$12 sps:$4 sm:$0xff]   ;;  %v2150_v33 = vld [vmem:[%s2642_s1 + $0x90] sm:$0xff]  }
  0x14   : > { %1099 = vmatprep.mubr.bf16.mxu1 %v2132_v12  ;;  %v2127_v19 = vld [vmem:[%s2309_s26] ss:$12 sps:$4 sm:$0xff]   ;;  %v2139_v24 = vld [vmem:[%s2309_s26 + $0x18] ss:$12 sps:$4 sm:$0xff]   ;;  %v2147_v31 = vld [vmem:[%s2309_s26 + $0x30] ss:$12 sps:$4 sm:$0xff]  }
  0x15   : > { %v2130_v20 = vld [vmem:[%s2309_s26 + $0x120] ss:$12 sps:$4 sm:$0xff]   ;;  %v2140_v26 = vld [vmem:[%s2309_s26 + $0x138] ss:$12 sps:$4 sm:$0xff]   ;;  %v2148_v32 = vld [vmem:[%s2309_s26 + $0x150] ss:$12 sps:$4 sm:$0xff]  }
  0x16   : > { %1891 = vmatpush3.bf16.msra.mxu0 %v2116_v5  ;;  %2080 = vmatpush3.bf16.msra.mxu1 %v2116_v5  ;;  %v2141_v25 = vld [vmem:[%s2642_s1 + $0xa8] sm:$0xff]   ;;  %v2142_v27 = vld [vmem:[%s2642_s1 + $0xa0] sm:$0xff]   ;;  %v2149_v30 = vld [vmem:[%s2642_s1 + $0x98] sm:$0xff]  }
  0x17   : > { %1892 = vmatprep.subr.bf16.mxu0 %v2117_v6  ;;  %2073 = vmatprep.subr.bf16.mxu1 %v2117_v6  ;;  %v2145_v29 = vld [vmem:[%s2309_s26 + $0x154] ss:$12 sps:$4 sm:$0xff]   ;;  %v2151_v34 = vld [vmem:[%s2309_s26 + $0x4c] ss:$12 sps:$4 sm:$0xff]   ;;  %v2159_v39 = vld [vmem:[%s2309_s26 + $0x64] ss:$12 sps:$4 sm:$0xff]  }
  0x18   : > { %v2153_v35 = vld [vmem:[%s2309_s26 + $0x16c] ss:$12 sps:$4 sm:$0xff]   ;;  %v2155_v37 = vld [vmem:[%s2309_s26 + $0x48] ss:$12 sps:$4 sm:$0xff]   ;;  %v2158_v40 = vld [vmem:[%s2642_s1 + $0x80] sm:$0xff]  }
  0x19   : > { %v2157_v36 = vld [vmem:[%s2642_s1 + $0x88] sm:$0xff]   ;;  %v2166_v45 = vld [vmem:[%s2309_s26 + $0x38] ss:$12 sps:$4 sm:$0xff]   ;;  %v2168_v47 = vld [vmem:[%s2309_s26 + $0x50] ss:$12 sps:$4 sm:$0xff]  }
  0x1a   : > { %1893 = vmatpush3.bf16.msra.mxu0 %v2118_v7  ;;  %2081 = vmatpush3.bf16.msra.mxu1 %v2118_v7  ;;  %v2156_v38 = vld [vmem:[%s2309_s26 + $0x168] ss:$12 sps:$4 sm:$0xff]   ;;  %v2162_v42 = vld [vmem:[%s2309_s26 + $0x60] ss:$12 sps:$4 sm:$0xff]   ;;  %v2167_v46 = vld [vmem:[%s2309_s26 + $0x78] ss:$12 sps:$4 sm:$0xff]  }
  0x1b   : > { %1894 = vmatprep.subr.bf16.mxu0 %v2119_v8  ;;  %2074 = vmatprep.subr.bf16.mxu1 %v2119_v8  ;;  %v2161_v41 = vld [vmem:[%s2309_s26 + $0x8] ss:$12 sps:$4 sm:$0xff]   ;;  %v2163_v43 = vld [vmem:[%s2309_s26 + $0x20] ss:$12 sps:$4 sm:$0xff]   ;;  %v2172_v50 = vld [vmem:[%s2309_s26 + $0x90] ss:$12 sps:$4 sm:$0xff]  }
  0x1c   : > { %v2164_v44 = vld [vmem:[%s2309_s26 + $0x7c] ss:$12 sps:$4 sm:$0xff]   ;;  %v2169_v48 = vld [vmem:[%s2309_s26 + $0x94] ss:$12 sps:$4 sm:$0xff]   ;;  %v2174_v52 = vld [vmem:[%s2309_s26 + $0xac] ss:$12 sps:$4 sm:$0xff]  }
  0x1d   : > { %v2171_v49 = vld [vmem:[%s2309_s26 + $0x68] ss:$12 sps:$4 sm:$0xff]   ;;  %v2173_v51 = vld [vmem:[%s2309_s26 + $0x80] ss:$12 sps:$4 sm:$0xff]   ;;  %v2176_v53 = vld [vmem:[%s2309_s26 + $0x98] ss:$12 sps:$4 sm:$0xff]  }
  0x1e   : > { %1895 = vmatpush3.bf16.msra.mxu0 %v2120_v9  ;;  %2082 = vmatpush3.bf16.msra.mxu1 %v2120_v9  ;;  %v2177_v54 = vld [vmem:[%s2309_s26 + $0xa8] ss:$12 sps:$4 sm:$0xff]   ;;  %v2178_v55 = vld [vmem:[%s2309_s26 + $0xb0] ss:$12 sps:$4 sm:$0xff]   ;;  %v2182_v58 = vld [vmem:[%s2309_s26 + $0xc0] ss:$12 sps:$4 sm:$0xff]  }
  0x1f   : > { %1896 = vmatprep.subr.bf16.mxu0 %v2121_v10  ;;  %2075 = vmatprep.subr.bf16.mxu1 %v2121_v10  ;;  %v2179_v56 = vld [vmem:[%s2309_s26 + $0xc4] ss:$12 sps:$4 sm:$0xff]   ;;  %v2181_v57 = vld [vmem:[%s2309_s26 + $0xc8] ss:$12 sps:$4 sm:$0xff]   ;;  %v2183_v59 = vld [vmem:[%s2309_s26 + $0xe0] ss:$12 sps:$4 sm:$0xff]  }
  0x20   : > { %v2184_v60 = vld [vmem:[%s2309_s26 + $0xdc] ss:$12 sps:$4 sm:$0xff]   ;;  %v2186_v61 = vld [vmem:[%s2309_s26 + $0xf8] ss:$12 sps:$4 sm:$0xff]   ;;  %v2189_v0 = vld [vmem:[%s2309_s26 + $0xf4] ss:$12 sps:$4 sm:$0xff]  }
  0x21   : > { %v2187_v62 = vld [vmem:[%s2309_s26 + $0xd8] ss:$12 sps:$4 sm:$0xff]   ;;  %v2188_v63 = vld [vmem:[%s2309_s26 + $0x110] ss:$12 sps:$4 sm:$0xff]   ;;  %v2191_v1 = vld [vmem:[%s2309_s26 + $0x128] ss:$12 sps:$4 sm:$0xff]  }
  0x22   : > { %1897 = vmatpush3.bf16.msra.mxu0 %v2122_v13  ;;  %2083 = vmatpush3.bf16.msra.mxu1 %v2122_v13  ;;  %v2192_v2 = vld [vmem:[%s2309_s26 + $0xf0] ss:$12 sps:$4 sm:$0xff]   ;;  %v2193_v3 = vld [vmem:[%s2309_s26 + $0x140] ss:$12 sps:$4 sm:$0xff]   ;;  %v2196_v5 = vld [vmem:[%s2309_s26 + $0x158] ss:$12 sps:$4 sm:$0xff]  }
  0x23   : > { %1898 = vmatprep.subr.bf16.mxu0 %v2123_v14  ;;  %2076 = vmatprep.subr.bf16.mxu1 %v2123_v14  ;;  %v2194_v4 = vld [vmem:[%s2309_s26 + $0x10c] ss:$12 sps:$4 sm:$0xff]   ;;  %v2197_v6 = vld [vmem:[%s2309_s26 + $0x108] ss:$12 sps:$4 sm:$0xff]   ;;  %v2198_v7 = vld [vmem:[%s2309_s26 + $0x170] ss:$12 sps:$4 sm:$0xff]  }
  0x26   : > { %1899 = vmatpush3.bf16.msra.mxu0 %v2124_v15  ;;  %2084 = vmatpush3.bf16.msra.mxu1 %v2124_v15 }
  0x27   : > { %1900 = vmatprep.subr.bf16.mxu0 %v2125_v16  ;;  %2077 = vmatprep.subr.bf16.mxu1 %v2125_v16 }
  0x2a   : > { %1901 = vmatpush3.bf16.msra.mxu0 %v2126_v17  ;;  %2085 = vmatpush3.bf16.msra.mxu1 %v2126_v17 }
  0x2b   : > { %2022 = vmatprep.subr.bf16.mxu1 %v2133_v18 }
  0x2d   : > { %1004 = vmatmul.mubr.bf16.vlgmr.msra.gmra.mxu0 %v2127_v19  ;;  %1100 = vmatmul.mubr.bf16.vlgmr.msra.gmra.mxu1 %v2130_v20 }
  0x2e   : > { %2023 = vmatpush3.bf16.msra.mxu1 %v2133_v18  ;;  %1011 = vmatprep.mubr.bf16.mxu0 %v2135_v21 }
  0x2f   : > { %2024 = vmatprep.subr.bf16.mxu1 %v2134_v22  ;;  %1107 = vmatprep.mubr.bf16.mxu1 %v2137_v23 }
  0x32   : > { %2025 = vmatpush3.bf16.msra.mxu1 %v2134_v22 }
  0x33   : > { %2026 = vmatprep.subr.bf16.mxu1 %v2141_v25 }
  0x35   : > { %1012 = vmatmul.mubr.bf16.gmra.mxu0 %v2139_v24  ;;  %1108 = vmatmul.mubr.bf16.gmra.mxu1 %v2140_v26 }
  0x36   : > { %2027 = vmatpush3.bf16.msra.mxu1 %v2141_v25  ;;  %1019 = vmatprep.mubr.bf16.mxu0 %v2143_v28 }
  0x37   : > { %2028 = vmatprep.subr.bf16.mxu1 %v2142_v27  ;;  %1115 = vmatprep.mubr.bf16.mxu1 %v2145_v29 }
  0x3a   : > { %2029 = vmatpush3.bf16.msra.mxu1 %v2142_v27 }
  0x3b   : > { %2030 = vmatprep.subr.bf16.mxu1 %v2149_v30 }
  0x3d   : > { %1020 = vmatmul.mubr.bf16.gmra.mxu0 %v2147_v31  ;;  %1116 = vmatmul.mubr.bf16.gmra.mxu1 %v2148_v32 }
  0x3e   : > { %2031 = vmatpush3.bf16.msra.mxu1 %v2149_v30  ;;  %1027 = vmatprep.mubr.bf16.mxu0 %v2151_v34 }
  0x3f   : > { %2032 = vmatprep.subr.bf16.mxu1 %v2150_v33  ;;  %1123 = vmatprep.mubr.bf16.mxu1 %v2153_v35 }
  0x42   : > { %2033 = vmatpush3.bf16.msra.mxu1 %v2150_v33 }
  0x43   : > { %2034 = vmatprep.subr.bf16.mxu1 %v2157_v36 }
  0x45   : > { %1028 = vmatmul.mubr.bf16.gmra.mxu0 %v2155_v37  ;;  %1124 = vmatmul.mubr.bf16.gmra.mxu1 %v2156_v38 }
  0x46   : > { %2035 = vmatpush3.bf16.msra.mxu1 %v2157_v36  ;;  %1035 = vmatprep.mubr.bf16.mxu0 %v2159_v39 }
  0x47   : > { %2036 = vmatprep.subr.bf16.mxu1 %v2158_v40  ;;  %2038 = vmatprep.mubr.bf16.mxu1 %v2161_v41 }
  0x4a   : > { %2037 = vmatpush3.bf16.msra.mxu1 %v2158_v40 }
  0x4d   : > { %1036 = vmatmul.mubr.bf16.gmra.mxu0 %v2162_v42  ;;  %2039 = vmatmul.mubr.bf16.vlgmr.msra.gmra.mxu1 %v2163_v43 }
  0x4e   : > { %1043 = vmatprep.mubr.bf16.mxu0 %v2164_v44  ;;  %2042 = vmatprep.mubr.bf16.mxu1 %v2166_v45 }
  0x55   : > { %1044 = vmatmul.mubr.bf16.gmra.mxu0 %v2167_v46  ;;  %2043 = vmatmul.mubr.bf16.gmra.mxu1 %v2168_v47 }
  0x56   : > { %1051 = vmatprep.mubr.bf16.mxu0 %v2169_v48  ;;  %2046 = vmatprep.mubr.bf16.mxu1 %v2171_v49 }
  0x5d   : > { %1052 = vmatmul.mubr.bf16.gmra.mxu0 %v2172_v50  ;;  %2047 = vmatmul.mubr.bf16.gmra.mxu1 %v2173_v51  ;;  %v2425_v51 = vld [vmem:[%s2643_s2] ss:$0 sm:$0xff] }
  0x5e   : > { %1059 = vmatprep.mubr.bf16.mxu0 %v2174_v52  ;;  %2050 = vmatprep.mubr.bf16.mxu1 %v2176_v53 }
  0x65   : > { %1060 = vmatmul.mubr.bf16.gmra.mxu0 %v2177_v54  ;;  %2051 = vmatmul.mubr.bf16.gmra.mxu1 %v2178_v55  ;;  %v2430_v54 = vld [vmem:[%s2644_s3] ss:$0 sm:$0xff] }
  0x66   : > { %1067 = vmatprep.mubr.bf16.mxu0 %v2179_v56  ;;  %2054 = vmatprep.mubr.bf16.mxu1 %v2181_v57 }
  0x6d   : > { %1068 = vmatmul.mubr.bf16.gmra.mxu0 %v2182_v58  ;;  %2055 = vmatmul.mubr.bf16.gmra.mxu1 %v2183_v59 }
  0x6e   : > { %1075 = vmatprep.mubr.bf16.mxu0 %v2184_v60  ;;  %2058 = vmatprep.mubr.bf16.mxu1 %v2186_v61  ;;  %v2438_v60 = vld [vmem:[%s2645_s4] ss:$0 sm:$0xff] }
  0x75   : > { %1076 = vmatmul.mubr.bf16.gmra.mxu0 %v2187_v62  ;;  %2059 = vmatmul.mubr.bf16.gmra.mxu1 %v2188_v63 }
  0x76   : > { %1083 = vmatprep.mubr.bf16.mxu0 %v2189_v0  ;;  %2062 = vmatprep.mubr.bf16.mxu1 %v2191_v1 }
  0x7d   : > { %1084 = vmatmul.mubr.bf16.gmra.mxu0 %v2192_v2  ;;  %2063 = vmatmul.mubr.bf16.gmra.mxu1 %v2193_v3  ;;  %v2448_v3 = vld [vmem:[%s2646_s5] ss:$0 sm:$0xff] }
  0x7e   : > { %1091 = vmatprep.mubr.bf16.mxu0 %v2194_v4  ;;  %2066 = vmatprep.mubr.bf16.mxu1 %v2196_v5 }
  0x85   : > { %1092 = vmatmul.mubr.bf16.gmra.mxu0 %v2197_v6  ;;  %2067 = vmatmul.mubr.bf16.gmra.mxu1 %v2198_v7 }
  0xed   : > { %v1902_v8 = vpop.f32.mrf.mxu0  ;;  %v1974_v9 = vpop.f32.mrf.mxu1 }
  0xef   : > { %v1903_v10 = vpop.f32.mrf.mxu0  ;;  %v1975_v11 = vpop.f32.mrf.mxu1 }
  0xf0   : > { %v2404_v12 = vadd.f32 %v1975_v11, %v1974_v9  ;;  %v1904_v52 = vadd.f32 %v1903_v10, %v1902_v8 }
  0xf1   : > { %v1905_v13 = vpop.f32.mrf.mxu0  ;;  %v1977_v14 = vpop.f32.mrf.mxu1 }
  0xf3   : > { %v1906_v15 = vpop.f32.mrf.mxu0  ;;  %v1978_v16 = vpop.f32.mrf.mxu1 }
  0xf4   : > { %v2406_v17 = vadd.f32 %v1978_v16, %v1977_v14  ;;  %v1907_v2 = vadd.f32 %v1906_v15, %v1905_v13 }
  0xf5   : > { %v1908_v18 = vpop.f32.mrf.mxu0  ;;  %v1980_v19 = vpop.f32.mrf.mxu1 }
  0xf7   : > { %v1909_v20 = vpop.f32.mrf.mxu0  ;;  %v1981_v21 = vpop.f32.mrf.mxu1 }
  0xf8   : > { %v2408_v22 = vadd.f32 %v1981_v21, %v1980_v19  ;;  %v1910_v47 = vadd.f32 %v1909_v20, %v1908_v18 }
  0xf9   : > { %v1911_v23 = vpop.f32.mrf.mxu0  ;;  %v1983_v24 = vpop.f32.mrf.mxu1 }
  0xfb   : > { %v1912_v25 = vpop.f32.mrf.mxu0  ;;  %v1984_v26 = vpop.f32.mrf.mxu1 }
  0xfc   : > { %v2410_v27 = vadd.f32 %v1984_v26, %v1983_v24  ;;  %v1913_v57 = vadd.f32 %v1912_v25, %v1911_v23 }
  0xfd   : > { %v1914_v28 = vpop.f32.mrf.mxu0  ;;  %v1986_v29 = vpop.f32.mrf.mxu1 }
  0xff   : > { %v1915_v30 = vpop.f32.mrf.mxu0  ;;  %v1987_v31 = vpop.f32.mrf.mxu1 }
 0x100   : > { %v2412_v32 = vadd.f32 %v1987_v31, %v1986_v29  ;;  %v1916_v18 = vadd.f32 %v1915_v30, %v1914_v28 }
 0x101   : > { %v1917_v33 = vpop.f32.mrf.mxu0  ;;  %v1989_v34 = vpop.f32.mrf.mxu1 }
 0x103   : > { %v1918_v35 = vpop.f32.mrf.mxu0  ;;  %v1990_v36 = vpop.f32.mrf.mxu1 }
 0x104   : > { %v2414_v37 = vadd.f32 %v1990_v36, %v1989_v34  ;;  %v1919_v31 = vadd.f32 %v1918_v35, %v1917_v33 }
 0x105   : > { %v1920_v38 = vpop.f32.mrf.mxu0  ;;  %v1992_v39 = vpop.f32.mrf.mxu1 }
 0x107   : > { %v1921_v40 = vpop.f32.mrf.mxu0  ;;  %v1993_v41 = vpop.f32.mrf.mxu1 }
 0x108   : > { %v2416_v42 = vadd.f32 %v1993_v41, %v1992_v39  ;;  %v1922_v9 = vadd.f32 %v1921_v40, %v1920_v38 }
 0x109   : > { %v1923_v43 = vpop.f32.mrf.mxu0  ;;  %v1995_v44 = vpop.f32.mrf.mxu1 }
 0x10b   : > { %v1924_v45 = vpop.f32.mrf.mxu0  ;;  %v1996_v46 = vpop.f32.mrf.mxu1 }
 0x10c   : > { %v2418_v48 = vadd.f32 %v1996_v46, %v1995_v44  ;;  %v1925_v19 = vadd.f32 %v1924_v45, %v1923_v43 }
 0x10d   : > { %v2420_v49 = vpop.f32.mrf.mxu0  ;;  %v2040_v50 = vpop.f32.mrf.mxu1 }
 0x10e   : > { %v1175_v53 = vadd.f32 %v2040_v50, %v1910_v47 }
 0x10f   : > { %v2432_v55 = vpop.f32.mrf.mxu0  ;;  %v1166_v56 = vpop.f32.mrf.mxu1 }
 0x110   : > { %v1401_v58 = vadd.f32 %v2425_v51, %v1175_v53  ;;  %v1167_v59 = vadd.f32 %v1904_v52, %v1166_v56 }
 0x111   : > { %v2440_v61 = vpop.f32.mrf.mxu0  ;;  %v2041_v62 = vpop.f32.mrf.mxu1 }
 0x112   : > { %v1440_v63 = vmul.f32 %v2430_v54, %v1401_v58  ;;  %v1399_v0 = vadd.f32 %v2425_v51, %v1167_v59  ;;  %v1178_v1 = vadd.f32 %v2041_v62, %v1913_v57  ;;  %v1928_v62 = vadd.f32 %v2432_v55, %v2420_v49 }
 0x113   : > { %v2450_v4 = vpop.f32.mrf.mxu0  ;;  %v1169_v5 = vpop.f32.mrf.mxu1 }
 0x114   : > { %v1479_v6 = vadd.f32 %v2438_v60, %v1440_v63  ;;  %v1438_v7 = vmul.f32 %v2430_v54, %v1399_v0  ;;  %v1402_v8 = vadd.f32 %v2425_v51, %v1178_v1  ;;  %v1170_v10 = vadd.f32 %v1907_v2, %v1169_v5 }
 0x115   : > { %v1932_v11 = vpop.f32.mrf.mxu0  ;;  %v2044_v14 = vpop.f32.mrf.mxu1 }
 0x116   : > { %vm1511_vm0 = vcmp.gt.f32.partialorder %v1479_v6, 0.0  ;;  %v1550_v13 = vmul.f32 %v2448_v3, %v1479_v6  ;;  %v1477_v15 = vadd.f32 %v2438_v60, %v1438_v7  ;;  %v1441_v16 = vmul.f32 %v2430_v54, %v1402_v8 }
 0x117   : > { %v1400_v20 = vadd.f32 %v2425_v51, %v1170_v10  ;;  %v1191_v21 = vadd.f32 %v2044_v14, %v1922_v9  ;;  %v1933_v23 = vpop.f32.mrf.mxu0  ;;  %v1182_v24 = vpop.f32.mrf.mxu1 }
 0x118   : > { %v1582_v25 = vsel %vm1511_vm0, %v1479_v6, %v1550_v13  ;;  %vm1509_vm1 = vcmp.gt.f32.partialorder %v1477_v15, 0.0  ;;  %v1548_v26 = vmul.f32 %v2448_v3, %v1477_v15  ;;  %v1480_v29 = vadd.f32 %v2438_v60, %v1441_v16 }
 0x119   : > { %1614 = vst [vmem:[%s2458_s29 + $0x10] sm:$0xff] %v1582_v25  ;;  %v1439_v34 = vmul.f32 %v2430_v54, %v1400_v20  ;;  %v1405_v36 = vadd.f32 %v2425_v51, %v1191_v21  ;;  %v1183_v28 = vadd.f32 %v1916_v18, %v1182_v24  ;;  %v1935_v30 = vpop.f32.mrf.mxu0  ;;  %v2045_v38 = vpop.f32.mrf.mxu1  ;;  %v1934_v47 = vadd.f32 %v1933_v23, %v1932_v11 }
 0x11a   : > { %v1580_v39 = vsel %vm1509_vm1, %v1477_v15, %v1548_v26  ;;  %vm1512_vm2 = vcmp.gt.f32.partialorder %v1480_v29, 0.0  ;;  %v1551_v40 = vmul.f32 %v2448_v3, %v1480_v29  ;;  %v1194_v41 = vadd.f32 %v2045_v38, %v1925_v19 }
 0x11b   : > { %1612 = vst [vmem:[%s2458_s29] sm:$0xff] %v1580_v39  ;;  %v1478_v43 = vadd.f32 %v2438_v60, %v1439_v34  ;;  %v1444_v44 = vmul.f32 %v2430_v54, %v1405_v36  ;;  %v1403_v33 = vadd.f32 %v2425_v51, %v1183_v28  ;;  %v1936_v35 = vpop.f32.mrf.mxu0  ;;  %v1185_v45 = vpop.f32.mrf.mxu1  ;;  %v1931_v21 = vadd.f32 %v2450_v4, %v2440_v61 }
 0x11c   : > { %v1583_v46 = vsel %vm1512_vm2, %v1480_v29, %v1551_v40  ;;  %v1406_v50 = vadd.f32 %v2425_v51, %v1194_v41  ;;  %v1186_v52 = vadd.f32 %v1919_v31, %v1185_v45  ;;  %v1937_v10 = vadd.f32 %v1936_v35, %v1935_v30 }
 0x11d   : > { %1615 = vst [vmem:[%s2458_s29 + $0x18] sm:$0xff] %v1583_v46  ;;  %vm1510_vm3 = vcmp.gt.f32.partialorder %v1478_v43, 0.0  ;;  %v1549_v53 = vmul.f32 %v2448_v3, %v1478_v43  ;;  %v1483_v56 = vadd.f32 %v2438_v60, %v1444_v44  ;;  %v1442_v57 = vmul.f32 %v2430_v54, %v1403_v33  ;;  %v1938_v58 = vpop.f32.mrf.mxu0  ;;  %v2048_v59 = vpop.f32.mrf.mxu1 }
 0x11e   : > { %v1445_v63 = vmul.f32 %v2430_v54, %v1406_v50  ;;  %v1404_v0 = vadd.f32 %v2425_v51, %v1186_v52  ;;  %v1207_v1 = vadd.f32 %v2048_v59, %v1934_v47 }
 0x11f   : > { %v1581_v2 = vsel %vm1510_vm3, %v1478_v43, %v1549_v53  ;;  %vm1515_vm4 = vcmp.gt.f32.partialorder %v1483_v56, 0.0  ;;  %v1554_v5 = vmul.f32 %v2448_v3, %v1483_v56  ;;  %v1481_v6 = vadd.f32 %v2438_v60, %v1442_v57  ;;  %v1939_v7 = vpop.f32.mrf.mxu0  ;;  %v1198_v8 = vpop.f32.mrf.mxu1 }
 0x120   : > { %1613 = vst [vmem:[%s2458_s29 + $0x8] sm:$0xff] %v1581_v2  ;;  %v1484_v9 = vadd.f32 %v2438_v60, %v1445_v63  ;;  %v1443_v49 = vmul.f32 %v2430_v54, %v1404_v0  ;;  %v1409_v55 = vadd.f32 %v2425_v51, %v1207_v1  ;;  %v1199_v13 = vadd.f32 %v1928_v62, %v1198_v8 }
 0x121   : > { %v1586_v11 = vsel %vm1515_vm4, %v1483_v56, %v1554_v5  ;;  %vm1513_vm5 = vcmp.gt.f32.partialorder %v1481_v6, 0.0  ;;  %v1552_v14 = vmul.f32 %v2448_v3, %v1481_v6  ;;  %v1941_v15 = vpop.f32.mrf.mxu0  ;;  %v2049_v16 = vpop.f32.mrf.mxu1  ;;  %v1940_v41 = vadd.f32 %v1939_v7, %v1938_v58 }
 0x122   : > { %1618 = vst [vmem:[%s2458_s29 + $0x30] sm:$0xff] %v1586_v11  ;;  %vm1516_vm6 = vcmp.gt.f32.partialorder %v1484_v9, 0.0  ;;  %v1555_v18 = vmul.f32 %v2448_v3, %v1484_v9  ;;  %v1482_v19 = vadd.f32 %v2438_v60, %v1443_v49  ;;  %v1448_v20 = vmul.f32 %v2430_v54, %v1409_v55 }
 0x123   : > { %v1584_v23 = vsel %vm1513_vm5, %v1481_v6, %v1552_v14  ;;  %v1407_v24 = vadd.f32 %v2425_v51, %v1199_v13  ;;  %v1210_v25 = vadd.f32 %v2049_v16, %v1937_v10  ;;  %v1942_v26 = vpop.f32.mrf.mxu0  ;;  %v1201_v29 = vpop.f32.mrf.mxu1 }
 0x124   : > { %1616 = vst [vmem:[%s2458_s29 + $0x20] sm:$0xff] %v1584_v23  ;;  %v1587_v31 = vsel %vm1516_vm6, %v1484_v9, %v1555_v18  ;;  %vm1514_vm7 = vcmp.gt.f32.partialorder %v1482_v19, 0.0  ;;  %v1553_v34 = vmul.f32 %v2448_v3, %v1482_v19  ;;  %v1487_v36 = vadd.f32 %v2438_v60, %v1448_v20 }
 0x125   : > { %1619 = vst [vmem:[%s2458_s29 + $0x38] sm:$0xff] %v1587_v31  ;;  %v1446_v28 = vmul.f32 %v2430_v54, %v1407_v24  ;;  %v1410_v30 = vadd.f32 %v2425_v51, %v1210_v25  ;;  %v1202_v61 = vadd.f32 %v1931_v21, %v1201_v29  ;;  %v1944_v4 = vpop.f32.mrf.mxu0  ;;  %v2052_v38 = vpop.f32.mrf.mxu1  ;;  %v1943_v59 = vadd.f32 %v1942_v26, %v1941_v15 }
 0x126   : > { %v1585_v39 = vsel %vm1514_vm7, %v1482_v19, %v1553_v34  ;;  %vm1519_vm8 = vcmp.gt.f32.partialorder %v1487_v36, 0.0  ;;  %v1558_v40 = vmul.f32 %v2448_v3, %v1487_v36 }
 0x127   : > { %1617 = vst [vmem:[%s2458_s29 + $0x28] sm:$0xff] %v1585_v39  ;;  %v1485_v43 = vadd.f32 %v2438_v60, %v1446_v28  ;;  %v1449_v44 = vmul.f32 %v2430_v54, %v1410_v30  ;;  %v1408_v33 = vadd.f32 %v2425_v51, %v1202_v61  ;;  %v1945_v35 = vpop.f32.mrf.mxu0  ;;  %v1214_v45 = vpop.f32.mrf.mxu1 }
 0x128   : > { %v1590_v46 = vsel %vm1519_vm8, %v1487_v36, %v1558_v40  ;;  %v1946_v47 = vadd.f32 %v1945_v35, %v1944_v4  ;;  %v1215_v50 = vadd.f32 %v1940_v41, %v1214_v45 }
 0x129   : > { %1622 = vst [vmem:[%s2458_s29 + $0x50] sm:$0xff] %v1590_v46  ;;  %vm1517_vm9 = vcmp.gt.f32.partialorder %v1485_v43, 0.0  ;;  %v1556_v52 = vmul.f32 %v2448_v3, %v1485_v43  ;;  %v1488_v53 = vadd.f32 %v2438_v60, %v1449_v44  ;;  %v1447_v56 = vmul.f32 %v2430_v54, %v1408_v33  ;;  %v1947_v57 = vpop.f32.mrf.mxu0  ;;  %v2053_v58 = vpop.f32.mrf.mxu1 }
 0x12a   : > { %v1223_v62 = vadd.f32 %v2052_v38, %v1946_v47  ;;  %v1411_v63 = vadd.f32 %v2425_v51, %v1215_v50 }
 0x12b   : > { %v1588_v0 = vsel %vm1517_vm9, %v1485_v43, %v1556_v52  ;;  %vm1520_vm10 = vcmp.gt.f32.partialorder %v1488_v53, 0.0  ;;  %v1559_v1 = vmul.f32 %v2448_v3, %v1488_v53  ;;  %v1486_v2 = vadd.f32 %v2438_v60, %v1447_v56  ;;  %v1948_v5 = vpop.f32.mrf.mxu0  ;;  %v1217_v6 = vpop.f32.mrf.mxu1 }
 0x12c   : > { %1620 = vst [vmem:[%s2458_s29 + $0x40] sm:$0xff] %v1588_v0  ;;  %v1413_v7 = vadd.f32 %v2425_v51, %v1223_v62  ;;  %v1450_v8 = vmul.f32 %v2430_v54, %v1411_v63  ;;  %v1949_v9 = vadd.f32 %v1948_v5, %v1947_v57  ;;  %v1218_v10 = vadd.f32 %v1943_v59, %v1217_v6 }
 0x12d   : > { %v1591_v49 = vsel %vm1520_vm10, %v1488_v53, %v1559_v1  ;;  %vm1518_vm11 = vcmp.gt.f32.partialorder %v1486_v2, 0.0  ;;  %v1557_v55 = vmul.f32 %v2448_v3, %v1486_v2  ;;  %v1950_v11 = vpop.f32.mrf.mxu0  ;;  %v2056_v14 = vpop.f32.mrf.mxu1 }
 0x12e   : > { %1623 = vst [vmem:[%s2458_s29 + $0x58] sm:$0xff] %v1591_v49  ;;  %v1452_v13 = vmul.f32 %v2430_v54, %v1413_v7  ;;  %v1489_v15 = vadd.f32 %v2438_v60, %v1450_v8  ;;  %v1226_v16 = vadd.f32 %v2053_v58, %v1949_v9  ;;  %v1412_v18 = vadd.f32 %v2425_v51, %v1218_v10 }
 0x12f   : > { %v1589_v19 = vsel %vm1518_vm11, %v1486_v2, %v1557_v55  ;;  %v1951_v20 = vpop.f32.mrf.mxu0  ;;  %v1230_v21 = vpop.f32.mrf.mxu1 }
 0x130   : > { %1621 = vst [vmem:[%s2458_s29 + $0x48] sm:$0xff] %v1589_v19  ;;  %v1491_v23 = vadd.f32 %v2438_v60, %v1452_v13  ;;  %vm1521_vm12 = vcmp.gt.f32.partialorder %v1489_v15, 0.0  ;;  %v1560_v24 = vmul.f32 %v2448_v3, %v1489_v15  ;;  %v1414_v25 = vadd.f32 %v2425_v51, %v1226_v16 }
 0x131   : > { %v1451_v26 = vmul.f32 %v2430_v54, %v1412_v18  ;;  %v1952_v29 = vadd.f32 %v1951_v20, %v1950_v11  ;;  %v1953_v31 = vpop.f32.mrf.mxu0  ;;  %v2057_v34 = vpop.f32.mrf.mxu1 }
 0x132   : > { %vm1523_vm13 = vcmp.gt.f32.partialorder %v1491_v23, 0.0  ;;  %v1562_v36 = vmul.f32 %v2448_v3, %v1491_v23  ;;  %v1592_v28 = vsel %vm1521_vm12, %v1489_v15, %v1560_v24  ;;  %v1453_v30 = vmul.f32 %v2430_v54, %v1414_v25 }
 0x133   : > { %1624 = vst [vmem:[%s2458_s29 + $0x60] sm:$0xff] %v1592_v28  ;;  %v1490_v61 = vadd.f32 %v2438_v60, %v1451_v26  ;;  %v1231_v4 = vadd.f32 %v1952_v29, %v1230_v21  ;;  %v1954_v38 = vpop.f32.mrf.mxu0  ;;  %v1233_v39 = vpop.f32.mrf.mxu1 }
 0x134   : > { %v1594_v40 = vsel %vm1523_vm13, %v1491_v23, %v1562_v36  ;;  %v1492_v41 = vadd.f32 %v2438_v60, %v1453_v30  ;;  %v1955_v43 = vadd.f32 %v1954_v38, %v1953_v31 }
 0x135   : > { %1626 = vst [vmem:[%s2458_s29 + $0x70] sm:$0xff] %v1594_v40  ;;  %vm1522_vm14 = vcmp.gt.f32.partialorder %v1490_v61, 0.0  ;;  %v1561_v44 = vmul.f32 %v2448_v3, %v1490_v61  ;;  %v1415_v33 = vadd.f32 %v2425_v51, %v1231_v4  ;;  %v1956_v35 = vpop.f32.mrf.mxu0  ;;  %v2536_v45 = vpop.f32.mrf.mxu1 }
 0x136   : > { %vm1524_vm15 = vcmp.gt.f32.partialorder %v1492_v41, 0.0  ;;  %v1563_v46 = vmul.f32 %v2448_v3, %v1492_v41  ;;  %v1234_v47 = vadd.f32 %v1955_v43, %v1233_v39 }
 0x137   : > { %v1593_v50 = vsel %vm1522_vm14, %v1490_v61, %v1561_v44  ;;  %v1454_v52 = vmul.f32 %v2430_v54, %v1415_v33  ;;  %v1957_v53 = vpop.f32.mrf.mxu0  ;;  %v1246_v56 = vpop.f32.mrf.mxu1 }
 0x138   : > { %v1595_v57 = vsel %vm1524_vm15, %v1492_v41, %v1563_v46  ;;  %1625 = vst [vmem:[%s2458_s29 + $0x68] sm:$0xff] %v1593_v50  ;;  %v1416_v58 = vadd.f32 %v2425_v51, %v1234_v47  ;;  %v1958_v59 = vadd.f32 %v1957_v53, %v1956_v35 }
 0x139   : > { %1627 = vst [vmem:[%s2458_s29 + $0x78] sm:$0xff] %v1595_v57  ;;  %v1493_v62 = vadd.f32 %v2438_v60, %v1454_v52  ;;  %v1959_v63 = vpop.f32.mrf.mxu0  ;;  %v2544_v0 = vpop.f32.mrf.mxu1 }
 0x13a   : > { %v1455_v1 = vmul.f32 %v2430_v54, %v1416_v58  ;;  %v1239_v2 = vadd.f32 %v2056_v14, %v1958_v59 }
 0x13b   : > { %vm1525_vm0 = vcmp.gt.f32.partialorder %v1493_v62, 0.0  ;;  %v1564_v5 = vmul.f32 %v2448_v3, %v1493_v62  ;;  %v1960_v6 = vpop.f32.mrf.mxu0  ;;  %v1249_v7 = vpop.f32.mrf.mxu1 }
 0x13c   : > { %v1494_v8 = vadd.f32 %v2438_v60, %v1455_v1  ;;  %v1417_v9 = vadd.f32 %v2425_v51, %v1239_v2  ;;  %v1961_v10 = vadd.f32 %v1960_v6, %v1959_v63 }
 0x13d   : > { %v1596_v49 = vsel %vm1525_vm0, %v1493_v62, %v1564_v5  ;;  %v1962_v55 = vpop.f32.mrf.mxu0  ;;  %v2064_v11 = vpop.f32.mrf.mxu1 }
 0x13e   : > { %1628 = vst [vmem:[%s2458_s29 + $0x80] sm:$0xff] %v1596_v49  ;;  %vm1526_vm1 = vcmp.gt.f32.partialorder %v1494_v8, 0.0  ;;  %v1565_v13 = vmul.f32 %v2448_v3, %v1494_v8  ;;  %v1456_v14 = vmul.f32 %v2430_v54, %v1417_v9  ;;  %v1242_v15 = vadd.f32 %v2057_v34, %v1961_v10 }
 0x13f   : > { %v1271_v16 = vadd.f32 %v2064_v11, %v2408_v22  ;;  %v1963_v18 = vpop.f32.mrf.mxu0  ;;  %v1262_v19 = vpop.f32.mrf.mxu1 }
 0x140   : > { %v1597_v20 = vsel %vm1526_vm1, %v1494_v8, %v1565_v13  ;;  %v1495_v21 = vadd.f32 %v2438_v60, %v1456_v14  ;;  %v1418_v23 = vadd.f32 %v2425_v51, %v1242_v15  ;;  %v1964_v24 = vadd.f32 %v1963_v18, %v1962_v55 }
 0x141   : > { %1629 = vst [vmem:[%s2458_s29 + $0x88] sm:$0xff] %v1597_v20  ;;  %v1425_v25 = vadd.f32 %v2425_v51, %v1271_v16  ;;  %v1263_v26 = vadd.f32 %v2404_v12, %v1262_v19  ;;  %v1965_v29 = vpop.f32.mrf.mxu0  ;;  %v2065_v31 = vpop.f32.mrf.mxu1 }
 0x142   : > { %vm1527_vm2 = vcmp.gt.f32.partialorder %v1495_v21, 0.0  ;;  %v1566_v34 = vmul.f32 %v2448_v3, %v1495_v21  ;;  %v1457_v22 = vmul.f32 %v2430_v54, %v1418_v23  ;;  %v1247_v36 = vadd.f32 %v1964_v24, %v1246_v56 }
 0x143   : > { %v1464_v28 = vmul.f32 %v2430_v54, %v1425_v25  ;;  %v1423_v30 = vadd.f32 %v2425_v51, %v1263_v26  ;;  %v1274_v61 = vadd.f32 %v2065_v31, %v2410_v27  ;;  %v1966_v4 = vpop.f32.mrf.mxu0  ;;  %v1265_v38 = vpop.f32.mrf.mxu1 }
 0x144   : > { %v1598_v39 = vsel %vm1527_vm2, %v1495_v21, %v1566_v34  ;;  %v1496_v12 = vadd.f32 %v2438_v60, %v1457_v22  ;;  %v1419_v40 = vadd.f32 %v2425_v51, %v1247_v36  ;;  %v1967_v41 = vadd.f32 %v1966_v4, %v1965_v29 }
 0x145   : > { %1630 = vst [vmem:[%s2458_s29 + $0x90] sm:$0xff] %v1598_v39  ;;  %v1503_v43 = vadd.f32 %v2438_v60, %v1464_v28  ;;  %v1462_v44 = vmul.f32 %v2430_v54, %v1423_v30  ;;  %v1426_v33 = vadd.f32 %v2425_v51, %v1274_v61  ;;  %v1266_v35 = vadd.f32 %v2406_v17, %v1265_v38  ;;  %v1968_v46 = vpop.f32.mrf.mxu0  ;;  %v2068_v27 = vpop.f32.mrf.mxu1 }
 0x146   : > { %vm1528_vm3 = vcmp.gt.f32.partialorder %v1496_v12, 0.0  ;;  %v1567_v47 = vmul.f32 %v2448_v3, %v1496_v12  ;;  %v1458_v50 = vmul.f32 %v2430_v54, %v1419_v40  ;;  %v1250_v52 = vadd.f32 %v1967_v41, %v1249_v7 }
 0x147   : > { %vm1535_vm4 = vcmp.gt.f32.partialorder %v1503_v43, 0.0  ;;  %v1574_v53 = vmul.f32 %v2448_v3, %v1503_v43  ;;  %v1501_v56 = vadd.f32 %v2438_v60, %v1462_v44  ;;  %v1465_v57 = vmul.f32 %v2430_v54, %v1426_v33  ;;  %v1969_v58 = vpop.f32.mrf.mxu0  ;;  %v1278_v59 = vpop.f32.mrf.mxu1 }
 0x148   : > { %v1599_v17 = vsel %vm1528_vm3, %v1496_v12, %v1567_v47  ;;  %v1497_v62 = vadd.f32 %v2438_v60, %v1458_v50  ;;  %v1420_v63 = vadd.f32 %v2425_v51, %v1250_v52  ;;  %v1424_v1 = vadd.f32 %v2425_v51, %v1266_v35 }
 0x149   : > { %1631 = vst [vmem:[%s2458_s29 + $0x98] sm:$0xff] %v1599_v17  ;;  %v1606_v2 = vsel %vm1535_vm4, %v1503_v43, %v1574_v53  ;;  %vm1533_vm5 = vcmp.gt.f32.partialorder %v1501_v56, 0.0  ;;  %v1572_v5 = vmul.f32 %v2448_v3, %v1501_v56  ;;  %v1504_v6 = vadd.f32 %v2438_v60, %v1465_v57  ;;  %v1971_v7 = vpop.f32.mrf.mxu0  ;;  %v2069_v8 = vpop.f32.mrf.mxu1 }
 0x14a   : > { %1638 = vst [vmem:[%s2458_s29 + $0xd0] sm:$0xff] %v1606_v2  ;;  %vm1529_vm6 = vcmp.gt.f32.partialorder %v1497_v62, 0.0  ;;  %v1568_v9 = vmul.f32 %v2448_v3, %v1497_v62  ;;  %v1459_v10 = vmul.f32 %v2430_v54, %v1420_v63  ;;  %v1463_v49 = vmul.f32 %v2430_v54, %v1424_v1 }
 0x14b   : > { %v1604_v55 = vsel %vm1533_vm5, %v1501_v56, %v1572_v5  ;;  %vm1536_vm7 = vcmp.gt.f32.partialorder %v1504_v6, 0.0  ;;  %v1575_v11 = vmul.f32 %v2448_v3, %v1504_v6  ;;  %v1287_v13 = vadd.f32 %v2068_v27, %v2416_v42  ;;  %v1972_v24 = vpop.f32.mrf.mxu0  ;;  %v1281_v25 = vpop.f32.mrf.mxu1 }
 0x14c   : > { %v1600_v14 = vsel %vm1529_vm6, %v1497_v62, %v1568_v9  ;;  %1636 = vst [vmem:[%s2458_s29 + $0xc0] sm:$0xff] %v1604_v55  ;;  %v1498_v15 = vadd.f32 %v2438_v60, %v1459_v10  ;;  %v1502_v16 = vadd.f32 %v2438_v60, %v1463_v49  ;;  %v1970_v18 = vadd.f32 %v1969_v58, %v1968_v46 }
 0x14d   : > { %1632 = vst [vmem:[%s2458_s29 + $0xa0] sm:$0xff] %v1600_v14  ;;  %v1607_v19 = vsel %vm1536_vm7, %v1504_v6, %v1575_v11  ;;  %v1429_v20 = vadd.f32 %v2425_v51, %v1287_v13  ;;  %v1279_v21 = vadd.f32 %v2412_v32, %v1278_v59  ;;  %v1290_v23 = vadd.f32 %v2069_v8, %v2418_v48 }
 0x14e   : > { %1639 = vst [vmem:[%s2458_s29 + $0xd8] sm:$0xff] %v1607_v19  ;;  %vm1530_vm8 = vcmp.gt.f32.partialorder %v1498_v15, 0.0  ;;  %v1569_v42 = vmul.f32 %v2448_v3, %v1498_v15  ;;  %vm1534_vm9 = vcmp.gt.f32.partialorder %v1502_v16, 0.0  ;;  %v1573_v26 = vmul.f32 %v2448_v3, %v1502_v16 }
 0x14f   : > { %v1468_v29 = vmul.f32 %v2430_v54, %v1429_v20  ;;  %v1255_v31 = vadd.f32 %v2536_v45, %v1970_v18  ;;  %v1427_v34 = vadd.f32 %v2425_v51, %v1279_v21  ;;  %v1430_v32 = vadd.f32 %v2425_v51, %v1290_v23 }
 0x150   : > { %v1601_v48 = vsel %vm1530_vm8, %v1498_v15, %v1569_v42  ;;  %v1605_v22 = vsel %vm1534_vm9, %v1502_v16, %v1573_v26  ;;  %v1973_v36 = vadd.f32 %v1972_v24, %v1971_v7  ;;  %v1282_v28 = vadd.f32 %v2414_v37, %v1281_v25 }
 0x151   : > { %1633 = vst [vmem:[%s2458_s29 + $0xa8] sm:$0xff] %v1601_v48  ;;  %1637 = vst [vmem:[%s2458_s29 + $0xc8] sm:$0xff] %v1605_v22  ;;  %v1507_v30 = vadd.f32 %v2438_v60, %v1468_v29  ;;  %v1421_v61 = vadd.f32 %v2425_v51, %v1255_v31  ;;  %v1466_v4 = vmul.f32 %v2430_v54, %v1427_v34 }
 0x152   : > { %v1469_v45 = vmul.f32 %v2430_v54, %v1430_v32  ;;  %v1258_v38 = vadd.f32 %v2544_v0, %v1973_v36  ;;  %v1428_v39 = vadd.f32 %v2425_v51, %v1282_v28 }
 0x153   : > { %vm1539_vm10 = vcmp.gt.f32.partialorder %v1507_v30, 0.0  ;;  %v1578_v12 = vmul.f32 %v2448_v3, %v1507_v30  ;;  %v1460_v37 = vmul.f32 %v2430_v54, %v1421_v61  ;;  %v1505_v40 = vadd.f32 %v2438_v60, %v1466_v4 }
 0x154   : > { %v1508_v41 = vadd.f32 %v2438_v60, %v1469_v45  ;;  %v1422_v43 = vadd.f32 %v2425_v51, %v1258_v38  ;;  %v1467_v44 = vmul.f32 %v2430_v54, %v1428_v39 }
 0x155   : > { %v1610_v33 = vsel %vm1539_vm10, %v1507_v30, %v1578_v12  ;;  %v1499_v35 = vadd.f32 %v2438_v60, %v1460_v37  ;;  %vm1537_vm11 = vcmp.gt.f32.partialorder %v1505_v40, 0.0  ;;  %v1576_v0 = vmul.f32 %v2448_v3, %v1505_v40 }
 0x156   : > { %1642 = vst [vmem:[%s2458_s29 + $0xf0] sm:$0xff] %v1610_v33  ;;  %vm1540_vm12 = vcmp.gt.f32.partialorder %v1508_v41, 0.0  ;;  %v1579_v46 = vmul.f32 %v2448_v3, %v1508_v41  ;;  %v1461_v27 = vmul.f32 %v2430_v54, %v1422_v43  ;;  %v1506_v47 = vadd.f32 %v2438_v60, %v1467_v44 }
 0x157   : > { %vm1531_vm13 = vcmp.gt.f32.partialorder %v1499_v35, 0.0  ;;  %v1570_v51 = vmul.f32 %v2448_v3, %v1499_v35  ;;  %v1608_v50 = vsel %vm1537_vm11, %v1505_v40, %v1576_v0 }
 0x158   : > { %1640 = vst [vmem:[%s2458_s29 + $0xe0] sm:$0xff] %v1608_v50  ;;  %v1611_v52 = vsel %vm1540_vm12, %v1508_v41, %v1579_v46  ;;  %v1500_v53 = vadd.f32 %v2438_v60, %v1461_v27  ;;  %vm1538_vm14 = vcmp.gt.f32.partialorder %v1506_v47, 0.0  ;;  %v1577_v56 = vmul.f32 %v2448_v3, %v1506_v47 }
 0x159   : > { %v1602_v57 = vsel %vm1531_vm13, %v1499_v35, %v1570_v51  ;;  %1643 = vst [vmem:[%s2458_s29 + $0xf8] sm:$0xff] %v1611_v52 }
 0x15a   : > { %1634 = vst [vmem:[%s2458_s29 + $0xb0] sm:$0xff] %v1602_v57  ;;  %vm1532_vm15 = vcmp.gt.f32.partialorder %v1500_v53, 0.0  ;;  %v1571_v54 = vmul.f32 %v2448_v3, %v1500_v53  ;;  %v1609_v58 = vsel %vm1538_vm14, %v1506_v47, %v1577_v56 }
 0x15b   : > { %1641 = vst [vmem:[%s2458_s29 + $0xe8] sm:$0xff] %v1609_v58 }
 0x15c   : > { %v1603_v59 = vsel %vm1532_vm15, %v1500_v53, %v1571_v54 }
 0x15d   : > { %1635 = vst [vmem:[%s2458_s29 + $0xb8] sm:$0xff] %v1603_v59 }
 0x15e PF: > { %s16_s23 = sadd.s32 1, %s2221_s23   ;;  %s2648_s21 = smov %s2217_s22 }
 0x15f   : > { %p13_p5 = scmp.ge.s32.totalorder %s16_s23, 10   ;;  %s2649_s22 = smov %s2651_s24 }
 0x161   :  { %15 = sbr.rel (!%p13_p5) target bundleno = 2 (0x2), region = 97 }

// kernel: a_call__.27
= control target key start
LH: loop header
LB: loop body
LE: loop exit
PB: predicated region body
PF: predicated region fallthrough
CT: control target
= control target key end

     0   :  { %s2675_s21 = smov 0   ;;  %s2677_s22 = smov 0   ;;  %s3146_s0 = inlined_call_operand.vmem [shape: bf16[8192,3072], index: 0, kind: input, shape index: {}]   ;;  %s3147_s1 = inlined_call_operand.vmem [shape: bf16[3072,128], index: 1, kind: input, shape index: {}]   ;;  %s3148_s2 = inlined_call_operand.vmem [shape: f32[1,128], index: 2, kind: input, shape index: {}]   ;;  %s3149_s3 = inlined_call_operand.vmem [shape: f32[1,128], index: 3, kind: input, shape index: {}]   ;;  %s3150_s4 = inlined_call_operand.vmem [shape: f32[1,128], index: 4, kind: input, shape index: {}, may-alias: {4,5}]   ;;  %s3151_s5 = inlined_call_operand.vmem [shape: f32[1,128], index: 5, kind: input, shape index: {}, may-alias: {4,5}]   ;;  %s3152_s6 = inlined_call_operand.vmem [shape: f32[8192,128], index: 6, kind: output, shape index: {}]  }
   0x1   :  { %s2679_s23 = smov 0   ;;  %s2681_s24 = smov 0  }
   0x2   :  { %s2683_s25 = smov 0   ;;  %s2685_s26 = smov 0  }
   0x3   :  { %s2687_s27 = smov 0  }
   0x4 LB: > { %s28_s5 = sadd.s32 1, %s2629_s25  ;;  %s35_s28 = sadd.s32 1, %s2633_s26  ;;  %s2637_s27 = sphi %s2687_s27, %s16_s27   ;;  %s2633_s26 = sphi %s2685_s26, %s3158_s26   ;;  %s2629_s25 = sphi %s2683_s25, %s3157_s25   ;;  %s2625_s24 = sphi %s2681_s24, %s3156_s24   ;;  %s2621_s23 = sphi %s2679_s23, %s3155_s23   ;;  %s2617_s22 = sphi %s2677_s22, %s3154_s22   ;;  %s2613_s21 = sphi %s2675_s21, %s3153_s21  }
   0x5   : > { %p29_p0 = scmp.ge.s32.totalorder %s28_s5, 6  ;;  %p51_p1 = scmp.ne.s32.totalorder %s2617_s22, %s2613_s21 }
   0x6   : > { %p52_p2 = scmp.eq.s32.totalorder %s2637_s27, 0  ;;  %s44_s8 = sadd.s32 1, %s2617_s22 }
   0x7   : > { %s3160_s5 = smov (%p29_p0, %s28_s5), 0  ;;  %s3162_s28 = smov (!%p29_p0, %s35_s28), %s2633_s26 }
   0x8   : > { %p53_p3 = por %p52_p2, %p51_p1  ;;  %p37_p4 = scmp.ge.s32.totalorder %s3162_s28, 32 }
   0x9   : > { %s40_s29 = ssub.s32 %s2629_s25, %s3160_s5  ;;  %p1994_p6 = scmp.ge.s32.totalorder %s2637_s27, 192 }
   0xa   : > { %s3164_s28 = smov (%p37_p4, %s3162_s28), 0 }
   0xb   : > { %s39_s30 = ssub.s32 %s2633_s26, %s3164_s28  ;;  %261 = sbr.rel (%p1994_p6) target bundleno = 56 (0x38), region = 32 }
   0xc   : > { %s41_s7 = sor.u32 %s40_s29, %s39_s30 }
   0xd   : > { %p42_p5 = scmp.eq.s32.totalorder %s41_s7, 0 }
   0xf   : > { %s2726_s9 = scalar_select %p42_p5, %s2617_s22, %s44_s8  }
  0x10   : > { %264 = sbr.rel (!%p53_p3) target bundleno = 56 (0x38), region = 36  ;;  %s266_s10 = sand.u32 (%p53_p3), 1, %s2617_s22  }
  0x11   : > { %s1997_s11 = sshll.u32 (%p53_p3), %s2629_s25, 2  ;;  %s1995_s12 = sshll.u32 (%p53_p3), %s266_s10, 9 }
  0x12   : > { %s2333_s13 = smul.u32 (%p53_p3), 768, %s2633_s26  ;;  %s2740_s19 = scalar_lea.vmem (%p53_p3), [#allocation3], %s1995_s12 }
  0x14   : > { %s272_s14 = sadd.s32 (%p53_p3), %s2333_s13, %s1997_s11 }
  0x15   : > { %s1999_s15 = sshll.u32 %s272_s14, 2 }
  0x16   : > { %s2735_s18 = scalar_lea.vmem %s3146_s0, %s1999_s15 }
  0x17   : > { %v287_v0 = vld [vmem:[%s2735_s18] sm:$0xff]  ;;  %v289_v1 = vld [vmem:[%s2735_s18 + $0x8] sm:$0xff] }
  0x18   : > { %v291_v2 = vld [vmem:[%s2735_s18 + $0x60] sm:$0xff]  ;;  %288 = vst [vmem:[%s2740_s19] sm:$0xff] %v287_v0  ;;  %290 = vst [vmem:[%s2740_s19 + $0x8] sm:$0xff] %v289_v1  ;;  %v293_v3 = vld [vmem:[%s2735_s18 + $0x68] sm:$0xff] }
  0x19   : > { %292 = vst [vmem:[%s2740_s19 + $0x10] sm:$0xff] %v291_v2  ;;  %v295_v4 = vld [vmem:[%s2735_s18 + $0xc0] sm:$0xff]  ;;  %v297_v5 = vld [vmem:[%s2735_s18 + $0xc8] sm:$0xff]  ;;  %294 = vst [vmem:[%s2740_s19 + $0x18] sm:$0xff] %v293_v3 }
  0x1a   : > { %296 = vst [vmem:[%s2740_s19 + $0x20] sm:$0xff] %v295_v4  ;;  %298 = vst [vmem:[%s2740_s19 + $0x28] sm:$0xff] %v297_v5  ;;  %v299_v6 = vld [vmem:[%s2735_s18 + $0x120] sm:$0xff]  ;;  %v301_v7 = vld [vmem:[%s2735_s18 + $0x128] sm:$0xff] }
  0x1b   : > { %v303_v8 = vld [vmem:[%s2735_s18 + $0x180] sm:$0xff]  ;;  %300 = vst [vmem:[%s2740_s19 + $0x30] sm:$0xff] %v299_v6  ;;  %302 = vst [vmem:[%s2740_s19 + $0x38] sm:$0xff] %v301_v7  ;;  %v305_v9 = vld [vmem:[%s2735_s18 + $0x188] sm:$0xff] }
  0x1c   : > { %304 = vst [vmem:[%s2740_s19 + $0x40] sm:$0xff] %v303_v8  ;;  %v307_v10 = vld [vmem:[%s2735_s18 + $0x1e0] sm:$0xff]  ;;  %v309_v11 = vld [vmem:[%s2735_s18 + $0x1e8] sm:$0xff]  ;;  %306 = vst [vmem:[%s2740_s19 + $0x48] sm:$0xff] %v305_v9 }
  0x1d   : > { %308 = vst [vmem:[%s2740_s19 + $0x50] sm:$0xff] %v307_v10  ;;  %310 = vst [vmem:[%s2740_s19 + $0x58] sm:$0xff] %v309_v11  ;;  %v311_v12 = vld [vmem:[%s2735_s18 + $0x240] sm:$0xff]  ;;  %v313_v13 = vld [vmem:[%s2735_s18 + $0x248] sm:$0xff] }
  0x1e   : > { %v315_v14 = vld [vmem:[%s2735_s18 + $0x2a0] sm:$0xff]  ;;  %312 = vst [vmem:[%s2740_s19 + $0x60] sm:$0xff] %v311_v12  ;;  %314 = vst [vmem:[%s2740_s19 + $0x68] sm:$0xff] %v313_v13  ;;  %v317_v15 = vld [vmem:[%s2735_s18 + $0x2a8] sm:$0xff] }
  0x1f   : > { %316 = vst [vmem:[%s2740_s19 + $0x70] sm:$0xff] %v315_v14  ;;  %v319_v16 = vld [vmem:[%s2735_s18 + $0x300] sm:$0xff]  ;;  %v321_v17 = vld [vmem:[%s2735_s18 + $0x308] sm:$0xff]  ;;  %318 = vst [vmem:[%s2740_s19 + $0x78] sm:$0xff] %v317_v15 }
  0x20   : > { %320 = vst [vmem:[%s2740_s19 + $0x80] sm:$0xff] %v319_v16  ;;  %322 = vst [vmem:[%s2740_s19 + $0x88] sm:$0xff] %v321_v17  ;;  %v323_v18 = vld [vmem:[%s2735_s18 + $0x360] sm:$0xff]  ;;  %v325_v19 = vld [vmem:[%s2735_s18 + $0x368] sm:$0xff] }
  0x21   : > { %v327_v20 = vld [vmem:[%s2735_s18 + $0x3c0] sm:$0xff]  ;;  %324 = vst [vmem:[%s2740_s19 + $0x90] sm:$0xff] %v323_v18  ;;  %326 = vst [vmem:[%s2740_s19 + $0x98] sm:$0xff] %v325_v19  ;;  %v329_v21 = vld [vmem:[%s2735_s18 + $0x3c8] sm:$0xff] }
  0x22   : > { %328 = vst [vmem:[%s2740_s19 + $0xa0] sm:$0xff] %v327_v20  ;;  %v331_v22 = vld [vmem:[%s2735_s18 + $0x420] sm:$0xff]  ;;  %v333_v23 = vld [vmem:[%s2735_s18 + $0x428] sm:$0xff]  ;;  %330 = vst [vmem:[%s2740_s19 + $0xa8] sm:$0xff] %v329_v21 }
  0x23   : > { %332 = vst [vmem:[%s2740_s19 + $0xb0] sm:$0xff] %v331_v22  ;;  %334 = vst [vmem:[%s2740_s19 + $0xb8] sm:$0xff] %v333_v23  ;;  %v335_v24 = vld [vmem:[%s2735_s18 + $0x480] sm:$0xff]  ;;  %v337_v25 = vld [vmem:[%s2735_s18 + $0x488] sm:$0xff] }
  0x24   : > { %v339_v26 = vld [vmem:[%s2735_s18 + $0x4e0] sm:$0xff]  ;;  %336 = vst [vmem:[%s2740_s19 + $0xc0] sm:$0xff] %v335_v24  ;;  %338 = vst [vmem:[%s2740_s19 + $0xc8] sm:$0xff] %v337_v25  ;;  %v341_v27 = vld [vmem:[%s2735_s18 + $0x4e8] sm:$0xff] }
  0x25   : > { %340 = vst [vmem:[%s2740_s19 + $0xd0] sm:$0xff] %v339_v26  ;;  %v343_v28 = vld [vmem:[%s2735_s18 + $0x540] sm:$0xff]  ;;  %v345_v29 = vld [vmem:[%s2735_s18 + $0x548] sm:$0xff]  ;;  %342 = vst [vmem:[%s2740_s19 + $0xd8] sm:$0xff] %v341_v27 }
  0x26   : > { %344 = vst [vmem:[%s2740_s19 + $0xe0] sm:$0xff] %v343_v28  ;;  %346 = vst [vmem:[%s2740_s19 + $0xe8] sm:$0xff] %v345_v29  ;;  %v347_v30 = vld [vmem:[%s2735_s18 + $0x5a0] sm:$0xff]  ;;  %v349_v31 = vld [vmem:[%s2735_s18 + $0x5a8] sm:$0xff] }
  0x27   : > { %v351_v32 = vld [vmem:[%s2735_s18 + $0x600] sm:$0xff]  ;;  %348 = vst [vmem:[%s2740_s19 + $0xf0] sm:$0xff] %v347_v30  ;;  %350 = vst [vmem:[%s2740_s19 + $0xf8] sm:$0xff] %v349_v31  ;;  %v353_v33 = vld [vmem:[%s2735_s18 + $0x608] sm:$0xff] }
  0x28   : > { %352 = vst [vmem:[%s2740_s19 + $0x100] sm:$0xff] %v351_v32  ;;  %v355_v34 = vld [vmem:[%s2735_s18 + $0x660] sm:$0xff]  ;;  %v357_v35 = vld [vmem:[%s2735_s18 + $0x668] sm:$0xff]  ;;  %354 = vst [vmem:[%s2740_s19 + $0x108] sm:$0xff] %v353_v33 }
  0x29   : > { %356 = vst [vmem:[%s2740_s19 + $0x110] sm:$0xff] %v355_v34  ;;  %358 = vst [vmem:[%s2740_s19 + $0x118] sm:$0xff] %v357_v35  ;;  %v359_v36 = vld [vmem:[%s2735_s18 + $0x6c0] sm:$0xff]  ;;  %v361_v37 = vld [vmem:[%s2735_s18 + $0x6c8] sm:$0xff] }
  0x2a   : > { %v363_v38 = vld [vmem:[%s2735_s18 + $0x720] sm:$0xff]  ;;  %360 = vst [vmem:[%s2740_s19 + $0x120] sm:$0xff] %v359_v36  ;;  %362 = vst [vmem:[%s2740_s19 + $0x128] sm:$0xff] %v361_v37  ;;  %v365_v39 = vld [vmem:[%s2735_s18 + $0x728] sm:$0xff] }
  0x2b   : > { %364 = vst [vmem:[%s2740_s19 + $0x130] sm:$0xff] %v363_v38  ;;  %v367_v40 = vld [vmem:[%s2735_s18 + $0x780] sm:$0xff]  ;;  %v369_v41 = vld [vmem:[%s2735_s18 + $0x788] sm:$0xff]  ;;  %366 = vst [vmem:[%s2740_s19 + $0x138] sm:$0xff] %v365_v39 }
  0x2c   : > { %368 = vst [vmem:[%s2740_s19 + $0x140] sm:$0xff] %v367_v40  ;;  %370 = vst [vmem:[%s2740_s19 + $0x148] sm:$0xff] %v369_v41  ;;  %v371_v42 = vld [vmem:[%s2735_s18 + $0x7e0] sm:$0xff]  ;;  %v373_v43 = vld [vmem:[%s2735_s18 + $0x7e8] sm:$0xff] }
  0x2d   : > { %v375_v44 = vld [vmem:[%s2735_s18 + $0x840] sm:$0xff]  ;;  %372 = vst [vmem:[%s2740_s19 + $0x150] sm:$0xff] %v371_v42  ;;  %374 = vst [vmem:[%s2740_s19 + $0x158] sm:$0xff] %v373_v43  ;;  %v377_v45 = vld [vmem:[%s2735_s18 + $0x848] sm:$0xff] }
  0x2e   : > { %376 = vst [vmem:[%s2740_s19 + $0x160] sm:$0xff] %v375_v44  ;;  %v379_v46 = vld [vmem:[%s2735_s18 + $0x8a0] sm:$0xff]  ;;  %v381_v47 = vld [vmem:[%s2735_s18 + $0x8a8] sm:$0xff]  ;;  %378 = vst [vmem:[%s2740_s19 + $0x168] sm:$0xff] %v377_v45 }
  0x2f   : > { %380 = vst [vmem:[%s2740_s19 + $0x170] sm:$0xff] %v379_v46  ;;  %382 = vst [vmem:[%s2740_s19 + $0x178] sm:$0xff] %v381_v47  ;;  %v383_v48 = vld [vmem:[%s2735_s18 + $0x900] sm:$0xff]  ;;  %v385_v49 = vld [vmem:[%s2735_s18 + $0x908] sm:$0xff] }
  0x30   : > { %v387_v50 = vld [vmem:[%s2735_s18 + $0x960] sm:$0xff]  ;;  %384 = vst [vmem:[%s2740_s19 + $0x180] sm:$0xff] %v383_v48  ;;  %386 = vst [vmem:[%s2740_s19 + $0x188] sm:$0xff] %v385_v49  ;;  %v389_v51 = vld [vmem:[%s2735_s18 + $0x968] sm:$0xff] }
  0x31   : > { %388 = vst [vmem:[%s2740_s19 + $0x190] sm:$0xff] %v387_v50  ;;  %v391_v52 = vld [vmem:[%s2735_s18 + $0x9c0] sm:$0xff]  ;;  %v393_v53 = vld [vmem:[%s2735_s18 + $0x9c8] sm:$0xff]  ;;  %390 = vst [vmem:[%s2740_s19 + $0x198] sm:$0xff] %v389_v51 }
  0x32   : > { %392 = vst [vmem:[%s2740_s19 + $0x1a0] sm:$0xff] %v391_v52  ;;  %394 = vst [vmem:[%s2740_s19 + $0x1a8] sm:$0xff] %v393_v53  ;;  %v395_v54 = vld [vmem:[%s2735_s18 + $0xa20] sm:$0xff]  ;;  %v397_v55 = vld [vmem:[%s2735_s18 + $0xa28] sm:$0xff] }
  0x33   : > { %v399_v56 = vld [vmem:[%s2735_s18 + $0xa80] sm:$0xff]  ;;  %396 = vst [vmem:[%s2740_s19 + $0x1b0] sm:$0xff] %v395_v54  ;;  %398 = vst [vmem:[%s2740_s19 + $0x1b8] sm:$0xff] %v397_v55  ;;  %v401_v57 = vld [vmem:[%s2735_s18 + $0xa88] sm:$0xff] }
  0x34   : > { %400 = vst [vmem:[%s2740_s19 + $0x1c0] sm:$0xff] %v399_v56  ;;  %v403_v58 = vld [vmem:[%s2735_s18 + $0xae0] sm:$0xff]  ;;  %v405_v59 = vld [vmem:[%s2735_s18 + $0xae8] sm:$0xff]  ;;  %402 = vst [vmem:[%s2740_s19 + $0x1c8] sm:$0xff] %v401_v57 }
  0x35   : > { %404 = vst [vmem:[%s2740_s19 + $0x1d0] sm:$0xff] %v403_v58  ;;  %406 = vst [vmem:[%s2740_s19 + $0x1d8] sm:$0xff] %v405_v59  ;;  %v407_v60 = vld [vmem:[%s2735_s18 + $0xb40] sm:$0xff]  ;;  %v409_v61 = vld [vmem:[%s2735_s18 + $0xb48] sm:$0xff] }
  0x36   : > { %v411_v62 = vld [vmem:[%s2735_s18 + $0xba0] sm:$0xff]  ;;  %408 = vst [vmem:[%s2740_s19 + $0x1e0] sm:$0xff] %v407_v60  ;;  %410 = vst [vmem:[%s2740_s19 + $0x1e8] sm:$0xff] %v409_v61  ;;  %v413_v63 = vld [vmem:[%s2735_s18 + $0xba8] sm:$0xff] }
  0x37   : > { %412 = vst [vmem:[%s2740_s19 + $0x1f0] sm:$0xff] %v411_v62  ;;  %414 = vst [vmem:[%s2740_s19 + $0x1f8] sm:$0xff] %v413_v63 }
  0x38 PF: > { %p2000_p7 = scmp.ge.s32.totalorder %s2637_s27, 1  ;;  %p431_p8 = scmp.lt.s32.totalorder %s2637_s27, 193 }
  0x3a   : > { %p432_p9 = pnand %p2000_p7, %p431_p8 }
  0x3b   : > { %s438_s20 = sand.u32 (!%p432_p9), 1, %s2613_s21   ;;  %s2002_s29 = sshll.u32 (!%p432_p9), %s2621_s23, 6 }
  0x3c   : > { %435 = sbr.rel (%p432_p9) target bundleno = 506 (0x1fa), region = 63  ;;  %s2001_s30 = sshll.u32 (!%p432_p9), %s438_s20, 9 }
  0x3d   : > { %p493_p10 = scmp.lt.s32.totalorder (!%p432_p9), %s2002_s29, 383  ;;  %s2004_s7 = sshll.u32 (!%p432_p9), %s2625_s24, 5 }
  0x3e   : > { %p514_p11 = scmp.lt.s32.totalorder (!%p432_p9), %s2004_s7, 1023  ;;  %s2882_s21 = scalar_lea.vmem (!%p432_p9), [#allocation3], %s2001_s30 }
  0x3f   : > { %p2006_p12 = scmp.ne.s32.totalorder (!%p432_p9), %s2621_s23, 0 }
  0x41   : > { %s3166_s29 = smov (!%p493_p10, %s2002_s29), 383  ;;  %s3168_s7 = smov (!%p514_p11, %s2004_s7), 1023 }
  0x42   : > { %s2003_s8 = sshll.u32 %s3166_s29, 2  ;;  %s2005_s13 = sshll.u32 %s3168_s7, 3 }
  0x43   : > { %s2875_s12 = scalar_lea.vmem %s3147_s1, %s2003_s8  ;;  %s2880_s16 = scalar_lea.vmem %s3152_s6, %s2005_s13 }
  0x44   : > { %526 = sbr.rel (%p2006_p12) target bundleno = 90 (0x5a), region = 71 }
  0x49   : > { %v2639_v0 = vmov 0.0  }
  0x4a   : > { %527 = vst [vmem:[#allocation2 + $0xb0] sm:$0xff] %v2639_v0  ;;  %528 = vst [vmem:[#allocation2] sm:$0xff] %v2639_v0 }
  0x4b   : > { %529 = vst [vmem:[#allocation2 + $0xd8] sm:$0xff] %v2639_v0  ;;  %530 = vst [vmem:[#allocation2 + $0x18] sm:$0xff] %v2639_v0 }
  0x4c   : > { %531 = vst [vmem:[#allocation2 + $0x50] sm:$0xff] %v2639_v0  ;;  %532 = vst [vmem:[#allocation2 + $0x68] sm:$0xff] %v2639_v0 }
  0x4d   : > { %533 = vst [vmem:[#allocation2 + $0x30] sm:$0xff] %v2639_v0  ;;  %534 = vst [vmem:[#allocation2 + $0x48] sm:$0xff] %v2639_v0 }
  0x4e   : > { %535 = vst [vmem:[#allocation2 + $0x80] sm:$0xff] %v2639_v0  ;;  %536 = vst [vmem:[#allocation2 + $0x88] sm:$0xff] %v2639_v0 }
  0x4f   : > { %537 = vst [vmem:[#allocation2 + $0xe8] sm:$0xff] %v2639_v0  ;;  %538 = vst [vmem:[#allocation2 + $0xb8] sm:$0xff] %v2639_v0 }
  0x50   : > { %539 = vst [vmem:[#allocation2 + $0x60] sm:$0xff] %v2639_v0  ;;  %540 = vst [vmem:[#allocation2 + $0xf0] sm:$0xff] %v2639_v0 }
  0x51   : > { %541 = vst [vmem:[#allocation2 + $0x8] sm:$0xff] %v2639_v0  ;;  %542 = vst [vmem:[#allocation2 + $0x78] sm:$0xff] %v2639_v0 }
  0x52   : > { %543 = vst [vmem:[#allocation2 + $0x38] sm:$0xff] %v2639_v0  ;;  %544 = vst [vmem:[#allocation2 + $0x58] sm:$0xff] %v2639_v0 }
  0x53   : > { %545 = vst [vmem:[#allocation2 + $0x40] sm:$0xff] %v2639_v0  ;;  %546 = vst [vmem:[#allocation2 + $0xc8] sm:$0xff] %v2639_v0 }
  0x54   : > { %547 = vst [vmem:[#allocation2 + $0xe0] sm:$0xff] %v2639_v0  ;;  %548 = vst [vmem:[#allocation2 + $0x90] sm:$0xff] %v2639_v0 }
  0x55   : > { %549 = vst [vmem:[#allocation2 + $0x70] sm:$0xff] %v2639_v0  ;;  %550 = vst [vmem:[#allocation2 + $0xc0] sm:$0xff] %v2639_v0 }
  0x56   : > { %551 = vst [vmem:[#allocation2 + $0xa8] sm:$0xff] %v2639_v0  ;;  %552 = vst [vmem:[#allocation2 + $0xd0] sm:$0xff] %v2639_v0 }
  0x57   : > { %553 = vst [vmem:[#allocation2 + $0x10] sm:$0xff] %v2639_v0  ;;  %554 = vst [vmem:[#allocation2 + $0x28] sm:$0xff] %v2639_v0 }
  0x58   : > { %555 = vst [vmem:[#allocation2 + $0xa0] sm:$0xff] %v2639_v0  ;;  %556 = vst [vmem:[#allocation2 + $0xf8] sm:$0xff] %v2639_v0 }
  0x59   : > { %557 = vst [vmem:[#allocation2 + $0x20] sm:$0xff] %v2639_v0  ;;  %558 = vst [vmem:[#allocation2 + $0x98] sm:$0xff] %v2639_v0 }
  0x5a PF: > { %v2391_v1 = vld [vmem:[%s2875_s12 + $0x78] sm:$0xff]   ;;  %v2395_v5 = vld [vmem:[%s2875_s12 + $0x70] sm:$0xff]   ;;  %v2399_v9 = vld [vmem:[%s2875_s12 + $0x68] sm:$0xff]   ;;  %p2103_p13 = scmp.ne.s32.totalorder %s2621_s23, 5 }
  0x5b   : > { %v2392_v2 = vld [vmem:[%s2875_s12 + $0xf8] sm:$0xff]   ;;  %2109 = vmatprep.subr.bf16.mxu0 %v2391_v1  ;;  %v2396_v6 = vld [vmem:[%s2875_s12 + $0xf0] sm:$0xff]   ;;  %v2400_v10 = vld [vmem:[%s2875_s12 + $0xe8] sm:$0xff]  }
  0x5c   : > { %v2393_v3 = vld [vmem:[%s2875_s12 + $0x38] sm:$0xff]   ;;  %2221 = vmatprep.subr.bf16.mxu1 %v2392_v2  ;;  %v2397_v7 = vld [vmem:[%s2875_s12 + $0x30] sm:$0xff]   ;;  %v2401_v11 = vld [vmem:[%s2875_s12 + $0x28] sm:$0xff]  }
  0x5d   : > { %v2394_v4 = vld [vmem:[%s2875_s12 + $0xb8] sm:$0xff]   ;;  %2110 = vmatpush3.bf16.msra.mxu0 %v2393_v3  ;;  %v2398_v8 = vld [vmem:[%s2875_s12 + $0xb0] sm:$0xff]   ;;  %v2402_v12 = vld [vmem:[%s2875_s12 + $0xa8] sm:$0xff]  }
  0x5e   : > { %2222 = vmatpush3.bf16.msra.mxu1 %v2394_v4  ;;  %2111 = vmatprep.subr.bf16.mxu0 %v2395_v5  ;;  %v2403_v13 = vld [vmem:[%s2875_s12 + $0x60] sm:$0xff]   ;;  %v2407_v17 = vld [vmem:[%s2875_s12 + $0x58] sm:$0xff]   ;;  %v2411_v21 = vld [vmem:[%s2875_s12 + $0x50] sm:$0xff]  }
  0x5f   : > { %2223 = vmatprep.subr.bf16.mxu1 %v2396_v6  ;;  %v2404_v14 = vld [vmem:[%s2875_s12 + $0xe0] sm:$0xff]   ;;  %v2408_v18 = vld [vmem:[%s2875_s12 + $0xd8] sm:$0xff]   ;;  %v2412_v22 = vld [vmem:[%s2875_s12 + $0xd0] sm:$0xff]  }
  0x60   : > { %v2405_v15 = vld [vmem:[%s2875_s12 + $0x20] sm:$0xff]   ;;  %v2409_v19 = vld [vmem:[%s2875_s12 + $0x18] sm:$0xff]   ;;  %v2413_v23 = vld [vmem:[%s2875_s12 + $0x10] sm:$0xff]  }
  0x61   : > { %2112 = vmatpush3.bf16.msra.mxu0 %v2397_v7  ;;  %v2406_v16 = vld [vmem:[%s2875_s12 + $0xa0] sm:$0xff]   ;;  %v2410_v20 = vld [vmem:[%s2875_s12 + $0x98] sm:$0xff]   ;;  %v2414_v24 = vld [vmem:[%s2875_s12 + $0x90] sm:$0xff]  }
  0x62   : > { %2224 = vmatpush3.bf16.msra.mxu1 %v2398_v8  ;;  %2113 = vmatprep.subr.bf16.mxu0 %v2399_v9  ;;  %v2415_v25 = vld [vmem:[%s2875_s12 + $0x48] sm:$0xff]   ;;  %v2419_v29 = vld [vmem:[%s2875_s12 + $0x40] sm:$0xff]  }
  0x63   : > { %2225 = vmatprep.subr.bf16.mxu1 %v2400_v10  ;;  %v2416_v26 = vld [vmem:[%s2875_s12 + $0xc8] sm:$0xff]   ;;  %v2420_v30 = vld [vmem:[%s2875_s12 + $0xc0] sm:$0xff]  }
  0x64   : > { %v2417_v27 = vld [vmem:[%s2875_s12 + $0x8] sm:$0xff]   ;;  %v2421_v31 = vld [vmem:[%s2875_s12] sm:$0xff]  }
  0x65   : > { %2114 = vmatpush3.bf16.msra.mxu0 %v2401_v11  ;;  %v2418_v28 = vld [vmem:[%s2875_s12 + $0x88] sm:$0xff]   ;;  %v2422_v32 = vld [vmem:[%s2875_s12 + $0x80] sm:$0xff]  }
  0x66   : > { %2226 = vmatpush3.bf16.msra.mxu1 %v2402_v12  ;;  %2115 = vmatprep.subr.bf16.mxu0 %v2403_v13  ;;  %v2423_v33 = vld [vmem:[%s2882_s21] ss:$16 sps:$4 sm:$0xff]   ;;  %v2425_v34 = vld [vmem:[%s2882_s21 + $0x4] ss:$16 sps:$4 sm:$0xff]   ;;  %v2426_v35 = vld [vmem:[%s2882_s21 + $0x8] ss:$16 sps:$4 sm:$0xff]  }
  0x67   : > { %2227 = vmatprep.subr.bf16.mxu1 %v2404_v14  ;;  %v2428_v36 = vld [vmem:[%s2882_s21 + $0xc] ss:$16 sps:$4 sm:$0xff]   ;;  %1263 = vmatprep.mubr.bf16.mxu0 %v2425_v34  ;;  %v2429_v37 = vld [vmem:[%s2882_s21 + $0x24] ss:$16 sps:$4 sm:$0xff]   ;;  %v2433_v39 = vld [vmem:[%s2882_s21 + $0x20] ss:$16 sps:$4 sm:$0xff]  }
  0x68   : > { %1424 = vmatprep.mubr.bf16.mxu1 %v2428_v36  ;;  %v2431_v38 = vld [vmem:[%s2882_s21 + $0x2c] ss:$16 sps:$4 sm:$0xff]   ;;  %v2434_v40 = vld [vmem:[%s2882_s21 + $0x28] ss:$16 sps:$4 sm:$0xff]   ;;  %v2435_v41 = vld [vmem:[%s2882_s21 + $0x44] ss:$16 sps:$4 sm:$0xff]  }
  0x69   : > { %2116 = vmatpush3.bf16.msra.mxu0 %v2405_v15  ;;  %v2437_v42 = vld [vmem:[%s2882_s21 + $0x4c] ss:$16 sps:$4 sm:$0xff]   ;;  %v2439_v43 = vld [vmem:[%s2882_s21 + $0x40] ss:$16 sps:$4 sm:$0xff]   ;;  %v2440_v44 = vld [vmem:[%s2882_s21 + $0x48] ss:$16 sps:$4 sm:$0xff]  }
  0x6a   : > { %2228 = vmatpush3.bf16.msra.mxu1 %v2406_v16  ;;  %2117 = vmatprep.subr.bf16.mxu0 %v2407_v17  ;;  %v2441_v45 = vld [vmem:[%s2882_s21 + $0x64] ss:$16 sps:$4 sm:$0xff]   ;;  %v2443_v46 = vld [vmem:[%s2882_s21 + $0x6c] ss:$16 sps:$4 sm:$0xff]   ;;  %v2445_v47 = vld [vmem:[%s2882_s21 + $0x60] ss:$16 sps:$4 sm:$0xff]  }
  0x6b   : > { %2229 = vmatprep.subr.bf16.mxu1 %v2408_v18  ;;  %v2446_v48 = vld [vmem:[%s2882_s21 + $0x68] ss:$16 sps:$4 sm:$0xff]   ;;  %v2447_v49 = vld [vmem:[%s2882_s21 + $0x84] ss:$16 sps:$4 sm:$0xff]   ;;  %v2449_v50 = vld [vmem:[%s2882_s21 + $0x8c] ss:$16 sps:$4 sm:$0xff]  }
  0x6c   : > { %v2451_v51 = vld [vmem:[%s2882_s21 + $0x80] ss:$16 sps:$4 sm:$0xff]   ;;  %v2452_v52 = vld [vmem:[%s2882_s21 + $0x88] ss:$16 sps:$4 sm:$0xff]   ;;  %v2453_v53 = vld [vmem:[%s2882_s21 + $0xa4] ss:$16 sps:$4 sm:$0xff]  }
  0x6d   : > { %2118 = vmatpush3.bf16.msra.mxu0 %v2409_v19  ;;  %v2455_v54 = vld [vmem:[%s2882_s21 + $0xac] ss:$16 sps:$4 sm:$0xff]   ;;  %v2457_v55 = vld [vmem:[%s2882_s21 + $0xa0] ss:$16 sps:$4 sm:$0xff]   ;;  %v2458_v56 = vld [vmem:[%s2882_s21 + $0xa8] ss:$16 sps:$4 sm:$0xff]  }
  0x6e   : > { %2230 = vmatpush3.bf16.msra.mxu1 %v2410_v20  ;;  %2119 = vmatprep.subr.bf16.mxu0 %v2411_v21  ;;  %v2459_v57 = vld [vmem:[%s2882_s21 + $0xc4] ss:$16 sps:$4 sm:$0xff]   ;;  %v2461_v58 = vld [vmem:[%s2882_s21 + $0xcc] ss:$16 sps:$4 sm:$0xff]   ;;  %v2463_v59 = vld [vmem:[%s2882_s21 + $0xc0] ss:$16 sps:$4 sm:$0xff]  }
  0x6f   : > { %2231 = vmatprep.subr.bf16.mxu1 %v2412_v22  ;;  %v2464_v60 = vld [vmem:[%s2882_s21 + $0xc8] ss:$16 sps:$4 sm:$0xff]   ;;  %v2465_v61 = vld [vmem:[%s2882_s21 + $0xe4] ss:$16 sps:$4 sm:$0xff]   ;;  %v2467_v62 = vld [vmem:[%s2882_s21 + $0xec] ss:$16 sps:$4 sm:$0xff]  }
  0x70   : > { %v2469_v63 = vld [vmem:[%s2882_s21 + $0xe0] ss:$16 sps:$4 sm:$0xff]   ;;  %v2470_v0 = vld [vmem:[%s2882_s21 + $0xe8] ss:$16 sps:$4 sm:$0xff]   ;;  %v2471_v1 = vld [vmem:[%s2882_s21 + $0x104] ss:$16 sps:$4 sm:$0xff]  }
  0x71   : > { %2120 = vmatpush3.bf16.msra.mxu0 %v2413_v23  ;;  %v2473_v2 = vld [vmem:[%s2882_s21 + $0x10c] ss:$16 sps:$4 sm:$0xff]   ;;  %v2475_v3 = vld [vmem:[%s2882_s21 + $0x100] ss:$16 sps:$4 sm:$0xff]   ;;  %v2476_v4 = vld [vmem:[%s2882_s21 + $0x108] ss:$16 sps:$4 sm:$0xff]  }
  0x72   : > { %2232 = vmatpush3.bf16.msra.mxu1 %v2414_v24  ;;  %2121 = vmatprep.subr.bf16.mxu0 %v2415_v25  ;;  %v2477_v5 = vld [vmem:[%s2882_s21 + $0x124] ss:$16 sps:$4 sm:$0xff]   ;;  %v2479_v6 = vld [vmem:[%s2882_s21 + $0x12c] ss:$16 sps:$4 sm:$0xff]   ;;  %v2481_v7 = vld [vmem:[%s2882_s21 + $0x120] ss:$16 sps:$4 sm:$0xff]  }
  0x73   : > { %2233 = vmatprep.subr.bf16.mxu1 %v2416_v26  ;;  %v2482_v8 = vld [vmem:[%s2882_s21 + $0x128] ss:$16 sps:$4 sm:$0xff]   ;;  %v2483_v9 = vld [vmem:[%s2882_s21 + $0x144] ss:$16 sps:$4 sm:$0xff]   ;;  %v2485_v10 = vld [vmem:[%s2882_s21 + $0x14c] ss:$16 sps:$4 sm:$0xff]  }
  0x74   : > { %v2487_v11 = vld [vmem:[%s2882_s21 + $0x140] ss:$16 sps:$4 sm:$0xff]   ;;  %v2488_v12 = vld [vmem:[%s2882_s21 + $0x148] ss:$16 sps:$4 sm:$0xff]   ;;  %v2489_v13 = vld [vmem:[%s2882_s21 + $0x164] ss:$16 sps:$4 sm:$0xff]  }
  0x75   : > { %2122 = vmatpush3.bf16.msra.mxu0 %v2417_v27  ;;  %v2491_v14 = vld [vmem:[%s2882_s21 + $0x16c] ss:$16 sps:$4 sm:$0xff]   ;;  %v2493_v15 = vld [vmem:[%s2882_s21 + $0x160] ss:$16 sps:$4 sm:$0xff]   ;;  %v2494_v16 = vld [vmem:[%s2882_s21 + $0x168] ss:$16 sps:$4 sm:$0xff]  }
  0x76   : > { %2234 = vmatpush3.bf16.msra.mxu1 %v2418_v28  ;;  %2123 = vmatprep.subr.bf16.mxu0 %v2419_v29  ;;  %v2495_v17 = vld [vmem:[%s2882_s21 + $0x184] ss:$16 sps:$4 sm:$0xff]   ;;  %v2497_v18 = vld [vmem:[%s2882_s21 + $0x18c] ss:$16 sps:$4 sm:$0xff]   ;;  %v2499_v19 = vld [vmem:[%s2882_s21 + $0x180] ss:$16 sps:$4 sm:$0xff]  }
  0x77   : > { %2235 = vmatprep.subr.bf16.mxu1 %v2420_v30  ;;  %v2500_v20 = vld [vmem:[%s2882_s21 + $0x188] ss:$16 sps:$4 sm:$0xff]   ;;  %v2501_v21 = vld [vmem:[%s2882_s21 + $0x1a4] ss:$16 sps:$4 sm:$0xff]   ;;  %v2503_v22 = vld [vmem:[%s2882_s21 + $0x1ac] ss:$16 sps:$4 sm:$0xff]  }
  0x78   : > { %v2505_v23 = vld [vmem:[%s2882_s21 + $0x1a0] ss:$16 sps:$4 sm:$0xff]   ;;  %v2506_v24 = vld [vmem:[%s2882_s21 + $0x1a8] ss:$16 sps:$4 sm:$0xff]   ;;  %v2507_v25 = vld [vmem:[%s2882_s21 + $0x1c4] ss:$16 sps:$4 sm:$0xff]  }
  0x79   : > { %2124 = vmatpush3.bf16.msra.mxu0 %v2421_v31  ;;  %v2509_v26 = vld [vmem:[%s2882_s21 + $0x1cc] ss:$16 sps:$4 sm:$0xff]   ;;  %v2511_v27 = vld [vmem:[%s2882_s21 + $0x1c0] ss:$16 sps:$4 sm:$0xff]   ;;  %v2512_v28 = vld [vmem:[%s2882_s21 + $0x1c8] ss:$16 sps:$4 sm:$0xff]  }
  0x7a   : > { %2236 = vmatpush3.bf16.msra.mxu1 %v2422_v32  ;;  %v2513_v29 = vld [vmem:[%s2882_s21 + $0x1e4] ss:$16 sps:$4 sm:$0xff]   ;;  %v2515_v30 = vld [vmem:[%s2882_s21 + $0x1ec] ss:$16 sps:$4 sm:$0xff]   ;;  %v2517_v31 = vld [vmem:[%s2882_s21 + $0x1e0] ss:$16 sps:$4 sm:$0xff]  }
  0x7b   : > { %v2518_v32 = vld [vmem:[%s2882_s21 + $0x1e8] ss:$16 sps:$4 sm:$0xff]  }
  0x7c   : > { %1264 = vmatmul.mubr.bf16.vlgmr.msra.gmra.mxu0 %v2423_v33 }
  0x7d   : > { %1425 = vmatmul.mubr.bf16.vlgmr.msra.gmra.mxu1 %v2426_v35  ;;  %1271 = vmatprep.mubr.bf16.mxu0 %v2429_v37 }
  0x7e   : > { %1432 = vmatprep.mubr.bf16.mxu1 %v2431_v38 }
  0x84   : > { %1272 = vmatmul.mubr.bf16.gmra.mxu0 %v2433_v39 }
  0x85   : > { %1433 = vmatmul.mubr.bf16.gmra.mxu1 %v2434_v40  ;;  %1279 = vmatprep.mubr.bf16.mxu0 %v2435_v41  ;;  %v559_v40 = vld [vmem:[#allocation2 + $0xb0] sm:$0xff] }
  0x86   : > { %1440 = vmatprep.mubr.bf16.mxu1 %v2437_v42 }
  0x8c   : > { %1280 = vmatmul.mubr.bf16.gmra.mxu0 %v2439_v43 }
  0x8d   : > { %1441 = vmatmul.mubr.bf16.gmra.mxu1 %v2440_v44  ;;  %1287 = vmatprep.mubr.bf16.mxu0 %v2441_v45 }
  0x8e   : > { %1448 = vmatprep.mubr.bf16.mxu1 %v2443_v46 }
  0x94   : > { %1288 = vmatmul.mubr.bf16.gmra.mxu0 %v2445_v47 }
  0x95   : > { %1449 = vmatmul.mubr.bf16.gmra.mxu1 %v2446_v48  ;;  %1295 = vmatprep.mubr.bf16.mxu0 %v2447_v49  ;;  %v560_v49 = vld [vmem:[#allocation2] sm:$0xff] }
  0x96   : > { %1456 = vmatprep.mubr.bf16.mxu1 %v2449_v50 }
  0x9c   : > { %1296 = vmatmul.mubr.bf16.gmra.mxu0 %v2451_v51 }
  0x9d   : > { %1457 = vmatmul.mubr.bf16.gmra.mxu1 %v2452_v52  ;;  %1303 = vmatprep.mubr.bf16.mxu0 %v2453_v53 }
  0x9e   : > { %1464 = vmatprep.mubr.bf16.mxu1 %v2455_v54 }
  0xa4   : > { %1304 = vmatmul.mubr.bf16.gmra.mxu0 %v2457_v55 }
  0xa5   : > { %1465 = vmatmul.mubr.bf16.gmra.mxu1 %v2458_v56  ;;  %1311 = vmatprep.mubr.bf16.mxu0 %v2459_v57 }
  0xa6   : > { %1472 = vmatprep.mubr.bf16.mxu1 %v2461_v58  ;;  %v561_v58 = vld [vmem:[#allocation2 + $0xd8] sm:$0xff] }
  0xac   : > { %1312 = vmatmul.mubr.bf16.gmra.mxu0 %v2463_v59 }
  0xad   : > { %1473 = vmatmul.mubr.bf16.gmra.mxu1 %v2464_v60  ;;  %1319 = vmatprep.mubr.bf16.mxu0 %v2465_v61 }
  0xae   : > { %1480 = vmatprep.mubr.bf16.mxu1 %v2467_v62 }
  0xb4   : > { %1320 = vmatmul.mubr.bf16.gmra.mxu0 %v2469_v63 }
  0xb5   : > { %1481 = vmatmul.mubr.bf16.gmra.mxu1 %v2470_v0  ;;  %1327 = vmatprep.mubr.bf16.mxu0 %v2471_v1 }
  0xb6   : > { %1488 = vmatprep.mubr.bf16.mxu1 %v2473_v2 }
  0xbc   : > { %1328 = vmatmul.mubr.bf16.gmra.mxu0 %v2475_v3  ;;  %v562_v3 = vld [vmem:[#allocation2 + $0x18] sm:$0xff] }
  0xbd   : > { %1489 = vmatmul.mubr.bf16.gmra.mxu1 %v2476_v4  ;;  %1335 = vmatprep.mubr.bf16.mxu0 %v2477_v5 }
  0xbe   : > { %1496 = vmatprep.mubr.bf16.mxu1 %v2479_v6 }
  0xc4   : > { %1336 = vmatmul.mubr.bf16.gmra.mxu0 %v2481_v7 }
  0xc5   : > { %1497 = vmatmul.mubr.bf16.gmra.mxu1 %v2482_v8  ;;  %1343 = vmatprep.mubr.bf16.mxu0 %v2483_v9 }
  0xc6   : > { %1504 = vmatprep.mubr.bf16.mxu1 %v2485_v10 }
  0xcc   : > { %1344 = vmatmul.mubr.bf16.gmra.mxu0 %v2487_v11 }
  0xcd   : > { %1505 = vmatmul.mubr.bf16.gmra.mxu1 %v2488_v12  ;;  %1351 = vmatprep.mubr.bf16.mxu0 %v2489_v13  ;;  %v563_v12 = vld [vmem:[#allocation2 + $0x50] sm:$0xff] }
  0xce   : > { %1512 = vmatprep.mubr.bf16.mxu1 %v2491_v14 }
  0xd4   : > { %1352 = vmatmul.mubr.bf16.gmra.mxu0 %v2493_v15 }
  0xd5   : > { %1513 = vmatmul.mubr.bf16.gmra.mxu1 %v2494_v16  ;;  %1359 = vmatprep.mubr.bf16.mxu0 %v2495_v17 }
  0xd6   : > { %1520 = vmatprep.mubr.bf16.mxu1 %v2497_v18 }
  0xdc   : > { %1360 = vmatmul.mubr.bf16.gmra.mxu0 %v2499_v19 }
  0xdd   : > { %1521 = vmatmul.mubr.bf16.gmra.mxu1 %v2500_v20  ;;  %1367 = vmatprep.mubr.bf16.mxu0 %v2501_v21  ;;  %v564_v21 = vld [vmem:[#allocation2 + $0x68] sm:$0xff] }
  0xde   : > { %1528 = vmatprep.mubr.bf16.mxu1 %v2503_v22 }
  0xe4   : > { %1368 = vmatmul.mubr.bf16.gmra.mxu0 %v2505_v23 }
  0xe5   : > { %1529 = vmatmul.mubr.bf16.gmra.mxu1 %v2506_v24  ;;  %1375 = vmatprep.mubr.bf16.mxu0 %v2507_v25 }
  0xe6   : > { %1536 = vmatprep.mubr.bf16.mxu1 %v2509_v26 }
  0xec   : > { %1376 = vmatmul.mubr.bf16.gmra.mxu0 %v2511_v27 }
  0xed   : > { %1537 = vmatmul.mubr.bf16.gmra.mxu1 %v2512_v28  ;;  %1383 = vmatprep.mubr.bf16.mxu0 %v2513_v29 }
  0xee   : > { %1544 = vmatprep.mubr.bf16.mxu1 %v2515_v30  ;;  %v565_v30 = vld [vmem:[#allocation2 + $0x30] sm:$0xff] }
  0xf4   : > { %1384 = vmatmul.mubr.bf16.gmra.mxu0 %v2517_v31 }
  0xf5   : > { %1545 = vmatmul.mubr.bf16.gmra.mxu1 %v2518_v32 }
 0x13c   : > { %v2125_v33 = vpop.f32.mrf.mxu0 }
 0x13d   : > { %v2237_v34 = vpop.f32.mrf.mxu1 }
 0x13e   : > { %v2126_v35 = vpop.f32.mrf.mxu0 }
 0x13f   : > { %v2127_v36 = vadd.f32 %v2126_v35, %v2125_v33  ;;  %v2238_v37 = vpop.f32.mrf.mxu1 }
 0x140   : > { %v2239_v38 = vadd.f32 %v2238_v37, %v2237_v34  ;;  %v2128_v39 = vpop.f32.mrf.mxu0 }
 0x141   : > { %v2240_v41 = vpop.f32.mrf.mxu1 }
 0x142   : > { %v1427_v42 = vadd.f32 %v2239_v38, %v2127_v36  ;;  %v2129_v43 = vpop.f32.mrf.mxu0 }
 0x143   : > { %v2130_v44 = vadd.f32 %v2129_v43, %v2128_v39  ;;  %v2241_v45 = vpop.f32.mrf.mxu1  ;;  %v566_v39 = vld [vmem:[#allocation2 + $0x48] sm:$0xff] }
 0x144   : > { %v1553_v46 = vadd.f32 %v1427_v42, %v559_v40  ;;  %v2242_v47 = vadd.f32 %v2241_v45, %v2240_v41  ;;  %v2131_v48 = vpop.f32.mrf.mxu0 }
 0x145   : > { %v2243_v50 = vpop.f32.mrf.mxu1 }
 0x146   : > { %1585 = vst [vmem:[#allocation2 + $0xb0] sm:$0xff] %v1553_v46  ;;  %v1430_v51 = vadd.f32 %v2242_v47, %v2130_v44  ;;  %v2132_v52 = vpop.f32.mrf.mxu0 }
 0x147   : > { %v2133_v53 = vadd.f32 %v2132_v52, %v2131_v48  ;;  %v2244_v54 = vpop.f32.mrf.mxu1  ;;  %v567_v48 = vld [vmem:[#allocation2 + $0x80] sm:$0xff] }
 0x148   : > { %v1554_v55 = vadd.f32 %v1430_v51, %v560_v49  ;;  %v2245_v56 = vadd.f32 %v2244_v54, %v2243_v50  ;;  %v2134_v57 = vpop.f32.mrf.mxu0 }
 0x149   : > { %v2246_v59 = vpop.f32.mrf.mxu1 }
 0x14a   : > { %1586 = vst [vmem:[#allocation2] sm:$0xff] %v1554_v55  ;;  %v1435_v60 = vadd.f32 %v2245_v56, %v2133_v53  ;;  %v2135_v61 = vpop.f32.mrf.mxu0 }
 0x14b   : > { %v2136_v62 = vadd.f32 %v2135_v61, %v2134_v57  ;;  %v2247_v63 = vpop.f32.mrf.mxu1  ;;  %v568_v57 = vld [vmem:[#allocation2 + $0x88] sm:$0xff] }
 0x14c   : > { %v1555_v0 = vadd.f32 %v1435_v60, %v561_v58  ;;  %v2248_v1 = vadd.f32 %v2247_v63, %v2246_v59  ;;  %v2137_v2 = vpop.f32.mrf.mxu0 }
 0x14d   : > { %v2249_v4 = vpop.f32.mrf.mxu1 }
 0x14e   : > { %1587 = vst [vmem:[#allocation2 + $0xd8] sm:$0xff] %v1555_v0  ;;  %v1438_v5 = vadd.f32 %v2248_v1, %v2136_v62  ;;  %v2138_v6 = vpop.f32.mrf.mxu0 }
 0x14f   : > { %v2139_v7 = vadd.f32 %v2138_v6, %v2137_v2  ;;  %v2250_v8 = vpop.f32.mrf.mxu1  ;;  %v569_v2 = vld [vmem:[#allocation2 + $0xe8] sm:$0xff] }
 0x150   : > { %v1556_v9 = vadd.f32 %v1438_v5, %v562_v3  ;;  %v2251_v10 = vadd.f32 %v2250_v8, %v2249_v4  ;;  %v2140_v11 = vpop.f32.mrf.mxu0 }
 0x151   : > { %v2252_v13 = vpop.f32.mrf.mxu1 }
 0x152   : > { %1588 = vst [vmem:[#allocation2 + $0x18] sm:$0xff] %v1556_v9  ;;  %v1443_v14 = vadd.f32 %v2251_v10, %v2139_v7  ;;  %v2141_v15 = vpop.f32.mrf.mxu0 }
 0x153   : > { %v2142_v16 = vadd.f32 %v2141_v15, %v2140_v11  ;;  %v2253_v17 = vpop.f32.mrf.mxu1  ;;  %v570_v11 = vld [vmem:[#allocation2 + $0xb8] sm:$0xff] }
 0x154   : > { %v1557_v18 = vadd.f32 %v1443_v14, %v563_v12  ;;  %v2254_v19 = vadd.f32 %v2253_v17, %v2252_v13  ;;  %v2143_v20 = vpop.f32.mrf.mxu0 }
 0x155   : > { %v2255_v22 = vpop.f32.mrf.mxu1 }
 0x156   : > { %1589 = vst [vmem:[#allocation2 + $0x50] sm:$0xff] %v1557_v18  ;;  %v1446_v23 = vadd.f32 %v2254_v19, %v2142_v16  ;;  %v2144_v24 = vpop.f32.mrf.mxu0 }
 0x157   : > { %v2145_v25 = vadd.f32 %v2144_v24, %v2143_v20  ;;  %v2256_v26 = vpop.f32.mrf.mxu1  ;;  %v571_v20 = vld [vmem:[#allocation2 + $0x60] sm:$0xff] }
 0x158   : > { %v1558_v27 = vadd.f32 %v1446_v23, %v564_v21  ;;  %v2257_v28 = vadd.f32 %v2256_v26, %v2255_v22  ;;  %v2146_v29 = vpop.f32.mrf.mxu0 }
 0x159   : > { %v2258_v31 = vpop.f32.mrf.mxu1 }
 0x15a   : > { %1590 = vst [vmem:[#allocation2 + $0x68] sm:$0xff] %v1558_v27  ;;  %v1451_v32 = vadd.f32 %v2257_v28, %v2145_v25  ;;  %v2147_v33 = vpop.f32.mrf.mxu0 }
 0x15b   : > { %v2148_v34 = vadd.f32 %v2147_v33, %v2146_v29  ;;  %v2259_v35 = vpop.f32.mrf.mxu1  ;;  %v572_v29 = vld [vmem:[#allocation2 + $0xf0] sm:$0xff] }
 0x15c   : > { %v1559_v36 = vadd.f32 %v1451_v32, %v565_v30  ;;  %v2260_v37 = vadd.f32 %v2259_v35, %v2258_v31  ;;  %v2149_v38 = vpop.f32.mrf.mxu0 }
 0x15d   : > { %v2261_v40 = vpop.f32.mrf.mxu1 }
 0x15e   : > { %1591 = vst [vmem:[#allocation2 + $0x30] sm:$0xff] %v1559_v36  ;;  %v1454_v41 = vadd.f32 %v2260_v37, %v2148_v34  ;;  %v2150_v42 = vpop.f32.mrf.mxu0 }
 0x15f   : > { %v2151_v43 = vadd.f32 %v2150_v42, %v2149_v38  ;;  %v2262_v44 = vpop.f32.mrf.mxu1  ;;  %v573_v38 = vld [vmem:[#allocation2 + $0x8] sm:$0xff] }
 0x160   : > { %v1560_v45 = vadd.f32 %v1454_v41, %v566_v39  ;;  %v2263_v46 = vadd.f32 %v2262_v44, %v2261_v40  ;;  %v2152_v47 = vpop.f32.mrf.mxu0 }
 0x161   : > { %v2264_v49 = vpop.f32.mrf.mxu1 }
 0x162   : > { %1592 = vst [vmem:[#allocation2 + $0x48] sm:$0xff] %v1560_v45  ;;  %v1459_v50 = vadd.f32 %v2263_v46, %v2151_v43  ;;  %v2153_v51 = vpop.f32.mrf.mxu0 }
 0x163   : > { %v2154_v52 = vadd.f32 %v2153_v51, %v2152_v47  ;;  %v2265_v53 = vpop.f32.mrf.mxu1  ;;  %v574_v47 = vld [vmem:[#allocation2 + $0x78] sm:$0xff] }
 0x164   : > { %v1561_v54 = vadd.f32 %v1459_v50, %v567_v48  ;;  %v2266_v55 = vadd.f32 %v2265_v53, %v2264_v49  ;;  %v2155_v56 = vpop.f32.mrf.mxu0 }
 0x165   : > { %v2267_v58 = vpop.f32.mrf.mxu1 }
 0x166   : > { %1593 = vst [vmem:[#allocation2 + $0x80] sm:$0xff] %v1561_v54  ;;  %v1462_v59 = vadd.f32 %v2266_v55, %v2154_v52  ;;  %v2156_v60 = vpop.f32.mrf.mxu0 }
 0x167   : > { %v2157_v61 = vadd.f32 %v2156_v60, %v2155_v56  ;;  %v2268_v62 = vpop.f32.mrf.mxu1  ;;  %v575_v56 = vld [vmem:[#allocation2 + $0x38] sm:$0xff] }
 0x168   : > { %v1562_v63 = vadd.f32 %v1462_v59, %v568_v57  ;;  %v2269_v0 = vadd.f32 %v2268_v62, %v2267_v58  ;;  %v2158_v1 = vpop.f32.mrf.mxu0 }
 0x169   : > { %v2270_v3 = vpop.f32.mrf.mxu1 }
 0x16a   : > { %1594 = vst [vmem:[#allocation2 + $0x88] sm:$0xff] %v1562_v63  ;;  %v1467_v4 = vadd.f32 %v2269_v0, %v2157_v61  ;;  %v2159_v5 = vpop.f32.mrf.mxu0 }
 0x16b   : > { %v2160_v6 = vadd.f32 %v2159_v5, %v2158_v1  ;;  %v2271_v7 = vpop.f32.mrf.mxu1  ;;  %v576_v1 = vld [vmem:[#allocation2 + $0x58] sm:$0xff] }
 0x16c   : > { %v1563_v8 = vadd.f32 %v1467_v4, %v569_v2  ;;  %v2272_v9 = vadd.f32 %v2271_v7, %v2270_v3  ;;  %v2161_v10 = vpop.f32.mrf.mxu0 }
 0x16d   : > { %v2273_v12 = vpop.f32.mrf.mxu1 }
 0x16e   : > { %1595 = vst [vmem:[#allocation2 + $0xe8] sm:$0xff] %v1563_v8  ;;  %v1470_v13 = vadd.f32 %v2272_v9, %v2160_v6  ;;  %v2162_v14 = vpop.f32.mrf.mxu0 }
 0x16f   : > { %v2163_v15 = vadd.f32 %v2162_v14, %v2161_v10  ;;  %v2274_v16 = vpop.f32.mrf.mxu1  ;;  %v577_v10 = vld [vmem:[#allocation2 + $0x40] sm:$0xff] }
 0x170   : > { %v1564_v17 = vadd.f32 %v1470_v13, %v570_v11  ;;  %v2275_v18 = vadd.f32 %v2274_v16, %v2273_v12  ;;  %v2164_v19 = vpop.f32.mrf.mxu0 }
 0x171   : > { %v2276_v21 = vpop.f32.mrf.mxu1 }
 0x172   : > { %1596 = vst [vmem:[#allocation2 + $0xb8] sm:$0xff] %v1564_v17  ;;  %v1475_v22 = vadd.f32 %v2275_v18, %v2163_v15  ;;  %v2165_v23 = vpop.f32.mrf.mxu0 }
 0x173   : > { %v2166_v24 = vadd.f32 %v2165_v23, %v2164_v19  ;;  %v2277_v25 = vpop.f32.mrf.mxu1  ;;  %v578_v19 = vld [vmem:[#allocation2 + $0xc8] sm:$0xff] }
 0x174   : > { %v1565_v26 = vadd.f32 %v1475_v22, %v571_v20  ;;  %v2278_v27 = vadd.f32 %v2277_v25, %v2276_v21  ;;  %v2167_v28 = vpop.f32.mrf.mxu0 }
 0x175   : > { %v2279_v30 = vpop.f32.mrf.mxu1 }
 0x176   : > { %1597 = vst [vmem:[#allocation2 + $0x60] sm:$0xff] %v1565_v26  ;;  %v1478_v31 = vadd.f32 %v2278_v27, %v2166_v24  ;;  %v2168_v32 = vpop.f32.mrf.mxu0 }
 0x177   : > { %v2169_v33 = vadd.f32 %v2168_v32, %v2167_v28  ;;  %v2280_v34 = vpop.f32.mrf.mxu1  ;;  %v579_v28 = vld [vmem:[#allocation2 + $0xe0] sm:$0xff] }
 0x178   : > { %v1566_v35 = vadd.f32 %v1478_v31, %v572_v29  ;;  %v2281_v36 = vadd.f32 %v2280_v34, %v2279_v30  ;;  %v2170_v37 = vpop.f32.mrf.mxu0 }
 0x179   : > { %v2282_v39 = vpop.f32.mrf.mxu1 }
 0x17a   : > { %1598 = vst [vmem:[#allocation2 + $0xf0] sm:$0xff] %v1566_v35  ;;  %v1483_v40 = vadd.f32 %v2281_v36, %v2169_v33  ;;  %v2171_v41 = vpop.f32.mrf.mxu0 }
 0x17b   : > { %v2172_v42 = vadd.f32 %v2171_v41, %v2170_v37  ;;  %v2283_v43 = vpop.f32.mrf.mxu1  ;;  %v580_v37 = vld [vmem:[#allocation2 + $0x90] sm:$0xff] }
 0x17c   : > { %v1567_v44 = vadd.f32 %v1483_v40, %v573_v38  ;;  %v2284_v45 = vadd.f32 %v2283_v43, %v2282_v39  ;;  %v2173_v46 = vpop.f32.mrf.mxu0 }
 0x17d   : > { %v2285_v48 = vpop.f32.mrf.mxu1 }
 0x17e   : > { %1599 = vst [vmem:[#allocation2 + $0x8] sm:$0xff] %v1567_v44  ;;  %v1486_v49 = vadd.f32 %v2284_v45, %v2172_v42  ;;  %v2174_v50 = vpop.f32.mrf.mxu0 }
 0x17f   : > { %v2175_v51 = vadd.f32 %v2174_v50, %v2173_v46  ;;  %v2286_v52 = vpop.f32.mrf.mxu1  ;;  %v581_v46 = vld [vmem:[#allocation2 + $0x70] sm:$0xff] }
 0x180   : > { %v1568_v53 = vadd.f32 %v1486_v49, %v574_v47  ;;  %v2287_v54 = vadd.f32 %v2286_v52, %v2285_v48  ;;  %v2176_v55 = vpop.f32.mrf.mxu0 }
 0x181   : > { %v2288_v57 = vpop.f32.mrf.mxu1 }
 0x182   : > { %1600 = vst [vmem:[#allocation2 + $0x78] sm:$0xff] %v1568_v53  ;;  %v1491_v58 = vadd.f32 %v2287_v54, %v2175_v51  ;;  %v2177_v59 = vpop.f32.mrf.mxu0 }
 0x183   : > { %v2178_v60 = vadd.f32 %v2177_v59, %v2176_v55  ;;  %v2289_v61 = vpop.f32.mrf.mxu1  ;;  %v582_v55 = vld [vmem:[#allocation2 + $0xc0] sm:$0xff] }
 0x184   : > { %v1569_v62 = vadd.f32 %v1491_v58, %v575_v56  ;;  %v2290_v63 = vadd.f32 %v2289_v61, %v2288_v57  ;;  %v2179_v0 = vpop.f32.mrf.mxu0 }
 0x185   : > { %v2291_v2 = vpop.f32.mrf.mxu1 }
 0x186   : > { %1601 = vst [vmem:[#allocation2 + $0x38] sm:$0xff] %v1569_v62  ;;  %v1494_v3 = vadd.f32 %v2290_v63, %v2178_v60  ;;  %v2180_v4 = vpop.f32.mrf.mxu0 }
 0x187   : > { %v2181_v5 = vadd.f32 %v2180_v4, %v2179_v0  ;;  %v2292_v6 = vpop.f32.mrf.mxu1  ;;  %v583_v0 = vld [vmem:[#allocation2 + $0xa8] sm:$0xff] }
 0x188   : > { %v1570_v7 = vadd.f32 %v1494_v3, %v576_v1  ;;  %v2293_v8 = vadd.f32 %v2292_v6, %v2291_v2  ;;  %v2182_v9 = vpop.f32.mrf.mxu0 }
 0x189   : > { %v2294_v11 = vpop.f32.mrf.mxu1 }
 0x18a   : > { %1602 = vst [vmem:[#allocation2 + $0x58] sm:$0xff] %v1570_v7  ;;  %v1499_v12 = vadd.f32 %v2293_v8, %v2181_v5  ;;  %v2183_v13 = vpop.f32.mrf.mxu0 }
 0x18b   : > { %v2184_v14 = vadd.f32 %v2183_v13, %v2182_v9  ;;  %v2295_v15 = vpop.f32.mrf.mxu1  ;;  %v584_v9 = vld [vmem:[#allocation2 + $0xd0] sm:$0xff] }
 0x18c   : > { %v1571_v16 = vadd.f32 %v1499_v12, %v577_v10  ;;  %v2296_v17 = vadd.f32 %v2295_v15, %v2294_v11  ;;  %v2185_v18 = vpop.f32.mrf.mxu0 }
 0x18d   : > { %v2297_v20 = vpop.f32.mrf.mxu1 }
 0x18e   : > { %1603 = vst [vmem:[#allocation2 + $0x40] sm:$0xff] %v1571_v16  ;;  %v1502_v21 = vadd.f32 %v2296_v17, %v2184_v14  ;;  %v2186_v22 = vpop.f32.mrf.mxu0 }
 0x18f   : > { %v2187_v23 = vadd.f32 %v2186_v22, %v2185_v18  ;;  %v2298_v24 = vpop.f32.mrf.mxu1  ;;  %v585_v18 = vld [vmem:[#allocation2 + $0x10] sm:$0xff] }
 0x190   : > { %v1572_v25 = vadd.f32 %v1502_v21, %v578_v19  ;;  %v2299_v26 = vadd.f32 %v2298_v24, %v2297_v20  ;;  %v2188_v27 = vpop.f32.mrf.mxu0 }
 0x191   : > { %v2300_v29 = vpop.f32.mrf.mxu1 }
 0x192   : > { %1604 = vst [vmem:[#allocation2 + $0xc8] sm:$0xff] %v1572_v25  ;;  %v1507_v30 = vadd.f32 %v2299_v26, %v2187_v23  ;;  %v2189_v31 = vpop.f32.mrf.mxu0 }
 0x193   : > { %v2190_v32 = vadd.f32 %v2189_v31, %v2188_v27  ;;  %v2301_v33 = vpop.f32.mrf.mxu1  ;;  %v586_v27 = vld [vmem:[#allocation2 + $0x28] sm:$0xff] }
 0x194   : > { %v1573_v34 = vadd.f32 %v1507_v30, %v579_v28  ;;  %v2302_v35 = vadd.f32 %v2301_v33, %v2300_v29  ;;  %v2191_v36 = vpop.f32.mrf.mxu0 }
 0x195   : > { %v2303_v38 = vpop.f32.mrf.mxu1 }
 0x196   : > { %1605 = vst [vmem:[#allocation2 + $0xe0] sm:$0xff] %v1573_v34  ;;  %v1510_v39 = vadd.f32 %v2302_v35, %v2190_v32  ;;  %v2192_v40 = vpop.f32.mrf.mxu0 }
 0x197   : > { %v2193_v41 = vadd.f32 %v2192_v40, %v2191_v36  ;;  %v2304_v42 = vpop.f32.mrf.mxu1  ;;  %v587_v36 = vld [vmem:[#allocation2 + $0xa0] sm:$0xff] }
 0x198   : > { %v1574_v43 = vadd.f32 %v1510_v39, %v580_v37  ;;  %v2305_v44 = vadd.f32 %v2304_v42, %v2303_v38  ;;  %v2194_v45 = vpop.f32.mrf.mxu0 }
 0x199   : > { %v2306_v47 = vpop.f32.mrf.mxu1 }
 0x19a   : > { %1606 = vst [vmem:[#allocation2 + $0x90] sm:$0xff] %v1574_v43  ;;  %v1515_v48 = vadd.f32 %v2305_v44, %v2193_v41  ;;  %v2195_v49 = vpop.f32.mrf.mxu0 }
 0x19b   : > { %v2196_v50 = vadd.f32 %v2195_v49, %v2194_v45  ;;  %v2307_v51 = vpop.f32.mrf.mxu1  ;;  %v588_v45 = vld [vmem:[#allocation2 + $0xf8] sm:$0xff] }
 0x19c   : > { %v1575_v52 = vadd.f32 %v1515_v48, %v581_v46  ;;  %v2308_v53 = vadd.f32 %v2307_v51, %v2306_v47  ;;  %v2197_v54 = vpop.f32.mrf.mxu0 }
 0x19d   : > { %v2309_v56 = vpop.f32.mrf.mxu1 }
 0x19e   : > { %1607 = vst [vmem:[#allocation2 + $0x70] sm:$0xff] %v1575_v52  ;;  %v1518_v57 = vadd.f32 %v2308_v53, %v2196_v50  ;;  %v2198_v58 = vpop.f32.mrf.mxu0 }
 0x19f   : > { %v2199_v59 = vadd.f32 %v2198_v58, %v2197_v54  ;;  %v2310_v60 = vpop.f32.mrf.mxu1  ;;  %v589_v54 = vld [vmem:[#allocation2 + $0x20] sm:$0xff] }
 0x1a0   : > { %v1576_v61 = vadd.f32 %v1518_v57, %v582_v55  ;;  %v2311_v62 = vadd.f32 %v2310_v60, %v2309_v56  ;;  %v2200_v63 = vpop.f32.mrf.mxu0 }
 0x1a1   : > { %v2312_v1 = vpop.f32.mrf.mxu1 }
 0x1a2   : > { %1608 = vst [vmem:[#allocation2 + $0xc0] sm:$0xff] %v1576_v61  ;;  %v1523_v2 = vadd.f32 %v2311_v62, %v2199_v59  ;;  %v2201_v3 = vpop.f32.mrf.mxu0  ;;  %v590_v62 = vld [vmem:[#allocation2 + $0x98] sm:$0xff] }
 0x1a3   : > { %v2202_v4 = vadd.f32 %v2201_v3, %v2200_v63  ;;  %v2313_v5 = vpop.f32.mrf.mxu1 }
 0x1a4   : > { %v1577_v6 = vadd.f32 %v1523_v2, %v583_v0  ;;  %v2314_v7 = vadd.f32 %v2313_v5, %v2312_v1  ;;  %v2203_v8 = vpop.f32.mrf.mxu0 }
 0x1a5   : > { %v2315_v10 = vpop.f32.mrf.mxu1 }
 0x1a6   : > { %1609 = vst [vmem:[#allocation2 + $0xa8] sm:$0xff] %v1577_v6  ;;  %v1526_v11 = vadd.f32 %v2314_v7, %v2202_v4  ;;  %v2204_v12 = vpop.f32.mrf.mxu0 }
 0x1a7   : > { %v2205_v13 = vadd.f32 %v2204_v12, %v2203_v8  ;;  %v2316_v14 = vpop.f32.mrf.mxu1 }
 0x1a8   : > { %v1578_v15 = vadd.f32 %v1526_v11, %v584_v9  ;;  %v2317_v16 = vadd.f32 %v2316_v14, %v2315_v10  ;;  %v2206_v17 = vpop.f32.mrf.mxu0 }
 0x1a9   : > { %v2318_v19 = vpop.f32.mrf.mxu1 }
 0x1aa   : > { %1610 = vst [vmem:[#allocation2 + $0xd0] sm:$0xff] %v1578_v15  ;;  %v1531_v20 = vadd.f32 %v2317_v16, %v2205_v13  ;;  %v2207_v21 = vpop.f32.mrf.mxu0 }
 0x1ab   : > { %v2208_v22 = vadd.f32 %v2207_v21, %v2206_v17  ;;  %v2319_v23 = vpop.f32.mrf.mxu1 }
 0x1ac   : > { %v1579_v24 = vadd.f32 %v1531_v20, %v585_v18  ;;  %v2320_v25 = vadd.f32 %v2319_v23, %v2318_v19  ;;  %v2209_v26 = vpop.f32.mrf.mxu0 }
 0x1ad   : > { %v2321_v28 = vpop.f32.mrf.mxu1 }
 0x1ae   : > { %1611 = vst [vmem:[#allocation2 + $0x10] sm:$0xff] %v1579_v24  ;;  %v1534_v29 = vadd.f32 %v2320_v25, %v2208_v22  ;;  %v2210_v30 = vpop.f32.mrf.mxu0 }
 0x1af   : > { %v2211_v31 = vadd.f32 %v2210_v30, %v2209_v26  ;;  %v2322_v32 = vpop.f32.mrf.mxu1 }
 0x1b0   : > { %v1580_v33 = vadd.f32 %v1534_v29, %v586_v27  ;;  %v2323_v34 = vadd.f32 %v2322_v32, %v2321_v28  ;;  %v2212_v35 = vpop.f32.mrf.mxu0 }
 0x1b1   : > { %v2324_v37 = vpop.f32.mrf.mxu1 }
 0x1b2   : > { %1612 = vst [vmem:[#allocation2 + $0x28] sm:$0xff] %v1580_v33  ;;  %v1539_v38 = vadd.f32 %v2323_v34, %v2211_v31  ;;  %v2213_v39 = vpop.f32.mrf.mxu0 }
 0x1b3   : > { %v2214_v40 = vadd.f32 %v2213_v39, %v2212_v35  ;;  %v2325_v41 = vpop.f32.mrf.mxu1 }
 0x1b4   : > { %v1581_v42 = vadd.f32 %v1539_v38, %v587_v36  ;;  %v2326_v43 = vadd.f32 %v2325_v41, %v2324_v37  ;;  %v2215_v44 = vpop.f32.mrf.mxu0 }
 0x1b5   : > { %v2327_v46 = vpop.f32.mrf.mxu1 }
 0x1b6   : > { %1613 = vst [vmem:[#allocation2 + $0xa0] sm:$0xff] %v1581_v42  ;;  %v1542_v47 = vadd.f32 %v2326_v43, %v2214_v40  ;;  %v2216_v48 = vpop.f32.mrf.mxu0 }
 0x1b7   : > { %v2217_v49 = vadd.f32 %v2216_v48, %v2215_v44  ;;  %v2328_v50 = vpop.f32.mrf.mxu1 }
 0x1b8   : > { %v1582_v51 = vadd.f32 %v1542_v47, %v588_v45  ;;  %v2329_v52 = vadd.f32 %v2328_v50, %v2327_v46  ;;  %v2218_v53 = vpop.f32.mrf.mxu0 }
 0x1b9   : > { %v2330_v55 = vpop.f32.mrf.mxu1 }
 0x1ba   : > { %1614 = vst [vmem:[#allocation2 + $0xf8] sm:$0xff] %v1582_v51  ;;  %v1547_v56 = vadd.f32 %v2329_v52, %v2217_v49  ;;  %v2219_v57 = vpop.f32.mrf.mxu0 }
 0x1bb   : > { %v2220_v58 = vadd.f32 %v2219_v57, %v2218_v53  ;;  %v2331_v59 = vpop.f32.mrf.mxu1 }
 0x1bc   : > { %v1583_v60 = vadd.f32 %v1547_v56, %v589_v54  ;;  %v2332_v61 = vadd.f32 %v2331_v59, %v2330_v55 }
 0x1be   : > { %1615 = vst [vmem:[#allocation2 + $0x20] sm:$0xff] %v1583_v60  ;;  %v1550_v63 = vadd.f32 %v2332_v61, %v2220_v58  ;;  %1620 = sbr.rel (%p2103_p13) target bundleno = 506 (0x1fa), region = 75 }
 0x1c0   : > { %v1584_v0 = vadd.f32 %v1550_v63, %v590_v62 }
 0x1c2   : > { %1616 = vst [vmem:[#allocation2 + $0x98] sm:$0xff] %v1584_v0 }
 0x1c3   : > { %v1621_v1 = vld [vmem:[#allocation2 + $0xb0] sm:$0xff]  ;;  %v2985_v2 = vld [vmem:[%s3148_s2] ss:$0 sm:$0xff]  ;;  %v1623_v7 = vld [vmem:[#allocation2 + $0xd8] sm:$0xff] }
 0x1c4   : > { %v2990_v3 = vld [vmem:[%s3149_s3] ss:$0 sm:$0xff]  ;;  %v1660_v4 = vadd.f32 %v2985_v2, %v1621_v1  ;;  %v1662_v9 = vadd.f32 %v2985_v2, %v1623_v7  ;;  %v1624_v10 = vld [vmem:[#allocation2 + $0x18] sm:$0xff]  ;;  %v1625_v11 = vld [vmem:[#allocation2 + $0x50] sm:$0xff] }
 0x1c5   : > { %v2996_v5 = vld [vmem:[%s3150_s4] ss:$0 sm:$0xff]  ;;  %v1626_v12 = vld [vmem:[#allocation2 + $0x68] sm:$0xff]  ;;  %v1663_v14 = vadd.f32 %v2985_v2, %v1624_v10  ;;  %v1664_v15 = vadd.f32 %v2985_v2, %v1625_v11  ;;  %v1627_v17 = vld [vmem:[#allocation2 + $0x30] sm:$0xff] }
 0x1c6   : > { %v1622_v6 = vld [vmem:[#allocation2] sm:$0xff]  ;;  %v1699_v13 = vmul.f32 %v2990_v3, %v1660_v4  ;;  %v1665_v16 = vadd.f32 %v2985_v2, %v1626_v12  ;;  %v1628_v18 = vld [vmem:[#allocation2 + $0x48] sm:$0xff]  ;;  %v1701_v20 = vmul.f32 %v2990_v3, %v1662_v9  ;;  %v1666_v21 = vadd.f32 %v2985_v2, %v1627_v17  ;;  %v1632_v34 = vld [vmem:[#allocation2 + $0xb8] sm:$0xff] }
 0x1c7   : > { %v1661_v8 = vadd.f32 %v2985_v2, %v1622_v6  ;;  %v1667_v22 = vadd.f32 %v2985_v2, %v1628_v18  ;;  %v1702_v24 = vmul.f32 %v2990_v3, %v1663_v14  ;;  %v1703_v25 = vmul.f32 %v2990_v3, %v1664_v15  ;;  %v1629_v27 = vld [vmem:[#allocation2 + $0x80] sm:$0xff]  ;;  %v1630_v32 = vld [vmem:[#allocation2 + $0x88] sm:$0xff]  ;;  %v1634_v39 = vld [vmem:[#allocation2 + $0xf0] sm:$0xff] }
 0x1c8   : > { %v1738_v23 = vadd.f32 %v2996_v5, %v1699_v13  ;;  %v1704_v26 = vmul.f32 %v2990_v3, %v1665_v16  ;;  %v1740_v29 = vadd.f32 %v2996_v5, %v1701_v20  ;;  %v1705_v30 = vmul.f32 %v2990_v3, %v1666_v21  ;;  %v1631_v33 = vld [vmem:[#allocation2 + $0xe8] sm:$0xff]  ;;  %v1633_v38 = vld [vmem:[#allocation2 + $0x60] sm:$0xff]  ;;  %v1636_v56 = vld [vmem:[#allocation2 + $0x78] sm:$0xff] }
 0x1c9   : > { %v1700_v19 = vmul.f32 %v2990_v3, %v1661_v8  ;;  %v1706_v31 = vmul.f32 %v2990_v3, %v1667_v22  ;;  %v1741_v35 = vadd.f32 %v2996_v5, %v1702_v24  ;;  %v1742_v36 = vadd.f32 %v2996_v5, %v1703_v25  ;;  %v1635_v52 = vld [vmem:[#allocation2 + $0x8] sm:$0xff]  ;;  %v1637_v57 = vld [vmem:[#allocation2 + $0x38] sm:$0xff]  ;;  %v1639_v62 = vld [vmem:[#allocation2 + $0x40] sm:$0xff] }
 0x1ca   : > { %2519 = vtanh.f32 %v1738_v23  ;;  %v1743_v37 = vadd.f32 %v2996_v5, %v1704_v26  ;;  %v1744_v40 = vadd.f32 %v2996_v5, %v1705_v30  ;;  %v1668_v42 = vadd.f32 %v2985_v2, %v1629_v27  ;;  %v1638_v58 = vld [vmem:[#allocation2 + $0x58] sm:$0xff]  ;;  %v1640_v63 = vld [vmem:[#allocation2 + $0xc8] sm:$0xff]  ;;  %v1641_v15 = vld [vmem:[#allocation2 + $0xe0] sm:$0xff] }
 0x1cb   : > { %v1739_v28 = vadd.f32 %v2996_v5, %v1700_v19  ;;  %v1745_v41 = vadd.f32 %v2996_v5, %v1706_v31  ;;  %v1669_v43 = vadd.f32 %v2985_v2, %v1630_v32  ;;  %v1670_v44 = vadd.f32 %v2985_v2, %v1631_v33  ;;  %v1642_v19 = vld [vmem:[#allocation2 + $0x90] sm:$0xff]  ;;  %v1644_v21 = vld [vmem:[#allocation2 + $0xc0] sm:$0xff]  ;;  %v1645_v25 = vld [vmem:[#allocation2 + $0xa8] sm:$0xff] }
 0x1cc   : > { %v1671_v45 = vadd.f32 %v2985_v2, %v1632_v34  ;;  %v1707_v46 = vmul.f32 %v2990_v3, %v1668_v42  ;;  %v1672_v47 = vadd.f32 %v2985_v2, %v1633_v38  ;;  %v1673_v48 = vadd.f32 %v2985_v2, %v1634_v39  ;;  %v1643_v20 = vld [vmem:[#allocation2 + $0x70] sm:$0xff] }
 0x1cd   : > { %2521 = vtanh.f32 %v1739_v28  ;;  %v1708_v49 = vmul.f32 %v2990_v3, %v1669_v43  ;;  %v1709_v50 = vmul.f32 %v2990_v3, %v1670_v44  ;;  %v1674_v4 = vadd.f32 %v2985_v2, %v1635_v52  ;;  %v1646_v26 = vld [vmem:[#allocation2 + $0xd0] sm:$0xff] }
 0x1ce   : > { %2523 = vtanh.f32 %v1740_v29  ;;  %v1710_v51 = vmul.f32 %v2990_v3, %v1671_v45  ;;  %v1746_v53 = vadd.f32 %v2996_v5, %v1707_v46  ;;  %v1711_v54 = vmul.f32 %v2990_v3, %v1672_v47  ;;  %v1647_v43 = vld [vmem:[#allocation2 + $0x10] sm:$0xff] }
 0x1cf   : > { %2525 = vtanh.f32 %v1741_v35  ;;  %v1712_v55 = vmul.f32 %v2990_v3, %v1673_v48  ;;  %v1747_v59 = vadd.f32 %v2996_v5, %v1708_v49  ;;  %v1748_v60 = vadd.f32 %v2996_v5, %v1709_v50  ;;  %v1648_v48 = vld [vmem:[#allocation2 + $0x28] sm:$0xff]  ;;  %v1649_v49 = vld [vmem:[#allocation2 + $0xa0] sm:$0xff]  ;;  %v1650_v50 = vld [vmem:[#allocation2 + $0xf8] sm:$0xff] }
 0x1d0   : > { %2527 = vtanh.f32 %v1742_v36  ;;  %v1749_v61 = vadd.f32 %v2996_v5, %v1710_v51  ;;  %v1750_v0 = vadd.f32 %v2996_v5, %v1711_v54  ;;  %v1675_v6 = vadd.f32 %v2985_v2, %v1636_v56  ;;  %v1652_v56 = vld [vmem:[#allocation2 + $0x98] sm:$0xff] }
 0x1d1   : > { %2529 = vtanh.f32 %v1743_v37  ;;  %v1751_v1 = vadd.f32 %v2996_v5, %v1712_v55  ;;  %v1676_v7 = vadd.f32 %v2985_v2, %v1637_v57  ;;  %v1677_v8 = vadd.f32 %v2985_v2, %v1638_v58  ;;  %v1651_v55 = vld [vmem:[#allocation2 + $0x20] sm:$0xff] }
 0x1d2   : > { %2531 = vtanh.f32 %v1744_v40  ;;  %v1713_v9 = vmul.f32 %v2990_v3, %v1674_v4  ;;  %v1678_v10 = vadd.f32 %v2985_v2, %v1639_v62  ;;  %v1679_v11 = vadd.f32 %v2985_v2, %v1640_v63 }
 0x1d3   : > { %2533 = vtanh.f32 %v1745_v41  ;;  %v1714_v12 = vmul.f32 %v2990_v3, %v1675_v6  ;;  %v1715_v13 = vmul.f32 %v2990_v3, %v1676_v7  ;;  %v1716_v14 = vmul.f32 %v2990_v3, %v1677_v8 }
 0x1d4   : > { %2535 = vtanh.f32 %v1746_v53  ;;  %v1752_v16 = vadd.f32 %v2996_v5, %v1713_v9  ;;  %v1717_v17 = vmul.f32 %v2990_v3, %v1678_v10  ;;  %v1718_v18 = vmul.f32 %v2990_v3, %v1679_v11 }
 0x1d5   : > { %2537 = vtanh.f32 %v1747_v59  ;;  %v1753_v22 = vadd.f32 %v2996_v5, %v1714_v12  ;;  %v1754_v23 = vadd.f32 %v2996_v5, %v1715_v13  ;;  %v1755_v24 = vadd.f32 %v2996_v5, %v1716_v14 }
 0x1d6   : > { %2539 = vtanh.f32 %v1748_v60  ;;  %v1756_v28 = vadd.f32 %v2996_v5, %v1717_v17  ;;  %v1757_v29 = vadd.f32 %v2996_v5, %v1718_v18  ;;  %v1680_v30 = vadd.f32 %v2985_v2, %v1641_v15 }
 0x1d7   : > { %2541 = vtanh.f32 %v1749_v61  ;;  %v2520_v27 = vpop.eup %2519  ;;  %v1681_v32 = vadd.f32 %v2985_v2, %v1642_v19  ;;  %v1682_v33 = vadd.f32 %v2985_v2, %v1643_v20  ;;  %v1683_v34 = vadd.f32 %v2985_v2, %v1644_v21 }
 0x1d8   : > { %2543 = vtanh.f32 %v1750_v0  ;;  %1802 = vst [vmem:[%s2880_s16] sm:$0xff] %v2520_v27  ;;  %v1719_v36 = vmul.f32 %v2990_v3, %v1680_v30  ;;  %v1684_v37 = vadd.f32 %v2985_v2, %v1645_v25  ;;  %v1685_v38 = vadd.f32 %v2985_v2, %v1646_v26 }
 0x1d9   : > { %2545 = vtanh.f32 %v1751_v1  ;;  %v1720_v40 = vmul.f32 %v2990_v3, %v1681_v32  ;;  %v1721_v41 = vmul.f32 %v2990_v3, %v1682_v33  ;;  %v1722_v42 = vmul.f32 %v2990_v3, %v1683_v34 }
 0x1da   : > { %v2522_v31 = vpop.eup %2521  ;;  %2547 = vtanh.f32 %v1752_v16  ;;  %v1758_v45 = vadd.f32 %v2996_v5, %v1719_v36  ;;  %v1723_v46 = vmul.f32 %v2990_v3, %v1684_v37  ;;  %v1724_v47 = vmul.f32 %v2990_v3, %v1685_v38 }
 0x1db   : > { %v2524_v35 = vpop.eup %2523  ;;  %1803 = vst [vmem:[%s2880_s16 + $0x8] sm:$0xff] %v2522_v31  ;;  %2549 = vtanh.f32 %v1753_v22  ;;  %v1759_v52 = vadd.f32 %v2996_v5, %v1720_v40  ;;  %v1760_v53 = vadd.f32 %v2996_v5, %v1721_v41  ;;  %v1761_v54 = vadd.f32 %v2996_v5, %v1722_v42 }
 0x1dc   : > { %v2526_v39 = vpop.eup %2525  ;;  %1804 = vst [vmem:[%s2880_s16 + $0x10] sm:$0xff] %v2524_v35  ;;  %2551 = vtanh.f32 %v1754_v23  ;;  %v1762_v58 = vadd.f32 %v2996_v5, %v1723_v46  ;;  %v1763_v59 = vadd.f32 %v2996_v5, %v1724_v47  ;;  %v1686_v60 = vadd.f32 %v2985_v2, %v1647_v43 }
 0x1dd   : > { %v2528_v44 = vpop.eup %2527  ;;  %1805 = vst [vmem:[%s2880_s16 + $0x18] sm:$0xff] %v2526_v39  ;;  %2553 = vtanh.f32 %v1755_v24  ;;  %v1687_v62 = vadd.f32 %v2985_v2, %v1648_v48  ;;  %v1688_v63 = vadd.f32 %v2985_v2, %v1649_v49  ;;  %v1689_v0 = vadd.f32 %v2985_v2, %v1650_v50 }
 0x1de   : > { %v2530_v51 = vpop.eup %2529  ;;  %1806 = vst [vmem:[%s2880_s16 + $0x20] sm:$0xff] %v2528_v44  ;;  %2555 = vtanh.f32 %v1756_v28  ;;  %v1725_v4 = vmul.f32 %v2990_v3, %v1686_v60  ;;  %v1690_v6 = vadd.f32 %v2985_v2, %v1651_v55  ;;  %v1691_v7 = vadd.f32 %v2985_v2, %v1652_v56 }
 0x1df   : > { %v2532_v57 = vpop.eup %2531  ;;  %1807 = vst [vmem:[%s2880_s16 + $0x28] sm:$0xff] %v2530_v51  ;;  %2557 = vtanh.f32 %v1757_v29  ;;  %v1726_v9 = vmul.f32 %v2990_v3, %v1687_v62  ;;  %v1727_v10 = vmul.f32 %v2990_v3, %v1688_v63  ;;  %v1728_v11 = vmul.f32 %v2990_v3, %v1689_v0 }
 0x1e0   : > { %v2534_v61 = vpop.eup %2533  ;;  %1808 = vst [vmem:[%s2880_s16 + $0x30] sm:$0xff] %v2532_v57  ;;  %2559 = vtanh.f32 %v1758_v45  ;;  %v1764_v13 = vadd.f32 %v2996_v5, %v1725_v4  ;;  %v1729_v14 = vmul.f32 %v2990_v3, %v1690_v6  ;;  %v1730_v2 = vmul.f32 %v2990_v3, %v1691_v7 }
 0x1e1   : > { %v2536_v1 = vpop.eup %2535  ;;  %1809 = vst [vmem:[%s2880_s16 + $0x38] sm:$0xff] %v2534_v61  ;;  %2561 = vtanh.f32 %v1759_v52  ;;  %v1765_v16 = vadd.f32 %v2996_v5, %v1726_v9  ;;  %v1766_v17 = vadd.f32 %v2996_v5, %v1727_v10  ;;  %v1767_v19 = vadd.f32 %v2996_v5, %v1728_v11 }
 0x1e2   : > { %v2538_v8 = vpop.eup %2537  ;;  %1810 = vst [vmem:[%s2880_s16 + $0x40] sm:$0xff] %v2536_v1  ;;  %2563 = vtanh.f32 %v1760_v53  ;;  %v1768_v3 = vadd.f32 %v2996_v5, %v1729_v14  ;;  %v1769_v22 = vadd.f32 %v2996_v5, %v1730_v2 }
 0x1e3   : > { %v2540_v12 = vpop.eup %2539  ;;  %1811 = vst [vmem:[%s2880_s16 + $0x48] sm:$0xff] %v2538_v8  ;;  %2565 = vtanh.f32 %v1761_v54 }
 0x1e4   : > { %v2542_v15 = vpop.eup %2541  ;;  %1812 = vst [vmem:[%s2880_s16 + $0x50] sm:$0xff] %v2540_v12  ;;  %2567 = vtanh.f32 %v1762_v58 }
 0x1e5   : > { %v2544_v18 = vpop.eup %2543  ;;  %1813 = vst [vmem:[%s2880_s16 + $0x58] sm:$0xff] %v2542_v15  ;;  %2569 = vtanh.f32 %v1763_v59 }
 0x1e6   : > { %v2546_v20 = vpop.eup %2545  ;;  %1814 = vst [vmem:[%s2880_s16 + $0x60] sm:$0xff] %v2544_v18  ;;  %2571 = vtanh.f32 %v1764_v13 }
 0x1e7   : > { %v2548_v21 = vpop.eup %2547  ;;  %1815 = vst [vmem:[%s2880_s16 + $0x68] sm:$0xff] %v2546_v20  ;;  %2573 = vtanh.f32 %v1765_v16 }
 0x1e8   : > { %v2550_v23 = vpop.eup %2549  ;;  %1816 = vst [vmem:[%s2880_s16 + $0x70] sm:$0xff] %v2548_v21  ;;  %2575 = vtanh.f32 %v1766_v17 }
 0x1e9   : > { %v2552_v24 = vpop.eup %2551  ;;  %1817 = vst [vmem:[%s2880_s16 + $0x78] sm:$0xff] %v2550_v23  ;;  %2577 = vtanh.f32 %v1767_v19 }
 0x1ea   : > { %v2554_v25 = vpop.eup %2553  ;;  %1818 = vst [vmem:[%s2880_s16 + $0x80] sm:$0xff] %v2552_v24  ;;  %2579 = vtanh.f32 %v1768_v3 }
 0x1eb   : > { %v2556_v26 = vpop.eup %2555  ;;  %1819 = vst [vmem:[%s2880_s16 + $0x88] sm:$0xff] %v2554_v25  ;;  %2581 = vtanh.f32 %v1769_v22 }
 0x1ec   : > { %v2558_v5 = vpop.eup %2557  ;;  %1820 = vst [vmem:[%s2880_s16 + $0x90] sm:$0xff] %v2556_v26 }
 0x1ed   : > { %v2560_v27 = vpop.eup %2559  ;;  %1821 = vst [vmem:[%s2880_s16 + $0x98] sm:$0xff] %v2558_v5 }
 0x1ee   : > { %v2562_v28 = vpop.eup %2561  ;;  %1822 = vst [vmem:[%s2880_s16 + $0xa0] sm:$0xff] %v2560_v27 }
 0x1ef   : > { %v2564_v29 = vpop.eup %2563  ;;  %1823 = vst [vmem:[%s2880_s16 + $0xa8] sm:$0xff] %v2562_v28 }
 0x1f0   : > { %v2566_v30 = vpop.eup %2565  ;;  %1824 = vst [vmem:[%s2880_s16 + $0xb0] sm:$0xff] %v2564_v29 }
 0x1f1   : > { %v2568_v31 = vpop.eup %2567  ;;  %1825 = vst [vmem:[%s2880_s16 + $0xb8] sm:$0xff] %v2566_v30 }
 0x1f2   : > { %v2570_v32 = vpop.eup %2569  ;;  %1826 = vst [vmem:[%s2880_s16 + $0xc0] sm:$0xff] %v2568_v31 }
 0x1f3   : > { %v2572_v33 = vpop.eup %2571  ;;  %1827 = vst [vmem:[%s2880_s16 + $0xc8] sm:$0xff] %v2570_v32 }
 0x1f4   : > { %v2574_v34 = vpop.eup %2573  ;;  %1828 = vst [vmem:[%s2880_s16 + $0xd0] sm:$0xff] %v2572_v33 }
 0x1f5   : > { %v2576_v35 = vpop.eup %2575  ;;  %1829 = vst [vmem:[%s2880_s16 + $0xd8] sm:$0xff] %v2574_v34 }
 0x1f6   : > { %v2578_v36 = vpop.eup %2577  ;;  %1830 = vst [vmem:[%s2880_s16 + $0xe0] sm:$0xff] %v2576_v35 }
 0x1f7   : > { %v2580_v37 = vpop.eup %2579  ;;  %1831 = vst [vmem:[%s2880_s16 + $0xe8] sm:$0xff] %v2578_v36 }
 0x1f8   : > { %v2582_v38 = vpop.eup %2581  ;;  %1832 = vst [vmem:[%s2880_s16 + $0xf0] sm:$0xff] %v2580_v37 }
 0x1f9   : > { %1833 = vst [vmem:[%s2880_s16 + $0xf8] sm:$0xff] %v2582_v38 }
 0x1fa PF: > { %s16_s27 = sadd.s32 1, %s2637_s27   ;;  %s3153_s21 = smov %s2617_s22 }
 0x1fb   : > { %p13_p0 = scmp.ge.s32.totalorder %s16_s27, 194   ;;  %s3154_s22 = smov %s2726_s9 }
 0x1fc   : > { %s3155_s23 = smov %s2629_s25  ;;  %s3156_s24 = smov %s2633_s26 }
 0x1fd   : > { %s3157_s25 = smov %s3160_s5  ;;  %s3158_s26 = smov %s3164_s28 }
 0x1fe   :  { %15 = sbr.rel (!%p13_p0) target bundleno = 4 (0x4), region = 125 }

</bundles_post_ra>
